<compile_context>
chip_gen: v7x
topology: tpu7x:2x2x1
jax: 0.10.0
libtpu: 0.0.40
codegen_flags: <defaults>
</compile_context>

<pallas_src>
import jax
import jax.numpy as jnp
import numpy as np
from jax.experimental import pallas as pl
from jax.experimental.pallas import tpu as pltpu

# ----- static config (mirrors omegaconf cfg fields used by the module) -----
N_LAYERS = 2          # cfg.model.decoder.conv.n_conv_layers
KSIZE = 5             # cfg.model.decoder.conv.conv_kernel_size
PAD = (KSIZE - 1) // 2
DROPOUT = 0.1         # cfg.model.decoder.conv.dropout (identity in eval)
N_MELS = 8            # cfg.data.audio.n_mels
UPSAMPLE = 2          # get_upsample(cfg)
HIDDEN = 32           # hidden_channels
C_OUT = N_MELS * UPSAMPLE
BN_EPS = 1e-5
ALIGN = 8             # sublane-aligned offset of the scratch interior


def conv_decoder_kernel(x_ref, w_res_ref, bn_scale_ref, bn_shift_ref,
                        w_out_ref, b_out_ref, scat_ref, o_ref, xpad_ref):
    """One grid step == one block of BBLK batch elements.

    x_ref:        (BBLK, T, C)        activations, channels-last, f32
    w_res_ref:    (N_SUB, K, C, C)    conv weights [sub, tap, c_in, c_out], bf16
    bn_scale_ref: (N_SUB, C)          gamma / sqrt(running_var + eps), f32
    bn_shift_ref: (N_SUB, C)          beta - mean*scale + scale*conv_bias, f32
    w_out_ref:    (C, C_OUT)          1x1 out-conv weight (C_in, C_out), bf16
    b_out_ref:    (1, C_OUT)          out-conv bias, f32
    scat_ref:     (UP*T, T*UP)        fused 0/1 scatter matrix, bf16
    o_ref:        (BBLK, N_MELS, T*UPSAMPLE)
    xpad_ref:     VMEM scratch (BBLK, ALIGN + T + 8, C), bf16
    """
    bblk, t_len, c = x_ref.shape
    n_sub, ksize = w_res_ref.shape[0], w_res_ref.shape[1]
    pad = (ksize - 1) // 2
    n_layers = n_sub // 2
    out_t = scat_ref.shape[1]
    upsample = scat_ref.shape[0] // t_len
    n_mels = w_out_ref.shape[1] // upsample
    m_rows = bblk * t_len

    # Zero only the halo rows bracketing the aligned interior.  Every step
    # (see header comment): correct under megacore sharding, and cheap.
    zero_halo = jnp.zeros((bblk, pad, c), xpad_ref.dtype)
    xpad_ref[:, pl.ds(ALIGN - pad, pad), :] = zero_halo
    xpad_ref[:, pl.ds(ALIGN + t_len, pad), :] = zero_halo

    h = x_ref[...].reshape(m_rows, c)                       # (M, C) f32

    for layer in range(n_layers):
        res = h
        for sub in range(2):
            idx = layer * 2 + sub
            # Stage activation (bf16) into the padded scratch; interior starts
            # at sublane offset ALIGN=8 -> unmasked, full-width store.
            xpad_ref[:, pl.ds(ALIGN, t_len), :] = (
                h.astype(jnp.bfloat16).reshape(bblk, t_len, c))
            # K accumulated per-tap matmuls (no 160-lane concat / im2col).
            acc = None
            for j in range(ksize):
                tap = xpad_ref[:, pl.ds(ALIGN - pad + j, t_len), :]
                part = jnp.dot(tap.reshape(m_rows, c),
                               w_res_ref[idx, j, :, :],
                               preferred_element_type=jnp.float32)  # (M, C)
                acc = part if acc is None else acc + part
            # BatchNorm1d (eval) + conv bias, folded to per-channel affine.
            acc = (acc * bn_scale_ref[pl.ds(idx, 1), :]
                   + bn_shift_ref[pl.ds(idx, 1), :])
            # ReLU ; Dropout is identity in eval mode.
            h = jnp.maximum(acc, 0.0)
        h = h + res

    # out_layer: Conv1d kernel_size=1  ==  per-timestep matmul.
    y = jnp.dot(h.astype(jnp.bfloat16), w_out_ref[...],
                preferred_element_type=jnp.float32)             # (M, C_OUT)
    y = y + b_out_ref[...]                                      # (1, C_OUT) bcast

    # Fused tail permute/reshape/permute:
    #   out[b, m, UP*t + u] = y[b*T + t, u*N_MELS + m]
    # One 2D transpose, then a single (N_MELS, UP*T) x (UP*T, UP*T) 0/1
    # scatter matmul per batch element; bf16 operands (scat is exact 0/1).
    y_t = y.T.astype(jnp.bfloat16)                              # (C_OUT, M)
    for bi in range(bblk):
        a_cat = jnp.concatenate(
            [y_t[u * n_mels:(u + 1) * n_mels, bi * t_len:(bi + 1) * t_len]
             for u in range(upsample)], axis=1)                 # (N_MELS, UP*T)
        o_ref[bi] = jnp.dot(a_cat, scat_ref[...],
                            preferred_element_type=jnp.float32
                            ).astype(o_ref.dtype)


def _pick_batch_block(batch):
    """v5e/v6e (1 TensorCore): one grid step for the whole batch (extra steps
    are a serial loop = pure overhead).  v7x (2 TCs): exactly 2 steps so each
    core gets one chunk under dimension_semantics=('parallel',)."""
    try:
        kind = jax.devices()[0].device_kind.lower()
    except Exception:  # pragma: no cover - CPU/interpret fallback
        kind = ""
    two_core = "v7" in kind
    n_steps = 2 if (two_core and batch >= 2 and batch % 2 == 0) else 1
    return batch // n_steps


@jax.jit
def conv_decoder_forward(x, w_res, bn_scale, bn_shift, w_out, b_out):
    """x: (B, T, HIDDEN) -> (B, N_MELS, T*UPSAMPLE)"""
    B, T, C = x.shape
    assert T % 8 == 0, "T must be a multiple of 8 for clean sublane tiling"
    out_t = T * UPSAMPLE
    bblk = _pick_batch_block(B)
    tpad = ALIGN + T + 8   # aligned front halo + interior + (rounded) back halo

    # Fused 0/1 scatter matrix for the tail permute:
    #   scat[u*T + t, UPSAMPLE*t + u] = 1   (bf16 is exact for 0/1)
    t_idx = jnp.arange(T, dtype=jnp.int32)
    s_idx = jnp.arange(out_t, dtype=jnp.int32)
    scat = jnp.concatenate(
        [(s_idx[None, :] == (UPSAMPLE * t_idx[:, None] + u)).astype(jnp.bfloat16)
         for u in range(UPSAMPLE)], axis=0)                    # (UP*T, out_t)

    out = pl.pallas_call(
        conv_decoder_kernel,
        out_shape=jax.ShapeDtypeStruct((B, N_MELS, out_t), jnp.float32),
        grid_spec=pltpu.PrefetchScalarGridSpec(
            num_scalar_prefetch=0,
            grid=(B // bblk,),
            in_specs=[
                pl.BlockSpec((bblk, T, C), lambda b: (b, 0, 0)),
                pl.BlockSpec(w_res.shape, lambda b: (0, 0, 0, 0)),
                pl.BlockSpec(bn_scale.shape, lambda b: (0, 0)),
                pl.BlockSpec(bn_shift.shape, lambda b: (0, 0)),
                pl.BlockSpec(w_out.shape, lambda b: (0, 0)),
                pl.BlockSpec(b_out.shape, lambda b: (0, 0)),
                pl.BlockSpec((UPSAMPLE * T, out_t), lambda b: (0, 0)),
            ],
            out_specs=pl.BlockSpec((bblk, N_MELS, out_t), lambda b: (b, 0, 0)),
            scratch_shapes=[pltpu.VMEM((bblk, tpad, C), jnp.bfloat16)],
        ),
        compiler_params=pltpu.CompilerParams(
            dimension_semantics=("parallel",),
            # Per-step footprint is <1 MiB; 32 MiB cap is safe on every
            # generation (v7x physical VMEM = 64 MiB).
            vmem_limit_bytes=32 * 1024 * 1024),
    )(x, w_res, bn_scale, bn_shift, w_out, b_out, scat)
    return out


def reference_forward(x, w_res, bn_scale, bn_shift, w_out, b_out):
    """Pure-JAX reference with the same math (bf16 MXU inputs, f32 accum)."""
    B, T, C = x.shape
    n_sub, ksize = w_res.shape[0], w_res.shape[1]
    pad = (ksize - 1) // 2
    w_flat = w_res.reshape(n_sub, ksize * C, C)   # tap-major rows
    h = x
    for layer in range(n_sub // 2):
        res = h
        for sub in range(2):
            idx = layer * 2 + sub
            hp = jnp.pad(h, ((0, 0), (pad, pad), (0, 0)))
            im2col = jnp.concatenate([hp[:, j:j + T, :] for j in range(ksize)],
                                     axis=-1)
            acc = jnp.einsum("btk,kc->btc", im2col.astype(jnp.bfloat16),
                             w_flat[idx], preferred_element_type=jnp.float32)
            acc = acc * bn_scale[idx][None, None, :] + bn_shift[idx][None, None, :]
            h = jnp.maximum(acc, 0.0)
        h = h + res
    y = jnp.einsum("btc,cd->btd", h.astype(jnp.bfloat16), w_out,
                   preferred_element_type=jnp.float32) + b_out[0][None, None, :]
    y = y.reshape(B, T * UPSAMPLE, N_MELS)
    return jnp.transpose(y, (0, 2, 1))


def init_params(key):
    """Deterministic synthetic parameters (shapes match the nn.Module)."""
    ks = jax.random.split(key, 8)
    n_sub = N_LAYERS * 2
    # ResBlock convs: PyTorch weight (C_out, C_in, K) -> per sub-layer/tap
    # (K, C_in, C_out) so tap j's weight is w_res[idx, j].
    w_pt = 0.1 * jax.random.normal(ks[0], (n_sub, HIDDEN, HIDDEN, KSIZE),
                                   jnp.float32)
    w_res = jnp.transpose(w_pt, (0, 3, 2, 1))            # (n_sub, K, C_in, C_out)
    b_res = 0.1 * jax.random.normal(ks[1], (n_sub, HIDDEN), jnp.float32)
    # BatchNorm1d params + running stats folded to per-channel affine (eval);
    # conv bias folded into the shift (BN is affine).
    gamma = 1.0 + 0.05 * jax.random.normal(ks[2], (n_sub, HIDDEN), jnp.float32)
    beta = 0.05 * jax.random.normal(ks[3], (n_sub, HIDDEN), jnp.float32)
    run_mean = 0.05 * jax.random.normal(ks[4], (n_sub, HIDDEN), jnp.float32)
    run_var = 1.0 + 0.1 * jnp.abs(jax.random.normal(ks[5], (n_sub, HIDDEN),
                                                    jnp.float32))
    bn_scale = gamma / jnp.sqrt(run_var + BN_EPS)
    bn_shift = beta - run_mean * bn_scale + bn_scale * b_res
    # out_layer: Conv1d(HIDDEN, C_OUT, kernel_size=1) -> (C_in, C_out)
    w_out = (0.1 * jax.random.normal(ks[6], (C_OUT, HIDDEN), jnp.float32)).T
    b_out = 0.1 * jax.random.normal(ks[7], (1, C_OUT), jnp.float32)
    return (w_res.astype(jnp.bfloat16), bn_scale, bn_shift,
            w_out.astype(jnp.bfloat16), b_out)


if __name__ == "__main__":
    key = jax.random.PRNGKey(0)
    k_x, k_p = jax.random.split(key)

    B, T = 8, 64
    x = jax.random.normal(k_x, (B, T, HIDDEN), jnp.float32)  # (B, T, C) like the module
    params = init_params(k_p)

    out = jax.block_until_ready(conv_decoder_forward(x, *params))
    ref = reference_forward(x, *params)

    assert out.shape == (B, N_MELS, T * UPSAMPLE), out.shape
    # Tolerance covers bf16 rounding of MXU operands (accumulation is f32) and
    # the bf16 rounding of the final values at the 0/1 scatter matmul.
    np.testing.assert_allclose(np.asarray(out), np.asarray(ref),
                               rtol=2e-2, atol=2e-2)
    print("KERNEL_OK")
</pallas_src>

<mosaic_0001>
module attributes {stable_mosaic.version = 11 : i64} {
  func.func @conv_decoder_kernel(%arg0: i32, %arg1: memref<8x64x32xf32, #tpu.memory_space<vmem>>, %arg2: memref<4x5x32x32xbf16, #tpu.memory_space<vmem>>, %arg3: memref<4x32xf32, #tpu.memory_space<vmem>>, %arg4: memref<4x32xf32, #tpu.memory_space<vmem>>, %arg5: memref<32x16xbf16, #tpu.memory_space<vmem>>, %arg6: memref<1x16xf32, #tpu.memory_space<vmem>>, %arg7: memref<128x128xbf16, #tpu.memory_space<vmem>>, %arg8: memref<8x8x128xf32, #tpu.memory_space<vmem>>, %arg9: memref<8x80x32xbf16, #tpu.memory_space<vmem>>) attributes {dimension_semantics = [#tpu.dimension_semantics<parallel>], iteration_bounds = array<i64: 1>, scalar_prefetch = 0 : i64, scratch_operands = 1 : i64, tpu.core_type = #tpu.core_type<tc>, window_params = [{transform_indices = @transform_0, window_bounds = array<i64: 8, 64, 32>}, {pipeline_mode = #tpu.pipeline_mode<synchronous>, transform_indices = @transform_1, window_bounds = array<i64: 4, 5, 32, 32>}, {pipeline_mode = #tpu.pipeline_mode<synchronous>, transform_indices = @transform_2, window_bounds = array<i64: 4, 32>}, {pipeline_mode = #tpu.pipeline_mode<synchronous>, transform_indices = @transform_3, window_bounds = array<i64: 4, 32>}, {pipeline_mode = #tpu.pipeline_mode<synchronous>, transform_indices = @transform_4, window_bounds = array<i64: 32, 16>}, {pipeline_mode = #tpu.pipeline_mode<synchronous>, transform_indices = @transform_5, window_bounds = array<i64: 1, 16>}, {pipeline_mode = #tpu.pipeline_mode<synchronous>, transform_indices = @transform_6, window_bounds = array<i64: 128, 128>}, {transform_indices = @transform_7, window_bounds = array<i64: 8, 8, 128>}]} {
    %cst = arith.constant 0.000000e+00 : bf16
    %0 = vector.broadcast %cst : bf16 to vector<8x2x32xbf16>
    %c0 = arith.constant 0 : index
    %c6 = arith.constant 6 : index
    %c0_0 = arith.constant 0 : index
    %1 = vector.load %arg9[%c0, %c6, %c0_0] : memref<8x80x32xbf16, #tpu.memory_space<vmem>>, vector<8x2x32xbf16>
    tpu.vector_store %arg9[%c0, %c6, %c0_0], %0 {strides = array<i32>} : memref<8x80x32xbf16, #tpu.memory_space<vmem>>, vector<8x2x32xbf16>,
    %c0_1 = arith.constant 0 : index
    %c72 = arith.constant 72 : index
    %c0_2 = arith.constant 0 : index
    %2 = vector.load %arg9[%c0_1, %c72, %c0_2] : memref<8x80x32xbf16, #tpu.memory_space<vmem>>, vector<8x2x32xbf16>
    tpu.vector_store %arg9[%c0_1, %c72, %c0_2], %0 {strides = array<i32>} : memref<8x80x32xbf16, #tpu.memory_space<vmem>>, vector<8x2x32xbf16>,
    %c0_3 = arith.constant 0 : index
    %c0_4 = arith.constant 0 : index
    %c0_5 = arith.constant 0 : index
    %3 = vector.load %arg1[%c0_3, %c0_4, %c0_5] : memref<8x64x32xf32, #tpu.memory_space<vmem>>, vector<8x64x32xf32>
    %4 = vector.shape_cast %3 : vector<8x64x32xf32> to vector<512x32xf32>
    %5 = arith.truncf %4 : vector<512x32xf32> to vector<512x32xbf16>
    %6 = vector.shape_cast %5 : vector<512x32xbf16> to vector<8x64x32xbf16>
    %c0_6 = arith.constant 0 : index
    %c8 = arith.constant 8 : index
    %c0_7 = arith.constant 0 : index
    %7 = vector.load %arg9[%c0_6, %c8, %c0_7] : memref<8x80x32xbf16, #tpu.memory_space<vmem>>, vector<8x64x32xbf16>
    tpu.vector_store %arg9[%c0_6, %c8, %c0_7], %6 {strides = array<i32>} : memref<8x80x32xbf16, #tpu.memory_space<vmem>>, vector<8x64x32xbf16>,
    %c0_8 = arith.constant 0 : index
    %c6_9 = arith.constant 6 : index
    %c0_10 = arith.constant 0 : index
    %8 = vector.load %arg9[%c0_8, %c6_9, %c0_10] : memref<8x80x32xbf16, #tpu.memory_space<vmem>>, vector<8x64x32xbf16>
    %9 = vector.shape_cast %8 : vector<8x64x32xbf16> to vector<512x32xbf16>
    %c0_11 = arith.constant 0 : index
    %c0_12 = arith.constant 0 : index
    %c0_13 = arith.constant 0 : index
    %c0_14 = arith.constant 0 : index
    %10 = vector.load %arg2[%c0_11, %c0_12, %c0_13, %c0_14] : memref<4x5x32x32xbf16, #tpu.memory_space<vmem>>, vector<1x1x32x32xbf16>
    %11 = vector.shape_cast %10 : vector<1x1x32x32xbf16> to vector<32x32xbf16>
    %cst_15 = arith.constant dense<0.000000e+00> : vector<512x32xf32>
    %12 = tpu.matmul %9, %11, %cst_15 {dimension_numbers = #tpu.dot_dimension_numbers<[1], [0], [0], [1], [0, 0, 1, 1], [], []>} : vector<512x32xbf16>, vector<32x32xbf16>, vector<512x32xf32> -> vector<512x32xf32>
    %c0_16 = arith.constant 0 : index
    %c7 = arith.constant 7 : index
    %c0_17 = arith.constant 0 : index
    %13 = vector.load %arg9[%c0_16, %c7, %c0_17] : memref<8x80x32xbf16, #tpu.memory_space<vmem>>, vector<8x64x32xbf16>
    %14 = vector.shape_cast %13 : vector<8x64x32xbf16> to vector<512x32xbf16>
    %c0_18 = arith.constant 0 : index
    %c1 = arith.constant 1 : index
    %c0_19 = arith.constant 0 : index
    %c0_20 = arith.constant 0 : index
    %15 = vector.load %arg2[%c0_18, %c1, %c0_19, %c0_20] : memref<4x5x32x32xbf16, #tpu.memory_space<vmem>>, vector<1x1x32x32xbf16>
    %16 = vector.shape_cast %15 : vector<1x1x32x32xbf16> to vector<32x32xbf16>
    %cst_21 = arith.constant dense<0.000000e+00> : vector<512x32xf32>
    %17 = tpu.matmul %14, %16, %cst_21 {dimension_numbers = #tpu.dot_dimension_numbers<[1], [0], [0], [1], [0, 0, 1, 1], [], []>} : vector<512x32xbf16>, vector<32x32xbf16>, vector<512x32xf32> -> vector<512x32xf32>
    %18 = arith.addf %12, %17 : vector<512x32xf32>
    %c0_22 = arith.constant 0 : index
    %c8_23 = arith.constant 8 : index
    %c0_24 = arith.constant 0 : index
    %19 = vector.load %arg9[%c0_22, %c8_23, %c0_24] : memref<8x80x32xbf16, #tpu.memory_space<vmem>>, vector<8x64x32xbf16>
    %20 = vector.shape_cast %19 : vector<8x64x32xbf16> to vector<512x32xbf16>
    %c0_25 = arith.constant 0 : index
    %c2 = arith.constant 2 : index
    %c0_26 = arith.constant 0 : index
    %c0_27 = arith.constant 0 : index
    %21 = vector.load %arg2[%c0_25, %c2, %c0_26, %c0_27] : memref<4x5x32x32xbf16, #tpu.memory_space<vmem>>, vector<1x1x32x32xbf16>
    %22 = vector.shape_cast %21 : vector<1x1x32x32xbf16> to vector<32x32xbf16>
    %cst_28 = arith.constant dense<0.000000e+00> : vector<512x32xf32>
    %23 = tpu.matmul %20, %22, %cst_28 {dimension_numbers = #tpu.dot_dimension_numbers<[1], [0], [0], [1], [0, 0, 1, 1], [], []>} : vector<512x32xbf16>, vector<32x32xbf16>, vector<512x32xf32> -> vector<512x32xf32>
    %24 = arith.addf %18, %23 : vector<512x32xf32>
    %c0_29 = arith.constant 0 : index
    %c9 = arith.constant 9 : index
    %c0_30 = arith.constant 0 : index
    %25 = vector.load %arg9[%c0_29, %c9, %c0_30] : memref<8x80x32xbf16, #tpu.memory_space<vmem>>, vector<8x64x32xbf16>
    %26 = vector.shape_cast %25 : vector<8x64x32xbf16> to vector<512x32xbf16>
    %c0_31 = arith.constant 0 : index
    %c3 = arith.constant 3 : index
    %c0_32 = arith.constant 0 : index
    %c0_33 = arith.constant 0 : index
    %27 = vector.load %arg2[%c0_31, %c3, %c0_32, %c0_33] : memref<4x5x32x32xbf16, #tpu.memory_space<vmem>>, vector<1x1x32x32xbf16>
    %28 = vector.shape_cast %27 : vector<1x1x32x32xbf16> to vector<32x32xbf16>
    %cst_34 = arith.constant dense<0.000000e+00> : vector<512x32xf32>
    %29 = tpu.matmul %26, %28, %cst_34 {dimension_numbers = #tpu.dot_dimension_numbers<[1], [0], [0], [1], [0, 0, 1, 1], [], []>} : vector<512x32xbf16>, vector<32x32xbf16>, vector<512x32xf32> -> vector<512x32xf32>
    %30 = arith.addf %24, %29 : vector<512x32xf32>
    %c0_35 = arith.constant 0 : index
    %c10 = arith.constant 10 : index
    %c0_36 = arith.constant 0 : index
    %31 = vector.load %arg9[%c0_35, %c10, %c0_36] : memref<8x80x32xbf16, #tpu.memory_space<vmem>>, vector<8x64x32xbf16>
    %32 = vector.shape_cast %31 : vector<8x64x32xbf16> to vector<512x32xbf16>
    %c0_37 = arith.constant 0 : index
    %c4 = arith.constant 4 : index
    %c0_38 = arith.constant 0 : index
    %c0_39 = arith.constant 0 : index
    %33 = vector.load %arg2[%c0_37, %c4, %c0_38, %c0_39] : memref<4x5x32x32xbf16, #tpu.memory_space<vmem>>, vector<1x1x32x32xbf16>
    %34 = vector.shape_cast %33 : vector<1x1x32x32xbf16> to vector<32x32xbf16>
    %cst_40 = arith.constant dense<0.000000e+00> : vector<512x32xf32>
    %35 = tpu.matmul %32, %34, %cst_40 {dimension_numbers = #tpu.dot_dimension_numbers<[1], [0], [0], [1], [0, 0, 1, 1], [], []>} : vector<512x32xbf16>, vector<32x32xbf16>, vector<512x32xf32> -> vector<512x32xf32>
    %36 = arith.addf %30, %35 : vector<512x32xf32>
    %c0_41 = arith.constant 0 : index
    %c0_42 = arith.constant 0 : index
    %37 = vector.load %arg3[%c0_41, %c0_42] : memref<4x32xf32, #tpu.memory_space<vmem>>, vector<1x32xf32>
    %38 = vector.broadcast %37 : vector<1x32xf32> to vector<512x32xf32>
    %39 = arith.mulf %36, %38 : vector<512x32xf32>
    %c0_43 = arith.constant 0 : index
    %c0_44 = arith.constant 0 : index
    %40 = vector.load %arg4[%c0_43, %c0_44] : memref<4x32xf32, #tpu.memory_space<vmem>>, vector<1x32xf32>
    %41 = vector.broadcast %40 : vector<1x32xf32> to vector<512x32xf32>
    %42 = arith.addf %39, %41 : vector<512x32xf32>
    %cst_45 = arith.constant 0.000000e+00 : f32
    %43 = vector.broadcast %cst_45 : f32 to vector<512x32xf32>
    %44 = arith.maximumf %42, %43 : vector<512x32xf32>
    %45 = arith.truncf %44 : vector<512x32xf32> to vector<512x32xbf16>
    %46 = vector.shape_cast %45 : vector<512x32xbf16> to vector<8x64x32xbf16>
    %c0_46 = arith.constant 0 : index
    %c8_47 = arith.constant 8 : index
    %c0_48 = arith.constant 0 : index
    %47 = vector.load %arg9[%c0_46, %c8_47, %c0_48] : memref<8x80x32xbf16, #tpu.memory_space<vmem>>, vector<8x64x32xbf16>
    tpu.vector_store %arg9[%c0_46, %c8_47, %c0_48], %46 {strides = array<i32>} : memref<8x80x32xbf16, #tpu.memory_space<vmem>>, vector<8x64x32xbf16>,
    %c0_49 = arith.constant 0 : index
    %c6_50 = arith.constant 6 : index
    %c0_51 = arith.constant 0 : index
    %48 = vector.load %arg9[%c0_49, %c6_50, %c0_51] : memref<8x80x32xbf16, #tpu.memory_space<vmem>>, vector<8x64x32xbf16>
    %49 = vector.shape_cast %48 : vector<8x64x32xbf16> to vector<512x32xbf16>
    %c1_52 = arith.constant 1 : index
    %c0_53 = arith.constant 0 : index
    %c0_54 = arith.constant 0 : index
    %c0_55 = arith.constant 0 : index
    %50 = vector.load %arg2[%c1_52, %c0_53, %c0_54, %c0_55] : memref<4x5x32x32xbf16, #tpu.memory_space<vmem>>, vector<1x1x32x32xbf16>
    %51 = vector.shape_cast %50 : vector<1x1x32x32xbf16> to vector<32x32xbf16>
    %cst_56 = arith.constant dense<0.000000e+00> : vector<512x32xf32>
    %52 = tpu.matmul %49, %51, %cst_56 {dimension_numbers = #tpu.dot_dimension_numbers<[1], [0], [0], [1], [0, 0, 1, 1], [], []>} : vector<512x32xbf16>, vector<32x32xbf16>, vector<512x32xf32> -> vector<512x32xf32>
    %c0_57 = arith.constant 0 : index
    %c7_58 = arith.constant 7 : index
    %c0_59 = arith.constant 0 : index
    %53 = vector.load %arg9[%c0_57, %c7_58, %c0_59] : memref<8x80x32xbf16, #tpu.memory_space<vmem>>, vector<8x64x32xbf16>
    %54 = vector.shape_cast %53 : vector<8x64x32xbf16> to vector<512x32xbf16>
    %c1_60 = arith.constant 1 : index
    %c1_61 = arith.constant 1 : index
    %c0_62 = arith.constant 0 : index
    %c0_63 = arith.constant 0 : index
    %55 = vector.load %arg2[%c1_60, %c1_61, %c0_62, %c0_63] : memref<4x5x32x32xbf16, #tpu.memory_space<vmem>>, vector<1x1x32x32xbf16>
    %56 = vector.shape_cast %55 : vector<1x1x32x32xbf16> to vector<32x32xbf16>
    %cst_64 = arith.constant dense<0.000000e+00> : vector<512x32xf32>
    %57 = tpu.matmul %54, %56, %cst_64 {dimension_numbers = #tpu.dot_dimension_numbers<[1], [0], [0], [1], [0, 0, 1, 1], [], []>} : vector<512x32xbf16>, vector<32x32xbf16>, vector<512x32xf32> -> vector<512x32xf32>
    %58 = arith.addf %52, %57 : vector<512x32xf32>
    %c0_65 = arith.constant 0 : index
    %c8_66 = arith.constant 8 : index
    %c0_67 = arith.constant 0 : index
    %59 = vector.load %arg9[%c0_65, %c8_66, %c0_67] : memref<8x80x32xbf16, #tpu.memory_space<vmem>>, vector<8x64x32xbf16>
    %60 = vector.shape_cast %59 : vector<8x64x32xbf16> to vector<512x32xbf16>
    %c1_68 = arith.constant 1 : index
    %c2_69 = arith.constant 2 : index
    %c0_70 = arith.constant 0 : index
    %c0_71 = arith.constant 0 : index
    %61 = vector.load %arg2[%c1_68, %c2_69, %c0_70, %c0_71] : memref<4x5x32x32xbf16, #tpu.memory_space<vmem>>, vector<1x1x32x32xbf16>
    %62 = vector.shape_cast %61 : vector<1x1x32x32xbf16> to vector<32x32xbf16>
    %cst_72 = arith.constant dense<0.000000e+00> : vector<512x32xf32>
    %63 = tpu.matmul %60, %62, %cst_72 {dimension_numbers = #tpu.dot_dimension_numbers<[1], [0], [0], [1], [0, 0, 1, 1], [], []>} : vector<512x32xbf16>, vector<32x32xbf16>, vector<512x32xf32> -> vector<512x32xf32>
    %64 = arith.addf %58, %63 : vector<512x32xf32>
    %c0_73 = arith.constant 0 : index
    %c9_74 = arith.constant 9 : index
    %c0_75 = arith.constant 0 : index
    %65 = vector.load %arg9[%c0_73, %c9_74, %c0_75] : memref<8x80x32xbf16, #tpu.memory_space<vmem>>, vector<8x64x32xbf16>
    %66 = vector.shape_cast %65 : vector<8x64x32xbf16> to vector<512x32xbf16>
    %c1_76 = arith.constant 1 : index
    %c3_77 = arith.constant 3 : index
    %c0_78 = arith.constant 0 : index
    %c0_79 = arith.constant 0 : index
    %67 = vector.load %arg2[%c1_76, %c3_77, %c0_78, %c0_79] : memref<4x5x32x32xbf16, #tpu.memory_space<vmem>>, vector<1x1x32x32xbf16>
    %68 = vector.shape_cast %67 : vector<1x1x32x32xbf16> to vector<32x32xbf16>
    %cst_80 = arith.constant dense<0.000000e+00> : vector<512x32xf32>
    %69 = tpu.matmul %66, %68, %cst_80 {dimension_numbers = #tpu.dot_dimension_numbers<[1], [0], [0], [1], [0, 0, 1, 1], [], []>} : vector<512x32xbf16>, vector<32x32xbf16>, vector<512x32xf32> -> vector<512x32xf32>
    %70 = arith.addf %64, %69 : vector<512x32xf32>
    %c0_81 = arith.constant 0 : index
    %c10_82 = arith.constant 10 : index
    %c0_83 = arith.constant 0 : index
    %71 = vector.load %arg9[%c0_81, %c10_82, %c0_83] : memref<8x80x32xbf16, #tpu.memory_space<vmem>>, vector<8x64x32xbf16>
    %72 = vector.shape_cast %71 : vector<8x64x32xbf16> to vector<512x32xbf16>
    %c1_84 = arith.constant 1 : index
    %c4_85 = arith.constant 4 : index
    %c0_86 = arith.constant 0 : index
    %c0_87 = arith.constant 0 : index
    %73 = vector.load %arg2[%c1_84, %c4_85, %c0_86, %c0_87] : memref<4x5x32x32xbf16, #tpu.memory_space<vmem>>, vector<1x1x32x32xbf16>
    %74 = vector.shape_cast %73 : vector<1x1x32x32xbf16> to vector<32x32xbf16>
    %cst_88 = arith.constant dense<0.000000e+00> : vector<512x32xf32>
    %75 = tpu.matmul %72, %74, %cst_88 {dimension_numbers = #tpu.dot_dimension_numbers<[1], [0], [0], [1], [0, 0, 1, 1], [], []>} : vector<512x32xbf16>, vector<32x32xbf16>, vector<512x32xf32> -> vector<512x32xf32>
    %76 = arith.addf %70, %75 : vector<512x32xf32>
    %c1_89 = arith.constant 1 : index
    %c0_90 = arith.constant 0 : index
    %77 = vector.load %arg3[%c1_89, %c0_90] : memref<4x32xf32, #tpu.memory_space<vmem>>, vector<1x32xf32>
    %78 = vector.broadcast %77 : vector<1x32xf32> to vector<512x32xf32>
    %79 = arith.mulf %76, %78 : vector<512x32xf32>
    %c1_91 = arith.constant 1 : index
    %c0_92 = arith.constant 0 : index
    %80 = vector.load %arg4[%c1_91, %c0_92] : memref<4x32xf32, #tpu.memory_space<vmem>>, vector<1x32xf32>
    %81 = vector.broadcast %80 : vector<1x32xf32> to vector<512x32xf32>
    %82 = arith.addf %79, %81 : vector<512x32xf32>
    %cst_93 = arith.constant 0.000000e+00 : f32
    %83 = vector.broadcast %cst_93 : f32 to vector<512x32xf32>
    %84 = arith.maximumf %82, %83 : vector<512x32xf32>
    %85 = arith.addf %84, %4 : vector<512x32xf32>
    %86 = arith.truncf %85 : vector<512x32xf32> to vector<512x32xbf16>
    %87 = vector.shape_cast %86 : vector<512x32xbf16> to vector<8x64x32xbf16>
    %c0_94 = arith.constant 0 : index
    %c8_95 = arith.constant 8 : index
    %c0_96 = arith.constant 0 : index
    %88 = vector.load %arg9[%c0_94, %c8_95, %c0_96] : memref<8x80x32xbf16, #tpu.memory_space<vmem>>, vector<8x64x32xbf16>
    tpu.vector_store %arg9[%c0_94, %c8_95, %c0_96], %87 {strides = array<i32>} : memref<8x80x32xbf16, #tpu.memory_space<vmem>>, vector<8x64x32xbf16>,
    %c0_97 = arith.constant 0 : index
    %c6_98 = arith.constant 6 : index
    %c0_99 = arith.constant 0 : index
    %89 = vector.load %arg9[%c0_97, %c6_98, %c0_99] : memref<8x80x32xbf16, #tpu.memory_space<vmem>>, vector<8x64x32xbf16>
    %90 = vector.shape_cast %89 : vector<8x64x32xbf16> to vector<512x32xbf16>
    %c2_100 = arith.constant 2 : index
    %c0_101 = arith.constant 0 : index
    %c0_102 = arith.constant 0 : index
    %c0_103 = arith.constant 0 : index
    %91 = vector.load %arg2[%c2_100, %c0_101, %c0_102, %c0_103] : memref<4x5x32x32xbf16, #tpu.memory_space<vmem>>, vector<1x1x32x32xbf16>
    %92 = vector.shape_cast %91 : vector<1x1x32x32xbf16> to vector<32x32xbf16>
    %cst_104 = arith.constant dense<0.000000e+00> : vector<512x32xf32>
    %93 = tpu.matmul %90, %92, %cst_104 {dimension_numbers = #tpu.dot_dimension_numbers<[1], [0], [0], [1], [0, 0, 1, 1], [], []>} : vector<512x32xbf16>, vector<32x32xbf16>, vector<512x32xf32> -> vector<512x32xf32>
    %c0_105 = arith.constant 0 : index
    %c7_106 = arith.constant 7 : index
    %c0_107 = arith.constant 0 : index
    %94 = vector.load %arg9[%c0_105, %c7_106, %c0_107] : memref<8x80x32xbf16, #tpu.memory_space<vmem>>, vector<8x64x32xbf16>
    %95 = vector.shape_cast %94 : vector<8x64x32xbf16> to vector<512x32xbf16>
    %c2_108 = arith.constant 2 : index
    %c1_109 = arith.constant 1 : index
    %c0_110 = arith.constant 0 : index
    %c0_111 = arith.constant 0 : index
    %96 = vector.load %arg2[%c2_108, %c1_109, %c0_110, %c0_111] : memref<4x5x32x32xbf16, #tpu.memory_space<vmem>>, vector<1x1x32x32xbf16>
    %97 = vector.shape_cast %96 : vector<1x1x32x32xbf16> to vector<32x32xbf16>
    %cst_112 = arith.constant dense<0.000000e+00> : vector<512x32xf32>
    %98 = tpu.matmul %95, %97, %cst_112 {dimension_numbers = #tpu.dot_dimension_numbers<[1], [0], [0], [1], [0, 0, 1, 1], [], []>} : vector<512x32xbf16>, vector<32x32xbf16>, vector<512x32xf32> -> vector<512x32xf32>
    %99 = arith.addf %93, %98 : vector<512x32xf32>
    %c0_113 = arith.constant 0 : index
    %c8_114 = arith.constant 8 : index
    %c0_115 = arith.constant 0 : index
    %100 = vector.load %arg9[%c0_113, %c8_114, %c0_115] : memref<8x80x32xbf16, #tpu.memory_space<vmem>>, vector<8x64x32xbf16>
    %101 = vector.shape_cast %100 : vector<8x64x32xbf16> to vector<512x32xbf16>
    %c2_116 = arith.constant 2 : index
    %c2_117 = arith.constant 2 : index
    %c0_118 = arith.constant 0 : index
    %c0_119 = arith.constant 0 : index
    %102 = vector.load %arg2[%c2_116, %c2_117, %c0_118, %c0_119] : memref<4x5x32x32xbf16, #tpu.memory_space<vmem>>, vector<1x1x32x32xbf16>
    %103 = vector.shape_cast %102 : vector<1x1x32x32xbf16> to vector<32x32xbf16>
    %cst_120 = arith.constant dense<0.000000e+00> : vector<512x32xf32>
    %104 = tpu.matmul %101, %103, %cst_120 {dimension_numbers = #tpu.dot_dimension_numbers<[1], [0], [0], [1], [0, 0, 1, 1], [], []>} : vector<512x32xbf16>, vector<32x32xbf16>, vector<512x32xf32> -> vector<512x32xf32>
    %105 = arith.addf %99, %104 : vector<512x32xf32>
    %c0_121 = arith.constant 0 : index
    %c9_122 = arith.constant 9 : index
    %c0_123 = arith.constant 0 : index
    %106 = vector.load %arg9[%c0_121, %c9_122, %c0_123] : memref<8x80x32xbf16, #tpu.memory_space<vmem>>, vector<8x64x32xbf16>
    %107 = vector.shape_cast %106 : vector<8x64x32xbf16> to vector<512x32xbf16>
    %c2_124 = arith.constant 2 : index
    %c3_125 = arith.constant 3 : index
    %c0_126 = arith.constant 0 : index
    %c0_127 = arith.constant 0 : index
    %108 = vector.load %arg2[%c2_124, %c3_125, %c0_126, %c0_127] : memref<4x5x32x32xbf16, #tpu.memory_space<vmem>>, vector<1x1x32x32xbf16>
    %109 = vector.shape_cast %108 : vector<1x1x32x32xbf16> to vector<32x32xbf16>
    %cst_128 = arith.constant dense<0.000000e+00> : vector<512x32xf32>
    %110 = tpu.matmul %107, %109, %cst_128 {dimension_numbers = #tpu.dot_dimension_numbers<[1], [0], [0], [1], [0, 0, 1, 1], [], []>} : vector<512x32xbf16>, vector<32x32xbf16>, vector<512x32xf32> -> vector<512x32xf32>
    %111 = arith.addf %105, %110 : vector<512x32xf32>
    %c0_129 = arith.constant 0 : index
    %c10_130 = arith.constant 10 : index
    %c0_131 = arith.constant 0 : index
    %112 = vector.load %arg9[%c0_129, %c10_130, %c0_131] : memref<8x80x32xbf16, #tpu.memory_space<vmem>>, vector<8x64x32xbf16>
    %113 = vector.shape_cast %112 : vector<8x64x32xbf16> to vector<512x32xbf16>
    %c2_132 = arith.constant 2 : index
    %c4_133 = arith.constant 4 : index
    %c0_134 = arith.constant 0 : index
    %c0_135 = arith.constant 0 : index
    %114 = vector.load %arg2[%c2_132, %c4_133, %c0_134, %c0_135] : memref<4x5x32x32xbf16, #tpu.memory_space<vmem>>, vector<1x1x32x32xbf16>
    %115 = vector.shape_cast %114 : vector<1x1x32x32xbf16> to vector<32x32xbf16>
    %cst_136 = arith.constant dense<0.000000e+00> : vector<512x32xf32>
    %116 = tpu.matmul %113, %115, %cst_136 {dimension_numbers = #tpu.dot_dimension_numbers<[1], [0], [0], [1], [0, 0, 1, 1], [], []>} : vector<512x32xbf16>, vector<32x32xbf16>, vector<512x32xf32> -> vector<512x32xf32>
    %117 = arith.addf %111, %116 : vector<512x32xf32>
    %c2_137 = arith.constant 2 : index
    %c0_138 = arith.constant 0 : index
    %118 = vector.load %arg3[%c2_137, %c0_138] : memref<4x32xf32, #tpu.memory_space<vmem>>, vector<1x32xf32>
    %119 = vector.broadcast %118 : vector<1x32xf32> to vector<512x32xf32>
    %120 = arith.mulf %117, %119 : vector<512x32xf32>
    %c2_139 = arith.constant 2 : index
    %c0_140 = arith.constant 0 : index
    %121 = vector.load %arg4[%c2_139, %c0_140] : memref<4x32xf32, #tpu.memory_space<vmem>>, vector<1x32xf32>
    %122 = vector.broadcast %121 : vector<1x32xf32> to vector<512x32xf32>
    %123 = arith.addf %120, %122 : vector<512x32xf32>
    %cst_141 = arith.constant 0.000000e+00 : f32
    %124 = vector.broadcast %cst_141 : f32 to vector<512x32xf32>
    %125 = arith.maximumf %123, %124 : vector<512x32xf32>
    %126 = arith.truncf %125 : vector<512x32xf32> to vector<512x32xbf16>
    %127 = vector.shape_cast %126 : vector<512x32xbf16> to vector<8x64x32xbf16>
    %c0_142 = arith.constant 0 : index
    %c8_143 = arith.constant 8 : index
    %c0_144 = arith.constant 0 : index
    %128 = vector.load %arg9[%c0_142, %c8_143, %c0_144] : memref<8x80x32xbf16, #tpu.memory_space<vmem>>, vector<8x64x32xbf16>
    tpu.vector_store %arg9[%c0_142, %c8_143, %c0_144], %127 {strides = array<i32>} : memref<8x80x32xbf16, #tpu.memory_space<vmem>>, vector<8x64x32xbf16>,
    %c0_145 = arith.constant 0 : index
    %c6_146 = arith.constant 6 : index
    %c0_147 = arith.constant 0 : index
    %129 = vector.load %arg9[%c0_145, %c6_146, %c0_147] : memref<8x80x32xbf16, #tpu.memory_space<vmem>>, vector<8x64x32xbf16>
    %130 = vector.shape_cast %129 : vector<8x64x32xbf16> to vector<512x32xbf16>
    %c3_148 = arith.constant 3 : index
    %c0_149 = arith.constant 0 : index
    %c0_150 = arith.constant 0 : index
    %c0_151 = arith.constant 0 : index
    %131 = vector.load %arg2[%c3_148, %c0_149, %c0_150, %c0_151] : memref<4x5x32x32xbf16, #tpu.memory_space<vmem>>, vector<1x1x32x32xbf16>
    %132 = vector.shape_cast %131 : vector<1x1x32x32xbf16> to vector<32x32xbf16>
    %cst_152 = arith.constant dense<0.000000e+00> : vector<512x32xf32>
    %133 = tpu.matmul %130, %132, %cst_152 {dimension_numbers = #tpu.dot_dimension_numbers<[1], [0], [0], [1], [0, 0, 1, 1], [], []>} : vector<512x32xbf16>, vector<32x32xbf16>, vector<512x32xf32> -> vector<512x32xf32>
    %c0_153 = arith.constant 0 : index
    %c7_154 = arith.constant 7 : index
    %c0_155 = arith.constant 0 : index
    %134 = vector.load %arg9[%c0_153, %c7_154, %c0_155] : memref<8x80x32xbf16, #tpu.memory_space<vmem>>, vector<8x64x32xbf16>
    %135 = vector.shape_cast %134 : vector<8x64x32xbf16> to vector<512x32xbf16>
    %c3_156 = arith.constant 3 : index
    %c1_157 = arith.constant 1 : index
    %c0_158 = arith.constant 0 : index
    %c0_159 = arith.constant 0 : index
    %136 = vector.load %arg2[%c3_156, %c1_157, %c0_158, %c0_159] : memref<4x5x32x32xbf16, #tpu.memory_space<vmem>>, vector<1x1x32x32xbf16>
    %137 = vector.shape_cast %136 : vector<1x1x32x32xbf16> to vector<32x32xbf16>
    %cst_160 = arith.constant dense<0.000000e+00> : vector<512x32xf32>
    %138 = tpu.matmul %135, %137, %cst_160 {dimension_numbers = #tpu.dot_dimension_numbers<[1], [0], [0], [1], [0, 0, 1, 1], [], []>} : vector<512x32xbf16>, vector<32x32xbf16>, vector<512x32xf32> -> vector<512x32xf32>
    %139 = arith.addf %133, %138 : vector<512x32xf32>
    %c0_161 = arith.constant 0 : index
    %c8_162 = arith.constant 8 : index
    %c0_163 = arith.constant 0 : index
    %140 = vector.load %arg9[%c0_161, %c8_162, %c0_163] : memref<8x80x32xbf16, #tpu.memory_space<vmem>>, vector<8x64x32xbf16>
    %141 = vector.shape_cast %140 : vector<8x64x32xbf16> to vector<512x32xbf16>
    %c3_164 = arith.constant 3 : index
    %c2_165 = arith.constant 2 : index
    %c0_166 = arith.constant 0 : index
    %c0_167 = arith.constant 0 : index
    %142 = vector.load %arg2[%c3_164, %c2_165, %c0_166, %c0_167] : memref<4x5x32x32xbf16, #tpu.memory_space<vmem>>, vector<1x1x32x32xbf16>
    %143 = vector.shape_cast %142 : vector<1x1x32x32xbf16> to vector<32x32xbf16>
    %cst_168 = arith.constant dense<0.000000e+00> : vector<512x32xf32>
    %144 = tpu.matmul %141, %143, %cst_168 {dimension_numbers = #tpu.dot_dimension_numbers<[1], [0], [0], [1], [0, 0, 1, 1], [], []>} : vector<512x32xbf16>, vector<32x32xbf16>, vector<512x32xf32> -> vector<512x32xf32>
    %145 = arith.addf %139, %144 : vector<512x32xf32>
    %c0_169 = arith.constant 0 : index
    %c9_170 = arith.constant 9 : index
    %c0_171 = arith.constant 0 : index
    %146 = vector.load %arg9[%c0_169, %c9_170, %c0_171] : memref<8x80x32xbf16, #tpu.memory_space<vmem>>, vector<8x64x32xbf16>
    %147 = vector.shape_cast %146 : vector<8x64x32xbf16> to vector<512x32xbf16>
    %c3_172 = arith.constant 3 : index
    %c3_173 = arith.constant 3 : index
    %c0_174 = arith.constant 0 : index
    %c0_175 = arith.constant 0 : index
    %148 = vector.load %arg2[%c3_172, %c3_173, %c0_174, %c0_175] : memref<4x5x32x32xbf16, #tpu.memory_space<vmem>>, vector<1x1x32x32xbf16>
    %149 = vector.shape_cast %148 : vector<1x1x32x32xbf16> to vector<32x32xbf16>
    %cst_176 = arith.constant dense<0.000000e+00> : vector<512x32xf32>
    %150 = tpu.matmul %147, %149, %cst_176 {dimension_numbers = #tpu.dot_dimension_numbers<[1], [0], [0], [1], [0, 0, 1, 1], [], []>} : vector<512x32xbf16>, vector<32x32xbf16>, vector<512x32xf32> -> vector<512x32xf32>
    %151 = arith.addf %145, %150 : vector<512x32xf32>
    %c0_177 = arith.constant 0 : index
    %c10_178 = arith.constant 10 : index
    %c0_179 = arith.constant 0 : index
    %152 = vector.load %arg9[%c0_177, %c10_178, %c0_179] : memref<8x80x32xbf16, #tpu.memory_space<vmem>>, vector<8x64x32xbf16>
    %153 = vector.shape_cast %152 : vector<8x64x32xbf16> to vector<512x32xbf16>
    %c3_180 = arith.constant 3 : index
    %c4_181 = arith.constant 4 : index
    %c0_182 = arith.constant 0 : index
    %c0_183 = arith.constant 0 : index
    %154 = vector.load %arg2[%c3_180, %c4_181, %c0_182, %c0_183] : memref<4x5x32x32xbf16, #tpu.memory_space<vmem>>, vector<1x1x32x32xbf16>
    %155 = vector.shape_cast %154 : vector<1x1x32x32xbf16> to vector<32x32xbf16>
    %cst_184 = arith.constant dense<0.000000e+00> : vector<512x32xf32>
    %156 = tpu.matmul %153, %155, %cst_184 {dimension_numbers = #tpu.dot_dimension_numbers<[1], [0], [0], [1], [0, 0, 1, 1], [], []>} : vector<512x32xbf16>, vector<32x32xbf16>, vector<512x32xf32> -> vector<512x32xf32>
    %157 = arith.addf %151, %156 : vector<512x32xf32>
    %c3_185 = arith.constant 3 : index
    %c0_186 = arith.constant 0 : index
    %158 = vector.load %arg3[%c3_185, %c0_186] : memref<4x32xf32, #tpu.memory_space<vmem>>, vector<1x32xf32>
    %159 = vector.broadcast %158 : vector<1x32xf32> to vector<512x32xf32>
    %160 = arith.mulf %157, %159 : vector<512x32xf32>
    %c3_187 = arith.constant 3 : index
    %c0_188 = arith.constant 0 : index
    %161 = vector.load %arg4[%c3_187, %c0_188] : memref<4x32xf32, #tpu.memory_space<vmem>>, vector<1x32xf32>
    %162 = vector.broadcast %161 : vector<1x32xf32> to vector<512x32xf32>
    %163 = arith.addf %160, %162 : vector<512x32xf32>
    %cst_189 = arith.constant 0.000000e+00 : f32
    %164 = vector.broadcast %cst_189 : f32 to vector<512x32xf32>
    %165 = arith.maximumf %163, %164 : vector<512x32xf32>
    %166 = arith.addf %165, %85 : vector<512x32xf32>
    %167 = arith.truncf %166 : vector<512x32xf32> to vector<512x32xbf16>
    %c0_190 = arith.constant 0 : index
    %c0_191 = arith.constant 0 : index
    %168 = vector.load %arg5[%c0_190, %c0_191] : memref<32x16xbf16, #tpu.memory_space<vmem>>, vector<32x16xbf16>
    %cst_192 = arith.constant dense<0.000000e+00> : vector<512x16xf32>
    %169 = tpu.matmul %167, %168, %cst_192 {dimension_numbers = #tpu.dot_dimension_numbers<[1], [0], [0], [1], [0, 0, 1, 1], [], []>} : vector<512x32xbf16>, vector<32x16xbf16>, vector<512x16xf32> -> vector<512x16xf32>
    %c0_193 = arith.constant 0 : index
    %c0_194 = arith.constant 0 : index
    %170 = vector.load %arg6[%c0_193, %c0_194] : memref<1x16xf32, #tpu.memory_space<vmem>>, vector<1x16xf32>
    %171 = vector.broadcast %170 : vector<1x16xf32> to vector<512x16xf32>
    %172 = arith.addf %169, %171 : vector<512x16xf32>
    %173 = tpu.transpose %172, [1, 0] : vector<512x16xf32> -> vector<16x512xf32>
    %174 = arith.truncf %173 : vector<16x512xf32> to vector<16x512xbf16>
    %175 = vector.extract_strided_slice %174 {offsets = [0, 0], sizes = [8, 64], strides = [1, 1]} : vector<16x512xbf16> to vector<8x64xbf16>
    %176 = vector.extract_strided_slice %174 {offsets = [8, 0], sizes = [8, 64], strides = [1, 1]} : vector<16x512xbf16> to vector<8x64xbf16>
    %177 = tpu.concatenate %175, %176 in 1 : vector<8x64xbf16>, vector<8x64xbf16> -> vector<8x128xbf16>
    %c0_195 = arith.constant 0 : index
    %c0_196 = arith.constant 0 : index
    %178 = vector.load %arg7[%c0_195, %c0_196] : memref<128x128xbf16, #tpu.memory_space<vmem>>, vector<128x128xbf16>
    %cst_197 = arith.constant dense<0.000000e+00> : vector<8x128xf32>
    %179 = tpu.matmul %177, %178, %cst_197 {dimension_numbers = #tpu.dot_dimension_numbers<[1], [0], [0], [1], [0, 0, 1, 1], [], []>} : vector<8x128xbf16>, vector<128x128xbf16>, vector<8x128xf32> -> vector<8x128xf32>
    %c0_198 = arith.constant 0 : index
    %c0_199 = arith.constant 0 : index
    %c0_200 = arith.constant 0 : index
    %180 = vector.load %arg8[%c0_198, %c0_199, %c0_200] : memref<8x8x128xf32, #tpu.memory_space<vmem>>, vector<1x8x128xf32>
    %181 = vector.shape_cast %180 : vector<1x8x128xf32> to vector<8x128xf32>
    %182 = vector.shape_cast %179 : vector<8x128xf32> to vector<1x8x128xf32>
    tpu.vector_store %arg8[%c0_198, %c0_199, %c0_200], %182 {strides = array<i32>} : memref<8x8x128xf32, #tpu.memory_space<vmem>>, vector<1x8x128xf32>,
    %183 = vector.extract_strided_slice %174 {offsets = [0, 64], sizes = [8, 64], strides = [1, 1]} : vector<16x512xbf16> to vector<8x64xbf16>
    %184 = vector.extract_strided_slice %174 {offsets = [8, 64], sizes = [8, 64], strides = [1, 1]} : vector<16x512xbf16> to vector<8x64xbf16>
    %185 = tpu.concatenate %183, %184 in 1 : vector<8x64xbf16>, vector<8x64xbf16> -> vector<8x128xbf16>
    %c0_201 = arith.constant 0 : index
    %c0_202 = arith.constant 0 : index
    %186 = vector.load %arg7[%c0_201, %c0_202] : memref<128x128xbf16, #tpu.memory_space<vmem>>, vector<128x128xbf16>
    %cst_203 = arith.constant dense<0.000000e+00> : vector<8x128xf32>
    %187 = tpu.matmul %185, %186, %cst_203 {dimension_numbers = #tpu.dot_dimension_numbers<[1], [0], [0], [1], [0, 0, 1, 1], [], []>} : vector<8x128xbf16>, vector<128x128xbf16>, vector<8x128xf32> -> vector<8x128xf32>
    %c1_204 = arith.constant 1 : index
    %c0_205 = arith.constant 0 : index
    %c0_206 = arith.constant 0 : index
    %188 = vector.load %arg8[%c1_204, %c0_205, %c0_206] : memref<8x8x128xf32, #tpu.memory_space<vmem>>, vector<1x8x128xf32>
    %189 = vector.shape_cast %188 : vector<1x8x128xf32> to vector<8x128xf32>
    %190 = vector.shape_cast %187 : vector<8x128xf32> to vector<1x8x128xf32>
    tpu.vector_store %arg8[%c1_204, %c0_205, %c0_206], %190 {strides = array<i32>} : memref<8x8x128xf32, #tpu.memory_space<vmem>>, vector<1x8x128xf32>,
    %191 = vector.extract_strided_slice %174 {offsets = [0, 128], sizes = [8, 64], strides = [1, 1]} : vector<16x512xbf16> to vector<8x64xbf16>
    %192 = vector.extract_strided_slice %174 {offsets = [8, 128], sizes = [8, 64], strides = [1, 1]} : vector<16x512xbf16> to vector<8x64xbf16>
    %193 = tpu.concatenate %191, %192 in 1 : vector<8x64xbf16>, vector<8x64xbf16> -> vector<8x128xbf16>
    %c0_207 = arith.constant 0 : index
    %c0_208 = arith.constant 0 : index
    %194 = vector.load %arg7[%c0_207, %c0_208] : memref<128x128xbf16, #tpu.memory_space<vmem>>, vector<128x128xbf16>
    %cst_209 = arith.constant dense<0.000000e+00> : vector<8x128xf32>
    %195 = tpu.matmul %193, %194, %cst_209 {dimension_numbers = #tpu.dot_dimension_numbers<[1], [0], [0], [1], [0, 0, 1, 1], [], []>} : vector<8x128xbf16>, vector<128x128xbf16>, vector<8x128xf32> -> vector<8x128xf32>
    %c2_210 = arith.constant 2 : index
    %c0_211 = arith.constant 0 : index
    %c0_212 = arith.constant 0 : index
    %196 = vector.load %arg8[%c2_210, %c0_211, %c0_212] : memref<8x8x128xf32, #tpu.memory_space<vmem>>, vector<1x8x128xf32>
    %197 = vector.shape_cast %196 : vector<1x8x128xf32> to vector<8x128xf32>
    %198 = vector.shape_cast %195 : vector<8x128xf32> to vector<1x8x128xf32>
    tpu.vector_store %arg8[%c2_210, %c0_211, %c0_212], %198 {strides = array<i32>} : memref<8x8x128xf32, #tpu.memory_space<vmem>>, vector<1x8x128xf32>,
    %199 = vector.extract_strided_slice %174 {offsets = [0, 192], sizes = [8, 64], strides = [1, 1]} : vector<16x512xbf16> to vector<8x64xbf16>
    %200 = vector.extract_strided_slice %174 {offsets = [8, 192], sizes = [8, 64], strides = [1, 1]} : vector<16x512xbf16> to vector<8x64xbf16>
    %201 = tpu.concatenate %199, %200 in 1 : vector<8x64xbf16>, vector<8x64xbf16> -> vector<8x128xbf16>
    %c0_213 = arith.constant 0 : index
    %c0_214 = arith.constant 0 : index
    %202 = vector.load %arg7[%c0_213, %c0_214] : memref<128x128xbf16, #tpu.memory_space<vmem>>, vector<128x128xbf16>
    %cst_215 = arith.constant dense<0.000000e+00> : vector<8x128xf32>
    %203 = tpu.matmul %201, %202, %cst_215 {dimension_numbers = #tpu.dot_dimension_numbers<[1], [0], [0], [1], [0, 0, 1, 1], [], []>} : vector<8x128xbf16>, vector<128x128xbf16>, vector<8x128xf32> -> vector<8x128xf32>
    %c3_216 = arith.constant 3 : index
    %c0_217 = arith.constant 0 : index
    %c0_218 = arith.constant 0 : index
    %204 = vector.load %arg8[%c3_216, %c0_217, %c0_218] : memref<8x8x128xf32, #tpu.memory_space<vmem>>, vector<1x8x128xf32>
    %205 = vector.shape_cast %204 : vector<1x8x128xf32> to vector<8x128xf32>
    %206 = vector.shape_cast %203 : vector<8x128xf32> to vector<1x8x128xf32>
    tpu.vector_store %arg8[%c3_216, %c0_217, %c0_218], %206 {strides = array<i32>} : memref<8x8x128xf32, #tpu.memory_space<vmem>>, vector<1x8x128xf32>,
    %207 = vector.extract_strided_slice %174 {offsets = [0, 256], sizes = [8, 64], strides = [1, 1]} : vector<16x512xbf16> to vector<8x64xbf16>
    %208 = vector.extract_strided_slice %174 {offsets = [8, 256], sizes = [8, 64], strides = [1, 1]} : vector<16x512xbf16> to vector<8x64xbf16>
    %209 = tpu.concatenate %207, %208 in 1 : vector<8x64xbf16>, vector<8x64xbf16> -> vector<8x128xbf16>
    %c0_219 = arith.constant 0 : index
    %c0_220 = arith.constant 0 : index
    %210 = vector.load %arg7[%c0_219, %c0_220] : memref<128x128xbf16, #tpu.memory_space<vmem>>, vector<128x128xbf16>
    %cst_221 = arith.constant dense<0.000000e+00> : vector<8x128xf32>
    %211 = tpu.matmul %209, %210, %cst_221 {dimension_numbers = #tpu.dot_dimension_numbers<[1], [0], [0], [1], [0, 0, 1, 1], [], []>} : vector<8x128xbf16>, vector<128x128xbf16>, vector<8x128xf32> -> vector<8x128xf32>
    %c4_222 = arith.constant 4 : index
    %c0_223 = arith.constant 0 : index
    %c0_224 = arith.constant 0 : index
    %212 = vector.load %arg8[%c4_222, %c0_223, %c0_224] : memref<8x8x128xf32, #tpu.memory_space<vmem>>, vector<1x8x128xf32>
    %213 = vector.shape_cast %212 : vector<1x8x128xf32> to vector<8x128xf32>
    %214 = vector.shape_cast %211 : vector<8x128xf32> to vector<1x8x128xf32>
    tpu.vector_store %arg8[%c4_222, %c0_223, %c0_224], %214 {strides = array<i32>} : memref<8x8x128xf32, #tpu.memory_space<vmem>>, vector<1x8x128xf32>,
    %215 = vector.extract_strided_slice %174 {offsets = [0, 320], sizes = [8, 64], strides = [1, 1]} : vector<16x512xbf16> to vector<8x64xbf16>
    %216 = vector.extract_strided_slice %174 {offsets = [8, 320], sizes = [8, 64], strides = [1, 1]} : vector<16x512xbf16> to vector<8x64xbf16>
    %217 = tpu.concatenate %215, %216 in 1 : vector<8x64xbf16>, vector<8x64xbf16> -> vector<8x128xbf16>
    %c0_225 = arith.constant 0 : index
    %c0_226 = arith.constant 0 : index
    %218 = vector.load %arg7[%c0_225, %c0_226] : memref<128x128xbf16, #tpu.memory_space<vmem>>, vector<128x128xbf16>
    %cst_227 = arith.constant dense<0.000000e+00> : vector<8x128xf32>
    %219 = tpu.matmul %217, %218, %cst_227 {dimension_numbers = #tpu.dot_dimension_numbers<[1], [0], [0], [1], [0, 0, 1, 1], [], []>} : vector<8x128xbf16>, vector<128x128xbf16>, vector<8x128xf32> -> vector<8x128xf32>
    %c5 = arith.constant 5 : index
    %c0_228 = arith.constant 0 : index
    %c0_229 = arith.constant 0 : index
    %220 = vector.load %arg8[%c5, %c0_228, %c0_229] : memref<8x8x128xf32, #tpu.memory_space<vmem>>, vector<1x8x128xf32>
    %221 = vector.shape_cast %220 : vector<1x8x128xf32> to vector<8x128xf32>
    %222 = vector.shape_cast %219 : vector<8x128xf32> to vector<1x8x128xf32>
    tpu.vector_store %arg8[%c5, %c0_228, %c0_229], %222 {strides = array<i32>} : memref<8x8x128xf32, #tpu.memory_space<vmem>>, vector<1x8x128xf32>,
    %223 = vector.extract_strided_slice %174 {offsets = [0, 384], sizes = [8, 64], strides = [1, 1]} : vector<16x512xbf16> to vector<8x64xbf16>
    %224 = vector.extract_strided_slice %174 {offsets = [8, 384], sizes = [8, 64], strides = [1, 1]} : vector<16x512xbf16> to vector<8x64xbf16>
    %225 = tpu.concatenate %223, %224 in 1 : vector<8x64xbf16>, vector<8x64xbf16> -> vector<8x128xbf16>
    %c0_230 = arith.constant 0 : index
    %c0_231 = arith.constant 0 : index
    %226 = vector.load %arg7[%c0_230, %c0_231] : memref<128x128xbf16, #tpu.memory_space<vmem>>, vector<128x128xbf16>
    %cst_232 = arith.constant dense<0.000000e+00> : vector<8x128xf32>
    %227 = tpu.matmul %225, %226, %cst_232 {dimension_numbers = #tpu.dot_dimension_numbers<[1], [0], [0], [1], [0, 0, 1, 1], [], []>} : vector<8x128xbf16>, vector<128x128xbf16>, vector<8x128xf32> -> vector<8x128xf32>
    %c6_233 = arith.constant 6 : index
    %c0_234 = arith.constant 0 : index
    %c0_235 = arith.constant 0 : index
    %228 = vector.load %arg8[%c6_233, %c0_234, %c0_235] : memref<8x8x128xf32, #tpu.memory_space<vmem>>, vector<1x8x128xf32>
    %229 = vector.shape_cast %228 : vector<1x8x128xf32> to vector<8x128xf32>
    %230 = vector.shape_cast %227 : vector<8x128xf32> to vector<1x8x128xf32>
    tpu.vector_store %arg8[%c6_233, %c0_234, %c0_235], %230 {strides = array<i32>} : memref<8x8x128xf32, #tpu.memory_space<vmem>>, vector<1x8x128xf32>,
    %231 = vector.extract_strided_slice %174 {offsets = [0, 448], sizes = [8, 64], strides = [1, 1]} : vector<16x512xbf16> to vector<8x64xbf16>
    %232 = vector.extract_strided_slice %174 {offsets = [8, 448], sizes = [8, 64], strides = [1, 1]} : vector<16x512xbf16> to vector<8x64xbf16>
    %233 = tpu.concatenate %231, %232 in 1 : vector<8x64xbf16>, vector<8x64xbf16> -> vector<8x128xbf16>
    %c0_236 = arith.constant 0 : index
    %c0_237 = arith.constant 0 : index
    %234 = vector.load %arg7[%c0_236, %c0_237] : memref<128x128xbf16, #tpu.memory_space<vmem>>, vector<128x128xbf16>
    %cst_238 = arith.constant dense<0.000000e+00> : vector<8x128xf32>
    %235 = tpu.matmul %233, %234, %cst_238 {dimension_numbers = #tpu.dot_dimension_numbers<[1], [0], [0], [1], [0, 0, 1, 1], [], []>} : vector<8x128xbf16>, vector<128x128xbf16>, vector<8x128xf32> -> vector<8x128xf32>
    %c7_239 = arith.constant 7 : index
    %c0_240 = arith.constant 0 : index
    %c0_241 = arith.constant 0 : index
    %236 = vector.load %arg8[%c7_239, %c0_240, %c0_241] : memref<8x8x128xf32, #tpu.memory_space<vmem>>, vector<1x8x128xf32>
    %237 = vector.shape_cast %236 : vector<1x8x128xf32> to vector<8x128xf32>
    %238 = vector.shape_cast %235 : vector<8x128xf32> to vector<1x8x128xf32>
    tpu.vector_store %arg8[%c7_239, %c0_240, %c0_241], %238 {strides = array<i32>} : memref<8x8x128xf32, #tpu.memory_space<vmem>>, vector<1x8x128xf32>,
    return
  }
  func.func @transform_0(%arg0: i32) -> (i32, i32, i32) {
    %c0_i32 = arith.constant 0 : i32
    %c0_i32_0 = arith.constant 0 : i32
    %c0_i32_1 = arith.constant 0 : i32
    return %arg0, %c0_i32, %c0_i32_0 : i32, i32, i32
  }
  func.func @transform_1(%arg0: i32) -> (i32, i32, i32, i32) {
    %c0_i32 = arith.constant 0 : i32
    %c0_i32_0 = arith.constant 0 : i32
    %c0_i32_1 = arith.constant 0 : i32
    %c0_i32_2 = arith.constant 0 : i32
    %c0_i32_3 = arith.constant 0 : i32
    return %c0_i32, %c0_i32_0, %c0_i32_1, %c0_i32_2 : i32, i32, i32, i32
  }
  func.func @transform_2(%arg0: i32) -> (i32, i32) {
    %c0_i32 = arith.constant 0 : i32
    %c0_i32_0 = arith.constant 0 : i32
    %c0_i32_1 = arith.constant 0 : i32
    return %c0_i32, %c0_i32_0 : i32, i32
  }
  func.func @transform_3(%arg0: i32) -> (i32, i32) {
    %c0_i32 = arith.constant 0 : i32
    %c0_i32_0 = arith.constant 0 : i32
    %c0_i32_1 = arith.constant 0 : i32
    return %c0_i32, %c0_i32_0 : i32, i32
  }
  func.func @transform_4(%arg0: i32) -> (i32, i32) {
    %c0_i32 = arith.constant 0 : i32
    %c0_i32_0 = arith.constant 0 : i32
    %c0_i32_1 = arith.constant 0 : i32
    return %c0_i32, %c0_i32_0 : i32, i32
  }
  func.func @transform_5(%arg0: i32) -> (i32, i32) {
    %c0_i32 = arith.constant 0 : i32
    %c0_i32_0 = arith.constant 0 : i32
    %c0_i32_1 = arith.constant 0 : i32
    return %c0_i32, %c0_i32_0 : i32, i32
  }
  func.func @transform_6(%arg0: i32) -> (i32, i32) {
    %c0_i32 = arith.constant 0 : i32
    %c0_i32_0 = arith.constant 0 : i32
    %c0_i32_1 = arith.constant 0 : i32
    return %c0_i32, %c0_i32_0 : i32, i32
  }
  func.func @transform_7(%arg0: i32) -> (i32, i32, i32) {
    %c0_i32 = arith.constant 0 : i32
    %c0_i32_0 = arith.constant 0 : i32
    %c0_i32_1 = arith.constant 0 : i32
    return %arg0, %c0_i32, %c0_i32_0 : i32, i32, i32
  }
}

</mosaic_0001>

<bundles_post_ra>
// kernel: conv_decoder_forward.1
= control target key start
LH: loop header
LB: loop body
LE: loop exit
PB: predicated region body
PF: predicated region fallthrough
CT: control target
= control target key end

     0   :  { %vm28_vm0 = vcmask 257027   ;;  %v20607_v2 = vmov 0   ;;  %vm271_vm1 = vcmask 261124   ;;  %vm174_vm2 = vcmask 1043456   ;;  %s26304_s0 = inlined_call_operand.vmem [shape: f32[8,64,32], index: 0, kind: input, shape index: {}]   ;;  %s26305_s1 = inlined_call_operand.vmem [shape: bf16[4,5,32,32], index: 1, kind: input, shape index: {}]   ;;  %s26306_s2 = inlined_call_operand.vmem [shape: f32[4,32], index: 2, kind: input, shape index: {}]   ;;  %s26307_s3 = inlined_call_operand.vmem [shape: f32[4,32], index: 3, kind: input, shape index: {}]   ;;  %s26308_s4 = inlined_call_operand.vmem [shape: bf16[32,16], index: 4, kind: input, shape index: {}]   ;;  %s26309_s5 = inlined_call_operand.vmem [shape: f32[1,16], index: 5, kind: input, shape index: {}]   ;;  %s26310_s6 = inlined_call_operand.vmem [shape: bf16[128,128], index: 6, kind: input, shape index: {}]   ;;  %s26311_s7 = inlined_call_operand.hbm [shape: f32[8,8,128], index: 7, kind: output, shape index: {}]  }
   0x1   :  { %v20281_v0 = vld [vmem:[%s26305_s1 + $0x10] sm:$0xff]   ;;  %v20282_v1 = vld [vmem:[%s26305_s1 + $0x18] sm:$0xff]   ;;  %29 = vst.msk [vmem:[#allocation2] sm:$0x8] %vm28_vm0, %v20607_v2  ;;  %v46_v3 = vld [vmem:[%s26304_s0] sm:$0xff]  ;;  %vm273_vm3 = vcmask 261120  }
   0x2   :  { %17578 = vmatprep.subr.bf16.mxu0 %v20281_v0  ;;  %v47_v4 = vld [vmem:[%s26304_s0 + $0x8] sm:$0xff]  ;;  %v48_v5 = vld [vmem:[%s26304_s0 + $0x10] sm:$0xff]  ;;  %30 = vst.msk [vmem:[#allocation2 + $0x28] sm:$0x8] %vm28_vm0, %v20607_v2  ;;  %31 = vst.msk [vmem:[#allocation2 + $0x50] sm:$0x8] %vm28_vm0, %v20607_v2 }
   0x3   :  { %32 = vst.msk [vmem:[#allocation2 + $0x78] sm:$0x8] %vm28_vm0, %v20607_v2  ;;  %33 = vst.msk [vmem:[#allocation2 + $0xa0] sm:$0x8] %vm28_vm0, %v20607_v2  ;;  %17579 = vmatpush3.bf16.msra.mxu0 %v20281_v0  ;;  %v49_v6 = vld [vmem:[%s26304_s0 + $0x18] sm:$0xff]  ;;  %v110_v7 = vpack.c.bf16 %v47_v4, %v46_v3  ;;  %v20683_v8 = vld [vmem:[%s26305_s1] sm:$0xff]  }
   0x4   :  { %34 = vst.msk [vmem:[#allocation2 + $0xc8] sm:$0x8] %vm28_vm0, %v20607_v2  ;;  %35 = vst.msk [vmem:[#allocation2 + $0xf0] sm:$0x8] %vm28_vm0, %v20607_v2  ;;  %17580 = vmatprep.subr.bf16.mxu0 %v20282_v1  ;;  %v111_v9 = vpack.c.bf16 %v49_v6, %v48_v5  ;;  %v50_v10 = vld [vmem:[%s26304_s0 + $0x20] sm:$0xff]  ;;  %v51_v11 = vld [vmem:[%s26304_s0 + $0x28] sm:$0xff] }
   0x5   :  { %36 = vst.msk [vmem:[#allocation2 + $0x118] sm:$0x8] %vm28_vm0, %v20607_v2  ;;  %v175_v12 = vrot.slane %v110_v7, 4  ;;  %v112_v13 = vpack.c.bf16 %v51_v11, %v50_v10  ;;  %v52_v14 = vld [vmem:[%s26304_s0 + $0x30] sm:$0xff]  ;;  %v53_v15 = vld [vmem:[%s26304_s0 + $0x38] sm:$0xff]  ;;  %v54_v16 = vld [vmem:[%s26304_s0 + $0x40] sm:$0xff] }
   0x6   :  { %v176_v17 = vrot.slane %v111_v9, 4  ;;  %v113_v18 = vpack.c.bf16 %v53_v15, %v52_v14  ;;  %v55_v19 = vld [vmem:[%s26304_s0 + $0x48] sm:$0xff]  ;;  %v56_v20 = vld [vmem:[%s26304_s0 + $0x50] sm:$0xff]  ;;  %v57_v21 = vld [vmem:[%s26304_s0 + $0x58] sm:$0xff]  ;;  %vm277_vm4 = vcmask 257024   ;;  %vm394_vm6 = vcmask 1044480  }
   0x7   :  { %17581 = vmatpush3.bf16.msra.mxu0 %v20282_v1  ;;  %272 = vst.msk [vmem:[#allocation2] sm:$0xf0] %vm271_vm1, %v175_v12  ;;  %v178_v22 = vrot.slane %v112_v13, 4  ;;  %v114_v23 = vpack.c.bf16 %v55_v19, %v54_v16  ;;  %v115_v24 = vpack.c.bf16 %v57_v21, %v56_v20  ;;  %v58_v25 = vld [vmem:[%s26304_s0 + $0x60] sm:$0xff]  ;;  %v59_v26 = vld [vmem:[%s26304_s0 + $0x68] sm:$0xff]  ;;  %v60_v27 = vld [vmem:[%s26304_s0 + $0x70] sm:$0xff] }
   0x8   :  { %v177_v28 = vsel %vm174_vm2, %v175_v12, %v176_v17  ;;  %17646 = vmatprep.subr.bf16.mxu0 %v20683_v8  ;;  %v180_v29 = vrot.slane %v113_v18, 4  ;;  %v116_v30 = vpack.c.bf16 %v59_v26, %v58_v25  ;;  %v61_v31 = vld [vmem:[%s26304_s0 + $0x78] sm:$0xff]  ;;  %v62_v32 = vld [vmem:[%s26304_s0 + $0x80] sm:$0xff]  ;;  %v63_v33 = vld [vmem:[%s26304_s0 + $0x88] sm:$0xff]  ;;  %vm479_vm5 = vsmask.f32 4352 }
   0x9   :  { %274 = vst.msk [vmem:[#allocation2 + $0x8] sm:$0xff] %vm273_vm3, %v177_v28  ;;  %v179_v34 = vsel %vm174_vm2, %v176_v17, %v178_v22  ;;  %v182_v35 = vrot.slane %v114_v23, 4  ;;  %v183_v36 = vrot.slane %v115_v24, 4  ;;  %v117_v37 = vpack.c.bf16 %v61_v31, %v60_v27  ;;  %v64_v38 = vld [vmem:[%s26304_s0 + $0x90] sm:$0xff]  ;;  %v65_v39 = vld [vmem:[%s26304_s0 + $0x98] sm:$0xff]  ;;  %v66_v40 = vld [vmem:[%s26304_s0 + $0xa0] sm:$0xff] }
   0xa   :  { %275 = vst.msk [vmem:[#allocation2 + $0x10] sm:$0xff] %vm273_vm3, %v179_v34  ;;  %v181_v41 = vsel %vm174_vm2, %v178_v22, %v180_v29  ;;  %v185_v42 = vrot.slane %v116_v30, 4  ;;  %v118_v43 = vpack.c.bf16 %v63_v33, %v62_v32  ;;  %v119_v44 = vpack.c.bf16 %v65_v39, %v64_v38  ;;  %v67_v45 = vld [vmem:[%s26304_s0 + $0xa8] sm:$0xff]  ;;  %v68_v46 = vld [vmem:[%s26304_s0 + $0xb0] sm:$0xff]  ;;  %v69_v47 = vld [vmem:[%s26304_s0 + $0xb8] sm:$0xff] }
   0xb   :  { %278 = vst.msk [vmem:[#allocation2 + $0x20] sm:$0xf] %vm277_vm4, %v180_v29  ;;  %v184_v48 = vsel %vm174_vm2, %v182_v35, %v183_v36  ;;  %v187_v49 = vrot.slane %v117_v37, 4  ;;  %v120_v50 = vpack.c.bf16 %v67_v45, %v66_v40  ;;  %v121_v51 = vpack.c.bf16 %v69_v47, %v68_v46  ;;  %v70_v52 = vld [vmem:[%s26304_s0 + $0xc0] sm:$0xff]  ;;  %v71_v53 = vld [vmem:[%s26304_s0 + $0xc8] sm:$0xff]  ;;  %v72_v54 = vld [vmem:[%s26304_s0 + $0xd0] sm:$0xff] }
   0xc   :  { %276 = vst.msk [vmem:[#allocation2 + $0x18] sm:$0xff] %vm273_vm3, %v181_v41  ;;  %280 = vst.msk [vmem:[#allocation2 + $0x30] sm:$0xff] %vm273_vm3, %v184_v48  ;;  %v186_v55 = vsel %vm174_vm2, %v183_v36, %v185_v42  ;;  %v189_v56 = vrot.slane %v118_v43, 4  ;;  %v190_v57 = vrot.slane %v119_v44, 4  ;;  %v73_v58 = vld [vmem:[%s26304_s0 + $0xd8] sm:$0xff]  ;;  %v122_v59 = vpack.c.bf16 %v71_v53, %v70_v52  ;;  %v74_v60 = vld [vmem:[%s26304_s0 + $0xe0] sm:$0xff] }
   0xd   :  { %279 = vst.msk [vmem:[#allocation2 + $0x28] sm:$0xf0] %vm271_vm1, %v182_v35  ;;  %v75_v61 = vld [vmem:[%s26304_s0 + $0xe8] sm:$0xff]  ;;  %v188_v62 = vsel %vm174_vm2, %v185_v42, %v187_v49  ;;  %v192_v63 = vrot.slane %v120_v50, 4  ;;  %v194_v0 = vrot.slane %v121_v51, 4  ;;  %v123_v1 = vpack.c.bf16 %v73_v58, %v72_v54  ;;  %v76_v3 = vld [vmem:[%s26304_s0 + $0xf0] sm:$0xff] }
   0xe   :  { %281 = vst.msk [vmem:[#allocation2 + $0x38] sm:$0xff] %vm273_vm3, %v186_v55  ;;  %v77_v4 = vld [vmem:[%s26304_s0 + $0xf8] sm:$0xff]  ;;  %v314_v5 = vld [vmem:[#allocation2] sm:$0xf8]  ;;  %282 = vst.msk [vmem:[#allocation2 + $0x40] sm:$0xff] %vm273_vm3, %v188_v62  ;;  %v191_v6 = vsel %vm174_vm2, %v189_v56, %v190_v57  ;;  %v196_v7 = vrot.slane %v122_v59, 4  ;;  %v124_v9 = vpack.c.bf16 %v75_v61, %v74_v60 }
   0xf   :  { %283 = vst.msk [vmem:[#allocation2 + $0x48] sm:$0xf] %vm277_vm4, %v187_v49  ;;  %v125_v10 = vpack.c.bf16 %v77_v4, %v76_v3  ;;  %v481_v11 = vshrl.u32 %v314_v5, 16  ;;  %v484_v12 = vshll.u32 %v314_v5, 16  ;;  %v193_v13 = vsel %vm174_vm2, %v190_v57, %v192_v63  ;;  %288 = vst.msk [vmem:[#allocation2 + $0x70] sm:$0xf] %vm277_vm4, %v194_v0 }
  0x10   :  { %284 = vst.msk [vmem:[#allocation2 + $0x50] sm:$0xf0] %vm271_vm1, %v189_v56  ;;  %v195_v14 = vsel %vm174_vm2, %v192_v63, %v194_v0  ;;  %v20792_v15 = vld [vmem:[#allocation2 + $0x8] sm:$0xff]  ;;  %v197_v16 = vrot.slane %v123_v1, 4  ;;  %289 = vst.msk [vmem:[#allocation2 + $0x78] sm:$0xf0] %vm271_vm1, %v196_v7 }
  0x11   :  { %285 = vst.msk [vmem:[#allocation2 + $0x58] sm:$0xff] %vm273_vm3, %v191_v6  ;;  %286 = vst.msk [vmem:[#allocation2 + $0x60] sm:$0xff] %vm273_vm3, %v193_v13  ;;  %v20797_v17 = vrot.slane %v124_v9, 4  ;;  %v20799_v18 = vrot.slane %v125_v10, 4  ;;  %v483_v19 = vrot.slane %v481_v11, 3  ;;  %v486_v20 = vrot.slane %v484_v12, 4 }
  0x12   :  { %287 = vst.msk [vmem:[#allocation2 + $0x68] sm:$0xff] %vm273_vm3, %v195_v14  ;;  %v489_v21 = vshrl.u32 %v20792_v15, 16  ;;  %v492_v22 = vshll.u32 %v20792_v15, 16  ;;  %v20803_v23 = vld [vmem:[#allocation2 + $0x10] sm:$0xff]  ;;  %v471_v27 = vld [vmem:[#allocation2 + $0x20] sm:$0xf]  ;;  %v198_v28 = vsel %vm174_vm2, %v196_v7, %v197_v16 }
  0x13   :  { %v498_v24 = vshrl.u32 %v20803_v23, 16  ;;  %v501_v25 = vshll.u32 %v20803_v23, 16  ;;  %v20807_v26 = vld [vmem:[#allocation2 + $0x18] sm:$0xff]  ;;  %v200_v29 = vsel %vm174_vm2, %v197_v16, %v20797_v17  ;;  %293 = vst.msk [vmem:[#allocation2 + $0x98] sm:$0xf] %vm277_vm4, %v20799_v18  ;;  %v487_v30 = vor.u32 %v486_v20, %v483_v19  ;;  %v20825_v37 = vld [vmem:[#allocation2 + $0x30] sm:$0xff] }
  0x14   :  { %v491_v31 = vrot.slane %v489_v21, 3  ;;  %v494_v32 = vrot.slane %v492_v22, 4  ;;  %v26355_v33 = vshrl.u32 %v20807_v26, 16  ;;  %v319_v34 = vld [vmem:[#allocation2 + $0x28] sm:$0xf8]  ;;  %290 = vst.msk [vmem:[#allocation2 + $0x80] sm:$0xff] %vm273_vm3, %v198_v28 }
  0x15   :  { %291 = vst.msk [vmem:[#allocation2 + $0x88] sm:$0xff] %vm273_vm3, %v200_v29  ;;  %v500_v35 = vrot.slane %v498_v24, 3  ;;  %v503_v36 = vrot.slane %v501_v25, 4  ;;  %v26354_v40 = vshll.u32 %v20807_v26, 16  ;;  %v516_v41 = vshrl.u32 %v471_v27, 16  ;;  %v20834_v50 = vld [vmem:[#allocation2 + $0x38] sm:$0xff] }
  0x16   :  { %v495_v38 = vor.u32 %v494_v32, %v491_v31  ;;  %v509_v39 = vrot.slane %v26355_v33, 3  ;;  %v519_v43 = vshll.u32 %v471_v27, 16  ;;  %v525_v44 = vshrl.u32 %v319_v34, 16  ;;  %v20836_v51 = vld [vmem:[#allocation2 + $0x40] sm:$0xff]  ;;  %v20284_v52 = vld [vmem:[%s26305_s1 + $0x8] sm:$0xff]  }
  0x17   :  { %v504_v42 = vor.u32 %v503_v36, %v500_v35  ;;  %v528_v45 = vshll.u32 %v319_v34, 16  ;;  %v512_v47 = vrot.slane %v26354_v40, 4  ;;  %v518_v48 = vrot.slane %v516_v41, 3  ;;  %v472_v5 = vld [vmem:[#allocation2 + $0x48] sm:$0xf]  ;;  %v78_v41 = vld [vmem:[%s26304_s0 + $0x100] sm:$0xff] }
  0x18   :  { %v496_v46 = vsel %vm479_vm5, %v487_v30, %v495_v38  ;;  %v26347_v49 = vshrl.u32 %v20825_v37, 16  ;;  %v521_v54 = vrot.slane %v519_v43, 4  ;;  %v527_v55 = vrot.slane %v525_v44, 3  ;;  %v324_v6 = vld [vmem:[#allocation2 + $0x50] sm:$0xf8]  ;;  %v20863_v12 = vld [vmem:[#allocation2 + $0x58] sm:$0xff] }
  0x19   :  { %17582 = vmatprep.mubr.msk.bf16.mxu0 %vm273_vm3, %v496_v46  ;;  %v505_v53 = vsel %vm479_vm5, %v495_v38, %v504_v42  ;;  %v530_v56 = vrot.slane %v528_v45, 4  ;;  %v513_v57 = vor.u32 %v512_v47, %v509_v39  ;;  %v26343_v59 = vshll.u32 %v20825_v37, 16  ;;  %v20872_v31 = vld [vmem:[#allocation2 + $0x60] sm:$0xff]  ;;  %v20874_v36 = vld [vmem:[#allocation2 + $0x68] sm:$0xff]  ;;  %v20889_v47 = vld [vmem:[#allocation2 + $0x70] sm:$0xf] }
  0x1a   :  { %17583 = vmatmul.mubr.msk.bf16.vlgmr.msra.gmra.mrb[0].mxu0 %vm273_vm3, %v505_v53  ;;  %v535_v58 = vrot.slane %v26347_v49, 3  ;;  %v522_v60 = vor.u32 %v521_v54, %v518_v48  ;;  %v26342_v61 = vshrl.u32 %v20834_v50, 16  ;;  %v26340_v62 = vshll.u32 %v20834_v50, 16  ;;  %v20285_v38 = vld [vmem:[%s26305_s1 + $0x20] sm:$0xff]   ;;  %v80_v54 = vld [vmem:[%s26304_s0 + $0x110] sm:$0xff] }
  0x1b   :  { %17647 = vmatpush3.bf16.msra.mxu0 %v20683_v8  ;;  %v26337_v63 = vshrl.u32 %v20836_v51, 16  ;;  %v514_v0 = vsel %vm479_vm5, %v504_v42, %v513_v57  ;;  %v531_v1 = vor.u32 %v530_v56, %v527_v55  ;;  %v538_v3 = vrot.slane %v26343_v59, 4  ;;  %v79_v42 = vld [vmem:[%s26304_s0 + $0x108] sm:$0xff]  ;;  %v81_v55 = vld [vmem:[%s26304_s0 + $0x118] sm:$0xff] }
  0x1c   :  { %v26336_v4 = vshll.u32 %v20836_v51, 16  ;;  %17648 = vmatprep.subr.bf16.mxu0 %v20284_v52  ;;  %17586 = vmatprep.mubr.msk.bf16.mxu0 %vm273_vm3, %v514_v0  ;;  %v523_v7 = vsel %vm479_vm5, %v513_v57, %v522_v60  ;;  %v544_v9 = vrot.slane %v26342_v61, 3  ;;  %v547_v10 = vrot.slane %v26340_v62, 4  ;;  %v20903_v60 = vld [vmem:[#allocation2 + $0x78] sm:$0xf8] }
  0x1d   :  { %v539_v8 = vor.u32 %v538_v3, %v535_v58  ;;  %v553_v11 = vrot.slane %v26337_v63, 3  ;;  %v560_v16 = vshrl.u32 %v472_v5, 16  ;;  %v563_v19 = vshll.u32 %v472_v5, 16  ;;  %v83_v3 = vld [vmem:[%s26304_s0 + $0x128] sm:$0xff]  ;;  %v84_v5 = vld [vmem:[%s26304_s0 + $0x130] sm:$0xff] }
  0x1e   :  { %v556_v14 = vrot.slane %v26336_v4, 4  ;;  %v569_v20 = vshrl.u32 %v324_v6, 16  ;;  %v572_v27 = vshll.u32 %v324_v6, 16  ;;  %v26317_v28 = vshrl.u32 %v20863_v12, 16  ;;  %v86_v6 = vld [vmem:[%s26304_s0 + $0x140] sm:$0xff] }
  0x1f   :  { %17649 = vmatpush3.bf16.msra.mxu0 %v20284_v52  ;;  %v540_v13 = vsel %vm479_vm5, %v531_v1, %v539_v8  ;;  %v548_v29 = vor.u32 %v547_v10, %v544_v9  ;;  %v26316_v30 = vshll.u32 %v20863_v12, 16  ;;  %v562_v34 = vrot.slane %v560_v16, 3  ;;  %v82_v1 = vld [vmem:[%s26304_s0 + $0x120] sm:$0xff] }
  0x20   :  { %v557_v32 = vor.u32 %v556_v14, %v553_v11  ;;  %v565_v35 = vrot.slane %v563_v19, 4  ;;  %v571_v39 = vrot.slane %v569_v20, 3  ;;  %v574_v43 = vrot.slane %v572_v27, 4  ;;  %17714 = vmatprep.subr.bf16.mxu0 %v20285_v38  ;;  %v91_v27 = vld [vmem:[%s26304_s0 + $0x168] sm:$0xff] }
  0x21   :  { %v579_v44 = vrot.slane %v26317_v28, 3  ;;  %v26315_v45 = vshrl.u32 %v20872_v31, 16  ;;  %v26314_v46 = vshll.u32 %v20872_v31, 16  ;;  %v549_v48 = vsel %vm479_vm5, %v539_v8, %v548_v29  ;;  %v85_v8 = vld [vmem:[%s26304_s0 + $0x138] sm:$0xff] }
  0x22   :  { %17587 = vmatmul.mubr.msk.bf16.gmra.mrb[4].mxu0 %vm273_vm3, %v523_v7  ;;  %v582_v52 = vrot.slane %v26316_v30, 4  ;;  %v26313_v53 = vshrl.u32 %v20874_v36, 16  ;;  %v558_v56 = vsel %vm479_vm5, %v548_v29, %v557_v32  ;;  %v566_v57 = vor.u32 %v565_v35, %v562_v34  ;;  %v87_v7 = vld [vmem:[%s26304_s0 + $0x148] sm:$0xff] }
  0x23   :  { %17590 = vmatprep.mubr.msk.bf16.mxu0 %vm273_vm3, %v540_v13  ;;  %v26312_v58 = vshll.u32 %v20874_v36, 16  ;;  %v126_v0 = vpack.c.bf16 %v79_v42, %v78_v41  ;;  %v588_v9 = vrot.slane %v26315_v45, 3  ;;  %v591_v10 = vrot.slane %v26314_v46, 4  ;;  %v88_v13 = vld [vmem:[%s26304_s0 + $0x150] sm:$0xff]  ;;  %v93_v41 = vld [vmem:[%s26304_s0 + $0x178] sm:$0xff]  ;;  %v20985_v45 = vld [vmem:[#allocation2 + $0x80] sm:$0xff] }
  0x24   :  { %v202_v11 = vsel %vm174_vm2, %v20797_v17, %v20799_v18  ;;  %v575_v14 = vor.u32 %v574_v43, %v571_v39  ;;  %v20935_v16 = vor.u32 %v582_v52, %v579_v44  ;;  %v597_v19 = vrot.slane %v26313_v53, 3  ;;  %v89_v17 = vld [vmem:[%s26304_s0 + $0x158] sm:$0xff]  ;;  %v90_v18 = vld [vmem:[%s26304_s0 + $0x160] sm:$0xff]  ;;  %v92_v39 = vld [vmem:[%s26304_s0 + $0x170] sm:$0xff] }
  0x25   :  { %v604_v20 = vshrl.u32 %v20889_v47, 16  ;;  %292 = vst.msk [vmem:[#allocation2 + $0x90] sm:$0xff] %vm273_vm3, %v202_v11  ;;  %v567_v29 = vsel %vm479_vm5, %v557_v32, %v566_v57  ;;  %v600_v34 = vrot.slane %v26312_v58, 4  ;;  %v127_v35 = vpack.c.bf16 %v81_v55, %v80_v54  ;;  %v94_v32 = vld [vmem:[%s26304_s0 + $0x180] sm:$0xff]  ;;  %v95_v52 = vld [vmem:[%s26304_s0 + $0x188] sm:$0xff]  ;;  %v96_v54 = vld [vmem:[%s26304_s0 + $0x190] sm:$0xff] }
  0x26   :  { %v203_v38 = vrot.slane %v126_v0, 4  ;;  %v607_v42 = vshll.u32 %v20889_v47, 16  ;;  %v613_v43 = vshrl.u32 %v20903_v60, 16  ;;  %v128_v44 = vpack.c.bf16 %v83_v3, %v82_v1  ;;  %v97_v55 = vld [vmem:[%s26304_s0 + $0x198] sm:$0xff]  ;;  %v99_v57 = vld [vmem:[%s26304_s0 + $0x1a8] sm:$0xff] }
  0x27   :  { %v592_v0 = vor.u32 %v591_v10, %v588_v9  ;;  %v616_v1 = vshll.u32 %v20903_v60, 16  ;;  %v204_v3 = vrot.slane %v127_v35, 4  ;;  %v131_v53 = vpack.c.bf16 %v89_v17, %v88_v13  ;;  %v100_v13 = vld [vmem:[%s26304_s0 + $0x1b0] sm:$0xff] }
  0x28   :  { %294 = vst.msk [vmem:[#allocation2 + $0xa0] sm:$0xf0] %vm271_vm1, %v203_v38  ;;  %v206_v11 = vrot.slane %v128_v44, 4  ;;  %v20983_v46 = vor.u32 %v600_v34, %v597_v19  ;;  %v132_v9 = vpack.c.bf16 %v91_v27, %v90_v18  ;;  %v133_v10 = vpack.c.bf16 %v93_v41, %v92_v39 }
  0x29   :  { %v205_v30 = vsel %vm174_vm2, %v203_v38, %v204_v3  ;;  %v135_v19 = vpack.c.bf16 %v97_v55, %v96_v54  ;;  %v26331_v18 = vshll.u32 %v20985_v45, 16  ;;  %v593_v54 = vsel %vm479_vm5, %v20935_v16, %v592_v0 }
  0x2a   :  { %17591 = vmatmul.mubr.msk.bf16.gmra.mrb[8].mxu0 %vm273_vm3, %v549_v48  ;;  %v129_v48 = vpack.c.bf16 %v85_v8, %v84_v5  ;;  %v130_v5 = vpack.c.bf16 %v87_v7, %v86_v6  ;;  %v584_v8 = vsel %vm479_vm5, %v575_v14, %v20935_v16  ;;  %295 = vst.msk [vmem:[#allocation2 + $0xa8] sm:$0xff] %vm273_vm3, %v205_v30  ;;  %v211_v7 = vrot.slane %v131_v53, 4  ;;  %v101_v53 = vld [vmem:[%s26304_s0 + $0x1b8] sm:$0xff] }
  0x2b   :  { %17594 = vmatprep.mubr.msk.bf16.mxu0 %vm273_vm3, %v558_v56  ;;  %v98_v56 = vld [vmem:[%s26304_s0 + $0x1a0] sm:$0xff]  ;;  %v207_v60 = vsel %vm174_vm2, %v204_v3, %v206_v11  ;;  %v213_v30 = vrot.slane %v132_v9, 4  ;;  %v134_v14 = vpack.c.bf16 %v95_v52, %v94_v32  ;;  %v218_v38 = vrot.slane %v135_v19, 4  ;;  %v21030_v3 = vld [vmem:[#allocation2 + $0x88] sm:$0xff] }
  0x2c   :  { %v208_v58 = vrot.slane %v129_v48, 4  ;;  %v210_v28 = vrot.slane %v130_v5, 4  ;;  %296 = vst.msk [vmem:[#allocation2 + $0xb0] sm:$0xff] %vm273_vm3, %v207_v60  ;;  %v136_v17 = vpack.c.bf16 %v99_v57, %v98_v56  ;;  %v137_v44 = vpack.c.bf16 %v101_v53, %v100_v13  ;;  %v21032_v5 = vld [vmem:[#allocation2 + $0x90] sm:$0xff]  ;;  %v474_v60 = vld [vmem:[#allocation2 + $0x98] sm:$0xf] }
  0x2d   :  { %v214_v34 = vsel %vm174_vm2, %v211_v7, %v213_v30  ;;  %v217_v35 = vrot.slane %v134_v14, 4  ;;  %v606_v48 = vrot.slane %v604_v20, 3  ;;  %v615_v55 = vrot.slane %v613_v43, 3 }
  0x2e   :  { %v209_v6 = vsel %vm174_vm2, %v206_v11, %v208_v58  ;;  %298 = vst.msk [vmem:[#allocation2 + $0xc0] sm:$0xf] %vm277_vm4, %v208_v58  ;;  %v26334_v58 = vshrl.u32 %v20985_v45, 16  ;;  %v212_v27 = vsel %vm174_vm2, %v210_v28, %v211_v7  ;;  %v21008_v39 = vrot.slane %v136_v17, 4 }
  0x2f   :  { %297 = vst.msk [vmem:[#allocation2 + $0xb8] sm:$0xff] %vm273_vm3, %v209_v6  ;;  %300 = vst.msk [vmem:[#allocation2 + $0xd0] sm:$0xff] %vm273_vm3, %v212_v27  ;;  %v219_v32 = vsel %vm174_vm2, %v217_v35, %v218_v38  ;;  %v222_v47 = vrot.slane %v137_v44, 4  ;;  %v602_v20 = vsel %vm479_vm5, %v592_v0, %v20983_v46  ;;  %v626_v57 = vrot.slane %v26331_v18, 4  ;;  %v21047_v13 = vld [vmem:[#allocation2 + $0xa0] sm:$0xf8] }
  0x30   :  { %299 = vst.msk [vmem:[#allocation2 + $0xc8] sm:$0xf0] %vm271_vm1, %v210_v28  ;;  %v609_v28 = vrot.slane %v607_v42, 4  ;;  %304 = vst.msk [vmem:[#allocation2 + $0xf0] sm:$0xf0] %vm271_vm1, %v217_v35  ;;  %v221_v52 = vsel %vm174_vm2, %v218_v38, %v21008_v39  ;;  %v618_v42 = vrot.slane %v616_v1, 4 }
  0x31   :  { %301 = vst.msk [vmem:[#allocation2 + $0xd8] sm:$0xff] %vm273_vm3, %v214_v34  ;;  %305 = vst.msk [vmem:[#allocation2 + $0xf8] sm:$0xff] %vm273_vm3, %v219_v32  ;;  %v623_v56 = vrot.slane %v26334_v58, 3  ;;  %v26330_v43 = vshrl.u32 %v21030_v3, 16  ;;  %v26328_v0 = vshll.u32 %v21030_v3, 16  ;;  %v26325_v11 = vshrl.u32 %v21032_v5, 16 }
  0x32   :  { %17595 = vmatmul.mubr.msk.bf16.gmra.mrb[12].mxu0 %vm273_vm3, %v567_v29  ;;  %v215_v29 = vrot.slane %v133_v10, 4  ;;  %306 = vst.msk [vmem:[#allocation2 + $0x100] sm:$0xff] %vm273_vm3, %v221_v52  ;;  %v610_v16 = vor.u32 %v609_v28, %v606_v48  ;;  %v619_v1 = vor.u32 %v618_v42, %v615_v55  ;;  %v26318_v9 = vshll.u32 %v21032_v5, 16  ;;  %v21054_v27 = vld [vmem:[#allocation2 + $0xa8] sm:$0xff]  ;;  %v102_v34 = vld [vmem:[%s26304_s0 + $0x1c0] sm:$0xff]  ;;  %v104_v38 = vld [vmem:[%s26304_s0 + $0x1d0] sm:$0xff] }
  0x33   :  { %17598 = vmatprep.mubr.msk.bf16.mxu0 %vm273_vm3, %v584_v8  ;;  %308 = vst.msk [vmem:[#allocation2 + $0x110] sm:$0xf] %vm277_vm4, %v222_v47  ;;  %v627_v8 = vor.u32 %v626_v57, %v623_v56  ;;  %v632_v7 = vrot.slane %v26330_v43, 3  ;;  %v635_v10 = vrot.slane %v26328_v0, 4  ;;  %v641_v14 = vrot.slane %v26325_v11, 3  ;;  %v103_v35 = vld [vmem:[%s26304_s0 + $0x1c8] sm:$0xff] }
  0x34   :  { %v216_v41 = vsel %vm174_vm2, %v213_v30, %v215_v29  ;;  %303 = vst.msk [vmem:[#allocation2 + $0xe8] sm:$0xf] %vm277_vm4, %v215_v29  ;;  %v611_v6 = vsel %vm479_vm5, %v20983_v46, %v610_v16  ;;  %v644_v19 = vrot.slane %v26318_v9, 4  ;;  %v648_v17 = vshrl.u32 %v474_v60, 16  ;;  %v105_v44 = vld [vmem:[%s26304_s0 + $0x1d8] sm:$0xff]  ;;  %v106_v48 = vld [vmem:[%s26304_s0 + $0x1e0] sm:$0xff] }
  0x35   :  { %302 = vst.msk [vmem:[#allocation2 + $0xe0] sm:$0xff] %vm273_vm3, %v216_v41  ;;  %v628_v30 = vsel %vm479_vm5, %v619_v1, %v627_v8  ;;  %v651_v53 = vshll.u32 %v474_v60, 16  ;;  %v657_v46 = vshrl.u32 %v21047_v13, 16  ;;  %v660_v29 = vshll.u32 %v21047_v13, 16  ;;  %v108_v55 = vld [vmem:[%s26304_s0 + $0x1f0] sm:$0xff] }
  0x36   :  { %v636_v41 = vor.u32 %v635_v10, %v632_v7  ;;  %v645_v28 = vor.u32 %v644_v19, %v641_v14  ;;  %v26324_v32 = vshrl.u32 %v21054_v27, 16  ;;  %v26323_v52 = vshll.u32 %v21054_v27, 16  ;;  %v21087_v60 = vld [vmem:[#allocation2 + $0xb0] sm:$0xff] }
  0x37   :  { %v650_v42 = vrot.slane %v648_v17, 3  ;;  %v653_v56 = vrot.slane %v651_v53, 4  ;;  %v659_v57 = vrot.slane %v657_v46, 3  ;;  %v662_v16 = vrot.slane %v660_v29, 4  ;;  %v21094_v17 = vld [vmem:[#allocation2 + $0xb8] sm:$0xff] }
  0x38   :  { %v637_v1 = vsel %vm479_vm5, %v627_v8, %v636_v41  ;;  %v139_v7 = vpack.c.bf16 %v105_v44, %v104_v38  ;;  %v667_v14 = vrot.slane %v26324_v32, 3  ;;  %v670_v19 = vrot.slane %v26323_v52, 4 }
  0x39   :  { %v223_v53 = vsel %vm174_vm2, %v21008_v39, %v222_v47  ;;  %v654_v8 = vor.u32 %v653_v56, %v650_v42  ;;  %v663_v46 = vor.u32 %v662_v16, %v659_v57  ;;  %v26322_v29 = vshrl.u32 %v21087_v60, 16  ;;  %v21108_v42 = vld [vmem:[#allocation2 + $0xc8] sm:$0xf8]  ;;  %v21159_v11 = vld [vmem:[#allocation2 + $0x100] sm:$0xff] }
  0x3a   :  { %17599 = vmatmul.mubr.msk.bf16.gmra.mrb[16].mxu0 %vm273_vm3, %v593_v54  ;;  %v107_v54 = vld [vmem:[%s26304_s0 + $0x1e8] sm:$0xff]  ;;  %307 = vst.msk [vmem:[#allocation2 + $0x108] sm:$0xff] %vm273_vm3, %v223_v53  ;;  %v26319_v39 = vshll.u32 %v21094_v17, 16  ;;  %v704_v53 = vshll.u32 %v21108_v42, 16 }
  0x3b   :  { %17602 = vmatprep.mubr.msk.bf16.mxu0 %vm273_vm3, %v602_v20  ;;  %v109_v20 = vld [vmem:[%s26304_s0 + $0x1f8] sm:$0xff]  ;;  %v140_v10 = vpack.c.bf16 %v107_v54, %v106_v48  ;;  %v671_v48 = vor.u32 %v670_v19, %v667_v14  ;;  %v26320_v54 = vshrl.u32 %v21094_v17, 16  ;;  %v655_v57 = vsel %vm479_vm5, %v645_v28, %v654_v8 }
  0x3c   :  { %v141_v9 = vpack.c.bf16 %v109_v20, %v108_v55  ;;  %v21127_v14 = vld [vmem:[#allocation2 + $0xd8] sm:$0xff]  ;;  %v701_v19 = vshrl.u32 %v21108_v42, 16  ;;  %v21132_v8 = vld [vmem:[#allocation2 + $0xe0] sm:$0xff] }
  0x3d   :  { %v227_v44 = vrot.slane %v140_v10, 4  ;;  %v685_v10 = vrot.slane %v26320_v54, 3  ;;  %v21140_v54 = vld [vmem:[#allocation2 + $0xf0] sm:$0xf8] }
  0x3e   :  { %v229_v47 = vrot.slane %v141_v9, 4  ;;  %v676_v9 = vrot.slane %v26322_v29, 3  ;;  %v748_v29 = vshll.u32 %v21140_v54, 16 }
  0x40   :  { %v230_v56 = vsel %vm174_vm2, %v227_v44, %v229_v47  ;;  %313 = vst.msk [vmem:[#allocation2 + $0x138] sm:$0xf] %vm277_vm4, %v229_v47  ;;  %v750_v18 = vrot.slane %v748_v29, 4 }
  0x41   :  { %312 = vst.msk [vmem:[#allocation2 + $0x130] sm:$0xff] %vm273_vm3, %v230_v56  ;;  %v706_v56 = vrot.slane %v704_v53, 4  ;;  %v745_v53 = vshrl.u32 %v21140_v54, 16  ;;  %v21173_v43 = vld [vmem:[#allocation2 + $0x108] sm:$0xff] }
  0x42   :  { %17603 = vmatmul.mubr.msk.bf16.gmra.mrb[20].mxu0 %vm273_vm3, %v611_v6  ;;  %v138_v6 = vpack.c.bf16 %v103_v35, %v102_v34  ;;  %v26321_v34 = vshll.u32 %v21087_v60, 16  ;;  %v475_v35 = vld [vmem:[#allocation2 + $0xc0] sm:$0xf] }
  0x43   :  { %17606 = vmatprep.mubr.msk.bf16.mxu0 %vm273_vm3, %v628_v30  ;;  %v646_v30 = vsel %vm479_vm5, %v636_v41, %v645_v28  ;;  %v225_v41 = vrot.slane %v139_v7, 4  ;;  %v672_v7 = vsel %vm479_vm5, %v663_v46, %v671_v48  ;;  %v695_v28 = vshll.u32 %v475_v35, 16 }
  0x44   :  { %v224_v38 = vrot.slane %v138_v6, 4  ;;  %v679_v16 = vrot.slane %v26321_v34, 4  ;;  %v21119_v6 = vld [vmem:[#allocation2 + $0xd0] sm:$0xff] }
  0x45   :  { %v228_v20 = vsel %vm174_vm2, %v225_v41, %v227_v44  ;;  %v21137_v44 = vld [vmem:[#allocation2 + $0xe8] sm:$0xf] }
  0x46   :  { %v226_v55 = vsel %vm174_vm2, %v224_v38, %v225_v41  ;;  %309 = vst.msk [vmem:[#allocation2 + $0x118] sm:$0xf0] %vm271_vm1, %v224_v38  ;;  %v680_v46 = vor.u32 %v679_v16, %v676_v9  ;;  %v26326_v38 = vshrl.u32 %v21119_v6, 16  ;;  %v26327_v41 = vshll.u32 %v21119_v6, 16 }
  0x47   :  { %310 = vst.msk [vmem:[#allocation2 + $0x120] sm:$0xff] %vm273_vm3, %v226_v55  ;;  %311 = vst.msk [vmem:[#allocation2 + $0x128] sm:$0xff] %vm273_vm3, %v228_v20  ;;  %v697_v55 = vrot.slane %v695_v28, 4  ;;  %v703_v20 = vrot.slane %v701_v19, 3  ;;  %v26335_v9 = vshll.u32 %v21132_v8, 16  ;;  %v736_v16 = vshrl.u32 %v21137_v44, 16 }
  0x48   :  { %v681_v34 = vsel %vm479_vm5, %v671_v48, %v680_v46  ;;  %v21152_v28 = vld [vmem:[#allocation2 + $0xf8] sm:$0xff] }
  0x49   :  { %v707_v32 = vor.u32 %v706_v56, %v703_v20  ;;  %v732_v0 = vrot.slane %v26335_v9, 4  ;;  %v26338_v56 = vshrl.u32 %v21152_v28, 16 }
  0x4a   :  { %17607 = vmatmul.mubr.msk.bf16.gmra.mrb[24].mxu0 %vm273_vm3, %v637_v1  ;;  %v692_v1 = vshrl.u32 %v475_v35, 16 }
  0x4b   :  { %17610 = vmatprep.mubr.msk.bf16.mxu0 %vm273_vm3, %v646_v30  ;;  %v688_v30 = vrot.slane %v26319_v39, 4  ;;  %v26329_v39 = vshrl.u32 %v21127_v14, 16 }
  0x4c   :  { %v694_v47 = vrot.slane %v692_v1, 3  ;;  %v711_v1 = vrot.slane %v26326_v38, 3  ;;  %v21161_v38 = vld [vmem:[#allocation2 + $0x110] sm:$0xf] }
  0x4d   :  { %v689_v35 = vor.u32 %v688_v30, %v685_v10  ;;  %v714_v10 = vrot.slane %v26327_v41, 4  ;;  %v739_v30 = vshll.u32 %v21137_v44, 16  ;;  %v720_v48 = vrot.slane %v26329_v39, 3 }
  0x4e   :  { %v698_v52 = vor.u32 %v697_v55, %v694_v47  ;;  %v738_v47 = vrot.slane %v736_v16, 3  ;;  %v26339_v39 = vshll.u32 %v21152_v28, 16  ;;  %v780_v58 = vshrl.u32 %v21161_v38, 16  ;;  %v21201_v59 = vld [vmem:[#allocation2 + $0x120] sm:$0xff] }
  0x4f   :  { %v690_v19 = vsel %vm479_vm5, %v680_v46, %v689_v35  ;;  %v715_v55 = vor.u32 %v714_v10, %v711_v1  ;;  %v741_v20 = vrot.slane %v739_v30, 4  ;;  %v783_v16 = vshll.u32 %v21161_v38, 16 }
  0x50   :  { %v26346_v1 = vshll.u32 %v21173_v43, 16  ;;  %v699_v10 = vsel %vm479_vm5, %v689_v35, %v698_v52  ;;  %v755_v30 = vrot.slane %v26338_v56, 3  ;;  %v758_v29 = vrot.slane %v26339_v39, 4 }
  0x51   :  { %v716_v9 = vsel %vm479_vm5, %v707_v32, %v715_v55  ;;  %v782_v56 = vrot.slane %v780_v58, 3  ;;  %v785_v39 = vrot.slane %v783_v16, 4  ;;  %v26353_v58 = vshrl.u32 %v21201_v59, 16 }
  0x52   :  { %17611 = vmatmul.mubr.msk.bf16.gmra.mrb[28].mxu0 %vm273_vm3, %v655_v57  ;;  %v26332_v57 = vshll.u32 %v21127_v14, 16  ;;  %v776_v35 = vrot.slane %v26346_v1, 4  ;;  %v759_v16 = vor.u32 %v758_v29, %v755_v30  ;;  %v21225_v30 = vld [vmem:[#allocation2 + $0x138] sm:$0xf] }
  0x53   :  { %17614 = vmatprep.mubr.msk.bf16.mxu0 %vm273_vm3, %v672_v7  ;;  %v26333_v7 = vshrl.u32 %v21132_v8, 16 }
  0x54   :  { %v723_v41 = vrot.slane %v26332_v57, 4  ;;  %v26341_v57 = vshrl.u32 %v21159_v11, 16 }
  0x55   :  { %v729_v46 = vrot.slane %v26333_v7, 3  ;;  %v26344_v7 = vshll.u32 %v21159_v11, 16 }
  0x56   :  { %v764_v4 = vrot.slane %v26341_v57, 3  ;;  %v724_v62 = vor.u32 %v723_v41, %v720_v48  ;;  %v742_v41 = vor.u32 %v741_v20, %v738_v47 }
  0x57   :  { %v767_v63 = vrot.slane %v26344_v7, 4  ;;  %v733_v61 = vor.u32 %v732_v0, %v729_v46  ;;  %v21203_v7 = vld [vmem:[#allocation2 + $0x128] sm:$0xff] }
  0x58   :  { %v26351_v0 = vshrl.u32 %v21203_v7, 16  ;;  %v26350_v49 = vshll.u32 %v21203_v7, 16 }
  0x5a   :  { %17615 = vmatmul.mubr.msk.bf16.gmra.mrb[32].mxu0 %vm273_vm3, %v681_v34  ;;  %v747_v34 = vrot.slane %v745_v53, 3  ;;  %v21186_v53 = vld [vmem:[#allocation2 + $0x118] sm:$0xf8] }
  0x5b   :  { %17618 = vmatprep.mubr.msk.bf16.mxu0 %vm273_vm3, %v690_v19  ;;  %v26345_v19 = vshrl.u32 %v21173_v43, 16  ;;  %v789_v32 = vshrl.u32 %v21186_v53, 16  ;;  %v792_v57 = vshll.u32 %v21186_v53, 16 }
  0x5c   :  { %v751_v46 = vor.u32 %v750_v18, %v747_v34  ;;  %v768_v18 = vor.u32 %v767_v63, %v764_v4  ;;  %v811_v63 = vrot.slane %v26350_v49, 4  ;;  %v786_v4 = vor.u32 %v785_v39, %v782_v56 }
  0x5d   :  { %v773_v52 = vrot.slane %v26345_v19, 3  ;;  %v734_v19 = vsel %vm479_vm5, %v724_v62, %v733_v61  ;;  %v791_v48 = vrot.slane %v789_v32, 3  ;;  %v794_v1 = vrot.slane %v792_v57, 4 }
  0x5e   :  { %v808_v32 = vrot.slane %v26351_v0, 3 }
  0x5f   :  { %v777_v34 = vor.u32 %v776_v35, %v773_v52  ;;  %v824_v35 = vshrl.u32 %v21225_v30, 16 }
  0x60   :  { %v812_v39 = vor.u32 %v811_v63, %v808_v32 }
  0x61   :  { %v778_v29 = vsel %vm479_vm5, %v768_v18, %v777_v34  ;;  %v826_v56 = vrot.slane %v824_v35, 3 }
  0x62   :  { %17619 = vmatmul.mubr.msk.bf16.gmra.mrb[36].mxu0 %vm273_vm3, %v699_v10  ;;  %v725_v10 = vsel %vm479_vm5, %v715_v55, %v724_v62  ;;  %v21213_v55 = vld [vmem:[#allocation2 + $0x130] sm:$0xff]  ;;  %v743_v62 = vsel %vm479_vm5, %v733_v61, %v742_v41  ;;  %v769_v61 = vsel %vm479_vm5, %v759_v16, %v768_v18  ;;  %v795_v41 = vor.u32 %v794_v1, %v791_v48 }
  0x63   :  { %17622 = vmatprep.mubr.msk.bf16.mxu0 %vm273_vm3, %v716_v9  ;;  %v26352_v9 = vshll.u32 %v21201_v59, 16  ;;  %v26349_v47 = vshrl.u32 %v21213_v55, 16  ;;  %v26348_v20 = vshll.u32 %v21213_v55, 16 }
  0x65   :  { %v802_v57 = vrot.slane %v26352_v9, 4  ;;  %v817_v52 = vrot.slane %v26349_v47, 3 }
  0x6a   :  { %17623 = vmatmul.mubr.msk.bf16.gmra.mrb[40].mxu0 %vm273_vm3, %v725_v10  ;;  %v760_v10 = vsel %vm479_vm5, %v751_v46, %v759_v16  ;;  %v820_v16 = vrot.slane %v26348_v20, 4 }
  0x6b   :  { %17626 = vmatprep.mubr.msk.bf16.mxu0 %vm273_vm3, %v734_v19  ;;  %v799_v19 = vrot.slane %v26353_v58, 3 }
  0x6d   :  { %v803_v46 = vor.u32 %v802_v57, %v799_v19  ;;  %v20387_v57 = vld [vmem:[#allocation2] sm:$0xf8] }
  0x6f   :  { %v804_v18 = vsel %vm479_vm5, %v795_v41, %v803_v46  ;;  %v813_v1 = vsel %vm479_vm5, %v803_v46, %v812_v39 }
  0x72   :  { %17627 = vmatmul.mubr.msk.bf16.gmra.mrb[44].mxu0 %vm273_vm3, %v743_v62  ;;  %v827_v62 = vshll.u32 %v21225_v30, 16 }
  0x73   :  { %17630 = vmatprep.mubr.msk.bf16.mxu0 %vm273_vm3, %v760_v10  ;;  %v787_v10 = vsel %vm479_vm5, %v777_v34, %v786_v4  ;;  %v395_v34 = vrot.slane %v20387_v57, 3  ;;  %v21249_v4 = vld [vmem:[#allocation2 + $0x8] sm:$0xff] }
  0x74   :  { %v396_v41 = vrot.slane %v21249_v4, 3 }
  0x76   :  { %v397_v63 = vsel %vm394_vm6, %v395_v34, %v396_v41 }
  0x7a   :  { %17631 = vmatmul.mubr.msk.bf16.gmra.mrb[48].mxu0 %vm273_vm3, %v769_v61  ;;  %v829_v61 = vrot.slane %v827_v62, 4 }
  0x7b   :  { %17634 = vmatprep.mubr.msk.bf16.mxu0 %vm273_vm3, %v778_v29  ;;  %v821_v29 = vor.u32 %v820_v16, %v817_v52 }
  0x7c   :  { %v830_v19 = vor.u32 %v829_v61, %v826_v56 }
  0x7d   :  { %v822_v48 = vsel %vm479_vm5, %v812_v39, %v821_v29 }
  0x7e   :  { %v831_v32 = vsel %vm479_vm5, %v821_v29, %v830_v19 }
  0x82   :  { %17635 = vmatmul.mubr.msk.bf16.gmra.mrb[52].mxu0 %vm273_vm3, %v787_v10 }
  0x83   :  { %17638 = vmatprep.mubr.msk.bf16.mxu0 %vm273_vm3, %v804_v18 }
  0x8a   :  { %17639 = vmatmul.mubr.msk.bf16.gmra.mrb[56].mxu0 %vm273_vm3, %v813_v1 }
  0x8b   :  { %17642 = vmatprep.mubr.msk.bf16.mxu0 %vm273_vm3, %v822_v48 }
  0x8c   :  { %12 = vsyncpa [#allocation4], 0  ;;  %v21256_v52 = vld [vmem:[#allocation2 + $0x10] sm:$0xff]  ;;  %v21259_v46 = vld [vmem:[#allocation2 + $0x18] sm:$0xff]  ;;  %vm37_vm7 = vcmask 258052   ;;  %vm2924_vm9 = vcmask 1042432  }
  0x8d   :  { %v398_v35 = vrot.slane %v21256_v52, 3  ;;  %v400_v16 = vrot.slane %v21259_v46, 3  ;;  %v318_v18 = vld [vmem:[#allocation2 + $0x20] sm:$0x7]  ;;  %v20286_v39 = vld [vmem:[%s26305_s1 + $0x28] sm:$0xff]   ;;  %v21272_v48 = vld [vmem:[#allocation2 + $0x30] sm:$0xff] }
  0x8e   :  { %v20391_v56 = vld [vmem:[%s26305_s1 + $0x20] sm:$0xff]   ;;  %v402_v61 = vrot.slane %v318_v18, 3  ;;  %v20392_v29 = vld [vmem:[#allocation2 + $0x28] sm:$0xf8]  ;;  %v405_v19 = vrot.slane %v21272_v48, 3  ;;  %v21278_v57 = vld [vmem:[%s26305_s1 + $0x30] sm:$0xff]  }
  0x8f   :  { %v399_v62 = vsel %vm394_vm6, %v396_v41, %v398_v35  ;;  %v401_v10 = vsel %vm394_vm6, %v398_v35, %v400_v16  ;;  %v404_v1 = vrot.slane %v20392_v29, 3  ;;  %v21288_v35 = vld [vmem:[#allocation2 + $0x40] sm:$0xff]  ;;  %v323_v18 = vld [vmem:[#allocation2 + $0x48] sm:$0x7]  ;;  %v21295_v29 = vld [vmem:[#allocation2 + $0x58] sm:$0xff]  ;;  %vm20609_vm10 = vmmov 0  }
  0x90   :  { %v403_v34 = vsel %vm394_vm6, %v400_v16, %v402_v61  ;;  %v328_v20 = vld [vmem:[#allocation2 + $0x70] sm:$0x7]  ;;  %38 = vst.msk [vmem:[#allocation2 + $0x20] sm:$0x10] %vm37_vm7, %v20607_v2  ;;  %39 = vst.msk [vmem:[#allocation2 + $0x48] sm:$0x10] %vm37_vm7, %v20607_v2 }
  0x91   :  { %v406_v41 = vsel %vm394_vm6, %v404_v1, %v405_v19  ;;  %v414_v1 = vrot.slane %v21295_v29, 3  ;;  %40 = vst.msk [vmem:[#allocation2 + $0x70] sm:$0x10] %vm37_vm7, %v20607_v2  ;;  %41 = vst.msk [vmem:[#allocation2 + $0x98] sm:$0x10] %vm37_vm7, %v20607_v2  ;;  %s20610_s19 = smov 64  }
  0x92   :  { %17643 = vmatmul.mubr.msk.bf16.gmra.mrb[60].mxu0 %vm273_vm3, %v831_v32  ;;  %v21285_v32 = vld [vmem:[#allocation2 + $0x38] sm:$0xff]  ;;  %42 = vst.msk [vmem:[#allocation2 + $0xc0] sm:$0x10] %vm37_vm7, %v20607_v2  ;;  %43 = vst.msk [vmem:[#allocation2 + $0xe8] sm:$0x10] %vm37_vm7, %v20607_v2  ;;  %vm15013_vm11 = vcmask 523264  }
  0x93   :  { %17650 = vmatprep.mubr.msk.bf16.mxu0 %vm273_vm3, %v397_v63  ;;  %v407_v63 = vrot.slane %v21285_v32, 3  ;;  %44 = vst.msk [vmem:[#allocation2 + $0x110] sm:$0x10] %vm37_vm7, %v20607_v2  ;;  %45 = vst.msk [vmem:[#allocation2 + $0x138] sm:$0x10] %vm37_vm7, %v20607_v2 }
  0x94   :  { %v21475_v9 = vld [vmem:[#allocation2 + $0xc8] sm:$0xf0]  ;;  %vm2201_vm8 = vsmask.f32 3328 }
  0x9a   :  { %17651 = vmatmul.mubr.msk.bf16.vlgmr.msra.gmra.mrb[0].mxu0 %vm273_vm3, %v399_v62  ;;  %v409_v62 = vrot.slane %v21288_v35, 3 }
  0x9b   :  { %17715 = vmatpush3.bf16.msra.mxu0 %v20391_v56  ;;  %17654 = vmatprep.mubr.msk.bf16.mxu0 %vm273_vm3, %v401_v10  ;;  %v408_v10 = vsel %vm394_vm6, %v405_v19, %v407_v63  ;;  %v20396_v56 = vld [vmem:[#allocation2 + $0x50] sm:$0xf8]  ;;  %v21302_v19 = vld [vmem:[#allocation2 + $0x60] sm:$0xff] }
  0x9c   :  { %17716 = vmatprep.subr.bf16.mxu0 %v20286_v39  ;;  %v410_v16 = vsel %vm394_vm6, %v407_v63, %v409_v62  ;;  %v413_v61 = vrot.slane %v20396_v56, 3  ;;  %v416_v63 = vrot.slane %v21302_v19, 3 }
  0x9f   :  { %17717 = vmatpush3.bf16.msra.mxu0 %v20286_v39  ;;  %v411_v39 = vrot.slane %v323_v18, 3  ;;  %v417_v18 = vsel %vm394_vm6, %v414_v1, %v416_v63 }
  0xa0   :  { %17782 = vmatprep.subr.bf16.mxu0 %v21278_v57 }
  0xa2   :  { %17655 = vmatmul.mubr.msk.bf16.gmra.mrb[4].mxu0 %vm273_vm3, %v403_v34  ;;  %v412_v34 = vsel %vm394_vm6, %v409_v62, %v411_v39  ;;  %v420_v62 = vrot.slane %v328_v20, 3  ;;  %v20400_v39 = vld [vmem:[#allocation2 + $0x78] sm:$0xf8] }
  0xa3   :  { %17658 = vmatprep.mubr.msk.bf16.mxu0 %vm273_vm3, %v406_v41  ;;  %v415_v41 = vsel %vm394_vm6, %v413_v61, %v414_v1  ;;  %v422_v61 = vrot.slane %v20400_v39, 3  ;;  %v425_v1 = vrot.slane %v21030_v3, 3  ;;  %v432_v39 = vrot.slane %v21054_v27, 3 }
  0xaa   :  { %17659 = vmatmul.mubr.msk.bf16.gmra.mrb[8].mxu0 %vm273_vm3, %v408_v10  ;;  %v21305_v10 = vld [vmem:[#allocation2 + $0x68] sm:$0xff] }
  0xab   :  { %17662 = vmatprep.mubr.msk.bf16.mxu0 %vm273_vm3, %v410_v16  ;;  %v418_v16 = vrot.slane %v21305_v10, 3 }
  0xad   :  { %v419_v56 = vsel %vm394_vm6, %v416_v63, %v418_v16  ;;  %v427_v63 = vrot.slane %v21032_v5, 3 }
  0xaf   :  { %v428_v20 = vsel %vm394_vm6, %v425_v1, %v427_v63 }
  0xb2   :  { %17663 = vmatmul.mubr.msk.bf16.gmra.mrb[12].mxu0 %vm273_vm3, %v412_v34  ;;  %v423_v34 = vrot.slane %v20985_v45, 3 }
  0xb3   :  { %17666 = vmatprep.mubr.msk.bf16.mxu0 %vm273_vm3, %v415_v41  ;;  %v421_v41 = vsel %vm394_vm6, %v418_v16, %v420_v62  ;;  %v431_v62 = vrot.slane %v21047_v13, 3 }
  0xb4   :  { %v424_v47 = vsel %vm394_vm6, %v422_v61, %v423_v34 }
  0xb5   :  { %v433_v61 = vsel %vm394_vm6, %v431_v62, %v432_v39 }
  0xba   :  { %17667 = vmatmul.mubr.msk.bf16.gmra.mrb[16].mxu0 %vm273_vm3, %v417_v18  ;;  %v426_v18 = vsel %vm394_vm6, %v423_v34, %v425_v1  ;;  %v434_v34 = vrot.slane %v21087_v60, 3 }
  0xbb   :  { %17670 = vmatprep.mubr.msk.bf16.mxu0 %vm273_vm3, %v419_v56  ;;  %v333_v56 = vld [vmem:[#allocation2 + $0x98] sm:$0x7] }
  0xbc   :  { %v429_v16 = vrot.slane %v333_v56, 3  ;;  %v435_v1 = vsel %vm394_vm6, %v432_v39, %v434_v34  ;;  %v441_v56 = vrot.slane %v21119_v6, 3  ;;  %v443_v39 = vrot.slane %v21127_v14, 3 }
  0xc2   :  { %17671 = vmatmul.mubr.msk.bf16.gmra.mrb[20].mxu0 %vm273_vm3, %v421_v41  ;;  %v436_v41 = vrot.slane %v21094_v17, 3 }
  0xc3   :  { %17674 = vmatprep.mubr.msk.bf16.mxu0 %vm273_vm3, %v424_v47  ;;  %v430_v47 = vsel %vm394_vm6, %v427_v63, %v429_v16  ;;  %v440_v63 = vrot.slane %v21108_v42, 3 }
  0xc5   :  { %v442_v62 = vsel %vm394_vm6, %v440_v63, %v441_v56  ;;  %v452_v63 = vrot.slane %v21159_v11, 3 }
  0xca   :  { %17675 = vmatmul.mubr.msk.bf16.gmra.mrb[24].mxu0 %vm273_vm3, %v426_v18  ;;  %v437_v18 = vsel %vm394_vm6, %v434_v34, %v436_v41 }
  0xcb   :  { %17678 = vmatprep.mubr.msk.bf16.mxu0 %vm273_vm3, %v428_v20  ;;  %v338_v20 = vld [vmem:[#allocation2 + $0xc0] sm:$0x7] }
  0xcc   :  { %v438_v13 = vrot.slane %v338_v20, 3 }
  0xce   :  { %v439_v16 = vsel %vm394_vm6, %v436_v41, %v438_v13  ;;  %v449_v41 = vrot.slane %v21140_v54, 3 }
  0xd2   :  { %17679 = vmatmul.mubr.msk.bf16.gmra.mrb[28].mxu0 %vm273_vm3, %v430_v47  ;;  %v445_v47 = vrot.slane %v21132_v8, 3 }
  0xd3   :  { %17682 = vmatprep.mubr.msk.bf16.mxu0 %vm273_vm3, %v433_v61  ;;  %v444_v61 = vsel %vm394_vm6, %v441_v56, %v443_v39  ;;  %v454_v56 = vrot.slane %v21173_v43, 3 }
  0xd4   :  { %v446_v34 = vsel %vm394_vm6, %v443_v39, %v445_v47  ;;  %v348_v39 = vld [vmem:[#allocation2 + $0x110] sm:$0x7] }
  0xd5   :  { %v456_v54 = vrot.slane %v348_v39, 3  ;;  %v2215_v39 = vrot.slane %v501_v25, 5  ;;  %v20288_v25 = vld [vmem:[%s26305_s1 + $0x38] sm:$0xff]  }
  0xda   :  { %17683 = vmatmul.mubr.msk.bf16.gmra.mrb[32].mxu0 %vm273_vm3, %v435_v1  ;;  %v343_v1 = vld [vmem:[#allocation2 + $0xe8] sm:$0x7] }
  0xdb   :  { %17686 = vmatprep.mubr.msk.bf16.mxu0 %vm273_vm3, %v437_v18  ;;  %v447_v42 = vrot.slane %v343_v1, 3  ;;  %v450_v18 = vrot.slane %v21152_v28, 3 }
  0xdd   :  { %v448_v20 = vsel %vm394_vm6, %v445_v47, %v447_v42  ;;  %v451_v13 = vsel %vm394_vm6, %v449_v41, %v450_v18  ;;  %v458_v47 = vrot.slane %v21186_v53, 3  ;;  %v461_v42 = vrot.slane %v21203_v7, 3  ;;  %v21369_v53 = vld [vmem:[#allocation2] sm:$0xf0] }
  0xde   :  { %v463_v41 = vrot.slane %v21213_v55, 3 }
  0xe2   :  { %17687 = vmatmul.mubr.msk.bf16.gmra.mrb[36].mxu0 %vm273_vm3, %v439_v16  ;;  %v453_v16 = vsel %vm394_vm6, %v450_v18, %v452_v63 }
  0xe3   :  { %17690 = vmatprep.mubr.msk.bf16.mxu0 %vm273_vm3, %v442_v62  ;;  %v455_v62 = vsel %vm394_vm6, %v452_v63, %v454_v56 }
  0xea   :  { %17691 = vmatmul.mubr.msk.bf16.gmra.mrb[40].mxu0 %vm273_vm3, %v444_v61  ;;  %v459_v61 = vrot.slane %v21201_v59, 3 }
  0xeb   :  { %17694 = vmatprep.mubr.msk.bf16.mxu0 %vm273_vm3, %v446_v34  ;;  %v457_v34 = vsel %vm394_vm6, %v454_v56, %v456_v54  ;;  %v1655_v56 = vrot.slane %v21369_v53, 4 }
  0xec   :  { %v460_v1 = vsel %vm394_vm6, %v458_v47, %v459_v61  ;;  %v462_v18 = vsel %vm394_vm6, %v459_v61, %v461_v42  ;;  %v1658_v61 = vrot.slane %v21256_v52, 4 }
  0xf2   :  { %17695 = vmatmul.mubr.msk.bf16.gmra.mrb[44].mxu0 %vm273_vm3, %v448_v20  ;;  %v464_v20 = vsel %vm394_vm6, %v461_v42, %v463_v41  ;;  %v21400_v42 = vld [vmem:[#allocation2 + $0x28] sm:$0xf0] }
  0xf3   :  { %17698 = vmatprep.mubr.msk.bf16.mxu0 %vm273_vm3, %v451_v13  ;;  %v353_v13 = vld [vmem:[#allocation2 + $0x138] sm:$0x7]  ;;  %v1664_v2 = vrot.slane %v21400_v42, 4 }
  0xf4   :  { %v465_v63 = vrot.slane %v353_v13, 3  ;;  %v21410_v13 = vld [vmem:[%s26305_s1 + $0x40] sm:$0xff]  }
  0xf6   :  { %v466_v54 = vsel %vm394_vm6, %v463_v41, %v465_v63  ;;  %v20401_v41 = vld [vmem:[#allocation2 + $0x20] sm:$0xf] }
  0xfa   :  { %17699 = vmatmul.mubr.msk.bf16.gmra.mrb[48].mxu0 %vm273_vm3, %v453_v16  ;;  %v1656_v16 = vrot.slane %v21249_v4, 4 }
  0xfb   :  { %17702 = vmatprep.mubr.msk.bf16.mxu0 %vm273_vm3, %v455_v62  ;;  %v2214_v62 = vrot.slane %v498_v24, 4 }
  0xfc   :  { %v1657_v47 = vsel %vm174_vm2, %v1655_v56, %v1656_v16  ;;  %v1659_v23 = vsel %vm174_vm2, %v1656_v16, %v1658_v61  ;;  %v1669_v16 = vrot.slane %v21288_v35, 4 }
 0x102   :  { %17703 = vmatmul.mubr.msk.bf16.gmra.mrb[52].mxu0 %vm273_vm3, %v457_v34  ;;  %v21384_v34 = vor.u32 %v2215_v39, %v2214_v62 }
 0x103   :  { %17706 = vmatprep.mubr.msk.bf16.mxu0 %vm273_vm3, %v460_v1  ;;  %v1660_v1 = vrot.slane %v21259_v46, 4 }
 0x105   :  { %v1661_v24 = vsel %vm174_vm2, %v1658_v61, %v1660_v1 }
 0x10a   :  { %17707 = vmatmul.mubr.msk.bf16.gmra.mrb[56].mxu0 %vm273_vm3, %v462_v18  ;;  %v1662_v18 = vrot.slane %v20401_v41, 4  ;;  %v1676_v41 = vrot.slane %v21302_v19, 4 }
 0x10b   :  { %17710 = vmatprep.mubr.msk.bf16.mxu0 %vm273_vm3, %v464_v20  ;;  %v1665_v20 = vrot.slane %v21272_v48, 4 }
 0x10c   :  { %v1663_v63 = vsel %vm174_vm2, %v1660_v1, %v1662_v18  ;;  %v1678_v18 = vrot.slane %v21305_v10, 4 }
 0x10d   :  { %v1666_v56 = vsel %vm174_vm2, %v1664_v2, %v1665_v20 }
 0x112   :  { %17711 = vmatmul.mubr.msk.bf16.gmra.mrb[60].mxu0 %vm273_vm3, %v466_v54  ;;  %v21421_v54 = vld [vmem:[#allocation2 + $0x50] sm:$0xf0] }
 0x113   :  { %17718 = vmatprep.mubr.msk.bf16.mxu0 %vm273_vm3, %v1657_v47  ;;  %v20402_v47 = vld [vmem:[#allocation2 + $0x48] sm:$0xf]  ;;  %v1673_v1 = vrot.slane %v21421_v54, 4 }
 0x114   :  { %v1671_v61 = vrot.slane %v20402_v47, 4 }
 0x11a   :  { %17719 = vmatmul.mubr.msk.bf16.vlgmr.msra.gmra.mrb[0].mxu0 %vm273_vm3, %v1659_v23  ;;  %v1674_v23 = vrot.slane %v21295_v29, 4 }
 0x11b   :  { %17783 = vmatpush3.bf16.msra.mxu0 %v21278_v57  ;;  %17722 = vmatprep.mubr.msk.bf16.mxu0 %vm273_vm3, %v1661_v24  ;;  %v1667_v57 = vrot.slane %v21285_v32, 4  ;;  %v1672_v24 = vsel %vm174_vm2, %v1669_v16, %v1671_v61 }
 0x11c   :  { %17784 = vmatprep.subr.bf16.mxu0 %v20288_v25  ;;  %v1677_v2 = vsel %vm174_vm2, %v1674_v23, %v1676_v41 }
 0x11d   :  { %v1668_v62 = vsel %vm174_vm2, %v1665_v20, %v1667_v57  ;;  %v1670_v39 = vsel %vm174_vm2, %v1667_v57, %v1669_v16  ;;  %v1679_v20 = vsel %vm174_vm2, %v1676_v41, %v1678_v18 }
 0x11f   :  { %17785 = vmatpush3.bf16.msra.mxu0 %v20288_v25  ;;  %v1675_v25 = vsel %vm174_vm2, %v1673_v1, %v1674_v23  ;;  %v21447_v1 = vld [vmem:[#allocation2 + $0x88] sm:$0xff] }
 0x120   :  { %17850 = vmatprep.subr.bf16.mxu0 %v21410_v13  ;;  %v1685_v23 = vrot.slane %v21447_v1, 4 }
 0x122   :  { %17723 = vmatmul.mubr.msk.bf16.gmra.mrb[4].mxu0 %vm273_vm3, %v1663_v63  ;;  %v21435_v63 = vld [vmem:[#allocation2 + $0x78] sm:$0xf0] }
 0x123   :  { %17726 = vmatprep.mubr.msk.bf16.mxu0 %vm273_vm3, %v1666_v56  ;;  %v20403_v56 = vld [vmem:[#allocation2 + $0x70] sm:$0xf]  ;;  %v1682_v16 = vrot.slane %v21435_v63, 4 }
 0x124   :  { %v1680_v57 = vrot.slane %v20403_v56, 4 }
 0x126   :  { %v1681_v47 = vsel %vm174_vm2, %v1678_v18, %v1680_v57  ;;  %v20407_v18 = vld [vmem:[#allocation2 + $0x98] sm:$0xf] }
 0x127   :  { %v1689_v56 = vrot.slane %v20407_v18, 4 }
 0x12a   :  { %17727 = vmatmul.mubr.msk.bf16.gmra.mrb[8].mxu0 %vm273_vm3, %v1668_v62  ;;  %v21440_v62 = vld [vmem:[#allocation2 + $0x80] sm:$0xff] }
 0x12b   :  { %17730 = vmatprep.mubr.msk.bf16.mxu0 %vm273_vm3, %v1670_v39  ;;  %v1683_v39 = vrot.slane %v21440_v62, 4 }
 0x12d   :  { %v1684_v61 = vsel %vm174_vm2, %v1682_v16, %v1683_v39  ;;  %v1686_v41 = vsel %vm174_vm2, %v1683_v39, %v1685_v23  ;;  %v21460_v16 = vld [vmem:[#allocation2 + $0xa8] sm:$0xff] }
 0x132   :  { %17731 = vmatmul.mubr.msk.bf16.gmra.mrb[12].mxu0 %vm273_vm3, %v1672_v24  ;;  %v21450_v24 = vld [vmem:[#allocation2 + $0x90] sm:$0xff] }
 0x133   :  { %17734 = vmatprep.mubr.msk.bf16.mxu0 %vm273_vm3, %v1675_v25  ;;  %v1687_v25 = vrot.slane %v21450_v24, 4 }
 0x13a   :  { %17735 = vmatmul.mubr.msk.bf16.gmra.mrb[16].mxu0 %vm273_vm3, %v1677_v2  ;;  %v1688_v2 = vsel %vm174_vm2, %v1685_v23, %v1687_v25  ;;  %v21467_v23 = vld [vmem:[#allocation2 + $0xb0] sm:$0xff] }
 0x13b   :  { %17738 = vmatprep.mubr.msk.bf16.mxu0 %vm273_vm3, %v1679_v20  ;;  %v21455_v20 = vld [vmem:[#allocation2 + $0xa0] sm:$0xf0] }
 0x13c   :  { %v1691_v57 = vrot.slane %v21455_v20, 4 }
 0x142   :  { %17739 = vmatmul.mubr.msk.bf16.gmra.mrb[20].mxu0 %vm273_vm3, %v1681_v47  ;;  %v1692_v47 = vrot.slane %v21460_v16, 4 }
 0x143   :  { %17742 = vmatprep.mubr.msk.bf16.mxu0 %vm273_vm3, %v1684_v61  ;;  %v1690_v61 = vsel %vm174_vm2, %v1687_v25, %v1689_v56  ;;  %v20411_v25 = vld [vmem:[#allocation2 + $0xc0] sm:$0xf] }
 0x144   :  { %v1693_v39 = vsel %vm174_vm2, %v1691_v57, %v1692_v47  ;;  %v1698_v56 = vrot.slane %v20411_v25, 4  ;;  %v1700_v57 = vrot.slane %v21475_v9, 4  ;;  %v21489_v25 = vld [vmem:[#allocation2 + $0xf0] sm:$0xf0] }
 0x14a   :  { %17743 = vmatmul.mubr.msk.bf16.gmra.mrb[24].mxu0 %vm273_vm3, %v1686_v41  ;;  %v1694_v41 = vrot.slane %v21467_v23, 4 }
 0x14b   :  { %17746 = vmatprep.mubr.msk.bf16.mxu0 %vm273_vm3, %v1688_v2  ;;  %v21470_v2 = vld [vmem:[#allocation2 + $0xb8] sm:$0xff] }
 0x14c   :  { %26549 = vst [vmem:[#allocation6_spill] sm:$0xff] %v21470_v2  ;;  %v1696_v18 = vrot.slane %v21470_v2, 4  ;;  %v1695_v49 = vsel %vm174_vm2, %v1692_v47, %v1694_v41  ;;  %v1703_v47 = vrot.slane %v21127_v14, 4  ;;  %v21533_v2 = vld [vmem:[#allocation2 + $0x20] sm:$0x1f] }
 0x14e   :  { %v1697_v0 = vsel %vm174_vm2, %v1694_v41, %v1696_v18 }
 0x152   :  { %17747 = vmatmul.mubr.msk.bf16.gmra.mrb[28].mxu0 %vm273_vm3, %v1690_v61  ;;  %v1701_v61 = vrot.slane %v21119_v6, 4 }
 0x153   :  { %17750 = vmatprep.mubr.msk.bf16.mxu0 %vm273_vm3, %v1693_v39  ;;  %v1699_v39 = vsel %vm174_vm2, %v1696_v18, %v1698_v56  ;;  %v1707_v18 = vrot.slane %v21137_v44, 4  ;;  %v1709_v56 = vrot.slane %v21489_v25, 4 }
 0x154   :  { %v1702_v58 = vsel %vm174_vm2, %v1700_v57, %v1701_v61 }
 0x15a   :  { %17751 = vmatmul.mubr.msk.bf16.gmra.mrb[32].mxu0 %vm273_vm3, %v1695_v49  ;;  %v1705_v49 = vrot.slane %v21132_v8, 4 }
 0x15b   :  { %17754 = vmatprep.mubr.msk.bf16.mxu0 %vm273_vm3, %v1697_v0  ;;  %v1704_v0 = vsel %vm174_vm2, %v1701_v61, %v1703_v47  ;;  %v1712_v61 = vrot.slane %v21159_v11, 4 }
 0x15c   :  { %v1706_v41 = vsel %vm174_vm2, %v1703_v47, %v1705_v49  ;;  %v1708_v57 = vsel %vm174_vm2, %v1705_v49, %v1707_v18  ;;  %v1714_v47 = vrot.slane %v21173_v43, 4  ;;  %v1716_v49 = vrot.slane %v21161_v38, 4 }
 0x15d   :  { %v2206_v38 = vshll.u32 %v21369_v53, 16 }
 0x15e   :  { %v1715_v44 = vsel %vm174_vm2, %v1712_v61, %v1714_v47 }
 0x162   :  { %17755 = vmatmul.mubr.msk.bf16.gmra.mrb[36].mxu0 %vm273_vm3, %v1699_v39 }
 0x163   :  { %17758 = vmatprep.mubr.msk.bf16.mxu0 %vm273_vm3, %v1702_v58  ;;  %v1710_v58 = vrot.slane %v21152_v28, 4 }
 0x165   :  { %v1711_v39 = vsel %vm174_vm2, %v1709_v56, %v1710_v58  ;;  %v1719_v56 = vrot.slane %v21201_v59, 4 }
 0x16a   :  { %17759 = vmatmul.mubr.msk.bf16.gmra.mrb[40].mxu0 %vm273_vm3, %v1704_v0  ;;  %v1713_v0 = vsel %vm174_vm2, %v1710_v58, %v1712_v61  ;;  %v1721_v58 = vrot.slane %v21203_v7, 4  ;;  %v1723_v61 = vrot.slane %v21213_v55, 4 }
 0x16b   :  { %17762 = vmatprep.mubr.msk.bf16.mxu0 %vm273_vm3, %v1706_v41  ;;  %v21504_v41 = vld [vmem:[#allocation2 + $0x118] sm:$0xf0] }
 0x16c   :  { %v1718_v18 = vrot.slane %v21504_v41, 4  ;;  %v1724_v40 = vsel %vm174_vm2, %v1721_v58, %v1723_v61 }
 0x172   :  { %17763 = vmatmul.mubr.msk.bf16.gmra.mrb[44].mxu0 %vm273_vm3, %v1708_v57  ;;  %v1717_v57 = vsel %vm174_vm2, %v1714_v47, %v1716_v49  ;;  %v2208_v47 = vrot.slane %v2206_v38, 5  ;;  %v2210_v49 = vrot.slane %v489_v21, 4  ;;  %v26551_v38 = vshll.u32 %v20807_v26, 16 }
 0x173   :  { %17766 = vmatprep.mubr.msk.bf16.mxu0 %vm273_vm3, %v1711_v39  ;;  %v1720_v39 = vsel %vm174_vm2, %v1718_v18, %v1719_v56  ;;  %v2211_v18 = vrot.slane %v492_v22, 5  ;;  %v2223_v22 = vshrl.u32 %v21533_v2, 16 }
 0x174   :  { %v2219_v21 = vrot.slane %v26551_v38, 5 }
 0x17a   :  { %17767 = vmatmul.mubr.msk.bf16.gmra.mrb[48].mxu0 %vm273_vm3, %v1713_v0  ;;  %v2203_v0 = vshrl.u32 %v21369_v53, 16  ;;  %v2212_v53 = vor.u32 %v2211_v18, %v2210_v49 }
 0x17b   :  { %17770 = vmatprep.mubr.msk.bf16.mxu0 %vm273_vm3, %v1715_v44  ;;  %v1722_v44 = vsel %vm174_vm2, %v1719_v56, %v1721_v58  ;;  %v26550_v58 = vshrl.u32 %v20807_v26, 16 }
 0x17c   :  { %v2205_v33 = vrot.slane %v2203_v0, 4 }
 0x17d   :  { %v2218_v0 = vrot.slane %v26550_v58, 4  ;;  %v26553_v58 = vshll.u32 %v20825_v37, 16 }
 0x182   :  { %17771 = vmatmul.mubr.msk.bf16.gmra.mrb[52].mxu0 %vm273_vm3, %v1717_v57  ;;  %v1725_v57 = vrot.slane %v21225_v30, 4  ;;  %v2232_v30 = vshrl.u32 %v21400_v42, 16 }
 0x183   :  { %17774 = vmatprep.mubr.msk.bf16.mxu0 %vm273_vm3, %v1720_v39  ;;  %v2209_v39 = vor.u32 %v2208_v47, %v2205_v33  ;;  %v2226_v33 = vshll.u32 %v21533_v2, 16  ;;  %v2217_v47 = vsel %vm2201_vm8, %v2212_v53, %v21384_v34 }
 0x184   :  { %v1726_v56 = vsel %vm174_vm2, %v1723_v61, %v1725_v57  ;;  %v2235_v61 = vshll.u32 %v21400_v42, 16  ;;  %v2234_v18 = vrot.slane %v2232_v30, 4  ;;  %v20290_v42 = vld [vmem:[%s26305_s1 + $0x48] sm:$0xff]   ;;  %v26556_v30 = vshrl.u32 %v20836_v51, 16 }
 0x185   :  { %v2213_v15 = vsel %vm2201_vm8, %v2209_v39, %v2212_v53  ;;  %v2228_v26 = vrot.slane %v2226_v33, 5  ;;  %v26552_v39 = vshrl.u32 %v20825_v37, 16 }
 0x186   :  { %v2237_v57 = vrot.slane %v2235_v61, 5  ;;  %v2247_v61 = vrot.slane %v26556_v30, 4 }
 0x18a   :  { %17775 = vmatmul.mubr.msk.bf16.gmra.mrb[56].mxu0 %vm273_vm3, %v1722_v44  ;;  %v2225_v44 = vrot.slane %v2223_v22, 4  ;;  %v26555_v22 = vshll.u32 %v20834_v50, 16 }
 0x18b   :  { %17778 = vmatprep.mubr.msk.bf16.mxu0 %vm273_vm3, %v1724_v40  ;;  %v2220_v40 = vor.u32 %v2219_v21, %v2218_v0  ;;  %v2240_v0 = vrot.slane %v26553_v58, 5 }
 0x18c   :  { %v2229_v38 = vor.u32 %v2228_v26, %v2225_v44  ;;  %v2244_v33 = vrot.slane %v26555_v22, 5  ;;  %v26557_v44 = vshll.u32 %v20836_v51, 16  ;;  %v2264_v51 = vshll.u32 %v21421_v54, 16 }
 0x18d   :  { %v2221_v49 = vsel %vm2201_vm8, %v21384_v34, %v2220_v40  ;;  %v2238_v34 = vor.u32 %v2237_v57, %v2234_v18  ;;  %v2261_v57 = vshrl.u32 %v21421_v54, 16 }
 0x18e   :  { %v2230_v21 = vsel %vm2201_vm8, %v2220_v40, %v2229_v38  ;;  %v2248_v26 = vrot.slane %v26557_v44, 5  ;;  %v2266_v38 = vrot.slane %v2264_v51, 5  ;;  %v26561_v44 = vshll.u32 %v20872_v31, 16 }
 0x190   :  { %v2249_v18 = vor.u32 %v2248_v26, %v2247_v61  ;;  %v2273_v26 = vrot.slane %v26561_v44, 5 }
 0x192   :  { %17779 = vmatmul.mubr.msk.bf16.gmra.mrb[60].mxu0 %vm273_vm3, %v1726_v56  ;;  %v2239_v56 = vrot.slane %v26552_v39, 4 }
 0x193   :  { %17786 = vmatprep.mubr.msk.bf16.mxu0 %vm273_vm3, %v2213_v15  ;;  %v26554_v15 = vshrl.u32 %v20834_v50, 16 }
 0x194   :  { %v2241_v53 = vor.u32 %v2240_v0, %v2239_v56 }
 0x195   :  { %v2243_v37 = vrot.slane %v26554_v15, 4  ;;  %v26559_v15 = vshll.u32 %v20863_v12, 16 }
 0x197   :  { %v2245_v50 = vor.u32 %v2244_v33, %v2243_v37  ;;  %v2269_v22 = vrot.slane %v26559_v15, 5  ;;  %v26564_v15 = vshrl.u32 %v20985_v45, 16 }
 0x199   :  { %v2246_v58 = vsel %vm2201_vm8, %v2241_v53, %v2245_v50  ;;  %v2250_v0 = vsel %vm2201_vm8, %v2245_v50, %v2249_v18  ;;  %v21591_v50 = vld [vmem:[#allocation2 + $0x70] sm:$0x1f] }
 0x19a   :  { %17787 = vmatmul.mubr.msk.bf16.vlgmr.msra.gmra.mrb[0].mxu0 %vm273_vm3, %v2217_v47  ;;  %v2242_v47 = vsel %vm2201_vm8, %v2238_v34, %v2241_v53  ;;  %v26558_v34 = vshrl.u32 %v20863_v12, 16  ;;  %v26560_v53 = vshrl.u32 %v20872_v31, 16  ;;  %v26563_v12 = vshll.u32 %v20874_v36, 16 }
 0x19b   :  { %17851 = vmatpush3.bf16.msra.mxu0 %v21410_v13  ;;  %17790 = vmatprep.mubr.msk.bf16.mxu0 %vm273_vm3, %v2221_v49  ;;  %v21565_v13 = vld [vmem:[#allocation2 + $0x48] sm:$0x1f]  ;;  %v2284_v51 = vshll.u32 %v21591_v50, 16 }
 0x19c   :  { %17852 = vmatprep.subr.bf16.mxu0 %v20290_v42  ;;  %v2252_v40 = vshrl.u32 %v21565_v13, 16  ;;  %v2255_v49 = vshll.u32 %v21565_v13, 16  ;;  %v2272_v61 = vrot.slane %v26560_v53, 4 }
 0x19e   :  { %v2254_v39 = vrot.slane %v2252_v40, 4  ;;  %v2257_v56 = vrot.slane %v2255_v49, 5  ;;  %v2277_v49 = vrot.slane %v26563_v12, 5  ;;  %v2274_v31 = vor.u32 %v2273_v26, %v2272_v61 }
 0x19f   :  { %17853 = vmatpush3.bf16.msra.mxu0 %v20290_v42  ;;  %v2263_v42 = vrot.slane %v2261_v57, 4  ;;  %v26567_v26 = vshll.u32 %v21030_v3, 16 }
 0x1a0   :  { %v2258_v37 = vor.u32 %v2257_v56, %v2254_v39  ;;  %v2290_v56 = vshrl.u32 %v21435_v63, 16 }
 0x1a1   :  { %v2267_v54 = vor.u32 %v2266_v38, %v2263_v42 }
 0x1a2   :  { %17791 = vmatmul.mubr.msk.bf16.gmra.mrb[4].mxu0 %vm273_vm3, %v2230_v21  ;;  %v2268_v21 = vrot.slane %v26558_v34, 4  ;;  %v2259_v30 = vsel %vm2201_vm8, %v2249_v18, %v2258_v37  ;;  %v2281_v18 = vshrl.u32 %v21591_v50, 16  ;;  %v2292_v34 = vrot.slane %v2290_v56, 4 }
 0x1a3   :  { %17794 = vmatprep.mubr.msk.bf16.mxu0 %vm273_vm3, %v2242_v47  ;;  %v26562_v47 = vshrl.u32 %v20874_v36, 16  ;;  %v26565_v37 = vshll.u32 %v20985_v45, 16  ;;  %v26569_v45 = vshll.u32 %v21032_v5, 16  ;;  %v2319_v56 = vshrl.u32 %v21455_v20, 16 }
 0x1a4   :  { %v2270_v33 = vor.u32 %v2269_v22, %v2268_v21  ;;  %v2283_v36 = vrot.slane %v2281_v18, 4  ;;  %v2297_v22 = vrot.slane %v26564_v15, 4 }
 0x1a5   :  { %v2276_v40 = vrot.slane %v26562_v47, 4  ;;  %v2302_v47 = vrot.slane %v26567_v26, 5  ;;  %v26574_v26 = vshrl.u32 %v21094_v17, 16 }
 0x1a6   :  { %v2271_v57 = vsel %vm2201_vm8, %v2267_v54, %v2270_v33  ;;  %v2275_v42 = vsel %vm2201_vm8, %v2270_v33, %v2274_v31  ;;  %v2298_v54 = vrot.slane %v26565_v37, 5  ;;  %v26566_v33 = vshrl.u32 %v21030_v3, 16 }
 0x1a7   :  { %v2278_v39 = vor.u32 %v2277_v49, %v2276_v40  ;;  %v26568_v40 = vshrl.u32 %v21032_v5, 16  ;;  %v2306_v49 = vrot.slane %v26569_v45, 5 }
 0x1a8   :  { %v2299_v53 = vor.u32 %v2298_v54, %v2297_v22  ;;  %v2301_v44 = vrot.slane %v26566_v33, 4  ;;  %v26571_v22 = vshll.u32 %v21054_v27, 16  ;;  %v26573_v33 = vshll.u32 %v21087_v60, 16 }
 0x1a9   :  { %v2279_v38 = vsel %vm2201_vm8, %v2274_v31, %v2278_v39  ;;  %v2305_v12 = vrot.slane %v26568_v40, 4 }
 0x1aa   :  { %17795 = vmatmul.mubr.msk.bf16.gmra.mrb[8].mxu0 %vm273_vm3, %v2246_v58  ;;  %v2293_v58 = vshll.u32 %v21435_v63, 16  ;;  %v2303_v3 = vor.u32 %v2302_v47, %v2301_v44  ;;  %v2327_v37 = vrot.slane %v26571_v22, 5  ;;  %v2331_v44 = vrot.slane %v26573_v33, 5  ;;  %v21669_v33 = vld [vmem:[#allocation2 + $0xe8] sm:$0x1f] }
 0x1ab   :  { %17798 = vmatprep.mubr.msk.bf16.mxu0 %vm273_vm3, %v2250_v0  ;;  %v2286_v0 = vrot.slane %v2284_v51, 5  ;;  %v2334_v47 = vrot.slane %v26574_v26, 4  ;;  %v2368_v26 = vshrl.u32 %v21669_v33, 16 }
 0x1ac   :  { %v2295_v21 = vrot.slane %v2293_v58, 5  ;;  %v2322_v58 = vshll.u32 %v21455_v20, 16 }
 0x1ae   :  { %v2296_v63 = vor.u32 %v2295_v21, %v2292_v34  ;;  %v2324_v34 = vrot.slane %v2322_v58, 5  ;;  %v26570_v21 = vshrl.u32 %v21054_v27, 16  ;;  %v26575_v27 = vshll.u32 %v21094_v17, 16 }
 0x1b0   :  { %v2300_v18 = vsel %vm2201_vm8, %v2296_v63, %v2299_v53  ;;  %v2326_v15 = vrot.slane %v26570_v21, 4  ;;  %v2335_v40 = vrot.slane %v26575_v27, 5 }
 0x1b2   :  { %17799 = vmatmul.mubr.msk.bf16.gmra.mrb[12].mxu0 %vm273_vm3, %v2259_v30  ;;  %v2287_v30 = vor.u32 %v2286_v0, %v2283_v36  ;;  %v2304_v0 = vsel %vm2201_vm8, %v2299_v53, %v2303_v3  ;;  %v26572_v53 = vshrl.u32 %v21087_v60, 16 }
 0x1b3   :  { %17802 = vmatprep.mubr.msk.bf16.mxu0 %vm273_vm3, %v2271_v57  ;;  %v21617_v57 = vld [vmem:[#allocation2 + $0x98] sm:$0x1f] }
 0x1b4   :  { %v2288_v61 = vsel %vm2201_vm8, %v2278_v39, %v2287_v30  ;;  %v2310_v51 = vshrl.u32 %v21617_v57, 16  ;;  %v2313_v31 = vshll.u32 %v21617_v57, 16  ;;  %v2307_v39 = vor.u32 %v2306_v49, %v2305_v12  ;;  %v21643_v12 = vld [vmem:[#allocation2 + $0xc0] sm:$0x1f] }
 0x1b5   :  { %v2328_v30 = vor.u32 %v2327_v37, %v2326_v15  ;;  %v2339_v49 = vshrl.u32 %v21643_v12, 16  ;;  %v26578_v37 = vshrl.u32 %v21127_v14, 16 }
 0x1b6   :  { %v2312_v5 = vrot.slane %v2310_v51, 4  ;;  %v2315_v36 = vrot.slane %v2313_v31, 5  ;;  %v2336_v51 = vor.u32 %v2335_v40, %v2334_v47  ;;  %v2348_v31 = vshrl.u32 %v21475_v9, 16 }
 0x1b7   :  { %v2341_v17 = vrot.slane %v2339_v49, 4  ;;  %v2371_v47 = vshll.u32 %v21669_v33, 16  ;;  %v2377_v40 = vshrl.u32 %v21489_v25, 16 }
 0x1b8   :  { %v2316_v54 = vor.u32 %v2315_v36, %v2312_v5  ;;  %v2350_v5 = vrot.slane %v2348_v31, 4 }
 0x1b9   :  { %v2373_v49 = vrot.slane %v2371_v47, 5 }
 0x1ba   :  { %17803 = vmatmul.mubr.msk.bf16.gmra.mrb[16].mxu0 %vm273_vm3, %v2275_v42  ;;  %v2308_v42 = vsel %vm2201_vm8, %v2303_v3, %v2307_v39  ;;  %v2317_v63 = vsel %vm2201_vm8, %v2307_v39, %v2316_v54  ;;  %v2351_v3 = vshll.u32 %v21475_v9, 16  ;;  %v2359_v54 = vrot.slane %v26578_v37, 4  ;;  %v21696_v37 = vld [vmem:[#allocation2 + $0x110] sm:$0x1f] }
 0x1bb   :  { %17806 = vmatprep.mubr.msk.bf16.mxu0 %vm273_vm3, %v2279_v38  ;;  %v2321_v38 = vrot.slane %v2319_v56, 4 }
 0x1bc   :  { %v2353_v36 = vrot.slane %v2351_v3, 5  ;;  %v26582_v3 = vshrl.u32 %v21152_v28, 16 }
 0x1bd   :  { %v2325_v20 = vor.u32 %v2324_v34, %v2321_v38  ;;  %v26577_v38 = vshll.u32 %v21119_v6, 16 }
 0x1be   :  { %v2354_v9 = vor.u32 %v2353_v36, %v2350_v5 }
 0x1bf   :  { %v2329_v45 = vsel %vm2201_vm8, %v2325_v20, %v2328_v30  ;;  %v2356_v34 = vrot.slane %v26577_v38, 5  ;;  %v26579_v20 = vshll.u32 %v21127_v14, 16  ;;  %v26585_v38 = vshll.u32 %v21159_v11, 16 }
 0x1c2   :  { %17807 = vmatmul.mubr.msk.bf16.gmra.mrb[20].mxu0 %vm273_vm3, %v2288_v61  ;;  %v2330_v61 = vrot.slane %v26572_v53, 4 }
 0x1c3   :  { %17810 = vmatprep.mubr.msk.bf16.mxu0 %vm273_vm3, %v2300_v18  ;;  %v2342_v18 = vshll.u32 %v21643_v12, 16 }
 0x1c4   :  { %v2332_v60 = vor.u32 %v2331_v44, %v2330_v61 }
 0x1c5   :  { %v2344_v39 = vrot.slane %v2342_v18, 5 }
 0x1c6   :  { %v2333_v56 = vsel %vm2201_vm8, %v2328_v30, %v2332_v60  ;;  %v2337_v58 = vsel %vm2201_vm8, %v2332_v60, %v2336_v51  ;;  %v2360_v30 = vrot.slane %v26579_v20, 5 }
 0x1c7   :  { %v2345_v21 = vor.u32 %v2344_v39, %v2341_v17  ;;  %v2384_v17 = vrot.slane %v26582_v3, 4  ;;  %v26583_v39 = vshll.u32 %v21152_v28, 16  ;;  %v26587_v28 = vshll.u32 %v21173_v43, 16 }
 0x1c8   :  { %v2361_v14 = vor.u32 %v2360_v30, %v2359_v54  ;;  %v2397_v30 = vshrl.u32 %v21696_v37, 16 }
 0x1c9   :  { %v2346_v22 = vsel %vm2201_vm8, %v2336_v51, %v2345_v21  ;;  %v2379_v51 = vrot.slane %v2377_v40, 4  ;;  %v26586_v21 = vshrl.u32 %v21173_v43, 16  ;;  %v26589_v40 = vshll.u32 %v21201_v59, 16 }
 0x1ca   :  { %17811 = vmatmul.mubr.msk.bf16.gmra.mrb[24].mxu0 %vm273_vm3, %v2304_v0  ;;  %v26576_v0 = vshrl.u32 %v21119_v6, 16  ;;  %v26581_v6 = vshll.u32 %v21132_v8, 16 }
 0x1cb   :  { %17814 = vmatprep.mubr.msk.bf16.mxu0 %vm273_vm3, %v2308_v42 }
 0x1cc   :  { %v2355_v42 = vrot.slane %v26576_v0, 4  ;;  %v2364_v61 = vrot.slane %v26581_v6, 5  ;;  %v26584_v0 = vshrl.u32 %v21159_v11, 16  ;;  %v2400_v11 = vshll.u32 %v21696_v37, 16 }
 0x1ce   :  { %v2357_v15 = vor.u32 %v2356_v34, %v2355_v42  ;;  %v2388_v42 = vrot.slane %v26584_v0, 4  ;;  %v2389_v34 = vrot.slane %v26585_v38, 5 }
 0x1d0   :  { %v2358_v44 = vsel %vm2201_vm8, %v2354_v9, %v2357_v15  ;;  %v2362_v18 = vsel %vm2201_vm8, %v2357_v15, %v2361_v14  ;;  %v2392_v9 = vrot.slane %v26586_v21, 4  ;;  %v2393_v15 = vrot.slane %v26587_v28, 5 }
 0x1d1   :  { %v2390_v54 = vor.u32 %v2389_v34, %v2388_v42 }
 0x1d2   :  { %17815 = vmatmul.mubr.msk.bf16.gmra.mrb[28].mxu0 %vm273_vm3, %v2317_v63  ;;  %v26580_v63 = vshrl.u32 %v21132_v8, 16  ;;  %v2370_v8 = vrot.slane %v2368_v26, 4  ;;  %v2394_v20 = vor.u32 %v2393_v15, %v2392_v9  ;;  %v2926_v15 = vrot.slane %v21249_v4, 5 }
 0x1d3   :  { %17818 = vmatprep.mubr.msk.bf16.mxu0 %vm273_vm3, %v2329_v45  ;;  %v2380_v45 = vshll.u32 %v21489_v25, 16  ;;  %v2932_v4 = vrot.slane %v21533_v2, 5  ;;  %v2902_v2 = vld [vmem:[#allocation2 + $0x50] sm:$0xe0] }
 0x1d4   :  { %v2363_v53 = vrot.slane %v26580_v63, 4  ;;  %v2406_v63 = vshrl.u32 %v21504_v41, 16  ;;  %v2395_v6 = vsel %vm2201_vm8, %v2390_v54, %v2394_v20 }
 0x1d5   :  { %v2382_v31 = vrot.slane %v2380_v45, 5  ;;  %v2414_v45 = vrot.slane %v26589_v40, 5 }
 0x1d6   :  { %v2365_v27 = vor.u32 %v2364_v61, %v2363_v53  ;;  %v2409_v53 = vshll.u32 %v21504_v41, 16  ;;  %v2399_v61 = vrot.slane %v2397_v30, 4  ;;  %v2408_v26 = vrot.slane %v2406_v63, 4 }
 0x1d7   :  { %v2383_v25 = vor.u32 %v2382_v31, %v2379_v51  ;;  %v26591_v31 = vshll.u32 %v21203_v7, 16  ;;  %v2930_v30 = vrot.slane %v21259_v46, 5  ;;  %v2937_v46 = vrot.slane %v21285_v32, 5 }
 0x1d8   :  { %v2366_v60 = vsel %vm2201_vm8, %v2361_v14, %v2365_v27  ;;  %v2411_v47 = vrot.slane %v2409_v53, 5  ;;  %v26588_v14 = vshrl.u32 %v21201_v59, 16  ;;  %v26592_v59 = vshrl.u32 %v21213_v55, 16  ;;  %v2901_v53 = vld [vmem:[#allocation2 + $0x28] sm:$0xe0] }
 0x1d9   :  { %v2418_v3 = vrot.slane %v26591_v31, 5 }
 0x1da   :  { %17819 = vmatmul.mubr.msk.bf16.gmra.mrb[32].mxu0 %vm273_vm3, %v2333_v56  ;;  %v2385_v56 = vrot.slane %v26583_v39, 5  ;;  %v2412_v41 = vor.u32 %v2411_v47, %v2408_v26  ;;  %v2421_v39 = vrot.slane %v26592_v59, 4  ;;  %v2962_v59 = vrot.slane %v21460_v16, 5 }
 0x1db   :  { %17822 = vmatprep.mubr.msk.bf16.mxu0 %vm273_vm3, %v2337_v58  ;;  %v2374_v58 = vor.u32 %v2373_v49, %v2370_v8  ;;  %v2968_v16 = vrot.slane %v21643_v12, 5  ;;  %v2906_v12 = vld [vmem:[#allocation2 + $0xf0] sm:$0xe0] }
 0x1dc   :  { %v2386_v5 = vor.u32 %v2385_v56, %v2384_v17  ;;  %v26593_v56 = vshll.u32 %v21213_v55, 16  ;;  %v2900_v55 = vld [vmem:[#allocation2] sm:$0xe0] }
 0x1dd   :  { %v2375_v36 = vsel %vm2201_vm8, %v2365_v27, %v2374_v58  ;;  %v2413_v27 = vrot.slane %v26588_v14, 4  ;;  %v2925_v28 = vrot.slane %v2900_v55, 5  ;;  %v2943_v14 = vrot.slane %v2902_v2, 5  ;;  %v20414_v55 = vld [vmem:[#allocation2 + $0xe0] sm:$0xff] }
 0x1de   :  { %v2391_v43 = vsel %vm2201_vm8, %v2386_v5, %v2390_v54  ;;  %v2422_v58 = vrot.slane %v26593_v56, 5  ;;  %v26594_v56 = vld [vmem:[#allocation6_spill] sm:$0xff] }
 0x1df   :  { %v2415_v49 = vor.u32 %v2414_v45, %v2413_v27  ;;  %v2927_v54 = vsel %vm2924_vm9, %v2925_v28, %v2926_v15  ;;  %v2944_v27 = vrot.slane %v21295_v29, 5  ;;  %v2948_v45 = vrot.slane %v21305_v10, 5 }
 0x1e0   :  { %v2423_v0 = vor.u32 %v2422_v58, %v2421_v39  ;;  %v2950_v29 = vrot.slane %v21591_v50, 5  ;;  %v2955_v10 = vrot.slane %v21447_v1, 5  ;;  %v2904_v50 = vld [vmem:[#allocation2 + $0xa0] sm:$0xe0]  ;;  %v2966_v58 = vrot.slane %v26594_v56, 5 }
 0x1e1   :  { %v2416_v17 = vsel %vm2201_vm8, %v2412_v41, %v2415_v49  ;;  %v2945_v32 = vsel %vm2924_vm9, %v2943_v14, %v2944_v27  ;;  %v20419_v14 = vld [vmem:[#allocation2 + $0x128] sm:$0xff] }
 0x1e2   :  { %17823 = vmatmul.mubr.msk.bf16.gmra.mrb[36].mxu0 %vm273_vm3, %v2346_v22  ;;  %v2387_v22 = vsel %vm2201_vm8, %v2383_v25, %v2386_v5  ;;  %v21722_v25 = vld [vmem:[#allocation2 + $0x138] sm:$0x1f] }
 0x1e3   :  { %17826 = vmatprep.mubr.msk.bf16.mxu0 %vm273_vm3, %v2358_v44  ;;  %v2402_v44 = vrot.slane %v2400_v11, 5 }
 0x1e5   :  { %v2403_v8 = vor.u32 %v2402_v44, %v2399_v61  ;;  %v2933_v61 = vsel %vm2924_vm9, %v2930_v30, %v2932_v4  ;;  %v2939_v44 = vrot.slane %v21288_v35, 5  ;;  %v2946_v35 = vrot.slane %v21302_v19, 5 }
 0x1e7   :  { %v2940_v47 = vsel %vm2924_vm9, %v2937_v46, %v2939_v44  ;;  %v2949_v41 = vsel %vm2924_vm9, %v2946_v35, %v2948_v45 }
 0x1ea   :  { %17827 = vmatmul.mubr.msk.bf16.gmra.mrb[40].mxu0 %vm273_vm3, %v2362_v18  ;;  %v2404_v18 = vsel %vm2201_vm8, %v2394_v20, %v2403_v8  ;;  %v2928_v20 = vrot.slane %v21256_v52, 5  ;;  %v2947_v8 = vsel %vm2924_vm9, %v2944_v27, %v2946_v35  ;;  %v2991_v27 = vrot.slane %v20419_v14, 5 }
 0x1eb   :  { %17830 = vmatprep.mubr.msk.bf16.mxu0 %vm273_vm3, %v2366_v60  ;;  %v26590_v60 = vshrl.u32 %v21203_v7, 16  ;;  %v2429_v7 = vshll.u32 %v21722_v25, 16 }
 0x1ec   :  { %v2929_v11 = vsel %vm2924_vm9, %v2926_v15, %v2928_v20  ;;  %v2931_v63 = vsel %vm2924_vm9, %v2928_v20, %v2930_v30  ;;  %v20415_v20 = vld [vmem:[#allocation2 + $0xf8] sm:$0xff] }
 0x1ed   :  { %v2417_v51 = vrot.slane %v26590_v60, 4  ;;  %v2431_v34 = vrot.slane %v2429_v7, 5  ;;  %v2951_v60 = vsel %vm2924_vm9, %v2948_v45, %v2950_v29  ;;  %v2980_v30 = vrot.slane %v20415_v20, 5  ;;  %v21830_v29 = vld [vmem:[%s26305_s1 + $0x50] sm:$0xff]  }
 0x1ef   :  { %v2419_v5 = vor.u32 %v2418_v3, %v2417_v51  ;;  %v2957_v51 = vrot.slane %v21450_v24, 5  ;;  %v2964_v24 = vrot.slane %v21467_v23, 5 }
 0x1f1   :  { %v2420_v42 = vsel %vm2201_vm8, %v2415_v49, %v2419_v5  ;;  %v2424_v21 = vsel %vm2201_vm8, %v2419_v5, %v2423_v0  ;;  %v2958_v3 = vsel %vm2924_vm9, %v2955_v10, %v2957_v51  ;;  %v2965_v5 = vsel %vm2924_vm9, %v2962_v59, %v2964_v24 }
 0x1f2   :  { %17831 = vmatmul.mubr.msk.bf16.gmra.mrb[44].mxu0 %vm273_vm3, %v2375_v36  ;;  %v2426_v36 = vshrl.u32 %v21722_v25, 16 }
 0x1f3   :  { %17834 = vmatprep.mubr.msk.bf16.mxu0 %vm273_vm3, %v2387_v22 }
 0x1f4   :  { %v2428_v38 = vrot.slane %v2426_v36, 4  ;;  %v2967_v36 = vsel %vm2924_vm9, %v2964_v24, %v2966_v58 }
 0x1f6   :  { %v2432_v9 = vor.u32 %v2431_v34, %v2428_v38  ;;  %v2969_v38 = vsel %vm2924_vm9, %v2966_v58, %v2968_v16  ;;  %v20413_v34 = vld [vmem:[#allocation2 + $0xd8] sm:$0xff] }
 0x1f8   :  { %v2433_v22 = vsel %vm2201_vm8, %v2423_v0, %v2432_v9  ;;  %v20412_v0 = vld [vmem:[#allocation2 + $0xd0] sm:$0xff]  ;;  %v2975_v9 = vrot.slane %v20414_v55, 5 }
 0x1fa   :  { %17835 = vmatmul.mubr.msk.bf16.gmra.mrb[48].mxu0 %vm273_vm3, %v2391_v43  ;;  %v2934_v43 = vrot.slane %v2901_v53, 5  ;;  %v20416_v53 = vld [vmem:[#allocation2 + $0x100] sm:$0xff] }
 0x1fb   :  { %17838 = vmatprep.mubr.msk.bf16.mxu0 %vm273_vm3, %v2395_v6  ;;  %v2935_v6 = vrot.slane %v21272_v48, 5  ;;  %v2941_v48 = vrot.slane %v21565_v13, 5  ;;  %v2903_v13 = vld [vmem:[#allocation2 + $0x78] sm:$0xe0]  ;;  %v2982_v4 = vrot.slane %v20416_v53, 5 }
 0x1fc   :  { %v2952_v49 = vrot.slane %v2903_v13, 5 }
 0x1fd   :  { %v2936_v52 = vsel %vm2924_vm9, %v2934_v43, %v2935_v6  ;;  %v2938_v26 = vsel %vm2924_vm9, %v2935_v6, %v2937_v46  ;;  %v2942_v40 = vsel %vm2924_vm9, %v2939_v44, %v2941_v48  ;;  %v20417_v43 = vld [vmem:[#allocation2 + $0x108] sm:$0xff]  ;;  %v2986_v46 = vrot.slane %v21696_v37, 5  ;;  %v20291_v37 = vld [vmem:[%s26305_s1 + $0x60] sm:$0xff]  }
 0x1fe   :  { %v2984_v6 = vrot.slane %v20417_v43, 5  ;;  %17918 = vmatprep.subr.bf16.mxu1 %v20291_v37 }
 0x1ff   :  { %17919 = vmatpush3.bf16.msra.mxu1 %v20291_v37 }
 0x200   :  { %v2987_v2 = vsel %vm2924_vm9, %v2984_v6, %v2986_v46 }
 0x202   :  { %17839 = vmatmul.mubr.msk.bf16.gmra.mrb[52].mxu0 %vm273_vm3, %v2404_v18  ;;  %v2953_v18 = vrot.slane %v21440_v62, 5  ;;  %v2959_v62 = vrot.slane %v21617_v57, 5  ;;  %v2905_v57 = vld [vmem:[#allocation2 + $0xc8] sm:$0xe0] }
 0x203   :  { %17842 = vmatprep.mubr.msk.bf16.mxu0 %vm273_vm3, %v2416_v17  ;;  %v2961_v17 = vrot.slane %v2904_v50, 5  ;;  %v2970_v7 = vrot.slane %v2905_v57, 5 }
 0x204   :  { %v2954_v19 = vsel %vm2924_vm9, %v2952_v49, %v2953_v18  ;;  %v2956_v31 = vsel %vm2924_vm9, %v2953_v18, %v2955_v10  ;;  %v2960_v39 = vsel %vm2924_vm9, %v2957_v51, %v2959_v62  ;;  %v21841_v18 = vld [vmem:[%s26307_s3] ss:$0 sm:$0xff] }
 0x205   :  { %v2963_v1 = vsel %vm2924_vm9, %v2961_v17, %v2962_v59 }
 0x20a   :  { %17843 = vmatmul.mubr.msk.bf16.gmra.mrb[56].mxu0 %vm273_vm3, %v2420_v42  ;;  %v2971_v42 = vrot.slane %v20412_v0, 5 }
 0x20b   :  { %17846 = vmatprep.mubr.msk.bf16.mxu0 %vm273_vm3, %v2424_v21  ;;  %v2973_v21 = vrot.slane %v20413_v34, 5 }
 0x20c   :  { %v2972_v23 = vsel %vm2924_vm9, %v2970_v7, %v2971_v42 }
 0x20d   :  { %v2974_v28 = vsel %vm2924_vm9, %v2971_v42, %v2973_v21  ;;  %v2976_v15 = vsel %vm2924_vm9, %v2973_v21, %v2975_v9 }
 0x212   :  { %17847 = vmatmul.mubr.msk.bf16.gmra.mrb[60].mxu0 %vm273_vm3, %v2433_v22  ;;  %v2977_v22 = vrot.slane %v21669_v33, 5  ;;  %v2907_v33 = vld [vmem:[#allocation2 + $0x118] sm:$0xe0] }
 0x213   :  { %17854 = vmatprep.mubr.msk.bf16.mxu0 %vm273_vm3, %v2927_v54  ;;  %v2979_v54 = vrot.slane %v2906_v12, 5  ;;  %v2988_v44 = vrot.slane %v2907_v33, 5 }
 0x21a   :  { %17855 = vmatmul.mubr.msk.bf16.vlgmr.msra.gmra.mrb[0].mxu0 %vm273_vm3, %v2929_v11  ;;  %v2978_v11 = vsel %vm2924_vm9, %v2975_v9, %v2977_v22 }
 0x21b   :  { %17858 = vmatprep.mubr.msk.bf16.mxu0 %vm273_vm3, %v2931_v63  ;;  %v2981_v63 = vsel %vm2924_vm9, %v2979_v54, %v2980_v30 }
 0x222   :  { %17859 = vmatmul.mubr.msk.bf16.gmra.mrb[4].mxu0 %vm273_vm3, %v2933_v61  ;;  %v2983_v61 = vsel %vm2924_vm9, %v2980_v30, %v2982_v4 }
 0x223   :  { %17862 = vmatprep.mubr.msk.bf16.mxu0 %vm273_vm3, %v2936_v52  ;;  %v2985_v52 = vsel %vm2924_vm9, %v2982_v4, %v2984_v6 }
 0x22a   :  { %17863 = vmatmul.mubr.msk.bf16.gmra.mrb[8].mxu0 %vm273_vm3, %v2938_v26  ;;  %v20418_v26 = vld [vmem:[#allocation2 + $0x120] sm:$0xff] }
 0x22b   :  { %17866 = vmatprep.mubr.msk.bf16.mxu0 %vm273_vm3, %v2940_v47  ;;  %v2989_v47 = vrot.slane %v20418_v26, 5 }
 0x22d   :  { %v2990_v48 = vsel %vm2924_vm9, %v2988_v44, %v2989_v47  ;;  %v2992_v35 = vsel %vm2924_vm9, %v2989_v47, %v2991_v27 }
 0x232   :  { %17867 = vmatmul.mubr.msk.bf16.gmra.mrb[12].mxu0 %vm273_vm3, %v2942_v40  ;;  %v20420_v40 = vld [vmem:[#allocation2 + $0x130] sm:$0xff] }
 0x233   :  { %17870 = vmatprep.mubr.msk.bf16.mxu0 %vm273_vm3, %v2945_v32  ;;  %v2993_v32 = vrot.slane %v20420_v40, 5 }
 0x235   :  { %v2994_v45 = vsel %vm2924_vm9, %v2991_v27, %v2993_v32 }
 0x23a   :  { %17871 = vmatmul.mubr.msk.bf16.gmra.mrb[16].mxu0 %vm273_vm3, %v2947_v8  ;;  %v2995_v8 = vrot.slane %v21722_v25, 5  ;;  %v21836_v25 = vld [vmem:[%s26306_s2] ss:$0 sm:$0xff] }
 0x23b   :  { %17874 = vmatprep.mubr.msk.bf16.mxu0 %vm273_vm3, %v2949_v41  ;;  %v20292_v41 = vld [vmem:[%s26305_s1 + $0x68] sm:$0xff]  }
 0x23c   :  { %v2996_v13 = vsel %vm2924_vm9, %v2993_v32, %v2995_v8  ;;  %17920 = vmatprep.subr.bf16.mxu1 %v20292_v41 }
 0x23d   :  { %17921 = vmatpush3.bf16.msra.mxu1 %v20292_v41 }
 0x23e   :  { %17986 = vmatprep.subr.bf16.mxu1 %v21830_v29 }
 0x242   :  { %17875 = vmatmul.mubr.msk.bf16.gmra.mrb[20].mxu0 %vm273_vm3, %v2951_v60 }
 0x243   :  { %17878 = vmatprep.mubr.msk.bf16.mxu0 %vm273_vm3, %v2954_v19 }
 0x24a   :  { %17879 = vmatmul.mubr.msk.bf16.gmra.mrb[24].mxu0 %vm273_vm3, %v2956_v31 }
 0x24b   :  { %17882 = vmatprep.mubr.msk.bf16.mxu0 %vm273_vm3, %v2958_v3 }
 0x252   :  { %17883 = vmatmul.mubr.msk.bf16.gmra.mrb[28].mxu0 %vm273_vm3, %v2960_v39 }
 0x253   :  { %17886 = vmatprep.mubr.msk.bf16.mxu0 %vm273_vm3, %v2963_v1 }
 0x25a   :  { %17887 = vmatmul.mubr.msk.bf16.gmra.mrb[32].mxu0 %vm273_vm3, %v2965_v5 }
 0x25b   :  { %17890 = vmatprep.mubr.msk.bf16.mxu0 %vm273_vm3, %v2967_v36 }
 0x262   :  { %17891 = vmatmul.mubr.msk.bf16.gmra.mrb[36].mxu0 %vm273_vm3, %v2969_v38 }
 0x263   :  { %17894 = vmatprep.mubr.msk.bf16.mxu0 %vm273_vm3, %v2972_v23 }
 0x26a   :  { %17895 = vmatmul.mubr.msk.bf16.gmra.mrb[40].mxu0 %vm273_vm3, %v2974_v28 }
 0x26b   :  { %17898 = vmatprep.mubr.msk.bf16.mxu0 %vm273_vm3, %v2976_v15 }
 0x272   :  { %17899 = vmatmul.mubr.msk.bf16.gmra.mrb[44].mxu0 %vm273_vm3, %v2978_v11 }
 0x273   :  { %17902 = vmatprep.mubr.msk.bf16.mxu0 %vm273_vm3, %v2981_v63 }
 0x27a   :  { %17903 = vmatmul.mubr.msk.bf16.gmra.mrb[48].mxu0 %vm273_vm3, %v2983_v61 }
 0x27b   :  { %17906 = vmatprep.mubr.msk.bf16.mxu0 %vm273_vm3, %v2985_v52 }
 0x282   :  { %17907 = vmatmul.mubr.msk.bf16.gmra.mrb[52].mxu0 %vm273_vm3, %v2987_v2 }
 0x283   :  { %17910 = vmatprep.mubr.msk.bf16.mxu0 %vm273_vm3, %v2990_v48 }
 0x28a   :  { %17911 = vmatmul.mubr.msk.bf16.gmra.mrb[56].mxu0 %vm273_vm3, %v2992_v35 }
 0x28b   :  { %17914 = vmatprep.mubr.msk.bf16.mxu0 %vm273_vm3, %v2994_v45 }
 0x292   :  { %17915 = vmatmul.mubr.msk.bf16.gmra.mrb[60].mxu0 %vm273_vm3, %v2996_v13 }
 0x2ed   :  { %v17856_v49 = vpop.f32.mrb[0].mxu0 }
 0x2ee   :  { %v3470_v60 = vmul.f32 %v17856_v49, %v21836_v25  ;;  %v3144_v19 = vpop.f32.mrb[1].mxu0 }
 0x2ef   :  { %v3468_v10 = vmul.f32 %v21836_v25, %v3144_v19  ;;  %v17857_v51 = vpop.f32.mrb[2].mxu0 }
 0x2f0   :  { %v3539_v31 = vadd.f32 %v21841_v18, %v3470_v60  ;;  %v3471_v3 = vmul.f32 %v17857_v51, %v21836_v25  ;;  %v3147_v50 = vpop.f32.mrb[3].mxu0 }
 0x2f1   :  { %v3537_v62 = vadd.f32 %v21841_v18, %v3468_v10  ;;  %v3469_v17 = vmul.f32 %v21836_v25, %v3147_v50 }
 0x2f2   :  { %v3540_v59 = vadd.f32 %v21841_v18, %v3471_v3  ;;  %v3603_v1 = vmax.f32 %v3539_v31, 0.0 }
 0x2f3   :  { %v3538_v39 = vadd.f32 %v21841_v18, %v3469_v17  ;;  %v3601_v56 = vmax.f32 %v3537_v62, 0.0 }
 0x2f4   :  { %v3604_v24 = vmax.f32 %v3540_v59, 0.0 }
 0x2f5   :  { %v3602_v58 = vmax.f32 %v3538_v39, 0.0  ;;  %v17860_v5 = vpop.f32.mrb[4].mxu0 }
 0x2f6   :  { %v3666_v36 = vpack.c.bf16 %v3604_v24, %v3603_v1  ;;  %v3474_v57 = vmul.f32 %v17860_v5, %v21836_v25  ;;  %v3160_v16 = vpop.f32.mrb[5].mxu0 }
 0x2f7   :  { %v3665_v7 = vpack.c.bf16 %v3602_v58, %v3601_v56  ;;  %v3472_v0 = vmul.f32 %v21836_v25, %v3160_v16  ;;  %v17861_v42 = vpop.f32.mrb[6].mxu0 }
 0x2f8   :  { %v3730_v38 = vrot.slane %v3666_v36, 4  ;;  %v3543_v23 = vadd.f32 %v21841_v18, %v3474_v57  ;;  %v3475_v34 = vmul.f32 %v17861_v42, %v21836_v25  ;;  %v3163_v21 = vpop.f32.mrb[7].mxu0 }
 0x2f9   :  { %v3729_v55 = vrot.slane %v3665_v7, 4  ;;  %v3541_v9 = vadd.f32 %v21841_v18, %v3472_v0  ;;  %v3473_v28 = vmul.f32 %v21836_v25, %v3163_v21 }
 0x2fa   :  { %v3544_v15 = vadd.f32 %v21841_v18, %v3475_v34  ;;  %v3607_v54 = vmax.f32 %v3543_v23, 0.0 }
 0x2fb   :  { %v3731_v12 = vsel %vm174_vm2, %v3729_v55, %v3730_v38  ;;  %3825 = vst.msk [vmem:[#allocation2] sm:$0xf0] %vm271_vm1, %v3729_v55  ;;  %v3542_v22 = vadd.f32 %v21841_v18, %v3473_v28  ;;  %v3605_v30 = vmax.f32 %v3541_v9, 0.0 }
 0x2fc   :  { %3826 = vst.msk [vmem:[#allocation2 + $0x8] sm:$0xff] %vm273_vm3, %v3731_v12  ;;  %v3608_v20 = vmax.f32 %v3544_v15, 0.0 }
 0x2fd   :  { %v3606_v11 = vmax.f32 %v3542_v22, 0.0  ;;  %v17864_v63 = vpop.f32.mrb[8].mxu0 }
 0x2fe   :  { %v3668_v53 = vpack.c.bf16 %v3608_v20, %v3607_v54  ;;  %v3478_v4 = vmul.f32 %v17864_v63, %v21836_v25  ;;  %v3176_v43 = vpop.f32.mrb[9].mxu0 }
 0x2ff   :  { %v3667_v6 = vpack.c.bf16 %v3606_v11, %v3605_v30  ;;  %v3476_v61 = vmul.f32 %v21836_v25, %v3176_v43  ;;  %v17865_v52 = vpop.f32.mrb[10].mxu0 }
 0x300   :  { %v3734_v33 = vrot.slane %v3668_v53, 4  ;;  %v3547_v46 = vadd.f32 %v21841_v18, %v3478_v4  ;;  %v3479_v44 = vmul.f32 %v17865_v52, %v21836_v25  ;;  %v3179_v26 = vpop.f32.mrb[11].mxu0 }
 0x301   :  { %v3732_v47 = vrot.slane %v3667_v6, 4  ;;  %v3545_v2 = vadd.f32 %v21841_v18, %v3476_v61  ;;  %v3477_v48 = vmul.f32 %v21836_v25, %v3179_v26 }
 0x302   :  { %3829 = vst.msk [vmem:[#allocation2 + $0x20] sm:$0xf] %vm277_vm4, %v3734_v33  ;;  %v3548_v14 = vadd.f32 %v21841_v18, %v3479_v44  ;;  %v3865_v27 = vld [vmem:[#allocation2] sm:$0xf8]  ;;  %v3611_v35 = vmax.f32 %v3547_v46, 0.0 }
 0x303   :  { %v3733_v40 = vsel %vm174_vm2, %v3730_v38, %v3732_v47  ;;  %v3735_v32 = vsel %vm174_vm2, %v3732_v47, %v3734_v33  ;;  %v3546_v45 = vadd.f32 %v21841_v18, %v3477_v48  ;;  %v21873_v37 = vld [vmem:[#allocation2 + $0x8] sm:$0xff]  ;;  %v4031_v41 = vshrl.u32 %v3865_v27, 16 }
 0x304   :  { %3827 = vst.msk [vmem:[#allocation2 + $0x10] sm:$0xff] %vm273_vm3, %v3733_v40  ;;  %3828 = vst.msk [vmem:[#allocation2 + $0x18] sm:$0xff] %vm273_vm3, %v3735_v32  ;;  %v3612_v8 = vmax.f32 %v3548_v14, 0.0  ;;  %v4034_v13 = vshll.u32 %v3865_v27, 16  ;;  %v4039_v49 = vshrl.u32 %v21873_v37, 16  ;;  %v3609_v60 = vmax.f32 %v3545_v2, 0.0 }
 0x305   :  { %v3610_v19 = vmax.f32 %v3546_v45, 0.0  ;;  %v17868_v10 = vpop.f32.mrb[12].mxu0  ;;  %v4042_v51 = vshll.u32 %v21873_v37, 16  ;;  %v4033_v62 = vrot.slane %v4031_v41, 3 }
 0x306   :  { %v21879_v31 = vpack.c.bf16 %v3612_v8, %v3611_v35  ;;  %v3482_v3 = vmul.f32 %v17868_v10, %v21836_v25  ;;  %v3192_v50 = vpop.f32.mrb[13].mxu0  ;;  %v4036_v17 = vrot.slane %v4034_v13, 4  ;;  %v4041_v24 = vrot.slane %v4039_v49, 3 }
 0x307   :  { %v3669_v59 = vpack.c.bf16 %v3610_v19, %v3609_v60  ;;  %v3480_v39 = vmul.f32 %v21836_v25, %v3192_v50  ;;  %v17869_v1 = vpop.f32.mrb[14].mxu0  ;;  %v4044_v56 = vrot.slane %v4042_v51, 4  ;;  %v20294_v19 = vld [vmem:[%s26305_s1 + $0x58] sm:$0xff]  }
 0x308   :  { %v3737_v58 = vrot.slane %v21879_v31, 4  ;;  %v3551_v5 = vadd.f32 %v21841_v18, %v3482_v3  ;;  %v3483_v36 = vmul.f32 %v17869_v1, %v21836_v25  ;;  %v3195_v57 = vpop.f32.mrb[15].mxu0  ;;  %v4037_v16 = vor.u32 %v4036_v17, %v4033_v62 }
 0x309   :  { %v3736_v7 = vrot.slane %v3669_v59, 4  ;;  %v3549_v0 = vadd.f32 %v21841_v18, %v3480_v39  ;;  %v3481_v42 = vmul.f32 %v21836_v25, %v3195_v57  ;;  %v4045_v38 = vor.u32 %v4044_v56, %v4041_v24  ;;  %v4022_v23 = vld [vmem:[#allocation2 + $0x20] sm:$0xf] }
 0x30a   :  { %v3552_v34 = vadd.f32 %v21841_v18, %v3483_v36  ;;  %v4066_v21 = vshrl.u32 %v4022_v23, 16  ;;  %v4069_v22 = vshll.u32 %v4022_v23, 16  ;;  %v3615_v54 = vmax.f32 %v3551_v5, 0.0  ;;  %v22636_v37 = vld [vmem:[#allocation2 + $0x20] sm:$0x1f] }
 0x30b   :  { %v3738_v55 = vsel %vm174_vm2, %v3736_v7, %v3737_v58  ;;  %3830 = vst.msk [vmem:[#allocation2 + $0x28] sm:$0xf0] %vm271_vm1, %v3736_v7  ;;  %v3550_v9 = vadd.f32 %v21841_v18, %v3481_v42  ;;  %v4046_v28 = vsel %vm479_vm5, %v4037_v16, %v4045_v38  ;;  %v21897_v15 = vld [vmem:[#allocation2 + $0x10] sm:$0xff]  ;;  %v21899_v12 = vld [vmem:[#allocation2 + $0x18] sm:$0xff]  ;;  %v3613_v63 = vmax.f32 %v3549_v0, 0.0 }
 0x30c   :  { %3831 = vst.msk [vmem:[#allocation2 + $0x30] sm:$0xff] %vm273_vm3, %v3738_v55  ;;  %v3616_v20 = vmax.f32 %v3552_v34, 0.0  ;;  %17922 = vmatprep.mubr.msk.bf16.mxu1 %vm273_vm3, %v4046_v28  ;;  %v4048_v30 = vshrl.u32 %v21897_v15, 16  ;;  %v4051_v11 = vshll.u32 %v21897_v15, 16  ;;  %v4057_v43 = vshrl.u32 %v21899_v12, 16  ;;  %v20295_v42 = vld [vmem:[%s26305_s1 + $0x70] sm:$0xff]  }
 0x30d   :  { %v3614_v53 = vmax.f32 %v3550_v9, 0.0  ;;  %v17872_v4 = vpop.f32.mrb[16].mxu0  ;;  %v4060_v6 = vshll.u32 %v21899_v12, 16  ;;  %v4068_v48 = vrot.slane %v4066_v21, 3  ;;  %v4071_v14 = vrot.slane %v4069_v22, 4 }
 0x30e   :  { %v3672_v61 = vpack.c.bf16 %v3616_v20, %v3615_v54  ;;  %v3486_v52 = vmul.f32 %v17872_v4, %v21836_v25  ;;  %v3208_v33 = vpop.f32.mrb[17].mxu0  ;;  %v4050_v46 = vrot.slane %v4048_v30, 3  ;;  %v4053_v44 = vrot.slane %v4051_v11, 4 }
 0x30f   :  { %v3671_v26 = vpack.c.bf16 %v3614_v53, %v3613_v63  ;;  %v3484_v47 = vmul.f32 %v21836_v25, %v3208_v33  ;;  %v17873_v2 = vpop.f32.mrb[18].mxu0  ;;  %v4059_v60 = vrot.slane %v4057_v43, 3  ;;  %v4062_v3 = vrot.slane %v4060_v6, 4 }
 0x310   :  { %v3741_v27 = vrot.slane %v3672_v61, 4  ;;  %v3555_v40 = vadd.f32 %v21841_v18, %v3486_v52  ;;  %v3487_v32 = vmul.f32 %v17873_v2, %v21836_v25  ;;  %v3211_v35 = vpop.f32.mrb[19].mxu0  ;;  %v4054_v45 = vor.u32 %v4053_v44, %v4050_v46 }
 0x311   :  { %v3739_v8 = vrot.slane %v3671_v26, 4  ;;  %v3553_v41 = vadd.f32 %v21841_v18, %v3484_v47  ;;  %v3485_v13 = vmul.f32 %v21836_v25, %v3211_v35  ;;  %v4063_v5 = vor.u32 %v4062_v3, %v4059_v60 }
 0x312   :  { %3834 = vst.msk [vmem:[#allocation2 + $0x48] sm:$0xf] %vm277_vm4, %v3741_v27  ;;  %v3556_v10 = vadd.f32 %v21841_v18, %v3487_v32  ;;  %v4055_v31 = vsel %vm479_vm5, %v4045_v38, %v4054_v45  ;;  %v3870_v50 = vld [vmem:[#allocation2 + $0x28] sm:$0xf8]  ;;  %v3619_v59 = vmax.f32 %v3555_v40, 0.0  ;;  %v4072_v16 = vor.u32 %v4071_v14, %v4068_v48 }
 0x313   :  { %v3740_v62 = vsel %vm174_vm2, %v3737_v58, %v3739_v8  ;;  %v3742_v17 = vsel %vm174_vm2, %v3739_v8, %v3741_v27  ;;  %v3554_v39 = vadd.f32 %v21841_v18, %v3485_v13  ;;  %17923 = vmatmul.mubr.msk.bf16.vlgmr.msra.gmra.mrb[0].mxu1 %vm273_vm3, %v4055_v31  ;;  %v21931_v1 = vld [vmem:[#allocation2 + $0x30] sm:$0xff]  ;;  %v3617_v24 = vmax.f32 %v3553_v41, 0.0 }
 0x314   :  { %3832 = vst.msk [vmem:[#allocation2 + $0x38] sm:$0xff] %vm273_vm3, %v3740_v62  ;;  %3833 = vst.msk [vmem:[#allocation2 + $0x40] sm:$0xff] %vm273_vm3, %v3742_v17  ;;  %v3620_v56 = vmax.f32 %v3556_v10, 0.0  ;;  %17987 = vmatpush3.bf16.msra.mxu1 %v21830_v29  ;;  %v4075_v36 = vshrl.u32 %v3870_v50, 16  ;;  %v4078_v7 = vshll.u32 %v3870_v50, 16  ;;  %v4083_v0 = vshrl.u32 %v21931_v1, 16 }
 0x315   :  { %v3618_v58 = vmax.f32 %v3554_v39, 0.0  ;;  %v17876_v57 = vpop.f32.mrb[20].mxu0  ;;  %17988 = vmatprep.subr.bf16.mxu1 %v20294_v19  ;;  %v4064_v23 = vsel %vm479_vm5, %v4054_v45, %v4063_v5  ;;  %v4086_v21 = vshll.u32 %v21931_v1, 16  ;;  %v4073_v44 = vsel %vm479_vm5, %v4063_v5, %v4072_v16 }
 0x316   :  { %v21940_v38 = vpack.c.bf16 %v3620_v56, %v3619_v59  ;;  %v3490_v34 = vmul.f32 %v17876_v57, %v21836_v25  ;;  %v3224_v29 = vpop.f32.mrb[21].mxu0  ;;  %17926 = vmatprep.mubr.msk.bf16.mxu1 %vm273_vm3, %v4064_v23  ;;  %v4077_v22 = vrot.slane %v4075_v36, 3  ;;  %v4080_v54 = vrot.slane %v4078_v7, 4 }
 0x317   :  { %v3673_v55 = vpack.c.bf16 %v3618_v58, %v3617_v24  ;;  %v3488_v9 = vmul.f32 %v21836_v25, %v3224_v29  ;;  %v17877_v28 = vpop.f32.mrb[22].mxu0  ;;  %v4085_v61 = vrot.slane %v4083_v0, 3  ;;  %v4088_v14 = vrot.slane %v4086_v21, 4 }
 0x318   :  { %v3744_v20 = vrot.slane %v21940_v38, 4  ;;  %v3559_v63 = vadd.f32 %v21841_v18, %v3490_v34  ;;  %v3491_v53 = vmul.f32 %v17877_v28, %v21836_v25  ;;  %v3227_v4 = vpop.f32.mrb[23].mxu0  ;;  %17989 = vmatpush3.bf16.msra.mxu1 %v20294_v19  ;;  %v4081_v48 = vor.u32 %v4080_v54, %v4077_v22 }
 0x319   :  { %v3743_v52 = vrot.slane %v3673_v55, 4  ;;  %v3557_v33 = vadd.f32 %v21841_v18, %v3488_v9  ;;  %v3489_v46 = vmul.f32 %v21836_v25, %v3227_v4  ;;  %v4023_v26 = vld [vmem:[#allocation2 + $0x48] sm:$0xf]  ;;  %18054 = vmatprep.subr.bf16.mxu1 %v20295_v42  ;;  %v4089_v13 = vor.u32 %v4088_v14, %v4085_v61 }
 0x31a   :  { %v3623_v47 = vmax.f32 %v3559_v63, 0.0  ;;  %v3560_v2 = vadd.f32 %v21841_v18, %v3491_v53  ;;  %v4110_v8 = vshrl.u32 %v4023_v26, 16  ;;  %v4113_v62 = vshll.u32 %v4023_v26, 16 }
 0x31b   :  { %v3745_v27 = vsel %vm174_vm2, %v3743_v52, %v3744_v20  ;;  %3835 = vst.msk [vmem:[#allocation2 + $0x50] sm:$0xf0] %vm271_vm1, %v3743_v52  ;;  %v3621_v40 = vmax.f32 %v3557_v33, 0.0  ;;  %v3558_v32 = vadd.f32 %v21841_v18, %v3489_v46  ;;  %17927 = vmatmul.mubr.msk.bf16.gmra.mrb[4].mxu1 %vm273_vm3, %v4073_v44  ;;  %v21962_v35 = vld [vmem:[#allocation2 + $0x38] sm:$0xff]  ;;  %v21964_v45 = vld [vmem:[#allocation2 + $0x40] sm:$0xff]  ;;  %v4090_v59 = vsel %vm479_vm5, %v4081_v48, %v4089_v13 }
 0x31c   :  { %3836 = vst.msk [vmem:[#allocation2 + $0x58] sm:$0xff] %vm273_vm3, %v3745_v27  ;;  %v3624_v41 = vmax.f32 %v3560_v2, 0.0  ;;  %v4092_v60 = vshrl.u32 %v21962_v35, 16  ;;  %v26395_v19 = vshll.u32 %v21962_v35, 16  ;;  %v26394_v3 = vshrl.u32 %v21964_v45, 16  ;;  %17930 = vmatprep.mubr.msk.bf16.mxu1 %vm273_vm3, %v4090_v59  ;;  %v22409_v15 = vld [vmem:[#allocation2 + $0x40] sm:$0xff] }
 0x31d   :  { %v3622_v10 = vmax.f32 %v3558_v32, 0.0  ;;  %v17880_v31 = vpop.f32.mrb[24].mxu0  ;;  %v26381_v50 = vshll.u32 %v21964_v45, 16  ;;  %v4112_v63 = vrot.slane %v4110_v8, 3  ;;  %v4115_v53 = vrot.slane %v4113_v62, 4 }
 0x31e   :  { %v3676_v17 = vpack.c.bf16 %v3624_v41, %v3623_v47  ;;  %v3494_v39 = vmul.f32 %v17880_v31, %v21836_v25  ;;  %v3240_v24 = vpop.f32.mrb[25].mxu0  ;;  %v4094_v56 = vrot.slane %v4092_v60, 3  ;;  %v4097_v57 = vrot.slane %v26395_v19, 4 }
 0x31f   :  { %v3675_v5 = vpack.c.bf16 %v3622_v10, %v3621_v40  ;;  %v3492_v36 = vmul.f32 %v21836_v25, %v3240_v24  ;;  %v17881_v58 = vpop.f32.mrb[26].mxu0  ;;  %v4103_v16 = vrot.slane %v26394_v3, 3  ;;  %v4106_v34 = vrot.slane %v26381_v50, 4 }
 0x320   :  { %v3748_v7 = vrot.slane %v3676_v17, 4  ;;  %v3563_v42 = vadd.f32 %v21841_v18, %v3494_v39  ;;  %v3495_v38 = vmul.f32 %v17881_v58, %v21836_v25  ;;  %v3243_v23 = vpop.f32.mrb[27].mxu0  ;;  %v4098_v28 = vor.u32 %v4097_v57, %v4094_v56 }
 0x321   :  { %v3746_v29 = vrot.slane %v3675_v5, 4  ;;  %v3561_v55 = vadd.f32 %v21841_v18, %v3492_v36  ;;  %v3493_v9 = vmul.f32 %v21836_v25, %v3243_v23  ;;  %v4107_v54 = vor.u32 %v4106_v34, %v4103_v16 }
 0x322   :  { %3839 = vst.msk [vmem:[#allocation2 + $0x70] sm:$0xf] %vm277_vm4, %v3748_v7  ;;  %v3564_v22 = vadd.f32 %v21841_v18, %v3495_v38  ;;  %v21989_v4 = vld [vmem:[#allocation2 + $0x50] sm:$0xf8]  ;;  %v3627_v33 = vmax.f32 %v3563_v42, 0.0  ;;  %v4099_v2 = vsel %vm479_vm5, %v4089_v13, %v4098_v28  ;;  %v4116_v13 = vor.u32 %v4115_v53, %v4112_v63 }
 0x323   :  { %v3747_v61 = vsel %vm174_vm2, %v3744_v20, %v3746_v29  ;;  %v3749_v52 = vsel %vm174_vm2, %v3746_v29, %v3748_v7  ;;  %v3562_v46 = vadd.f32 %v21841_v18, %v3493_v9  ;;  %v21994_v44 = vld [vmem:[#allocation2 + $0x58] sm:$0xff]  ;;  %v3625_v26 = vmax.f32 %v3561_v55, 0.0  ;;  %17931 = vmatmul.mubr.msk.bf16.gmra.mrb[8].mxu1 %vm273_vm3, %v4099_v2 }
 0x324   :  { %3837 = vst.msk [vmem:[#allocation2 + $0x60] sm:$0xff] %vm273_vm3, %v3747_v61  ;;  %3838 = vst.msk [vmem:[#allocation2 + $0x68] sm:$0xff] %vm273_vm3, %v3749_v52  ;;  %v3628_v47 = vmax.f32 %v3564_v22, 0.0  ;;  %v4108_v48 = vsel %vm479_vm5, %v4098_v28, %v4107_v54  ;;  %v4119_v27 = vshrl.u32 %v21989_v4, 16  ;;  %v4122_v40 = vshll.u32 %v21989_v4, 16 }
 0x325   :  { %v3626_v14 = vmax.f32 %v3562_v46, 0.0  ;;  %v17884_v20 = vpop.f32.mrb[28].mxu0  ;;  %v26379_v32 = vshrl.u32 %v21994_v44, 16  ;;  %17934 = vmatprep.mubr.msk.bf16.mxu1 %vm273_vm3, %v4108_v48  ;;  %v26378_v31 = vshll.u32 %v21994_v44, 16  ;;  %v4117_v38 = vsel %vm479_vm5, %v4107_v54, %v4116_v13 }
 0x326   :  { %v22004_v8 = vpack.c.bf16 %v3628_v47, %v3627_v33  ;;  %v3498_v41 = vmul.f32 %v17884_v20, %v21836_v25  ;;  %v3256_v10 = vpop.f32.mrb[29].mxu0  ;;  %v4121_v39 = vrot.slane %v4119_v27, 3  ;;  %v4124_v24 = vrot.slane %v4122_v40, 4 }
 0x327   :  { %v3677_v62 = vpack.c.bf16 %v3626_v14, %v3625_v26  ;;  %v3496_v17 = vmul.f32 %v21836_v25, %v3256_v10  ;;  %v17885_v59 = vpop.f32.mrb[30].mxu0  ;;  %v4129_v57 = vrot.slane %v26379_v32, 3  ;;  %v4132_v9 = vrot.slane %v26378_v31, 4 }
 0x328   :  { %v3751_v56 = vrot.slane %v22004_v8, 4  ;;  %v3567_v5 = vadd.f32 %v21841_v18, %v3498_v41  ;;  %v3499_v36 = vmul.f32 %v17885_v59, %v21836_v25  ;;  %v3259_v58 = vpop.f32.mrb[31].mxu0  ;;  %v4125_v55 = vor.u32 %v4124_v24, %v4121_v39 }
 0x329   :  { %v3750_v16 = vrot.slane %v3677_v62, 4  ;;  %v3565_v7 = vadd.f32 %v21841_v18, %v3496_v17  ;;  %v3497_v42 = vmul.f32 %v21836_v25, %v3259_v58  ;;  %v4024_v23 = vld [vmem:[#allocation2 + $0x70] sm:$0xf]  ;;  %v4133_v33 = vor.u32 %v4132_v9, %v4129_v57 }
 0x32a   :  { %v3631_v34 = vmax.f32 %v3567_v5, 0.0  ;;  %v3568_v29 = vadd.f32 %v21841_v18, %v3499_v36  ;;  %v4154_v54 = vshrl.u32 %v4024_v23, 16  ;;  %v4157_v20 = vshll.u32 %v4024_v23, 16 }
 0x32b   :  { %v3752_v28 = vsel %vm174_vm2, %v3750_v16, %v3751_v56  ;;  %3840 = vst.msk [vmem:[#allocation2 + $0x78] sm:$0xf0] %vm271_vm1, %v3750_v16  ;;  %v3629_v22 = vmax.f32 %v3565_v7, 0.0  ;;  %v3566_v63 = vadd.f32 %v21841_v18, %v3497_v42  ;;  %v22024_v53 = vld [vmem:[#allocation2 + $0x60] sm:$0xff]  ;;  %v22026_v61 = vld [vmem:[#allocation2 + $0x68] sm:$0xff]  ;;  %17935 = vmatmul.mubr.msk.bf16.gmra.mrb[12].mxu1 %vm273_vm3, %v4117_v38  ;;  %v4134_v40 = vsel %vm479_vm5, %v4125_v55, %v4133_v33 }
 0x32c   :  { %3841 = vst.msk [vmem:[#allocation2 + $0x80] sm:$0xff] %vm273_vm3, %v3752_v28  ;;  %v3632_v52 = vmax.f32 %v3568_v29, 0.0  ;;  %v26374_v46 = vshrl.u32 %v22024_v53, 16  ;;  %v26373_v26 = vshll.u32 %v22024_v53, 16  ;;  %v26372_v48 = vshrl.u32 %v22026_v61, 16  ;;  %17938 = vmatprep.mubr.msk.bf16.mxu1 %vm273_vm3, %v4134_v40 }
 0x32d   :  { %v3630_v47 = vmax.f32 %v3566_v63, 0.0  ;;  %v17888_v2 = vpop.f32.mrb[32].mxu0  ;;  %v26368_v14 = vshll.u32 %v22026_v61, 16  ;;  %v4156_v29 = vrot.slane %v4154_v54, 3  ;;  %v4159_v55 = vrot.slane %v4157_v20, 4 }
 0x32e   :  { %v3680_v27 = vpack.c.bf16 %v3632_v52, %v3631_v34  ;;  %v3502_v8 = vmul.f32 %v17888_v2, %v21836_v25  ;;  %v3272_v41 = vpop.f32.mrb[33].mxu0  ;;  %v4138_v10 = vrot.slane %v26374_v46, 3  ;;  %v4141_v59 = vrot.slane %v26373_v26, 4 }
 0x32f   :  { %v3679_v13 = vpack.c.bf16 %v3630_v47, %v3629_v22  ;;  %v3500_v62 = vmul.f32 %v21836_v25, %v3272_v41  ;;  %v17889_v17 = vpop.f32.mrb[34].mxu0  ;;  %v4147_v39 = vrot.slane %v26372_v48, 3  ;;  %v4150_v57 = vrot.slane %v26368_v14, 4 }
 0x330   :  { %v3755_v24 = vrot.slane %v3680_v27, 4  ;;  %v3571_v5 = vadd.f32 %v21841_v18, %v3502_v8  ;;  %v3503_v36 = vmul.f32 %v17889_v17, %v21836_v25  ;;  %v3275_v58 = vpop.f32.mrb[35].mxu0  ;;  %v4142_v38 = vor.u32 %v4141_v59, %v4138_v10 }
 0x331   :  { %v3753_v16 = vrot.slane %v3679_v13, 4  ;;  %v3569_v7 = vadd.f32 %v21841_v18, %v3500_v62  ;;  %v3501_v42 = vmul.f32 %v21836_v25, %v3275_v58  ;;  %v4151_v34 = vor.u32 %v4150_v57, %v4147_v39 }
 0x332   :  { %3844 = vst.msk [vmem:[#allocation2 + $0x98] sm:$0xf] %vm277_vm4, %v3755_v24  ;;  %v3572_v23 = vadd.f32 %v21841_v18, %v3503_v36  ;;  %v22052_v9 = vld [vmem:[#allocation2 + $0x78] sm:$0xf8]  ;;  %v3635_v63 = vmax.f32 %v3571_v5, 0.0  ;;  %v4143_v54 = vsel %vm479_vm5, %v4133_v33, %v4142_v38  ;;  %v4160_v33 = vor.u32 %v4159_v55, %v4156_v29 }
 0x333   :  { %v3754_v28 = vsel %vm174_vm2, %v3751_v56, %v3753_v16  ;;  %v3756_v22 = vsel %vm174_vm2, %v3753_v16, %v3755_v24  ;;  %v3570_v52 = vadd.f32 %v21841_v18, %v3501_v42  ;;  %v22057_v47 = vld [vmem:[#allocation2 + $0x80] sm:$0xff]  ;;  %v3633_v2 = vmax.f32 %v3569_v7, 0.0  ;;  %17939 = vmatmul.mubr.msk.bf16.gmra.mrb[16].mxu1 %vm273_vm3, %v4143_v54 }
 0x334   :  { %3842 = vst.msk [vmem:[#allocation2 + $0x88] sm:$0xff] %vm273_vm3, %v3754_v28  ;;  %3843 = vst.msk [vmem:[#allocation2 + $0x90] sm:$0xff] %vm273_vm3, %v3756_v22  ;;  %v3636_v27 = vmax.f32 %v3572_v23, 0.0  ;;  %v4152_v20 = vsel %vm479_vm5, %v4142_v38, %v4151_v34  ;;  %v4163_v8 = vshrl.u32 %v22052_v9, 16  ;;  %v4166_v41 = vshll.u32 %v22052_v9, 16 }
 0x335   :  { %v3634_v40 = vmax.f32 %v3570_v52, 0.0  ;;  %v17892_v56 = vpop.f32.mrb[36].mxu0  ;;  %v26367_v10 = vshrl.u32 %v22057_v47, 16  ;;  %17942 = vmatprep.mubr.msk.bf16.mxu1 %vm273_vm3, %v4152_v20  ;;  %v26363_v59 = vshll.u32 %v22057_v47, 16  ;;  %v4161_v28 = vsel %vm479_vm5, %v4151_v34, %v4160_v33 }
 0x336   :  { %v22067_v13 = vpack.c.bf16 %v3636_v27, %v3635_v63  ;;  %v3506_v62 = vmul.f32 %v17892_v56, %v21836_v25  ;;  %v3288_v17 = vpop.f32.mrb[37].mxu0  ;;  %v4165_v36 = vrot.slane %v4163_v8, 3  ;;  %v4168_v58 = vrot.slane %v4166_v41, 4 }
 0x337   :  { %v3681_v39 = vpack.c.bf16 %v3634_v40, %v3633_v2  ;;  %v3504_v24 = vmul.f32 %v21836_v25, %v3288_v17  ;;  %v17893_v5 = vpop.f32.mrb[38].mxu0  ;;  %v4173_v38 = vrot.slane %v26367_v10, 3  ;;  %v4176_v27 = vrot.slane %v26363_v59, 4 }
 0x338   :  { %v3758_v57 = vrot.slane %v22067_v13, 4  ;;  %v3575_v16 = vadd.f32 %v21841_v18, %v3506_v62  ;;  %v3507_v7 = vmul.f32 %v17893_v5, %v21836_v25  ;;  %v3291_v42 = vpop.f32.mrb[39].mxu0  ;;  %v4169_v2 = vor.u32 %v4168_v58, %v4165_v36 }
 0x339   :  { %v3757_v23 = vrot.slane %v3681_v39, 4  ;;  %v3573_v29 = vadd.f32 %v21841_v18, %v3504_v24  ;;  %v3505_v55 = vmul.f32 %v21836_v25, %v3291_v42  ;;  %v4025_v22 = vld [vmem:[#allocation2 + $0x98] sm:$0xf]  ;;  %v4177_v13 = vor.u32 %v4176_v27, %v4173_v38 }
 0x33a   :  { %v3639_v63 = vmax.f32 %v3575_v16, 0.0  ;;  %v3576_v52 = vadd.f32 %v21841_v18, %v3507_v7  ;;  %v4198_v34 = vshrl.u32 %v4025_v22, 16  ;;  %v4201_v36 = vshll.u32 %v4025_v22, 16 }
 0x33b   :  { %v3759_v54 = vsel %vm174_vm2, %v3757_v23, %v3758_v57  ;;  %3845 = vst.msk [vmem:[#allocation2 + $0xa0] sm:$0xf0] %vm271_vm1, %v3757_v23  ;;  %v3637_v20 = vmax.f32 %v3573_v29, 0.0  ;;  %v3574_v40 = vadd.f32 %v21841_v18, %v3505_v55  ;;  %v22087_v56 = vld [vmem:[#allocation2 + $0x88] sm:$0xff]  ;;  %v22089_v8 = vld [vmem:[#allocation2 + $0x90] sm:$0xff]  ;;  %17943 = vmatmul.mubr.msk.bf16.gmra.mrb[20].mxu1 %vm273_vm3, %v4161_v28  ;;  %v4178_v16 = vsel %vm479_vm5, %v4169_v2, %v4177_v13 }
 0x33c   :  { %3846 = vst.msk [vmem:[#allocation2 + $0xa8] sm:$0xff] %vm273_vm3, %v3759_v54  ;;  %v3640_v41 = vmax.f32 %v3576_v52, 0.0  ;;  %v26362_v62 = vshrl.u32 %v22087_v56, 16  ;;  %v26361_v17 = vshll.u32 %v22087_v56, 16  ;;  %v26357_v24 = vshrl.u32 %v22089_v8, 16  ;;  %17946 = vmatprep.mubr.msk.bf16.mxu1 %vm273_vm3, %v4178_v16 }
 0x33d   :  { %v3638_v33 = vmax.f32 %v3574_v40, 0.0  ;;  %v17896_v39 = vpop.f32.mrb[40].mxu0  ;;  %v26358_v5 = vshll.u32 %v22089_v8, 16 }
 0x33e   :  { %v3684_v58 = vpack.c.bf16 %v3640_v41, %v3639_v63  ;;  %v3510_v7 = vmul.f32 %v17896_v39, %v21836_v25  ;;  %v3304_v42 = vpop.f32.mrb[41].mxu0  ;;  %v4182_v38 = vrot.slane %v26362_v62, 3  ;;  %v4185_v28 = vrot.slane %v26361_v17, 4 }
 0x33f   :  { %v3683_v23 = vpack.c.bf16 %v3638_v33, %v3637_v20  ;;  %v3508_v29 = vmul.f32 %v21836_v25, %v3304_v42  ;;  %v17897_v55 = vpop.f32.mrb[42].mxu0  ;;  %v4191_v22 = vrot.slane %v26357_v24, 3  ;;  %v4194_v54 = vrot.slane %v26358_v5, 4 }
 0x340   :  { %v3762_v63 = vrot.slane %v3684_v58, 4  ;;  %v3579_v52 = vadd.f32 %v21841_v18, %v3510_v7  ;;  %v3511_v2 = vmul.f32 %v17897_v55, %v21836_v25  ;;  %v3307_v27 = vpop.f32.mrb[43].mxu0  ;;  %v4186_v33 = vor.u32 %v4185_v28, %v4182_v38 }
 0x341   :  { %v3760_v20 = vrot.slane %v3683_v23, 4  ;;  %v3577_v40 = vadd.f32 %v21841_v18, %v3508_v29  ;;  %v3509_v41 = vmul.f32 %v21836_v25, %v3307_v27  ;;  %v4195_v16 = vor.u32 %v4194_v54, %v4191_v22 }
 0x342   :  { %3849 = vst.msk [vmem:[#allocation2 + $0xc0] sm:$0xf] %vm277_vm4, %v3762_v63  ;;  %v3580_v39 = vadd.f32 %v21841_v18, %v3511_v2  ;;  %v4200_v58 = vrot.slane %v4198_v34, 3  ;;  %v4203_v42 = vrot.slane %v4201_v36, 4  ;;  %v22115_v7 = vld [vmem:[#allocation2 + $0xa0] sm:$0xf8]  ;;  %v4187_v34 = vsel %vm479_vm5, %v4177_v13, %v4186_v33 }
 0x343   :  { %v3761_v55 = vsel %vm174_vm2, %v3758_v57, %v3760_v20  ;;  %v3763_v24 = vsel %vm174_vm2, %v3760_v20, %v3762_v63  ;;  %v3643_v5 = vmax.f32 %v3579_v52, 0.0  ;;  %v3578_v23 = vadd.f32 %v21841_v18, %v3509_v41  ;;  %v22120_v29 = vld [vmem:[#allocation2 + $0xa8] sm:$0xff]  ;;  %17947 = vmatmul.mubr.msk.bf16.gmra.mrb[24].mxu1 %vm273_vm3, %v4187_v34 }
 0x344   :  { %3847 = vst.msk [vmem:[#allocation2 + $0xb0] sm:$0xff] %vm273_vm3, %v3761_v55  ;;  %3848 = vst.msk [vmem:[#allocation2 + $0xb8] sm:$0xff] %vm273_vm3, %v3763_v24  ;;  %v3641_v38 = vmax.f32 %v3577_v40, 0.0  ;;  %v3644_v28 = vmax.f32 %v3580_v39, 0.0  ;;  %v4196_v36 = vsel %vm479_vm5, %v4186_v33, %v4195_v16  ;;  %v4207_v63 = vshrl.u32 %v22115_v7, 16 }
 0x345   :  { %v3642_v22 = vmax.f32 %v3578_v23, 0.0  ;;  %v17900_v57 = vpop.f32.mrb[44].mxu0  ;;  %v4210_v52 = vshll.u32 %v22115_v7, 16  ;;  %v26360_v2 = vshrl.u32 %v22120_v29, 16  ;;  %17950 = vmatprep.mubr.msk.bf16.mxu1 %vm273_vm3, %v4196_v36  ;;  %v4204_v13 = vor.u32 %v4203_v42, %v4200_v58 }
 0x346   :  { %v22130_v27 = vpack.c.bf16 %v3644_v28, %v3643_v5  ;;  %v3514_v24 = vmul.f32 %v17900_v57, %v21836_v25  ;;  %v3320_v54 = vpop.f32.mrb[45].mxu0  ;;  %v26359_v20 = vshll.u32 %v22120_v29, 16  ;;  %v4209_v39 = vrot.slane %v4207_v63, 3 }
 0x347   :  { %v3685_v40 = vpack.c.bf16 %v3642_v22, %v3641_v38  ;;  %v3512_v41 = vmul.f32 %v21836_v25, %v3320_v54  ;;  %v17901_v33 = vpop.f32.mrb[46].mxu0  ;;  %v4212_v55 = vrot.slane %v4210_v52, 4  ;;  %v4217_v36 = vrot.slane %v26360_v2, 3 }
 0x348   :  { %v3765_v23 = vrot.slane %v22130_v27, 4  ;;  %v3583_v34 = vadd.f32 %v21841_v18, %v3514_v24  ;;  %v3515_v5 = vmul.f32 %v17901_v33, %v21836_v25  ;;  %v3323_v28 = vpop.f32.mrb[47].mxu0  ;;  %v4205_v38 = vsel %vm479_vm5, %v4195_v16, %v4204_v13 }
 0x349   :  { %v3764_v57 = vrot.slane %v3685_v40, 4  ;;  %v3581_v58 = vadd.f32 %v21841_v18, %v3512_v41  ;;  %v3513_v42 = vmul.f32 %v21836_v25, %v3323_v28  ;;  %v22144_v22 = vld [vmem:[#allocation2 + $0xc0] sm:$0xf]  ;;  %v4213_v27 = vor.u32 %v4212_v55, %v4209_v39 }
 0x34a   :  { %v3647_v63 = vmax.f32 %v3583_v34, 0.0  ;;  %v3584_v52 = vadd.f32 %v21841_v18, %v3515_v5  ;;  %v4220_v24 = vrot.slane %v26359_v20, 4  ;;  %v4242_v16 = vshrl.u32 %v22144_v22, 16 }
 0x34b   :  { %v3766_v54 = vsel %vm174_vm2, %v3764_v57, %v3765_v23  ;;  %3850 = vst.msk [vmem:[#allocation2 + $0xc8] sm:$0xf0] %vm271_vm1, %v3764_v57  ;;  %v3645_v40 = vmax.f32 %v3581_v58, 0.0  ;;  %v3582_v41 = vadd.f32 %v21841_v18, %v3513_v42  ;;  %v22152_v33 = vld [vmem:[#allocation2 + $0xb0] sm:$0xff]  ;;  %v22154_v28 = vld [vmem:[#allocation2 + $0xb8] sm:$0xff]  ;;  %17951 = vmatmul.mubr.msk.bf16.gmra.mrb[28].mxu1 %vm273_vm3, %v4205_v38  ;;  %v4245_v20 = vshll.u32 %v22144_v22, 16 }
 0x34c   :  { %3851 = vst.msk [vmem:[#allocation2 + $0xd0] sm:$0xff] %vm273_vm3, %v3766_v54  ;;  %v3648_v13 = vmax.f32 %v3584_v52, 0.0  ;;  %v4221_v39 = vor.u32 %v4220_v24, %v4217_v36  ;;  %v26364_v55 = vshrl.u32 %v22152_v33, 16  ;;  %v26365_v34 = vshll.u32 %v22152_v33, 16 }
 0x34d   :  { %v3646_v5 = vmax.f32 %v3582_v41, 0.0  ;;  %v17904_v57 = vpop.f32.mrb[48].mxu0  ;;  %v26366_v58 = vshrl.u32 %v22154_v28, 16  ;;  %v26369_v42 = vshll.u32 %v22154_v28, 16  ;;  %v4247_v10 = vrot.slane %v4245_v20, 4 }
 0x34e   :  { %v3688_v2 = vpack.c.bf16 %v3648_v13, %v3647_v63  ;;  %v4222_v17 = vsel %vm479_vm5, %v4213_v27, %v4221_v39  ;;  %v3518_v52 = vmul.f32 %v17904_v57, %v21836_v25  ;;  %v3336_v36 = vpop.f32.mrb[49].mxu0  ;;  %v4226_v24 = vrot.slane %v26364_v55, 3 }
 0x34f   :  { %v3687_v54 = vpack.c.bf16 %v3646_v5, %v3645_v40  ;;  %17954 = vmatprep.mubr.msk.bf16.mxu1 %vm273_vm3, %v4222_v17  ;;  %v3516_v38 = vmul.f32 %v21836_v25, %v3336_v36  ;;  %v17905_v41 = vpop.f32.mrb[50].mxu0  ;;  %v4229_v62 = vrot.slane %v26365_v34, 4  ;;  %v4235_v63 = vrot.slane %v26366_v58, 3 }
 0x350   :  { %v3769_v13 = vrot.slane %v3688_v2, 4  ;;  %v3587_v27 = vadd.f32 %v21841_v18, %v3518_v52  ;;  %v3519_v57 = vmul.f32 %v17905_v41, %v21836_v25  ;;  %v3339_v59 = vpop.f32.mrb[51].mxu0  ;;  %v4238_v40 = vrot.slane %v26369_v42, 4 }
 0x351   :  { %v3767_v5 = vrot.slane %v3687_v54, 4  ;;  %v3585_v17 = vadd.f32 %v21841_v18, %v3516_v38  ;;  %v3517_v36 = vmul.f32 %v21836_v25, %v3339_v59  ;;  %v4230_v55 = vor.u32 %v4229_v62, %v4226_v24 }
 0x352   :  { %3854 = vst.msk [vmem:[#allocation2 + $0xe8] sm:$0xf] %vm277_vm4, %v3769_v13  ;;  %v3588_v34 = vadd.f32 %v21841_v18, %v3519_v57  ;;  %v4239_v58 = vor.u32 %v4238_v40, %v4235_v63  ;;  %v4244_v2 = vrot.slane %v4242_v16, 3  ;;  %v22182_v52 = vld [vmem:[#allocation2 + $0xc8] sm:$0xf8]  ;;  %v3651_v42 = vmax.f32 %v3587_v27, 0.0 }
 0x353   :  { %v3768_v41 = vsel %vm174_vm2, %v3765_v23, %v3767_v5  ;;  %v3770_v14 = vsel %vm174_vm2, %v3767_v5, %v3769_v13  ;;  %v3586_v54 = vadd.f32 %v21841_v18, %v3517_v36  ;;  %v22187_v38 = vld [vmem:[#allocation2 + $0xd0] sm:$0xff]  ;;  %v3649_v59 = vmax.f32 %v3585_v17, 0.0 }
 0x354   :  { %3852 = vst.msk [vmem:[#allocation2 + $0xd8] sm:$0xff] %vm273_vm3, %v3768_v41  ;;  %3853 = vst.msk [vmem:[#allocation2 + $0xe0] sm:$0xff] %vm273_vm3, %v3770_v14  ;;  %v3652_v62 = vmax.f32 %v3588_v34, 0.0  ;;  %v4231_v16 = vsel %vm479_vm5, %v4221_v39, %v4230_v55  ;;  %v4240_v20 = vsel %vm479_vm5, %v4230_v55, %v4239_v58  ;;  %v4251_v63 = vshrl.u32 %v22182_v52, 16 }
 0x355   :  { %v3650_v24 = vmax.f32 %v3586_v54, 0.0  ;;  %17955 = vmatmul.mubr.msk.bf16.gmra.mrb[32].mxu1 %vm273_vm3, %v4231_v16  ;;  %v17908_v23 = vpop.f32.mrb[52].mxu0  ;;  %v4254_v18 = vshll.u32 %v22182_v52, 16  ;;  %v26371_v13 = vshrl.u32 %v22187_v38, 16  ;;  %v4248_v39 = vor.u32 %v4247_v10, %v4244_v2  ;;  %v22213_v10 = vld [vmem:[%s26306_s2] ss:$0 sm:$0xff] }
 0x356   :  { %v22197_v27 = vpack.c.bf16 %v3652_v62, %v3651_v42  ;;  %17958 = vmatprep.mubr.msk.bf16.mxu1 %vm273_vm3, %v4240_v20  ;;  %v3522_v14 = vmul.f32 %v17908_v23, %v21836_v25  ;;  %v3352_v34 = vpop.f32.mrb[53].mxu0  ;;  %v26370_v55 = vshll.u32 %v22187_v38, 16  ;;  %v4253_v17 = vrot.slane %v4251_v63, 3  ;;  %v22207_v42 = vld [vmem:[%s26307_s3] ss:$0 sm:$0xff] }
 0x357   :  { %v3689_v57 = vpack.c.bf16 %v3650_v24, %v3649_v59  ;;  %v3520_v40 = vmul.f32 %v21836_v25, %v3352_v34  ;;  %v17909_v5 = vpop.f32.mrb[54].mxu0  ;;  %v4256_v36 = vrot.slane %v4254_v18, 4  ;;  %v4261_v59 = vrot.slane %v26371_v13, 3 }
 0x358   :  { %v3772_v41 = vrot.slane %v22197_v27, 4  ;;  %v3591_v54 = vadd.f32 %v22207_v42, %v3522_v14  ;;  %v3523_v2 = vmul.f32 %v22213_v10, %v17909_v5  ;;  %v3355_v25 = vpop.f32.mrb[55].mxu0  ;;  %v4249_v24 = vsel %vm479_vm5, %v4239_v58, %v4248_v39 }
 0x359   :  { %v3771_v62 = vrot.slane %v3689_v57, 4  ;;  %v3589_v16 = vadd.f32 %v22207_v42, %v3520_v40  ;;  %v3521_v20 = vmul.f32 %v22213_v10, %v3355_v25  ;;  %v22221_v23 = vld [vmem:[#allocation2 + $0xe8] sm:$0xf]  ;;  %v4257_v27 = vor.u32 %v4256_v36, %v4253_v17 }
 0x35a   :  { %v3655_v63 = vmax.f32 %v3591_v54, 0.0  ;;  %v3592_v18 = vadd.f32 %v22207_v42, %v3523_v2  ;;  %v4264_v14 = vrot.slane %v26370_v55, 4  ;;  %v4286_v58 = vshrl.u32 %v22221_v23, 16 }
 0x35b   :  { %v3773_v34 = vsel %vm174_vm2, %v3771_v62, %v3772_v41  ;;  %3855 = vst.msk [vmem:[#allocation2 + $0xf0] sm:$0xf0] %vm271_vm1, %v3771_v62  ;;  %v3653_v57 = vmax.f32 %v3589_v16, 0.0  ;;  %v3590_v40 = vadd.f32 %v22207_v42, %v3521_v20  ;;  %v22229_v5 = vld [vmem:[#allocation2 + $0xd8] sm:$0xff]  ;;  %v22231_v25 = vld [vmem:[#allocation2 + $0xe0] sm:$0xff]  ;;  %v4289_v55 = vshll.u32 %v22221_v23, 16 }
 0x35c   :  { %3856 = vst.msk [vmem:[#allocation2 + $0xf8] sm:$0xff] %vm273_vm3, %v3773_v34  ;;  %v3656_v39 = vmax.f32 %v3592_v18, 0.0  ;;  %v4265_v17 = vor.u32 %v4264_v14, %v4261_v59  ;;  %v26375_v36 = vshrl.u32 %v22229_v5, 16  ;;  %v26376_v54 = vshll.u32 %v22229_v5, 16 }
 0x35d   :  { %v3654_v2 = vmax.f32 %v3590_v40, 0.0  ;;  %17959 = vmatmul.mubr.msk.bf16.gmra.mrb[36].mxu1 %vm273_vm3, %v4249_v24  ;;  %v17912_v62 = vpop.f32.mrb[56].mxu0  ;;  %v26377_v16 = vshrl.u32 %v22231_v25, 16  ;;  %v26380_v20 = vshll.u32 %v22231_v25, 16  ;;  %v4288_v31 = vrot.slane %v4286_v58, 3 }
 0x35e   :  { %v3692_v13 = vpack.c.bf16 %v3656_v39, %v3655_v63  ;;  %v4266_v48 = vsel %vm479_vm5, %v4257_v27, %v4265_v17  ;;  %v3526_v18 = vmul.f32 %v22213_v10, %v17912_v62  ;;  %v3368_v59 = vpop.f32.mrb[57].mxu0  ;;  %v4270_v14 = vrot.slane %v26375_v36, 3 }
 0x35f   :  { %v3691_v34 = vpack.c.bf16 %v3654_v2, %v3653_v57  ;;  %17962 = vmatprep.mubr.msk.bf16.mxu1 %vm273_vm3, %v4266_v48  ;;  %v3524_v24 = vmul.f32 %v22213_v10, %v3368_v59  ;;  %v17913_v40 = vpop.f32.mrb[58].mxu0  ;;  %v4273_v26 = vrot.slane %v26376_v54, 4  ;;  %v4279_v63 = vrot.slane %v26377_v16, 3 }
 0x360   :  { %v3776_v39 = vrot.slane %v3692_v13, 4  ;;  %v3595_v27 = vadd.f32 %v22207_v42, %v3526_v18  ;;  %v3527_v62 = vmul.f32 %v22213_v10, %v17913_v40  ;;  %v3371_v46 = vpop.f32.mrb[59].mxu0  ;;  %v4282_v57 = vrot.slane %v26380_v20, 4 }
 0x361   :  { %v3774_v2 = vrot.slane %v3691_v34, 4  ;;  %v3593_v48 = vadd.f32 %v22207_v42, %v3524_v24  ;;  %v3525_v59 = vmul.f32 %v22213_v10, %v3371_v46  ;;  %v4274_v36 = vor.u32 %v4273_v26, %v4270_v14 }
 0x362   :  { %3859 = vst.msk [vmem:[#allocation2 + $0x110] sm:$0xf] %vm277_vm4, %v3776_v39  ;;  %v3659_v54 = vmax.f32 %v3595_v27, 0.0  ;;  %v3596_v16 = vadd.f32 %v22207_v42, %v3527_v62  ;;  %v4283_v13 = vor.u32 %v4282_v57, %v4279_v63  ;;  %v22259_v18 = vld [vmem:[#allocation2 + $0xf0] sm:$0xf8]  ;;  %v4291_v20 = vrot.slane %v4289_v55, 4 }
 0x363   :  { %v3775_v40 = vsel %vm174_vm2, %v3772_v41, %v3774_v2  ;;  %v3777_v32 = vsel %vm174_vm2, %v3774_v2, %v3776_v39  ;;  %v3594_v34 = vadd.f32 %v22207_v42, %v3525_v59  ;;  %v22264_v24 = vld [vmem:[#allocation2 + $0xf8] sm:$0xff]  ;;  %v3657_v46 = vmax.f32 %v3593_v48, 0.0 }
 0x364   :  { %3857 = vst.msk [vmem:[#allocation2 + $0x100] sm:$0xff] %vm273_vm3, %v3775_v40  ;;  %3858 = vst.msk [vmem:[#allocation2 + $0x108] sm:$0xff] %vm273_vm3, %v3777_v32  ;;  %v3660_v26 = vmax.f32 %v3596_v16, 0.0  ;;  %v4275_v14 = vsel %vm479_vm5, %v4265_v17, %v4274_v36  ;;  %v4284_v58 = vsel %vm479_vm5, %v4274_v36, %v4283_v13  ;;  %v4295_v39 = vshrl.u32 %v22259_v18, 16 }
 0x365   :  { %v3658_v63 = vmax.f32 %v3594_v34, 0.0  ;;  %17963 = vmatmul.mubr.msk.bf16.gmra.mrb[40].mxu1 %vm273_vm3, %v4275_v14  ;;  %v17916_v41 = vpop.f32.mrb[60].mxu0  ;;  %v4298_v55 = vshll.u32 %v22259_v18, 16  ;;  %v26393_v27 = vshrl.u32 %v22264_v24, 16  ;;  %v26392_v17 = vshll.u32 %v22264_v24, 16 }
 0x366   :  { %v3694_v62 = vpack.c.bf16 %v3660_v26, %v3659_v54  ;;  %17966 = vmatprep.mubr.msk.bf16.mxu1 %vm273_vm3, %v4284_v58  ;;  %v3530_v32 = vmul.f32 %v22213_v10, %v17916_v41  ;;  %v3384_v16 = vpop.f32.mrb[61].mxu0  ;;  %v4297_v48 = vrot.slane %v4295_v39, 3 }
 0x367   :  { %v3693_v57 = vpack.c.bf16 %v3658_v63, %v3657_v46  ;;  %v3528_v36 = vmul.f32 %v22213_v10, %v3384_v16  ;;  %v17917_v2 = vpop.f32.mrb[62].mxu0  ;;  %v4300_v59 = vrot.slane %v4298_v55, 4  ;;  %v4305_v54 = vrot.slane %v26393_v27, 3 }
 0x368   :  { %v3779_v40 = vrot.slane %v3694_v62, 4  ;;  %v3599_v34 = vadd.f32 %v22207_v42, %v3530_v32  ;;  %v3531_v14 = vmul.f32 %v22213_v10, %v17917_v2  ;;  %v3387_v50 = vpop.f32.mrb[63].mxu0  ;;  %v4292_v46 = vor.u32 %v4291_v20, %v4288_v31 }
 0x369   :  { %v3778_v26 = vrot.slane %v3693_v57, 4  ;;  %v3597_v58 = vadd.f32 %v22207_v42, %v3528_v36  ;;  %v3529_v41 = vmul.f32 %v22213_v10, %v3387_v50  ;;  %v4301_v16 = vor.u32 %v4300_v59, %v4297_v48 }
 0x36a   :  { %v3600_v63 = vadd.f32 %v22207_v42, %v3531_v14  ;;  %v4308_v39 = vrot.slane %v26392_v17, 4  ;;  %v3663_v62 = vmax.f32 %v3599_v34, 0.0  ;;  %v4293_v57 = vsel %vm479_vm5, %v4283_v13, %v4292_v46 }
 0x36b   :  { %v3780_v55 = vsel %vm174_vm2, %v3778_v26, %v3779_v40  ;;  %3860 = vst.msk [vmem:[#allocation2 + $0x118] sm:$0xf0] %vm271_vm1, %v3778_v26  ;;  %v3598_v32 = vadd.f32 %v22207_v42, %v3529_v41  ;;  %v22291_v2 = vld [vmem:[#allocation2 + $0x100] sm:$0xff]  ;;  %v22293_v36 = vld [vmem:[#allocation2 + $0x108] sm:$0xff]  ;;  %v3661_v48 = vmax.f32 %v3597_v58, 0.0 }
 0x36c   :  { %3861 = vst.msk [vmem:[#allocation2 + $0x120] sm:$0xff] %vm273_vm3, %v3780_v55  ;;  %v3664_v50 = vmax.f32 %v3600_v63, 0.0  ;;  %v4309_v31 = vor.u32 %v4308_v39, %v4305_v54  ;;  %v26385_v10 = vshrl.u32 %v22291_v2, 16  ;;  %v26384_v20 = vshll.u32 %v22291_v2, 16  ;;  %v22306_v41 = vld [vmem:[#allocation2 + $0x110] sm:$0xf] }
 0x36d   :  { %v3662_v59 = vmax.f32 %v3598_v32, 0.0  ;;  %17967 = vmatmul.mubr.msk.bf16.gmra.mrb[44].mxu1 %vm273_vm3, %v4293_v57  ;;  %v26383_v42 = vshrl.u32 %v22293_v36, 16  ;;  %v26382_v13 = vshll.u32 %v22293_v36, 16  ;;  %v4330_v32 = vshrl.u32 %v22306_v41, 16 }
 0x36e   :  { %v3696_v34 = vpack.c.bf16 %v3664_v50, %v3663_v62  ;;  %v4310_v14 = vsel %vm479_vm5, %v4301_v16, %v4309_v31  ;;  %v4314_v26 = vrot.slane %v26385_v10, 3  ;;  %v4317_v54 = vrot.slane %v26384_v20, 4 }
 0x36f   :  { %v3695_v46 = vpack.c.bf16 %v3662_v59, %v3661_v48  ;;  %17970 = vmatprep.mubr.msk.bf16.mxu1 %vm273_vm3, %v4310_v14  ;;  %v4323_v58 = vrot.slane %v26383_v42, 3  ;;  %v4326_v63 = vrot.slane %v26382_v13, 4  ;;  %v4333_v57 = vshll.u32 %v22306_v41, 16 }
 0x370   :  { %v3783_v39 = vrot.slane %v3696_v34, 4  ;;  %v4318_v55 = vor.u32 %v4317_v54, %v4314_v26 }
 0x371   :  { %v3781_v16 = vrot.slane %v3695_v46, 4  ;;  %v4327_v62 = vor.u32 %v4326_v63, %v4323_v58  ;;  %v4335_v58 = vrot.slane %v4333_v57, 4 }
 0x372   :  { %3864 = vst.msk [vmem:[#allocation2 + $0x138] sm:$0xf] %vm277_vm4, %v3783_v39  ;;  %v4319_v50 = vsel %vm479_vm5, %v4309_v31, %v4318_v55  ;;  %v22317_v48 = vld [vmem:[#allocation2 + $0x118] sm:$0xf8] }
 0x373   :  { %v3782_v59 = vsel %vm174_vm2, %v3779_v40, %v3781_v16  ;;  %v3784_v14 = vsel %vm174_vm2, %v3781_v16, %v3783_v39  ;;  %v4328_v13 = vsel %vm479_vm5, %v4318_v55, %v4327_v62  ;;  %v22322_v34 = vld [vmem:[#allocation2 + $0x120] sm:$0xff]  ;;  %v4339_v26 = vshrl.u32 %v22317_v48, 16 }
 0x374   :  { %3862 = vst.msk [vmem:[#allocation2 + $0x128] sm:$0xff] %vm273_vm3, %v3782_v59  ;;  %3863 = vst.msk [vmem:[#allocation2 + $0x130] sm:$0xff] %vm273_vm3, %v3784_v14  ;;  %v4342_v54 = vshll.u32 %v22317_v48, 16  ;;  %v26391_v31 = vshrl.u32 %v22322_v34, 16  ;;  %v26390_v46 = vshll.u32 %v22322_v34, 16  ;;  %v4332_v40 = vrot.slane %v4330_v32, 3 }
 0x375   :  { %17971 = vmatmul.mubr.msk.bf16.gmra.mrb[48].mxu1 %vm273_vm3, %v4319_v50  ;;  %v4341_v63 = vrot.slane %v4339_v26, 3 }
 0x376   :  { %17974 = vmatprep.mubr.msk.bf16.mxu1 %vm273_vm3, %v4328_v13  ;;  %v4344_v39 = vrot.slane %v4342_v54, 4  ;;  %v4349_v55 = vrot.slane %v26391_v31, 3  ;;  %v4352_v16 = vrot.slane %v26390_v46, 4  ;;  %v4336_v42 = vor.u32 %v4335_v58, %v4332_v40  ;;  %v22364_v46 = vld [vmem:[#allocation2 + $0x8] sm:$0xff]  ;;  %v22406_v31 = vld [vmem:[#allocation2 + $0x38] sm:$0xff] }
 0x378   :  { %v4345_v59 = vor.u32 %v4344_v39, %v4341_v63  ;;  %v4353_v14 = vor.u32 %v4352_v16, %v4349_v55  ;;  %v4337_v20 = vsel %vm479_vm5, %v4327_v62, %v4336_v42 }
 0x379   :  { %v22356_v63 = vld [vmem:[#allocation2 + $0x138] sm:$0xf] }
 0x37a   :  { %v4354_v10 = vsel %vm479_vm5, %v4345_v59, %v4353_v14  ;;  %v4377_v16 = vshll.u32 %v22356_v63, 16 }
 0x37b   :  { %v22338_v50 = vld [vmem:[#allocation2 + $0x128] sm:$0xff]  ;;  %v22340_v32 = vld [vmem:[#allocation2 + $0x130] sm:$0xff] }
 0x37c   :  { %v26388_v13 = vshrl.u32 %v22338_v50, 16  ;;  %v26387_v57 = vshll.u32 %v22338_v50, 16  ;;  %v26386_v26 = vshrl.u32 %v22340_v32, 16  ;;  %v26389_v54 = vshll.u32 %v22340_v32, 16 }
 0x37d   :  { %17975 = vmatmul.mubr.msk.bf16.gmra.mrb[52].mxu1 %vm273_vm3, %v4337_v20 }
 0x37e   :  { %17978 = vmatprep.mubr.msk.bf16.mxu1 %vm273_vm3, %v4354_v10  ;;  %v4358_v42 = vrot.slane %v26388_v13, 3  ;;  %v4361_v62 = vrot.slane %v26387_v57, 4  ;;  %v4367_v40 = vrot.slane %v26386_v26, 3  ;;  %v4370_v58 = vrot.slane %v26389_v54, 4  ;;  %v20423_v13 = vld [vmem:[#allocation2] sm:$0xf8] }
 0x37f   :  { %v4374_v10 = vshrl.u32 %v22356_v63, 16  ;;  %v4379_v57 = vrot.slane %v4377_v16, 4  ;;  %v3945_v54 = vrot.slane %v20423_v13, 3  ;;  %v22390_v16 = vld [vmem:[%s26305_s1 + $0x80] sm:$0xff]  }
 0x380   :  { %v4362_v39 = vor.u32 %v4361_v62, %v4358_v42  ;;  %v4371_v55 = vor.u32 %v4370_v58, %v4367_v40  ;;  %v3946_v42 = vrot.slane %v22364_v46, 3  ;;  %v22371_v58 = vld [vmem:[#allocation2 + $0x10] sm:$0xff] }
 0x381   :  { %v4376_v26 = vrot.slane %v4374_v10, 3  ;;  %v3869_v10 = vld [vmem:[#allocation2 + $0x20] sm:$0x7] }
 0x382   :  { %v4363_v20 = vsel %vm479_vm5, %v4353_v14, %v4362_v39  ;;  %v4372_v59 = vsel %vm479_vm5, %v4362_v39, %v4371_v55  ;;  %v3947_v40 = vsel %vm394_vm6, %v3945_v54, %v3946_v42  ;;  %v3948_v39 = vrot.slane %v22371_v58, 3 }
 0x383   :  { %v4380_v62 = vor.u32 %v4379_v57, %v4376_v26  ;;  %v20296_v57 = vld [vmem:[%s26305_s1 + $0x78] sm:$0xff]  }
 0x384   :  { %v3949_v26 = vsel %vm394_vm6, %v3946_v42, %v3948_v39 }
 0x385   :  { %17979 = vmatmul.mubr.msk.bf16.gmra.mrb[56].mxu1 %vm273_vm3, %v4363_v20  ;;  %v4381_v14 = vsel %vm479_vm5, %v4371_v55, %v4380_v62  ;;  %v22374_v20 = vld [vmem:[#allocation2 + $0x18] sm:$0xff]  ;;  %v20427_v55 = vld [vmem:[%s26305_s1 + $0x70] sm:$0xff]  }
 0x386   :  { %17982 = vmatprep.mubr.msk.bf16.mxu1 %vm273_vm3, %v4372_v59  ;;  %v3950_v13 = vrot.slane %v22374_v20, 3  ;;  %v20428_v59 = vld [vmem:[#allocation2 + $0x28] sm:$0xf8]  ;;  %v22392_v62 = vld [vmem:[#allocation2 + $0x30] sm:$0xff] }
 0x387   :  { %v3954_v42 = vrot.slane %v20428_v59, 3 }
 0x388   :  { %v3951_v54 = vsel %vm394_vm6, %v3948_v39, %v3950_v13  ;;  %v5764_v39 = vrot.slane %v4051_v11, 5  ;;  %v3959_v11 = vrot.slane %v22409_v15, 3 }
 0x38d   :  { %17983 = vmatmul.mubr.msk.bf16.gmra.mrb[60].mxu1 %vm273_vm3, %v4381_v14  ;;  %v3955_v14 = vrot.slane %v22392_v62, 3 }
 0x38e   :  { %17990 = vmatprep.mubr.msk.bf16.mxu1 %vm273_vm3, %v3947_v40  ;;  %v5763_v40 = vrot.slane %v4048_v30, 4  ;;  %v3957_v30 = vrot.slane %v22406_v31, 3 }
 0x390   :  { %v22404_v59 = vor.u32 %v5764_v39, %v5763_v40  ;;  %v3964_v40 = vrot.slane %v21994_v44, 3 }
 0x395   :  { %17991 = vmatmul.mubr.msk.bf16.vlgmr.msra.gmra.mrb[0].mxu1 %vm273_vm3, %v3949_v26  ;;  %v3952_v26 = vrot.slane %v3869_v10, 3  ;;  %v3874_v10 = vld [vmem:[#allocation2 + $0x48] sm:$0x7] }
 0x396   :  { %18055 = vmatpush3.bf16.msra.mxu1 %v20427_v55  ;;  %17994 = vmatprep.mubr.msk.bf16.mxu1 %vm273_vm3, %v3951_v54  ;;  %v3956_v55 = vsel %vm394_vm6, %v3954_v42, %v3955_v14  ;;  %v3963_v42 = vrot.slane %v21989_v4, 3  ;;  %v3961_v39 = vrot.slane %v3874_v10, 3 }
 0x397   :  { %18056 = vmatprep.subr.bf16.mxu1 %v20296_v57  ;;  %v3953_v54 = vsel %vm394_vm6, %v3950_v13, %v3952_v26  ;;  %v3960_v13 = vsel %vm394_vm6, %v3957_v30, %v3959_v11 }
 0x398   :  { %v3962_v26 = vsel %vm394_vm6, %v3959_v11, %v3961_v39  ;;  %v3972_v11 = vrot.slane %v22052_v9, 3 }
 0x39a   :  { %18057 = vmatpush3.bf16.msra.mxu1 %v20296_v57  ;;  %v3958_v57 = vsel %vm394_vm6, %v3955_v14, %v3957_v30  ;;  %v3966_v14 = vrot.slane %v22024_v53, 3 }
 0x39b   :  { %18122 = vmatprep.subr.bf16.mxu1 %v22390_v16 }
 0x39c   :  { %v3967_v30 = vsel %vm394_vm6, %v3964_v40, %v3966_v14 }
 0x39d   :  { %17995 = vmatmul.mubr.msk.bf16.gmra.mrb[4].mxu1 %vm273_vm3, %v3953_v54  ;;  %v3965_v54 = vsel %vm394_vm6, %v3963_v42, %v3964_v40  ;;  %v3975_v40 = vrot.slane %v22087_v56, 3 }
 0x39e   :  { %17998 = vmatprep.mubr.msk.bf16.mxu1 %vm273_vm3, %v3956_v55  ;;  %v3968_v55 = vrot.slane %v22026_v61, 3 }
 0x3a0   :  { %v3969_v4 = vsel %vm394_vm6, %v3966_v14, %v3968_v55  ;;  %v3884_v14 = vld [vmem:[#allocation2 + $0x98] sm:$0x7] }
 0x3a5   :  { %17999 = vmatmul.mubr.msk.bf16.gmra.mrb[8].mxu1 %vm273_vm3, %v3958_v57  ;;  %v3879_v57 = vld [vmem:[#allocation2 + $0x70] sm:$0x7] }
 0x3a6   :  { %18002 = vmatprep.mubr.msk.bf16.mxu1 %vm273_vm3, %v3960_v13  ;;  %v3973_v13 = vrot.slane %v22057_v47, 3  ;;  %v3970_v10 = vrot.slane %v3879_v57, 3 }
 0x3a8   :  { %v3971_v42 = vsel %vm394_vm6, %v3968_v55, %v3970_v10  ;;  %v3974_v39 = vsel %vm394_vm6, %v3972_v11, %v3973_v13  ;;  %v3981_v55 = vrot.slane %v22115_v7, 3  ;;  %v3986_v10 = vrot.slane %v22154_v28, 3 }
 0x3ad   :  { %18003 = vmatmul.mubr.msk.bf16.gmra.mrb[12].mxu1 %vm273_vm3, %v3962_v26  ;;  %v3977_v26 = vrot.slane %v22089_v8, 3 }
 0x3ae   :  { %18006 = vmatprep.mubr.msk.bf16.mxu1 %vm273_vm3, %v3965_v54  ;;  %v3976_v54 = vsel %vm394_vm6, %v3973_v13, %v3975_v40  ;;  %v3984_v13 = vrot.slane %v22152_v33, 3 }
 0x3af   :  { %v3978_v9 = vsel %vm394_vm6, %v3975_v40, %v3977_v26  ;;  %v3990_v40 = vrot.slane %v22182_v52, 3 }
 0x3b0   :  { %v3987_v7 = vsel %vm394_vm6, %v3984_v13, %v3986_v10 }
 0x3b5   :  { %18007 = vmatmul.mubr.msk.bf16.gmra.mrb[16].mxu1 %vm273_vm3, %v3967_v30  ;;  %v3982_v30 = vrot.slane %v22120_v29, 3 }
 0x3b6   :  { %18010 = vmatprep.mubr.msk.bf16.mxu1 %vm273_vm3, %v3969_v4  ;;  %v3979_v4 = vrot.slane %v3884_v14, 3 }
 0x3b7   :  { %v3983_v11 = vsel %vm394_vm6, %v3981_v55, %v3982_v30  ;;  %v3993_v55 = vrot.slane %v22229_v5, 3 }
 0x3b8   :  { %v3980_v57 = vsel %vm394_vm6, %v3977_v26, %v3979_v4  ;;  %v3991_v26 = vrot.slane %v22187_v38, 3 }
 0x3ba   :  { %v3992_v14 = vsel %vm394_vm6, %v3990_v40, %v3991_v26  ;;  %v3994_v4 = vsel %vm394_vm6, %v3991_v26, %v3993_v55  ;;  %v4004_v40 = vrot.slane %v22293_v36, 3 }
 0x3bd   :  { %18011 = vmatmul.mubr.msk.bf16.gmra.mrb[20].mxu1 %vm273_vm3, %v3971_v42  ;;  %v3985_v42 = vsel %vm394_vm6, %v3982_v30, %v3984_v13  ;;  %v3995_v30 = vrot.slane %v22231_v25, 3  ;;  %v4000_v13 = vrot.slane %v22264_v24, 3 }
 0x3be   :  { %18014 = vmatprep.mubr.msk.bf16.mxu1 %vm273_vm3, %v3974_v39  ;;  %v3889_v39 = vld [vmem:[#allocation2 + $0xc0] sm:$0x7] }
 0x3bf   :  { %v3996_v52 = vsel %vm394_vm6, %v3993_v55, %v3995_v30 }
 0x3c5   :  { %18015 = vmatmul.mubr.msk.bf16.gmra.mrb[24].mxu1 %vm273_vm3, %v3976_v54  ;;  %v3988_v54 = vrot.slane %v3889_v39, 3  ;;  %v4002_v39 = vrot.slane %v22291_v2, 3 }
 0x3c6   :  { %18018 = vmatprep.mubr.msk.bf16.mxu1 %vm273_vm3, %v3978_v9 }
 0x3c7   :  { %v3989_v9 = vsel %vm394_vm6, %v3986_v10, %v3988_v54  ;;  %v4003_v26 = vsel %vm394_vm6, %v4000_v13, %v4002_v39  ;;  %v3899_v54 = vld [vmem:[#allocation2 + $0x110] sm:$0x7] }
 0x3c8   :  { %v4006_v55 = vrot.slane %v3899_v54, 3  ;;  %v5210_v54 = vrot.slane %v22374_v20, 4 }
 0x3cd   :  { %18019 = vmatmul.mubr.msk.bf16.gmra.mrb[28].mxu1 %vm273_vm3, %v3980_v57  ;;  %v3894_v57 = vld [vmem:[#allocation2 + $0xe8] sm:$0x7] }
 0x3ce   :  { %18022 = vmatprep.mubr.msk.bf16.mxu1 %vm273_vm3, %v3983_v11  ;;  %v3999_v11 = vrot.slane %v22259_v18, 3  ;;  %v3997_v10 = vrot.slane %v3894_v57, 3  ;;  %v4005_v18 = vsel %vm394_vm6, %v4002_v39, %v4004_v40  ;;  %v4013_v57 = vrot.slane %v22340_v32, 3 }
 0x3d5   :  { %18023 = vmatmul.mubr.msk.bf16.gmra.mrb[32].mxu1 %vm273_vm3, %v3985_v42  ;;  %v3998_v42 = vsel %vm394_vm6, %v3995_v30, %v3997_v10  ;;  %v4007_v30 = vsel %vm394_vm6, %v4004_v40, %v4006_v55  ;;  %v3904_v10 = vld [vmem:[#allocation2 + $0x138] sm:$0x7] }
 0x3d6   :  { %18026 = vmatprep.mubr.msk.bf16.mxu1 %vm273_vm3, %v3987_v7  ;;  %v4001_v7 = vsel %vm394_vm6, %v3999_v11, %v4000_v13  ;;  %v22488_v13 = vld [vmem:[#allocation2] sm:$0xf0]  ;;  %v4015_v39 = vrot.slane %v3904_v10, 3 }
 0x3d8   :  { %v4016_v40 = vsel %vm394_vm6, %v4013_v57, %v4015_v39 }
 0x3dd   :  { %18027 = vmatmul.mubr.msk.bf16.gmra.mrb[36].mxu1 %vm273_vm3, %v3989_v9  ;;  %v4008_v9 = vrot.slane %v22317_v48, 3 }
 0x3de   :  { %18030 = vmatprep.mubr.msk.bf16.mxu1 %vm273_vm3, %v3992_v14  ;;  %v4009_v14 = vrot.slane %v22322_v34, 3 }
 0x3e5   :  { %18031 = vmatmul.mubr.msk.bf16.gmra.mrb[40].mxu1 %vm273_vm3, %v3994_v4  ;;  %v4010_v4 = vsel %vm394_vm6, %v4008_v9, %v4009_v14  ;;  %v20298_v9 = vld [vmem:[%s26305_s1 + $0x88] sm:$0xff]  }
 0x3e6   :  { %18034 = vmatprep.mubr.msk.bf16.mxu1 %vm273_vm3, %v3996_v52  ;;  %v4011_v52 = vrot.slane %v22338_v50, 3 }
 0x3e8   :  { %v4012_v11 = vsel %vm394_vm6, %v4009_v14, %v4011_v52  ;;  %v4014_v48 = vsel %vm394_vm6, %v4011_v52, %v4013_v57  ;;  %v5215_v57 = vrot.slane %v22392_v62, 4 }
 0x3ed   :  { %18035 = vmatmul.mubr.msk.bf16.gmra.mrb[44].mxu1 %vm273_vm3, %v3998_v42  ;;  %v5205_v42 = vrot.slane %v22488_v13, 4 }
 0x3ee   :  { %18038 = vmatprep.mubr.msk.bf16.mxu1 %vm273_vm3, %v4001_v7  ;;  %v5206_v7 = vrot.slane %v22364_v46, 4 }
 0x3f5   :  { %18039 = vmatmul.mubr.msk.bf16.gmra.mrb[48].mxu1 %vm273_vm3, %v4003_v26  ;;  %v5207_v26 = vsel %vm174_vm2, %v5205_v42, %v5206_v7  ;;  %v5217_v42 = vrot.slane %v22406_v31, 4 }
 0x3f6   :  { %18042 = vmatprep.mubr.msk.bf16.mxu1 %vm273_vm3, %v4005_v18  ;;  %v5208_v18 = vrot.slane %v22371_v58, 4 }
 0x3f7   :  { %v5218_v39 = vsel %vm174_vm2, %v5215_v57, %v5217_v42 }
 0x3f8   :  { %v5209_v14 = vsel %vm174_vm2, %v5206_v7, %v5208_v18  ;;  %v5211_v55 = vsel %vm174_vm2, %v5208_v18, %v5210_v54  ;;  %v5219_v7 = vrot.slane %v22409_v15, 4 }
 0x3fd   :  { %18043 = vmatmul.mubr.msk.bf16.gmra.mrb[52].mxu1 %vm273_vm3, %v4007_v30  ;;  %v22506_v30 = vld [vmem:[#allocation2 + $0x28] sm:$0xf0] }
 0x3fe   :  { %18046 = vmatprep.mubr.msk.bf16.mxu1 %vm273_vm3, %v4010_v4  ;;  %v22511_v4 = vld [vmem:[%s26305_s1 + $0x90] sm:$0xff]   ;;  %v5214_v52 = vrot.slane %v22506_v30, 4 }
 0x400   :  { %v5216_v10 = vsel %vm174_vm2, %v5214_v52, %v5215_v57 }
 0x405   :  { %18047 = vmatmul.mubr.msk.bf16.gmra.mrb[56].mxu1 %vm273_vm3, %v4012_v11  ;;  %v20432_v11 = vld [vmem:[#allocation2 + $0x20] sm:$0xf] }
 0x406   :  { %18050 = vmatprep.mubr.msk.bf16.mxu1 %vm273_vm3, %v4014_v48  ;;  %v5212_v48 = vrot.slane %v20432_v11, 4  ;;  %v22536_v11 = vld [vmem:[#allocation2 + $0x60] sm:$0xff] }
 0x40d   :  { %18051 = vmatmul.mubr.msk.bf16.gmra.mrb[60].mxu1 %vm273_vm3, %v4016_v40  ;;  %v5220_v40 = vsel %vm174_vm2, %v5217_v42, %v5219_v7 }
 0x40e   :  { %18058 = vmatprep.mubr.msk.bf16.mxu1 %vm273_vm3, %v5207_v26  ;;  %v22526_v26 = vld [vmem:[#allocation2 + $0x50] sm:$0xf0] }
 0x40f   :  { %v5223_v18 = vrot.slane %v22526_v26, 4 }
 0x415   :  { %18059 = vmatmul.mubr.msk.bf16.vlgmr.msra.gmra.mrb[0].mxu1 %vm273_vm3, %v5209_v14  ;;  %v20434_v14 = vld [vmem:[#allocation2 + $0x48] sm:$0xf] }
 0x416   :  { %18123 = vmatpush3.bf16.msra.mxu1 %v22390_v16  ;;  %18062 = vmatprep.mubr.msk.bf16.mxu1 %vm273_vm3, %v5211_v55  ;;  %v5213_v16 = vsel %vm174_vm2, %v5210_v54, %v5212_v48  ;;  %v22529_v54 = vld [vmem:[#allocation2 + $0x58] sm:$0xff]  ;;  %v5221_v55 = vrot.slane %v20434_v14, 4  ;;  %v5226_v48 = vrot.slane %v22536_v11, 4 }
 0x417   :  { %18124 = vmatprep.subr.bf16.mxu1 %v20298_v9 }
 0x418   :  { %v5222_v52 = vsel %vm174_vm2, %v5219_v7, %v5221_v55  ;;  %v20438_v55 = vld [vmem:[#allocation2 + $0x70] sm:$0xf] }
 0x41a   :  { %18125 = vmatpush3.bf16.msra.mxu1 %v20298_v9  ;;  %v5224_v9 = vrot.slane %v22529_v54, 4 }
 0x41b   :  { %18190 = vmatprep.subr.bf16.mxu1 %v22511_v4 }
 0x41c   :  { %v5225_v57 = vsel %vm174_vm2, %v5223_v18, %v5224_v9  ;;  %v5227_v42 = vsel %vm174_vm2, %v5224_v9, %v5226_v48  ;;  %v22549_v18 = vld [vmem:[#allocation2 + $0x80] sm:$0xff] }
 0x41d   :  { %18063 = vmatmul.mubr.msk.bf16.gmra.mrb[4].mxu1 %vm273_vm3, %v5213_v16  ;;  %v22539_v16 = vld [vmem:[#allocation2 + $0x68] sm:$0xff]  ;;  %v5233_v14 = vrot.slane %v22549_v18, 4 }
 0x41e   :  { %18066 = vmatprep.mubr.msk.bf16.mxu1 %vm273_vm3, %v5216_v10  ;;  %v5228_v10 = vrot.slane %v22539_v16, 4 }
 0x420   :  { %v5229_v7 = vsel %vm174_vm2, %v5226_v48, %v5228_v10  ;;  %v5235_v48 = vrot.slane %v22087_v56, 4 }
 0x425   :  { %18067 = vmatmul.mubr.msk.bf16.gmra.mrb[8].mxu1 %vm273_vm3, %v5218_v39  ;;  %v22546_v39 = vld [vmem:[#allocation2 + $0x78] sm:$0xf0] }
 0x426   :  { %18070 = vmatprep.mubr.msk.bf16.mxu1 %vm273_vm3, %v5220_v40  ;;  %v5232_v40 = vrot.slane %v22546_v39, 4 }
 0x428   :  { %v5234_v9 = vsel %vm174_vm2, %v5232_v40, %v5233_v14  ;;  %v5242_v40 = vrot.slane %v22120_v29, 4 }
 0x42d   :  { %18071 = vmatmul.mubr.msk.bf16.gmra.mrb[12].mxu1 %vm273_vm3, %v5222_v52  ;;  %v5230_v52 = vrot.slane %v20438_v55, 4  ;;  %v22562_v55 = vld [vmem:[#allocation2 + $0xa0] sm:$0xf0] }
 0x42e   :  { %18074 = vmatprep.mubr.msk.bf16.mxu1 %vm273_vm3, %v5225_v57 }
 0x42f   :  { %v5231_v57 = vsel %vm174_vm2, %v5228_v10, %v5230_v52  ;;  %v5241_v10 = vrot.slane %v22562_v55, 4  ;;  %v20439_v52 = vld [vmem:[#allocation2 + $0x98] sm:$0xf] }
 0x435   :  { %18075 = vmatmul.mubr.msk.bf16.gmra.mrb[16].mxu1 %vm273_vm3, %v5227_v42  ;;  %v5237_v42 = vrot.slane %v22089_v8, 4 }
 0x436   :  { %18078 = vmatprep.mubr.msk.bf16.mxu1 %vm273_vm3, %v5229_v7  ;;  %v5236_v7 = vsel %vm174_vm2, %v5233_v14, %v5235_v48  ;;  %v5243_v14 = vsel %vm174_vm2, %v5241_v10, %v5242_v40  ;;  %v5251_v10 = vrot.slane %v22187_v38, 4 }
 0x437   :  { %v5238_v17 = vsel %vm174_vm2, %v5235_v48, %v5237_v42  ;;  %v5244_v48 = vrot.slane %v22152_v33, 4 }
 0x43d   :  { %18079 = vmatmul.mubr.msk.bf16.gmra.mrb[20].mxu1 %vm273_vm3, %v5231_v57  ;;  %v5239_v57 = vrot.slane %v20439_v52, 4  ;;  %v22576_v52 = vld [vmem:[#allocation2 + $0xc8] sm:$0xf0] }
 0x43e   :  { %18082 = vmatprep.mubr.msk.bf16.mxu1 %vm273_vm3, %v5234_v9 }
 0x43f   :  { %v5240_v9 = vsel %vm174_vm2, %v5237_v42, %v5239_v57  ;;  %v5250_v42 = vrot.slane %v22576_v52, 4  ;;  %v5248_v57 = vrot.slane %v22144_v22, 4  ;;  %v22591_v22 = vld [vmem:[#allocation2 + $0xf0] sm:$0xf0] }
 0x445   :  { %18083 = vmatmul.mubr.msk.bf16.gmra.mrb[24].mxu1 %vm273_vm3, %v5236_v7  ;;  %v5245_v7 = vsel %vm174_vm2, %v5242_v40, %v5244_v48  ;;  %v5252_v40 = vsel %vm174_vm2, %v5250_v42, %v5251_v10  ;;  %v5260_v42 = vrot.slane %v22264_v24, 4 }
 0x446   :  { %18086 = vmatprep.mubr.msk.bf16.mxu1 %vm273_vm3, %v5238_v17  ;;  %v5246_v17 = vrot.slane %v22154_v28, 4 }
 0x448   :  { %v5247_v27 = vsel %vm174_vm2, %v5244_v48, %v5246_v17 }
 0x44d   :  { %18087 = vmatmul.mubr.msk.bf16.gmra.mrb[28].mxu1 %vm273_vm3, %v5240_v9  ;;  %v5249_v9 = vsel %vm174_vm2, %v5246_v17, %v5248_v57  ;;  %v5259_v17 = vrot.slane %v22591_v22, 4  ;;  %v5257_v57 = vrot.slane %v22221_v23, 4  ;;  %v22606_v23 = vld [vmem:[#allocation2 + $0x118] sm:$0xf0] }
 0x44e   :  { %18090 = vmatprep.mubr.msk.bf16.mxu1 %vm273_vm3, %v5243_v14  ;;  %v5253_v14 = vrot.slane %v22229_v5, 4 }
 0x450   :  { %v5254_v48 = vsel %vm174_vm2, %v5251_v10, %v5253_v14  ;;  %v5261_v10 = vsel %vm174_vm2, %v5259_v17, %v5260_v42  ;;  %v5269_v17 = vrot.slane %v22322_v34, 4 }
 0x455   :  { %18091 = vmatmul.mubr.msk.bf16.gmra.mrb[32].mxu1 %vm273_vm3, %v5245_v7 }
 0x456   :  { %18094 = vmatprep.mubr.msk.bf16.mxu1 %vm273_vm3, %v5247_v27  ;;  %v5255_v27 = vrot.slane %v22231_v25, 4 }
 0x458   :  { %v5256_v7 = vsel %vm174_vm2, %v5253_v14, %v5255_v27  ;;  %v5264_v14 = vrot.slane %v22293_v36, 4 }
 0x45d   :  { %18095 = vmatmul.mubr.msk.bf16.gmra.mrb[36].mxu1 %vm273_vm3, %v5249_v9  ;;  %v5258_v9 = vsel %vm174_vm2, %v5255_v27, %v5257_v57  ;;  %v5268_v27 = vrot.slane %v22606_v23, 4  ;;  %v5266_v57 = vrot.slane %v22306_v41, 4 }
 0x45e   :  { %18098 = vmatprep.mubr.msk.bf16.mxu1 %vm273_vm3, %v5252_v40  ;;  %v5262_v40 = vrot.slane %v22291_v2, 4 }
 0x465   :  { %18099 = vmatmul.mubr.msk.bf16.gmra.mrb[40].mxu1 %vm273_vm3, %v5254_v48  ;;  %v5263_v48 = vsel %vm174_vm2, %v5260_v42, %v5262_v40  ;;  %v5270_v42 = vsel %vm174_vm2, %v5268_v27, %v5269_v17  ;;  %v5759_v27 = vrot.slane %v4039_v49, 4  ;;  %v5768_v49 = vrot.slane %v4060_v6, 5 }
 0x466   :  { %18102 = vmatprep.mubr.msk.bf16.mxu1 %vm273_vm3, %v5256_v7  ;;  %v5265_v7 = vsel %vm174_vm2, %v5262_v40, %v5264_v14  ;;  %v5273_v40 = vrot.slane %v22340_v32, 4  ;;  %v5788_v6 = vrot.slane %v4083_v0, 4 }
 0x46d   :  { %18103 = vmatmul.mubr.msk.bf16.gmra.mrb[44].mxu1 %vm273_vm3, %v5258_v9  ;;  %v5267_v9 = vsel %vm174_vm2, %v5264_v14, %v5266_v57 }
 0x46e   :  { %18106 = vmatprep.mubr.msk.bf16.mxu1 %vm273_vm3, %v5261_v10  ;;  %v5271_v10 = vrot.slane %v22338_v50, 4 }
 0x470   :  { %v5272_v3 = vsel %vm174_vm2, %v5269_v17, %v5271_v10  ;;  %v5274_v41 = vsel %vm174_vm2, %v5271_v10, %v5273_v40  ;;  %v5767_v10 = vrot.slane %v4057_v43, 4  ;;  %v20300_v43 = vld [vmem:[%s26305_s1 + $0x98] sm:$0xff]  }
 0x475   :  { %18107 = vmatmul.mubr.msk.bf16.gmra.mrb[48].mxu1 %vm273_vm3, %v5263_v48  ;;  %v5752_v48 = vshrl.u32 %v22488_v13, 16 }
 0x476   :  { %18110 = vmatprep.mubr.msk.bf16.mxu1 %vm273_vm3, %v5265_v7  ;;  %v5755_v7 = vshll.u32 %v22488_v13, 16  ;;  %v5275_v13 = vrot.slane %v22356_v63, 4  ;;  %v5784_v63 = vshll.u32 %v22506_v30, 16 }
 0x477   :  { %v5754_v14 = vrot.slane %v5752_v48, 4  ;;  %v5781_v48 = vshrl.u32 %v22506_v30, 16 }
 0x478   :  { %v5757_v57 = vrot.slane %v5755_v7, 5  ;;  %v5276_v17 = vsel %vm174_vm2, %v5273_v40, %v5275_v13  ;;  %v5772_v40 = vshrl.u32 %v22636_v37, 16  ;;  %v5775_v7 = vshll.u32 %v22636_v37, 16 }
 0x479   :  { %v5783_v30 = vrot.slane %v5781_v48, 4  ;;  %v5792_v13 = vrot.slane %v4092_v60, 4  ;;  %v22668_v48 = vld [vmem:[#allocation2 + $0x48] sm:$0x1f] }
 0x47d   :  { %18111 = vmatmul.mubr.msk.bf16.gmra.mrb[52].mxu1 %vm273_vm3, %v5267_v9  ;;  %v5760_v9 = vrot.slane %v4042_v51, 5  ;;  %v5769_v51 = vor.u32 %v5768_v49, %v5767_v10 }
 0x47e   :  { %18114 = vmatprep.mubr.msk.bf16.mxu1 %vm273_vm3, %v5270_v42  ;;  %v5758_v42 = vor.u32 %v5757_v57, %v5754_v14  ;;  %v5786_v14 = vrot.slane %v5784_v63, 5  ;;  %v5789_v57 = vrot.slane %v4086_v21, 5  ;;  %v26596_v21 = vshrl.u32 %v21964_v45, 16 }
 0x47f   :  { %v5761_v19 = vor.u32 %v5760_v9, %v5759_v27  ;;  %v5774_v27 = vrot.slane %v5772_v40, 4  ;;  %v5777_v9 = vrot.slane %v5775_v7, 5  ;;  %v5801_v40 = vshrl.u32 %v22668_v48, 16 }
 0x480   :  { %v5804_v7 = vshll.u32 %v22668_v48, 16 }
 0x481   :  { %v5766_v12 = vsel %vm2201_vm8, %v5761_v19, %v22404_v59  ;;  %v5778_v0 = vor.u32 %v5777_v9, %v5774_v27 }
 0x482   :  { %v5806_v27 = vrot.slane %v5804_v7, 5 }
 0x485   :  { %18115 = vmatmul.mubr.msk.bf16.gmra.mrb[56].mxu1 %vm273_vm3, %v5272_v3  ;;  %v5762_v3 = vsel %vm2201_vm8, %v5758_v42, %v5761_v19  ;;  %v5787_v19 = vor.u32 %v5786_v14, %v5783_v30  ;;  %v5790_v42 = vor.u32 %v5789_v57, %v5788_v6  ;;  %v26599_v14 = vshll.u32 %v21994_v44, 16 }
 0x486   :  { %18118 = vmatprep.mubr.msk.bf16.mxu1 %vm273_vm3, %v5274_v41  ;;  %v5770_v41 = vsel %vm2201_vm8, %v22404_v59, %v5769_v51  ;;  %v5779_v59 = vsel %vm2201_vm8, %v5769_v51, %v5778_v0  ;;  %v5810_v51 = vshrl.u32 %v22526_v26, 16 }
 0x487   :  { %v5791_v49 = vsel %vm2201_vm8, %v5787_v19, %v5790_v42  ;;  %v5818_v57 = vrot.slane %v26599_v14, 5 }
 0x48d   :  { %18119 = vmatmul.mubr.msk.bf16.gmra.mrb[60].mxu1 %vm273_vm3, %v5276_v17  ;;  %v26595_v17 = vshll.u32 %v21962_v35, 16  ;;  %v5813_v35 = vshll.u32 %v22526_v26, 16  ;;  %v5803_v26 = vrot.slane %v5801_v40, 4 }
 0x48e   :  { %18126 = vmatprep.mubr.msk.bf16.mxu1 %vm273_vm3, %v5762_v3  ;;  %v26597_v3 = vshll.u32 %v21964_v45, 16 }
 0x48f   :  { %v5793_v1 = vrot.slane %v26595_v17, 5  ;;  %v5815_v6 = vrot.slane %v5813_v35, 5  ;;  %v5807_v0 = vor.u32 %v5806_v27, %v5803_v26  ;;  %v26601_v17 = vshll.u32 %v22024_v53, 16 }
 0x490   :  { %v5797_v10 = vrot.slane %v26597_v3, 5  ;;  %v26603_v3 = vshll.u32 %v22026_v61, 16 }
 0x491   :  { %v5794_v60 = vor.u32 %v5793_v1, %v5792_v13  ;;  %v26600_v13 = vshrl.u32 %v22024_v53, 16  ;;  %v5822_v1 = vrot.slane %v26601_v17, 5  ;;  %v5842_v53 = vshll.u32 %v22546_v39, 16 }
 0x493   :  { %v5795_v45 = vsel %vm2201_vm8, %v5790_v42, %v5794_v60 }
 0x495   :  { %18127 = vmatmul.mubr.msk.bf16.vlgmr.msra.gmra.mrb[0].mxu1 %vm273_vm3, %v5766_v12  ;;  %v5812_v12 = vrot.slane %v5810_v51, 4  ;;  %v5839_v51 = vshrl.u32 %v22546_v39, 16 }
 0x496   :  { %18191 = vmatpush3.bf16.msra.mxu1 %v22511_v4  ;;  %18130 = vmatprep.mubr.msk.bf16.mxu1 %vm273_vm3, %v5770_v41  ;;  %v5796_v4 = vrot.slane %v26596_v21, 4  ;;  %v26598_v41 = vshrl.u32 %v21994_v44, 16  ;;  %v26602_v21 = vshrl.u32 %v22026_v61, 16 }
 0x497   :  { %18192 = vmatprep.subr.bf16.mxu1 %v20300_v43  ;;  %v5816_v9 = vor.u32 %v5815_v6, %v5812_v12  ;;  %v5841_v12 = vrot.slane %v5839_v51, 4  ;;  %v5844_v6 = vrot.slane %v5842_v53, 5 }
 0x498   :  { %v5798_v63 = vor.u32 %v5797_v10, %v5796_v4  ;;  %v5817_v30 = vrot.slane %v26598_v41, 4  ;;  %v5825_v4 = vrot.slane %v26602_v21, 4  ;;  %v5826_v10 = vrot.slane %v26603_v3, 5  ;;  %v22720_v21 = vld [vmem:[#allocation2 + $0x98] sm:$0x1f] }
 0x499   :  { %v26605_v41 = vshll.u32 %v22057_v47, 16  ;;  %v5868_v3 = vshrl.u32 %v22562_v55, 16 }
 0x49a   :  { %18193 = vmatpush3.bf16.msra.mxu1 %v20300_v43  ;;  %v5799_v43 = vsel %vm2201_vm8, %v5794_v60, %v5798_v63  ;;  %v5819_v19 = vor.u32 %v5818_v57, %v5817_v30  ;;  %v5808_v42 = vsel %vm2201_vm8, %v5798_v63, %v5807_v0  ;;  %v5827_v63 = vor.u32 %v5826_v10, %v5825_v4 }
 0x49b   :  { %v5847_v30 = vrot.slane %v26605_v41, 5  ;;  %v5845_v57 = vor.u32 %v5844_v6, %v5841_v12  ;;  %v5870_v53 = vrot.slane %v5868_v3, 4 }
 0x49c   :  { %v5820_v44 = vsel %vm2201_vm8, %v5816_v9, %v5819_v19 }
 0x49d   :  { %18131 = vmatmul.mubr.msk.bf16.gmra.mrb[4].mxu1 %vm273_vm3, %v5779_v59  ;;  %v5821_v59 = vrot.slane %v26600_v13, 4 }
 0x49e   :  { %18134 = vmatprep.mubr.msk.bf16.mxu1 %vm273_vm3, %v5791_v49  ;;  %v22694_v49 = vld [vmem:[#allocation2 + $0x70] sm:$0x1f] }
 0x49f   :  { %v5823_v60 = vor.u32 %v5822_v1, %v5821_v59  ;;  %v5830_v35 = vshrl.u32 %v22694_v49, 16  ;;  %v5833_v40 = vshll.u32 %v22694_v49, 16  ;;  %v26608_v59 = vshrl.u32 %v22089_v8, 16 }
 0x4a0   :  { %v26609_v1 = vshll.u32 %v22089_v8, 16 }
 0x4a1   :  { %v5824_v7 = vsel %vm2201_vm8, %v5819_v19, %v5823_v60  ;;  %v5832_v39 = vrot.slane %v5830_v35, 4  ;;  %v5835_v14 = vrot.slane %v5833_v40, 5  ;;  %v26606_v19 = vshrl.u32 %v22087_v56, 16 }
 0x4a2   :  { %v5854_v17 = vrot.slane %v26608_v59, 4  ;;  %v26610_v40 = vshrl.u32 %v22120_v29, 16  ;;  %v5897_v59 = vshrl.u32 %v22576_v52, 16 }
 0x4a3   :  { %v5836_v27 = vor.u32 %v5835_v14, %v5832_v39  ;;  %v5850_v0 = vrot.slane %v26606_v19, 4 }
 0x4a5   :  { %18135 = vmatmul.mubr.msk.bf16.gmra.mrb[8].mxu1 %vm273_vm3, %v5795_v45  ;;  %v26604_v45 = vshrl.u32 %v22057_v47, 16  ;;  %v5837_v9 = vsel %vm2201_vm8, %v5827_v63, %v5836_v27  ;;  %v26614_v27 = vshrl.u32 %v22154_v28, 16 }
 0x4a6   :  { %18138 = vmatprep.mubr.msk.bf16.mxu1 %vm273_vm3, %v5799_v43  ;;  %v5828_v43 = vsel %vm2201_vm8, %v5823_v60, %v5827_v63  ;;  %v5859_v60 = vshrl.u32 %v22720_v21, 16  ;;  %v5862_v63 = vshll.u32 %v22720_v21, 16 }
 0x4a7   :  { %v5846_v61 = vrot.slane %v26604_v45, 4  ;;  %v26611_v45 = vshll.u32 %v22120_v29, 16  ;;  %v26615_v29 = vshll.u32 %v22154_v28, 16 }
 0x4a9   :  { %v5848_v26 = vor.u32 %v5847_v30, %v5846_v61  ;;  %v5876_v61 = vrot.slane %v26611_v45, 5  ;;  %v26612_v30 = vshrl.u32 %v22152_v33, 16  ;;  %v5884_v19 = vrot.slane %v26615_v29, 5 }
 0x4aa   :  { %v26622_v29 = vshrl.u32 %v22264_v24, 16 }
 0x4ab   :  { %v5849_v47 = vsel %vm2201_vm8, %v5845_v57, %v5848_v26  ;;  %v5879_v39 = vrot.slane %v26612_v30, 4  ;;  %v26613_v57 = vshll.u32 %v22152_v33, 16  ;;  %v5900_v33 = vshll.u32 %v22576_v52, 16  ;;  %v22772_v30 = vld [vmem:[#allocation2 + $0xe8] sm:$0x1f] }
 0x4ad   :  { %18139 = vmatmul.mubr.msk.bf16.gmra.mrb[12].mxu1 %vm273_vm3, %v5808_v42  ;;  %v26607_v42 = vshll.u32 %v22087_v56, 16  ;;  %v5871_v56 = vshll.u32 %v22562_v55, 16  ;;  %v5861_v55 = vrot.slane %v5859_v60, 4  ;;  %v5902_v3 = vrot.slane %v5900_v33, 5 }
 0x4ae   :  { %18142 = vmatprep.mubr.msk.bf16.mxu1 %vm273_vm3, %v5820_v44  ;;  %v5855_v44 = vrot.slane %v26609_v1, 5  ;;  %v26617_v60 = vshll.u32 %v22187_v38, 16 }
 0x4af   :  { %v5851_v13 = vrot.slane %v26607_v42, 5  ;;  %v5873_v35 = vrot.slane %v5871_v56, 5  ;;  %v22746_v42 = vld [vmem:[#allocation2 + $0xc0] sm:$0x1f] }
 0x4b0   :  { %v5856_v10 = vor.u32 %v5855_v44, %v5854_v17  ;;  %v5888_v17 = vshrl.u32 %v22746_v42, 16  ;;  %v5891_v1 = vshll.u32 %v22746_v42, 16 }
 0x4b1   :  { %v5852_v4 = vor.u32 %v5851_v13, %v5850_v0  ;;  %v5874_v12 = vor.u32 %v5873_v35, %v5870_v53 }
 0x4b2   :  { %v5890_v52 = vrot.slane %v5888_v17, 4 }
 0x4b3   :  { %v5853_v51 = vsel %vm2201_vm8, %v5848_v26, %v5852_v4  ;;  %v5857_v8 = vsel %vm2201_vm8, %v5852_v4, %v5856_v10  ;;  %v5880_v26 = vrot.slane %v26613_v57, 5  ;;  %v5899_v4 = vrot.slane %v5897_v59, 4 }
 0x4b4   :  { %v5926_v57 = vshrl.u32 %v22591_v22, 16 }
 0x4b5   :  { %18143 = vmatmul.mubr.msk.bf16.gmra.mrb[16].mxu1 %vm273_vm3, %v5824_v7  ;;  %v5875_v7 = vrot.slane %v26610_v40, 4  ;;  %v5881_v13 = vor.u32 %v5880_v26, %v5879_v39  ;;  %v5903_v53 = vor.u32 %v5902_v3, %v5899_v4  ;;  %v5917_v26 = vshrl.u32 %v22772_v30, 16 }
 0x4b6   :  { %18146 = vmatprep.mubr.msk.bf16.mxu1 %vm273_vm3, %v5828_v43  ;;  %v5864_v43 = vrot.slane %v5862_v63, 5  ;;  %v5905_v63 = vrot.slane %v26617_v60, 5  ;;  %v26624_v4 = vshrl.u32 %v22291_v2, 16  ;;  %v26626_v60 = vshrl.u32 %v22293_v36, 16 }
 0x4b7   :  { %v5877_v6 = vor.u32 %v5876_v61, %v5875_v7  ;;  %v26618_v7 = vshrl.u32 %v22229_v5, 16  ;;  %v26619_v61 = vshll.u32 %v22229_v5, 16  ;;  %v5929_v5 = vshll.u32 %v22591_v22, 16 }
 0x4b8   :  { %v5865_v41 = vor.u32 %v5864_v43, %v5861_v55  ;;  %v26620_v43 = vshrl.u32 %v22231_v25, 16  ;;  %v5919_v22 = vrot.slane %v5917_v26, 4  ;;  %v5937_v3 = vrot.slane %v26624_v4, 4  ;;  %v6449_v4 = vld [vmem:[#allocation2] sm:$0xe0] }
 0x4b9   :  { %v5878_v0 = vsel %vm2201_vm8, %v5874_v12, %v5877_v6  ;;  %v5882_v28 = vsel %vm2201_vm8, %v5877_v6, %v5881_v13  ;;  %v5908_v45 = vrot.slane %v26618_v7, 4  ;;  %v5909_v55 = vrot.slane %v26619_v61, 5 }
 0x4ba   :  { %v5866_v14 = vsel %vm2201_vm8, %v5856_v10, %v5865_v41  ;;  %v26616_v10 = vshrl.u32 %v22187_v38, 16  ;;  %v5912_v12 = vrot.slane %v26620_v43, 4  ;;  %v26621_v6 = vshll.u32 %v22231_v25, 16 }
 0x4bb   :  { %v5910_v39 = vor.u32 %v5909_v55, %v5908_v45  ;;  %v5933_v25 = vrot.slane %v26622_v29, 4  ;;  %v26628_v55 = vshrl.u32 %v22322_v34, 16  ;;  %v26631_v29 = vshll.u32 %v22338_v50, 16 }
 0x4bc   :  { %v5904_v56 = vrot.slane %v26616_v10, 4  ;;  %v5913_v41 = vrot.slane %v26621_v6, 5  ;;  %v26625_v10 = vshll.u32 %v22291_v2, 16  ;;  %v5958_v2 = vshll.u32 %v22606_v23, 16 }
 0x4bd   :  { %18147 = vmatmul.mubr.msk.bf16.gmra.mrb[20].mxu1 %vm273_vm3, %v5837_v9  ;;  %v5883_v9 = vrot.slane %v26614_v27, 4  ;;  %v5920_v27 = vshll.u32 %v22772_v30, 16  ;;  %v26629_v6 = vshll.u32 %v22322_v34, 16 }
 0x4be   :  { %18150 = vmatprep.mubr.msk.bf16.mxu1 %vm273_vm3, %v5849_v47 }
 0x4bf   :  { %v5885_v47 = vor.u32 %v5884_v19, %v5883_v9  ;;  %v5922_v33 = vrot.slane %v5920_v27, 5  ;;  %v26630_v27 = vshrl.u32 %v22338_v50, 16 }
 0x4c1   :  { %v5886_v44 = vsel %vm2201_vm8, %v5881_v13, %v5885_v47  ;;  %v5931_v13 = vrot.slane %v5929_v5, 5 }
 0x4c5   :  { %18151 = vmatmul.mubr.msk.bf16.gmra.mrb[24].mxu1 %vm273_vm3, %v5853_v51  ;;  %v5893_v51 = vrot.slane %v5891_v1, 5 }
 0x4c6   :  { %18154 = vmatprep.mubr.msk.bf16.mxu1 %vm273_vm3, %v5857_v8  ;;  %v5906_v8 = vor.u32 %v5905_v63, %v5904_v56  ;;  %v5938_v56 = vrot.slane %v26625_v10, 5  ;;  %v5941_v63 = vrot.slane %v26626_v60, 4  ;;  %v6474_v10 = vrot.slane %v22364_v46, 5 }
 0x4c7   :  { %v5894_v35 = vor.u32 %v5893_v51, %v5890_v52  ;;  %v26627_v52 = vshll.u32 %v22293_v36, 16  ;;  %v5962_v36 = vrot.slane %v26628_v55, 4  ;;  %v6476_v46 = vrot.slane %v22371_v58, 5 }
 0x4c8   :  { %v5907_v38 = vsel %vm2201_vm8, %v5903_v53, %v5906_v8  ;;  %v5911_v9 = vsel %vm2201_vm8, %v5906_v8, %v5910_v39  ;;  %v22798_v53 = vld [vmem:[#allocation2 + $0x110] sm:$0x1f]  ;;  %v5939_v8 = vor.u32 %v5938_v56, %v5937_v3  ;;  %v6473_v3 = vrot.slane %v6449_v4, 5 }
 0x4c9   :  { %v5895_v40 = vsel %vm2201_vm8, %v5885_v47, %v5894_v35  ;;  %v26623_v47 = vshll.u32 %v22264_v24, 16  ;;  %v5942_v51 = vrot.slane %v26627_v52, 5  ;;  %v5946_v7 = vshrl.u32 %v22798_v53, 16  ;;  %v20302_v52 = vld [vmem:[%s26305_s1 + $0xb8] sm:$0xff]  }
 0x4ca   :  { %v5949_v45 = vshll.u32 %v22798_v53, 16  ;;  %v6475_v60 = vsel %vm2924_vm9, %v6473_v3, %v6474_v10  ;;  %v6487_v55 = vrot.slane %v22409_v15, 5  ;;  %v6494_v15 = vrot.slane %v22536_v11, 5 }
 0x4cb   :  { %v5934_v59 = vrot.slane %v26623_v47, 5  ;;  %v5943_v35 = vor.u32 %v5942_v51, %v5941_v63  ;;  %v20301_v63 = vld [vmem:[%s26305_s1 + $0xb0] sm:$0xff]   ;;  %v6478_v51 = vrot.slane %v22374_v20, 5  ;;  %v6516_v3 = vrot.slane %v22746_v42, 5 }
 0x4cc   :  { %18258 = vmatprep.subr.bf16.mxu0 %v20301_v63  ;;  %v6455_v42 = vld [vmem:[#allocation2 + $0xf0] sm:$0xe0] }
 0x4cd   :  { %18155 = vmatmul.mubr.msk.bf16.gmra.mrb[28].mxu1 %vm273_vm3, %v5866_v14  ;;  %v5914_v14 = vor.u32 %v5913_v41, %v5912_v12  ;;  %v5935_v1 = vor.u32 %v5934_v59, %v5933_v25  ;;  %v5960_v12 = vrot.slane %v5958_v2, 5  ;;  %v5963_v41 = vrot.slane %v26629_v6, 5  ;;  %v22824_v59 = vld [vmem:[#allocation2 + $0x138] sm:$0x1f]  ;;  %18259 = vmatpush3.bf16.msra.mxu0 %v20301_v63  ;;  %v20447_v63 = vld [vmem:[#allocation2 + $0xe0] sm:$0xff] }
 0x4ce   :  { %18158 = vmatprep.mubr.msk.bf16.mxu1 %vm273_vm3, %v5878_v0  ;;  %v5928_v0 = vrot.slane %v5926_v57, 4  ;;  %v5967_v25 = vrot.slane %v26631_v29, 5  ;;  %v5978_v50 = vshll.u32 %v22824_v59, 16  ;;  %18260 = vmatprep.subr.bf16.mxu0 %v20302_v52 }
 0x4cf   :  { %v5915_v19 = vsel %vm2201_vm8, %v5910_v39, %v5914_v14  ;;  %v5940_v61 = vsel %vm2201_vm8, %v5935_v1, %v5939_v8  ;;  %v5951_v39 = vrot.slane %v5949_v45, 5  ;;  %v5964_v57 = vor.u32 %v5963_v41, %v5962_v36 }
 0x4d0   :  { %v5932_v17 = vor.u32 %v5931_v13, %v5928_v0  ;;  %v26633_v13 = vshll.u32 %v22340_v32, 16  ;;  %v6480_v45 = vrot.slane %v22636_v37, 5  ;;  %v6451_v37 = vld [vmem:[#allocation2 + $0x50] sm:$0xe0]  ;;  %v6496_v41 = vrot.slane %v22539_v16, 5  ;;  %v20440_v16 = vld [vmem:[#allocation2 + $0x88] sm:$0xff] }
 0x4d1   :  { %18261 = vmatpush3.bf16.msra.mxu0 %v20302_v52  ;;  %v6523_v52 = vrot.slane %v20447_v63, 5 }
 0x4d2   :  { %v5936_v24 = vsel %vm2201_vm8, %v5932_v17, %v5935_v1  ;;  %v5971_v47 = vrot.slane %v26633_v13, 5  ;;  %v5975_v17 = vshrl.u32 %v22824_v59, 16  ;;  %v6481_v58 = vsel %vm2924_vm9, %v6478_v51, %v6480_v45 }
 0x4d5   :  { %18159 = vmatmul.mubr.msk.bf16.gmra.mrb[32].mxu1 %vm273_vm3, %v5882_v28  ;;  %v5923_v28 = vor.u32 %v5922_v33, %v5919_v22 }
 0x4d6   :  { %18162 = vmatprep.mubr.msk.bf16.mxu1 %vm273_vm3, %v5886_v44 }
 0x4d7   :  { %v5924_v44 = vsel %vm2201_vm8, %v5914_v14, %v5923_v28 }
 0x4dd   :  { %18163 = vmatmul.mubr.msk.bf16.gmra.mrb[36].mxu1 %vm273_vm3, %v5895_v40  ;;  %v5955_v40 = vshrl.u32 %v22606_v23, 16  ;;  %v5948_v23 = vrot.slane %v5946_v7, 4  ;;  %v6483_v7 = vrot.slane %v22392_v62, 5 }
 0x4de   :  { %18166 = vmatprep.mubr.msk.bf16.mxu1 %vm273_vm3, %v5907_v38  ;;  %v5944_v38 = vsel %vm2201_vm8, %v5939_v8, %v5943_v35  ;;  %v6477_v8 = vsel %vm2924_vm9, %v6474_v10, %v6476_v46 }
 0x4df   :  { %v5957_v43 = vrot.slane %v5955_v40, 4  ;;  %v5952_v5 = vor.u32 %v5951_v39, %v5948_v23  ;;  %v6450_v40 = vld [vmem:[#allocation2 + $0x28] sm:$0xe0] }
 0x4e0   :  { %v6482_v2 = vrot.slane %v6450_v40, 5 }
 0x4e1   :  { %v5961_v14 = vor.u32 %v5960_v12, %v5957_v43  ;;  %v5953_v26 = vsel %vm2201_vm8, %v5943_v35, %v5952_v5  ;;  %v6479_v35 = vsel %vm2924_vm9, %v6476_v46, %v6478_v51  ;;  %v6492_v43 = vrot.slane %v22529_v54, 5 }
 0x4e2   :  { %v6484_v20 = vsel %vm2924_vm9, %v6482_v2, %v6483_v7  ;;  %v6489_v12 = vrot.slane %v22668_v48, 5  ;;  %v6497_v54 = vsel %vm2924_vm9, %v6494_v15, %v6496_v41  ;;  %v6452_v48 = vld [vmem:[#allocation2 + $0x78] sm:$0xe0]  ;;  %v6525_v2 = vrot.slane %v22772_v30, 5 }
 0x4e3   :  { %v5965_v34 = vsel %vm2201_vm8, %v5961_v14, %v5964_v57  ;;  %v6495_v23 = vsel %vm2924_vm9, %v6492_v43, %v6494_v15  ;;  %v6500_v39 = vrot.slane %v6452_v48, 5  ;;  %v6501_v14 = vrot.slane %v22549_v18, 5  ;;  %v6456_v30 = vld [vmem:[#allocation2 + $0x118] sm:$0xe0]  ;;  %v20452_v15 = vld [vmem:[#allocation2 + $0x128] sm:$0xff] }
 0x4e4   :  { %v6490_v6 = vsel %vm2924_vm9, %v6487_v55, %v6489_v12  ;;  %v6534_v12 = vrot.slane %v22798_v53, 5  ;;  %v6543_v53 = vrot.slane %v22824_v59, 5  ;;  %v22936_v59 = vld [vmem:[%s26307_s3 + $0x1] ss:$0 sm:$0xff] }
 0x4e5   :  { %18167 = vmatmul.mubr.msk.bf16.gmra.mrb[40].mxu1 %vm273_vm3, %v5911_v9  ;;  %v5966_v9 = vrot.slane %v26630_v27, 4  ;;  %v6502_v11 = vsel %vm2924_vm9, %v6500_v39, %v6501_v14  ;;  %v20441_v27 = vld [vmem:[#allocation2 + $0x90] sm:$0xff] }
 0x4e6   :  { %18170 = vmatprep.mubr.msk.bf16.mxu1 %vm273_vm3, %v5915_v19  ;;  %v26632_v19 = vshrl.u32 %v22340_v32, 16  ;;  %v5977_v32 = vrot.slane %v5975_v17, 4  ;;  %v20444_v17 = vld [vmem:[#allocation2 + $0xb8] sm:$0xff] }
 0x4e7   :  { %v5968_v22 = vor.u32 %v5967_v25, %v5966_v9  ;;  %v6505_v9 = vrot.slane %v20441_v27, 5 }
 0x4e8   :  { %v5970_v0 = vrot.slane %v26632_v19, 4 }
 0x4e9   :  { %v5969_v1 = vsel %vm2201_vm8, %v5964_v57, %v5968_v22  ;;  %v6498_v57 = vrot.slane %v22694_v49, 5  ;;  %v6453_v49 = vld [vmem:[#allocation2 + $0xa0] sm:$0xe0] }
 0x4ea   :  { %v5972_v33 = vor.u32 %v5971_v47, %v5970_v0  ;;  %v6509_v25 = vrot.slane %v6453_v49, 5  ;;  %v6507_v0 = vrot.slane %v22720_v21, 5  ;;  %v6454_v21 = vld [vmem:[#allocation2 + $0xc8] sm:$0xe0] }
 0x4eb   :  { %v6499_v5 = vsel %vm2924_vm9, %v6496_v41, %v6498_v57  ;;  %v6539_v41 = vrot.slane %v20452_v15, 5  ;;  %v22925_v57 = vld [vmem:[%s26305_s1 + $0xa0] sm:$0xff]  }
 0x4ec   :  { %v5973_v28 = vsel %vm2201_vm8, %v5968_v22, %v5972_v33  ;;  %v6508_v13 = vsel %vm2924_vm9, %v6505_v9, %v6507_v0  ;;  %v20443_v22 = vld [vmem:[#allocation2 + $0xb0] sm:$0xff]  ;;  %18326 = vmatprep.subr.bf16.mxu0 %v22925_v57 }
 0x4ed   :  { %18171 = vmatmul.mubr.msk.bf16.gmra.mrb[44].mxu1 %vm273_vm3, %v5924_v44  ;;  %v5980_v44 = vrot.slane %v5978_v50, 5  ;;  %v6514_v50 = vrot.slane %v20444_v17, 5 }
 0x4ee   :  { %18174 = vmatprep.mubr.msk.bf16.mxu1 %vm273_vm3, %v5936_v24 }
 0x4ef   :  { %v5981_v56 = vor.u32 %v5980_v44, %v5977_v32  ;;  %v6518_v32 = vrot.slane %v6454_v21, 5  ;;  %v20445_v44 = vld [vmem:[#allocation2 + $0xd0] sm:$0xff]  ;;  %v6517_v10 = vsel %vm2924_vm9, %v6514_v50, %v6516_v3 }
 0x4f0   :  { %v6519_v4 = vrot.slane %v20445_v44, 5 }
 0x4f1   :  { %v5982_v24 = vsel %vm2201_vm8, %v5972_v33, %v5981_v56  ;;  %v6512_v33 = vrot.slane %v20443_v22, 5 }
 0x4f2   :  { %v6520_v56 = vsel %vm2924_vm9, %v6518_v32, %v6519_v4 }
 0x4f5   :  { %18175 = vmatmul.mubr.msk.bf16.gmra.mrb[48].mxu1 %vm273_vm3, %v5940_v61  ;;  %v6485_v61 = vrot.slane %v22406_v31, 5 }
 0x4f6   :  { %18178 = vmatprep.mubr.msk.bf16.mxu1 %vm273_vm3, %v5944_v38  ;;  %v6491_v38 = vrot.slane %v6451_v37, 5  ;;  %v6536_v37 = vrot.slane %v6456_v30, 5  ;;  %v20458_v30 = vld [vmem:[%s26304_s0 + $0x30] sm:$0xff] }
 0x4f7   :  { %v6486_v36 = vsel %vm2924_vm9, %v6483_v7, %v6485_v61  ;;  %v6488_v62 = vsel %vm2924_vm9, %v6485_v61, %v6487_v55  ;;  %v6526_v7 = vsel %vm2924_vm9, %v6523_v52, %v6525_v2  ;;  %v20450_v61 = vld [vmem:[#allocation2 + $0x108] sm:$0xff] }
 0x4f8   :  { %v6493_v31 = vsel %vm2924_vm9, %v6491_v38, %v6492_v43  ;;  %v6532_v55 = vrot.slane %v20450_v61, 5  ;;  %v20451_v38 = vld [vmem:[#allocation2 + $0x120] sm:$0xff] }
 0x4f9   :  { %v6537_v43 = vrot.slane %v20451_v38, 5  ;;  %v20459_v38 = vld [vmem:[%s26304_s0 + $0x38] sm:$0xff] }
 0x4fb   :  { %v6540_v48 = vsel %vm2924_vm9, %v6537_v43, %v6539_v41 }
 0x4fd   :  { %18179 = vmatmul.mubr.msk.bf16.gmra.mrb[52].mxu1 %vm273_vm3, %v5953_v26  ;;  %v6503_v26 = vrot.slane %v20440_v16, 5 }
 0x4fe   :  { %18182 = vmatprep.mubr.msk.bf16.mxu1 %vm273_vm3, %v5965_v34  ;;  %v20442_v34 = vld [vmem:[#allocation2 + $0xa8] sm:$0xff] }
 0x4ff   :  { %v6504_v29 = vsel %vm2924_vm9, %v6501_v14, %v6503_v26  ;;  %v6506_v18 = vsel %vm2924_vm9, %v6503_v26, %v6505_v9  ;;  %v6510_v19 = vrot.slane %v20442_v34, 5 }
 0x501   :  { %v6511_v47 = vsel %vm2924_vm9, %v6509_v25, %v6510_v19 }
 0x505   :  { %18183 = vmatmul.mubr.msk.bf16.gmra.mrb[56].mxu1 %vm273_vm3, %v5969_v1  ;;  %v6513_v1 = vsel %vm2924_vm9, %v6510_v19, %v6512_v33 }
 0x506   :  { %18186 = vmatprep.mubr.msk.bf16.mxu1 %vm273_vm3, %v5973_v28  ;;  %v6515_v28 = vsel %vm2924_vm9, %v6512_v33, %v6514_v50  ;;  %v20454_v50 = vld [vmem:[%s26304_s0 + $0x10] sm:$0xff] }
 0x50d   :  { %18187 = vmatmul.mubr.msk.bf16.gmra.mrb[60].mxu1 %vm273_vm3, %v5982_v24  ;;  %v20446_v24 = vld [vmem:[#allocation2 + $0xd8] sm:$0xff] }
 0x50e   :  { %18194 = vmatprep.mubr.msk.bf16.mxu1 %vm273_vm3, %v6475_v60  ;;  %v6521_v60 = vrot.slane %v20446_v24, 5 }
 0x510   :  { %v6522_v46 = vsel %vm2924_vm9, %v6519_v4, %v6521_v60  ;;  %v6524_v51 = vsel %vm2924_vm9, %v6521_v60, %v6523_v52  ;;  %v20456_v4 = vld [vmem:[%s26304_s0] sm:$0xff] }
 0x515   :  { %18195 = vmatmul.mubr.msk.bf16.vlgmr.msra.gmra.mrb[0].mxu1 %vm273_vm3, %v6477_v8  ;;  %v6527_v8 = vrot.slane %v6455_v42, 5 }
 0x516   :  { %18198 = vmatprep.mubr.msk.bf16.mxu1 %vm273_vm3, %v6479_v35  ;;  %v20448_v35 = vld [vmem:[#allocation2 + $0xf8] sm:$0xff] }
 0x517   :  { %v6528_v40 = vrot.slane %v20448_v35, 5 }
 0x519   :  { %v6529_v45 = vsel %vm2924_vm9, %v6527_v8, %v6528_v40 }
 0x51d   :  { %18199 = vmatmul.mubr.msk.bf16.gmra.mrb[4].mxu1 %vm273_vm3, %v6481_v58  ;;  %v20449_v58 = vld [vmem:[#allocation2 + $0x100] sm:$0xff] }
 0x51e   :  { %18202 = vmatprep.mubr.msk.bf16.mxu1 %vm273_vm3, %v6484_v20  ;;  %v6530_v20 = vrot.slane %v20449_v58, 5 }
 0x525   :  { %18203 = vmatmul.mubr.msk.bf16.gmra.mrb[8].mxu1 %vm273_vm3, %v6486_v36  ;;  %v6531_v36 = vsel %vm2924_vm9, %v6528_v40, %v6530_v20 }
 0x526   :  { %18206 = vmatprep.mubr.msk.bf16.mxu1 %vm273_vm3, %v6488_v62  ;;  %v6533_v62 = vsel %vm2924_vm9, %v6530_v20, %v6532_v55 }
 0x52d   :  { %18207 = vmatmul.mubr.msk.bf16.gmra.mrb[12].mxu1 %vm273_vm3, %v6490_v6  ;;  %v6535_v6 = vsel %vm2924_vm9, %v6532_v55, %v6534_v12 }
 0x52e   :  { %18210 = vmatprep.mubr.msk.bf16.mxu1 %vm273_vm3, %v6493_v31  ;;  %v6538_v31 = vsel %vm2924_vm9, %v6536_v37, %v6537_v43 }
 0x535   :  { %18211 = vmatmul.mubr.msk.bf16.gmra.mrb[16].mxu1 %vm273_vm3, %v6495_v23  ;;  %v20453_v23 = vld [vmem:[#allocation2 + $0x130] sm:$0xff] }
 0x536   :  { %18214 = vmatprep.mubr.msk.bf16.mxu1 %vm273_vm3, %v6497_v54  ;;  %v6541_v54 = vrot.slane %v20453_v23, 5 }
 0x538   :  { %v6542_v39 = vsel %vm2924_vm9, %v6539_v41, %v6541_v54  ;;  %v6544_v14 = vsel %vm2924_vm9, %v6541_v54, %v6543_v53  ;;  %v20461_v41 = vld [vmem:[%s26304_s0 + $0x28] sm:$0xff] }
 0x53d   :  { %18215 = vmatmul.mubr.msk.bf16.gmra.mrb[20].mxu1 %vm273_vm3, %v6499_v5  ;;  %v22931_v5 = vld [vmem:[%s26306_s2 + $0x1] ss:$0 sm:$0xff] }
 0x53e   :  { %18218 = vmatprep.mubr.msk.bf16.mxu1 %vm273_vm3, %v6502_v11 }
 0x545   :  { %18219 = vmatmul.mubr.msk.bf16.gmra.mrb[24].mxu1 %vm273_vm3, %v6504_v29 }
 0x546   :  { %18222 = vmatprep.mubr.msk.bf16.mxu1 %vm273_vm3, %v6506_v18 }
 0x54d   :  { %18223 = vmatmul.mubr.msk.bf16.gmra.mrb[28].mxu1 %vm273_vm3, %v6508_v13 }
 0x54e   :  { %18226 = vmatprep.mubr.msk.bf16.mxu1 %vm273_vm3, %v6511_v47 }
 0x555   :  { %18227 = vmatmul.mubr.msk.bf16.gmra.mrb[32].mxu1 %vm273_vm3, %v6513_v1 }
 0x556   :  { %18230 = vmatprep.mubr.msk.bf16.mxu1 %vm273_vm3, %v6515_v28  ;;  %v20455_v28 = vld [vmem:[%s26304_s0 + $0x18] sm:$0xff] }
 0x55d   :  { %18231 = vmatmul.mubr.msk.bf16.gmra.mrb[36].mxu1 %vm273_vm3, %v6517_v10  ;;  %v20457_v10 = vld [vmem:[%s26304_s0 + $0x8] sm:$0xff] }
 0x55e   :  { %18234 = vmatprep.mubr.msk.bf16.mxu1 %vm273_vm3, %v6520_v56 }
 0x565   :  { %18235 = vmatmul.mubr.msk.bf16.gmra.mrb[40].mxu1 %vm273_vm3, %v6522_v46 }
 0x566   :  { %18238 = vmatprep.mubr.msk.bf16.mxu1 %vm273_vm3, %v6524_v51 }
 0x56d   :  { %18239 = vmatmul.mubr.msk.bf16.gmra.mrb[44].mxu1 %vm273_vm3, %v6526_v7 }
 0x56e   :  { %18242 = vmatprep.mubr.msk.bf16.mxu1 %vm273_vm3, %v6529_v45 }
 0x575   :  { %18243 = vmatmul.mubr.msk.bf16.gmra.mrb[48].mxu1 %vm273_vm3, %v6531_v36 }
 0x576   :  { %18246 = vmatprep.mubr.msk.bf16.mxu1 %vm273_vm3, %v6533_v62 }
 0x57d   :  { %18247 = vmatmul.mubr.msk.bf16.gmra.mrb[52].mxu1 %vm273_vm3, %v6535_v6 }
 0x57e   :  { %18250 = vmatprep.mubr.msk.bf16.mxu1 %vm273_vm3, %v6538_v31  ;;  %v20460_v31 = vld [vmem:[%s26304_s0 + $0x20] sm:$0xff] }
 0x585   :  { %18251 = vmatmul.mubr.msk.bf16.gmra.mrb[56].mxu1 %vm273_vm3, %v6540_v48 }
 0x586   :  { %18254 = vmatprep.mubr.msk.bf16.mxu1 %vm273_vm3, %v6542_v39 }
 0x58d   :  { %18255 = vmatmul.mubr.msk.bf16.gmra.mrb[60].mxu1 %vm273_vm3, %v6544_v14 }
 0x5e8   :  { %v18196_v11 = vpop.f32.mrb[0].mxu1 }
 0x5e9   :  { %v7018_v16 = vmul.f32 %v18196_v11, %v22931_v5  ;;  %v6692_v26 = vpop.f32.mrb[1].mxu1 }
 0x5ea   :  { %v7016_v27 = vmul.f32 %v22931_v5, %v6692_v26  ;;  %v18197_v9 = vpop.f32.mrb[2].mxu1 }
 0x5eb   :  { %v7087_v29 = vadd.f32 %v22936_v59, %v7018_v16  ;;  %v7019_v18 = vmul.f32 %v18197_v9, %v22931_v5  ;;  %v6695_v49 = vpop.f32.mrb[3].mxu1 }
 0x5ec   :  { %v7085_v25 = vadd.f32 %v22936_v59, %v7016_v27  ;;  %v7017_v34 = vmul.f32 %v22931_v5, %v6695_v49 }
 0x5ed   :  { %v7151_v19 = vmax.f32 %v7087_v29, 0.0  ;;  %v7088_v0 = vadd.f32 %v22936_v59, %v7019_v18 }
 0x5ee   :  { %v7149_v13 = vmax.f32 %v7085_v25, 0.0  ;;  %v7086_v47 = vadd.f32 %v22936_v59, %v7017_v34 }
 0x5ef   :  { %v7152_v22 = vmax.f32 %v7088_v0, 0.0  ;;  %v22949_v1 = vadd.f32 %v20454_v50, %v7151_v19  ;;  %v20462_v19 = vld [vmem:[%s26304_s0 + $0x50] sm:$0xff] }
 0x5f0   :  { %v7150_v33 = vmax.f32 %v7086_v47, 0.0  ;;  %v18200_v17 = vpop.f32.mrb[4].mxu1  ;;  %v22960_v3 = vadd.f32 %v20456_v4, %v7149_v13  ;;  %v20464_v4 = vld [vmem:[%s26304_s0 + $0x58] sm:$0xff] }
 0x5f1   :  { %v22954_v21 = vadd.f32 %v20455_v28, %v7152_v22  ;;  %v7022_v32 = vmul.f32 %v18200_v17, %v22931_v5  ;;  %v6708_v44 = vpop.f32.mrb[5].mxu1  ;;  %v20463_v17 = vld [vmem:[%s26304_s0 + $0x40] sm:$0xff] }
 0x5f2   :  { %26634 = vst [vmem:[#allocation6_spill] sm:$0xff] %v22960_v3  ;;  %v22965_v56 = vadd.f32 %v20457_v10, %v7150_v33  ;;  %v7020_v24 = vmul.f32 %v22931_v5, %v6708_v44  ;;  %v18201_v60 = vpop.f32.mrb[6].mxu1 }
 0x5f3   :  { %v7278_v63 = vpack.c.bf16 %v22954_v21, %v22949_v1  ;;  %v7091_v52 = vadd.f32 %v22936_v59, %v7022_v32  ;;  %v7023_v46 = vmul.f32 %v18201_v60, %v22931_v5  ;;  %v6711_v51 = vpop.f32.mrb[7].mxu1 }
 0x5f4   :  { %26635 = vst [vmem:[#allocation7_spill] sm:$0xff] %v22965_v56  ;;  %v7277_v42 = vpack.c.bf16 %v22965_v56, %v22960_v3  ;;  %v7089_v8 = vadd.f32 %v22936_v59, %v7020_v24  ;;  %v7021_v35 = vmul.f32 %v22931_v5, %v6711_v51 }
 0x5f5   :  { %v7342_v40 = vrot.slane %v7278_v63, 4  ;;  %v7155_v2 = vmax.f32 %v7091_v52, 0.0  ;;  %v7092_v7 = vadd.f32 %v22936_v59, %v7023_v46  ;;  %v20465_v46 = vld [vmem:[%s26304_s0 + $0x48] sm:$0xff] }
 0x5f6   :  { %v7341_v45 = vrot.slane %v7277_v42, 4  ;;  %v7153_v58 = vmax.f32 %v7089_v8, 0.0  ;;  %v7090_v20 = vadd.f32 %v22936_v59, %v7021_v35 }
 0x5f7   :  { %v7156_v61 = vmax.f32 %v7092_v7, 0.0  ;;  %v22984_v37 = vadd.f32 %v20458_v30, %v7155_v2 }
 0x5f8   :  { %v7343_v55 = vsel %vm174_vm2, %v7341_v45, %v7342_v40  ;;  %7437 = vst.msk [vmem:[#allocation2] sm:$0xf0] %vm271_vm1, %v7341_v45  ;;  %v7154_v36 = vmax.f32 %v7090_v20, 0.0  ;;  %v18204_v62 = vpop.f32.mrb[8].mxu1  ;;  %v22995_v15 = vadd.f32 %v20460_v31, %v7153_v58 }
 0x5f9   :  { %7438 = vst.msk [vmem:[#allocation2 + $0x8] sm:$0xff] %vm273_vm3, %v7343_v55  ;;  %26636 = vst [vmem:[#allocation8_spill] sm:$0xff] %v22984_v37  ;;  %v22989_v43 = vadd.f32 %v20459_v38, %v7156_v61  ;;  %v7026_v12 = vmul.f32 %v18204_v62, %v22931_v5  ;;  %v6724_v6 = vpop.f32.mrb[9].mxu1 }
 0x5fa   :  { %26638 = vst [vmem:[#allocation10_spill] sm:$0xff] %v22995_v15  ;;  %v23000_v23 = vadd.f32 %v20461_v41, %v7154_v36  ;;  %v7024_v54 = vmul.f32 %v22931_v5, %v6724_v6  ;;  %v18205_v48 = vpop.f32.mrb[10].mxu1 }
 0x5fb   :  { %26637 = vst [vmem:[#allocation9_spill] sm:$0xff] %v22989_v43  ;;  %v7280_v39 = vpack.c.bf16 %v22989_v43, %v22984_v37  ;;  %v7095_v53 = vadd.f32 %v22936_v59, %v7026_v12  ;;  %v7027_v14 = vmul.f32 %v18205_v48, %v22931_v5  ;;  %v6727_v11 = vpop.f32.mrb[11].mxu1 }
 0x5fc   :  { %26639 = vst [vmem:[#allocation11_spill] sm:$0xff] %v23000_v23  ;;  %v7279_v16 = vpack.c.bf16 %v23000_v23, %v22995_v15  ;;  %v7093_v26 = vadd.f32 %v22936_v59, %v7024_v54  ;;  %v7025_v27 = vmul.f32 %v22931_v5, %v6727_v11 }
 0x5fd   :  { %v7346_v9 = vrot.slane %v7280_v39, 4  ;;  %v7159_v29 = vmax.f32 %v7095_v53, 0.0  ;;  %v7096_v18 = vadd.f32 %v22936_v59, %v7027_v14  ;;  %v20466_v53 = vld [vmem:[%s26304_s0 + $0x70] sm:$0xff] }
 0x5fe   :  { %v7344_v49 = vrot.slane %v7279_v16, 4  ;;  %v7157_v25 = vmax.f32 %v7093_v26, 0.0  ;;  %v7094_v34 = vadd.f32 %v22936_v59, %v7025_v27 }
 0x5ff   :  { %7441 = vst.msk [vmem:[#allocation2 + $0x20] sm:$0xf] %vm277_vm4, %v7346_v9  ;;  %v23017_v0 = vadd.f32 %v20462_v19, %v7159_v29  ;;  %v7160_v13 = vmax.f32 %v7096_v18, 0.0  ;;  %v7477_v47 = vld [vmem:[#allocation2] sm:$0xf8] }
 0x600   :  { %v7345_v22 = vsel %vm174_vm2, %v7342_v40, %v7344_v49  ;;  %v7347_v33 = vsel %vm174_vm2, %v7344_v49, %v7346_v9  ;;  %v23024_v50 = vadd.f32 %v20463_v17, %v7157_v25  ;;  %v7158_v28 = vmax.f32 %v7094_v34, 0.0  ;;  %v18208_v32 = vpop.f32.mrb[12].mxu1  ;;  %v23026_v44 = vld [vmem:[#allocation2 + $0x8] sm:$0xff]  ;;  %v20467_v9 = vld [vmem:[%s26304_s0 + $0x60] sm:$0xff] }
 0x601   :  { %26640 = vst [vmem:[#allocation12_spill] sm:$0xff] %v23017_v0  ;;  %7439 = vst.msk [vmem:[#allocation2 + $0x10] sm:$0xff] %vm273_vm3, %v7345_v22  ;;  %v23033_v10 = vadd.f32 %v20464_v4, %v7160_v13  ;;  %v7030_v24 = vmul.f32 %v18208_v32, %v22931_v5  ;;  %v6740_v60 = vpop.f32.mrb[13].mxu1  ;;  %v7643_v63 = vshrl.u32 %v7477_v47, 16  ;;  %v7646_v52 = vshll.u32 %v7477_v47, 16  ;;  %v20468_v13 = vld [vmem:[%s26304_s0 + $0x78] sm:$0xff] }
 0x602   :  { %26641 = vst [vmem:[#allocation13_spill] sm:$0xff] %v23024_v50  ;;  %7440 = vst.msk [vmem:[#allocation2 + $0x18] sm:$0xff] %vm273_vm3, %v7347_v33  ;;  %v23039_v51 = vadd.f32 %v20465_v46, %v7158_v28  ;;  %v7028_v42 = vmul.f32 %v22931_v5, %v6740_v60  ;;  %v18209_v8 = vpop.f32.mrb[14].mxu1  ;;  %v26407_v35 = vshrl.u32 %v23026_v44, 16  ;;  %v26406_v40 = vshll.u32 %v23026_v44, 16  ;;  %v20469_v32 = vld [vmem:[%s26304_s0 + $0x68] sm:$0xff] }
 0x603   :  { %26642 = vst [vmem:[#allocation14_spill] sm:$0xff] %v23033_v10  ;;  %v7282_v2 = vpack.c.bf16 %v23033_v10, %v23017_v0  ;;  %v7099_v7 = vadd.f32 %v22936_v59, %v7030_v24  ;;  %v7031_v45 = vmul.f32 %v18209_v8, %v22931_v5  ;;  %v6743_v58 = vpop.f32.mrb[15].mxu1  ;;  %v7645_v20 = vrot.slane %v7643_v63, 3 }
 0x604   :  { %26643 = vst [vmem:[#allocation15_spill] sm:$0xff] %v23039_v51  ;;  %v7281_v61 = vpack.c.bf16 %v23039_v51, %v23024_v50  ;;  %v7097_v55 = vadd.f32 %v22936_v59, %v7028_v42  ;;  %v7029_v36 = vmul.f32 %v22931_v5, %v6743_v58  ;;  %v7648_v62 = vrot.slane %v7646_v52, 4 }
 0x605   :  { %v7349_v30 = vrot.slane %v7282_v2, 4  ;;  %v7163_v38 = vmax.f32 %v7099_v7, 0.0  ;;  %v7100_v12 = vadd.f32 %v22936_v59, %v7031_v45  ;;  %v7653_v6 = vrot.slane %v26407_v35, 3 }
 0x606   :  { %v7348_v31 = vrot.slane %v7281_v61, 4  ;;  %v7161_v41 = vmax.f32 %v7097_v55, 0.0  ;;  %v7098_v54 = vadd.f32 %v22936_v59, %v7029_v36  ;;  %v7649_v48 = vor.u32 %v7648_v62, %v7645_v20  ;;  %v23056_v39 = vld [vmem:[#allocation2 + $0x20] sm:$0xf] }
 0x607   :  { %v23061_v14 = vadd.f32 %v20466_v53, %v7163_v38  ;;  %v7164_v11 = vmax.f32 %v7100_v12, 0.0  ;;  %v7656_v16 = vrot.slane %v26406_v40, 4  ;;  %v7678_v26 = vshrl.u32 %v23056_v39, 16 }
 0x608   :  { %v7350_v27 = vsel %vm174_vm2, %v7348_v31, %v7349_v30  ;;  %7442 = vst.msk [vmem:[#allocation2 + $0x28] sm:$0xf0] %vm271_vm1, %v7348_v31  ;;  %v23071_v29 = vadd.f32 %v20467_v9, %v7161_v41  ;;  %v7162_v18 = vmax.f32 %v7098_v54, 0.0  ;;  %v18212_v49 = vpop.f32.mrb[16].mxu1  ;;  %v23073_v25 = vld [vmem:[#allocation2 + $0x10] sm:$0xff]  ;;  %v7681_v19 = vshll.u32 %v23056_v39, 16 }
 0x609   :  { %26644 = vst [vmem:[#allocation16_spill] sm:$0xff] %v23061_v14  ;;  %v23075_v34 = vld [vmem:[#allocation2 + $0x18] sm:$0xff]  ;;  %7443 = vst.msk [vmem:[#allocation2 + $0x30] sm:$0xff] %vm273_vm3, %v7350_v27  ;;  %v23082_v47 = vadd.f32 %v20468_v13, %v7164_v11  ;;  %v7034_v22 = vmul.f32 %v18212_v49, %v22931_v5  ;;  %v7657_v33 = vor.u32 %v7656_v16, %v7653_v6  ;;  %v6756_v17 = vpop.f32.mrb[17].mxu1  ;;  %v26405_v28 = vshrl.u32 %v23073_v25, 16  ;;  %v20470_v54 = vld [vmem:[%s26304_s0 + $0x90] sm:$0xff] }
 0x60a   :  { %26645 = vst [vmem:[#allocation17_spill] sm:$0xff] %v23071_v29  ;;  %v23089_v4 = vadd.f32 %v20469_v32, %v7162_v18  ;;  %v7032_v24 = vmul.f32 %v22931_v5, %v6756_v17  ;;  %v18213_v60 = vpop.f32.mrb[18].mxu1  ;;  %v26404_v63 = vshll.u32 %v23073_v25, 16  ;;  %v26403_v52 = vshrl.u32 %v23075_v34, 16  ;;  %v20471_v18 = vld [vmem:[%s26304_s0 + $0x80] sm:$0xff]  ;;  %v20304_v17 = vld [vmem:[%s26305_s1 + $0xa8] sm:$0xff]  }
 0x60b   :  { %26646 = vst [vmem:[#allocation18_spill] sm:$0xff] %v23082_v47  ;;  %v7284_v46 = vpack.c.bf16 %v23082_v47, %v23061_v14  ;;  %v7103_v42 = vadd.f32 %v22936_v59, %v7034_v22  ;;  %v7658_v8 = vsel %vm479_vm5, %v7649_v48, %v7657_v33  ;;  %v7035_v2 = vmul.f32 %v18213_v60, %v22931_v5  ;;  %v6759_v7 = vpop.f32.mrb[19].mxu1 }
 0x60c   :  { %26647 = vst [vmem:[#allocation19_spill] sm:$0xff] %v23089_v4  ;;  %v7283_v45 = vpack.c.bf16 %v23089_v4, %v23071_v29  ;;  %18262 = vmatprep.mubr.msk.bf16.mxu0 %vm273_vm3, %v7658_v8  ;;  %v7101_v58 = vadd.f32 %v22936_v59, %v7032_v24  ;;  %v7033_v20 = vmul.f32 %v22931_v5, %v6759_v7  ;;  %v7662_v61 = vrot.slane %v26405_v28, 3  ;;  %v20473_v8 = vld [vmem:[%s26304_s0 + $0x88] sm:$0xff] }
 0x60d   :  { %v7353_v55 = vrot.slane %v7284_v46, 4  ;;  %v7167_v36 = vmax.f32 %v7103_v42, 0.0  ;;  %v7104_v62 = vadd.f32 %v22936_v59, %v7035_v2  ;;  %v7665_v38 = vrot.slane %v26404_v63, 4 }
 0x60e   :  { %v7351_v12 = vrot.slane %v7283_v45, 4  ;;  %v7165_v6 = vmax.f32 %v7101_v58, 0.0  ;;  %v7102_v31 = vadd.f32 %v22936_v59, %v7033_v20  ;;  %v7671_v41 = vrot.slane %v26403_v52, 3 }
 0x60f   :  { %7446 = vst.msk [vmem:[#allocation2 + $0x48] sm:$0xf] %vm277_vm4, %v7353_v55  ;;  %v23116_v48 = vadd.f32 %v20470_v54, %v7167_v36  ;;  %v7168_v53 = vmax.f32 %v7104_v62, 0.0  ;;  %v7666_v11 = vor.u32 %v7665_v38, %v7662_v61  ;;  %v26402_v16 = vshll.u32 %v23075_v34, 16 }
 0x610   :  { %v7352_v27 = vsel %vm174_vm2, %v7349_v30, %v7351_v12  ;;  %v7354_v9 = vsel %vm174_vm2, %v7351_v12, %v7353_v55  ;;  %v23124_v49 = vadd.f32 %v20471_v18, %v7165_v6  ;;  %v7166_v13 = vmax.f32 %v7102_v31, 0.0  ;;  %v18216_v22 = vpop.f32.mrb[20].mxu1  ;;  %v20472_v30 = vld [vmem:[%s26304_s0 + $0x98] sm:$0xff] }
 0x611   :  { %26648 = vst [vmem:[#allocation20_spill] sm:$0xff] %v23116_v48  ;;  %7444 = vst.msk [vmem:[#allocation2 + $0x38] sm:$0xff] %vm273_vm3, %v7352_v27  ;;  %v23134_v32 = vadd.f32 %v20472_v30, %v7168_v53  ;;  %v7038_v24 = vmul.f32 %v18216_v22, %v22931_v5  ;;  %v7667_v60 = vsel %vm479_vm5, %v7657_v33, %v7666_v11  ;;  %v6772_v46 = vpop.f32.mrb[21].mxu1  ;;  %v7674_v42 = vrot.slane %v26402_v16, 4 }
 0x612   :  { %26649 = vst [vmem:[#allocation21_spill] sm:$0xff] %v23124_v49  ;;  %7445 = vst.msk [vmem:[#allocation2 + $0x40] sm:$0xff] %vm273_vm3, %v7354_v9  ;;  %v23143_v2 = vadd.f32 %v20473_v8, %v7166_v13  ;;  %18263 = vmatmul.mubr.msk.bf16.vlgmr.msra.gmra.mrb[64].mxu0 %vm273_vm3, %v7667_v60  ;;  %v7036_v7 = vmul.f32 %v22931_v5, %v6772_v46  ;;  %v18217_v45 = vpop.f32.mrb[22].mxu1  ;;  %v7680_v58 = vrot.slane %v7678_v26, 3  ;;  %v7683_v20 = vrot.slane %v7681_v19, 4  ;;  %v20474_v13 = vld [vmem:[%s26304_s0 + $0xb0] sm:$0xff] }
 0x613   :  { %26650 = vst [vmem:[#allocation22_spill] sm:$0xff] %v23134_v32  ;;  %v7286_v33 = vpack.c.bf16 %v23134_v32, %v23116_v48  ;;  %v7107_v61 = vadd.f32 %v22936_v59, %v7038_v24  ;;  %18327 = vmatpush3.bf16.msra.mxu0 %v22925_v57  ;;  %v7675_v55 = vor.u32 %v7674_v42, %v7671_v41  ;;  %v6775_v62 = vpop.f32.mrb[23].mxu1  ;;  %v7482_v19 = vld [vmem:[#allocation2 + $0x28] sm:$0xf8]  ;;  %v23162_v41 = vld [vmem:[#allocation2 + $0x30] sm:$0xff]  ;;  %v20305_v60 = vld [vmem:[%s26305_s1 + $0xc0] sm:$0xff]  }
 0x614   :  { %26651 = vst [vmem:[#allocation23_spill] sm:$0xff] %v23143_v2  ;;  %v7039_v36 = vmul.f32 %v18217_v45, %v22931_v5  ;;  %v7285_v38 = vpack.c.bf16 %v23143_v2, %v23124_v49  ;;  %v7105_v12 = vadd.f32 %v22936_v59, %v7036_v7  ;;  %v7037_v39 = vmul.f32 %v22931_v5, %v6775_v62  ;;  %v20475_v42 = vld [vmem:[%s26304_s0 + $0xa0] sm:$0xff]  ;;  %v20477_v62 = vld [vmem:[%s26304_s0 + $0xa8] sm:$0xff] }
 0x615   :  { %v7684_v26 = vor.u32 %v7683_v20, %v7680_v58  ;;  %18328 = vmatprep.subr.bf16.mxu0 %v20304_v17  ;;  %v23158_v6 = vrot.slane %v7286_v33, 4  ;;  %v7171_v31 = vmax.f32 %v7107_v61, 0.0  ;;  %v7676_v54 = vsel %vm479_vm5, %v7666_v11, %v7675_v55 }
 0x616   :  { %v7108_v57 = vadd.f32 %v22936_v59, %v7039_v36  ;;  %v7355_v53 = vrot.slane %v7285_v38, 4  ;;  %v7169_v27 = vmax.f32 %v7105_v12, 0.0  ;;  %18266 = vmatprep.mubr.msk.bf16.mxu0 %vm273_vm3, %v7676_v54  ;;  %v7106_v9 = vadd.f32 %v22936_v59, %v7037_v39 }
 0x617   :  { %v7685_v18 = vsel %vm479_vm5, %v7675_v55, %v7684_v26  ;;  %v23170_v22 = vadd.f32 %v20474_v13, %v7171_v31  ;;  %v7687_v11 = vshrl.u32 %v7482_v19, 16  ;;  %v7690_v24 = vshll.u32 %v7482_v19, 16  ;;  %18329 = vmatpush3.bf16.msra.mxu0 %v20304_v17  ;;  %v20476_v17 = vld [vmem:[%s26304_s0 + $0xb8] sm:$0xff] }
 0x618   :  { %v7172_v30 = vmax.f32 %v7108_v57, 0.0  ;;  %v7357_v46 = vsel %vm174_vm2, %v7355_v53, %v23158_v6  ;;  %7447 = vst.msk [vmem:[#allocation2 + $0x50] sm:$0xf0] %vm271_vm1, %v7355_v53  ;;  %v23181_v8 = vadd.f32 %v20475_v42, %v7169_v27  ;;  %v7170_v7 = vmax.f32 %v7106_v9, 0.0  ;;  %v18220_v45 = vpop.f32.mrb[24].mxu1  ;;  %18394 = vmatprep.subr.bf16.mxu0 %v20305_v60  ;;  %v23201_v31 = vld [vmem:[#allocation2 + $0x38] sm:$0xff] }
 0x619   :  { %26652 = vst [vmem:[#allocation24_spill] sm:$0xff] %v23170_v22  ;;  %v26400_v58 = vshrl.u32 %v23162_v41, 16  ;;  %7448 = vst.msk [vmem:[#allocation2 + $0x58] sm:$0xff] %vm273_vm3, %v7357_v46  ;;  %v7042_v33 = vmul.f32 %v18220_v45, %v22931_v5  ;;  %v6788_v61 = vpop.f32.mrb[25].mxu1  ;;  %v7689_v55 = vrot.slane %v7687_v11, 3  ;;  %v7692_v36 = vrot.slane %v7690_v24, 4 }
 0x61a   :  { %26653 = vst [vmem:[#allocation25_spill] sm:$0xff] %v23181_v8  ;;  %v23188_v20 = vadd.f32 %v20476_v17, %v7172_v30  ;;  %v23194_v38 = vadd.f32 %v20477_v62, %v7170_v7  ;;  %18267 = vmatmul.mubr.msk.bf16.gmra.mrb[68].mxu0 %vm273_vm3, %v7685_v18  ;;  %v7040_v12 = vmul.f32 %v22931_v5, %v6788_v61  ;;  %v26398_v26 = vshll.u32 %v23162_v41, 16  ;;  %v18221_v19 = vpop.f32.mrb[26].mxu1  ;;  %v20478_v61 = vld [vmem:[%s26304_s0 + $0xd0] sm:$0xff] }
 0x61b   :  { %v7697_v39 = vrot.slane %v26400_v58, 3  ;;  %v7111_v57 = vadd.f32 %v22936_v59, %v7042_v33  ;;  %v7693_v53 = vor.u32 %v7692_v36, %v7689_v55  ;;  %v7043_v27 = vmul.f32 %v18221_v19, %v22931_v5  ;;  %v6791_v9 = vpop.f32.mrb[27].mxu1  ;;  %v23225_v19 = vld [vmem:[#allocation2 + $0x40] sm:$0xff] }
 0x61c   :  { %26654 = vst [vmem:[#allocation26_spill] sm:$0xff] %v23188_v20  ;;  %26655 = vst [vmem:[#allocation27_spill] sm:$0xff] %v23194_v38  ;;  %v7288_v54 = vpack.c.bf16 %v23188_v20, %v23170_v22  ;;  %v7287_v18 = vpack.c.bf16 %v23194_v38, %v23181_v8  ;;  %v7109_v13 = vadd.f32 %v22936_v59, %v7040_v12  ;;  %v7700_v30 = vrot.slane %v26398_v26, 4 }
 0x61d   :  { %v7041_v11 = vmul.f32 %v22931_v5, %v6791_v9  ;;  %v7175_v60 = vmax.f32 %v7111_v57, 0.0  ;;  %v7112_v46 = vadd.f32 %v22936_v59, %v7043_v27  ;;  %v26397_v42 = vshrl.u32 %v23201_v31, 16  ;;  %v20479_v27 = vld [vmem:[%s26304_s0 + $0xc0] sm:$0xff] }
 0x61e   :  { %v7360_v24 = vrot.slane %v7288_v54, 4  ;;  %v7358_v7 = vrot.slane %v7287_v18, 4  ;;  %v7173_v45 = vmax.f32 %v7109_v13, 0.0  ;;  %v7701_v17 = vor.u32 %v7700_v30, %v7697_v39  ;;  %v7635_v54 = vld [vmem:[#allocation2 + $0x48] sm:$0xf] }
 0x61f   :  { %v7110_v33 = vadd.f32 %v22936_v59, %v7041_v11  ;;  %v23220_v55 = vadd.f32 %v20478_v61, %v7175_v60  ;;  %v7176_v36 = vmax.f32 %v7112_v46, 0.0  ;;  %v7706_v62 = vrot.slane %v26397_v42, 3  ;;  %v23272_v58 = vld [vmem:[#allocation2 + $0x50] sm:$0xf8] }
 0x620   :  { %7451 = vst.msk [vmem:[#allocation2 + $0x70] sm:$0xf] %vm277_vm4, %v7360_v24  ;;  %v26396_v12 = vshll.u32 %v23201_v31, 16  ;;  %v7359_v39 = vsel %vm174_vm2, %v23158_v6, %v7358_v7  ;;  %v7361_v57 = vsel %vm174_vm2, %v7358_v7, %v7360_v24  ;;  %v23233_v9 = vadd.f32 %v20479_v27, %v7173_v45  ;;  %v18224_v13 = vpop.f32.mrb[28].mxu1  ;;  %v20480_v6 = vld [vmem:[%s26304_s0 + $0xd8] sm:$0xff] }
 0x621   :  { %26656 = vst [vmem:[#allocation28_spill] sm:$0xff] %v23220_v55  ;;  %v7702_v18 = vsel %vm479_vm5, %v7693_v53, %v7701_v17  ;;  %7449 = vst.msk [vmem:[#allocation2 + $0x60] sm:$0xff] %vm273_vm3, %v7359_v39  ;;  %v23242_v30 = vadd.f32 %v20480_v6, %v7176_v36  ;;  %v7174_v11 = vmax.f32 %v7110_v33, 0.0  ;;  %v7046_v24 = vmul.f32 %v18224_v13, %v22931_v5  ;;  %v6804_v53 = vpop.f32.mrb[29].mxu1  ;;  %v20481_v33 = vld [vmem:[%s26304_s0 + $0xc8] sm:$0xff] }
 0x622   :  { %26657 = vst [vmem:[#allocation29_spill] sm:$0xff] %v23233_v9  ;;  %7450 = vst.msk [vmem:[#allocation2 + $0x68] sm:$0xff] %vm273_vm3, %v7361_v57  ;;  %18270 = vmatprep.mubr.msk.bf16.mxu0 %vm273_vm3, %v7702_v18  ;;  %v7709_v60 = vrot.slane %v26396_v12, 4  ;;  %v7044_v46 = vmul.f32 %v22931_v5, %v6804_v53  ;;  %v26399_v7 = vshrl.u32 %v23225_v19, 16  ;;  %v26401_v45 = vshll.u32 %v23225_v19, 16  ;;  %v18225_v61 = vpop.f32.mrb[30].mxu1 }
 0x623   :  { %26658 = vst [vmem:[#allocation30_spill] sm:$0xff] %v23242_v30  ;;  %v7722_v39 = vshrl.u32 %v7635_v54, 16  ;;  %v7290_v57 = vpack.c.bf16 %v23242_v30, %v23220_v55  ;;  %v23255_v36 = vadd.f32 %v20481_v33, %v7174_v11  ;;  %v7115_v27 = vadd.f32 %v22936_v59, %v7046_v24  ;;  %v6807_v13 = vpop.f32.mrb[31].mxu1  ;;  %v20494_v30 = vld [vmem:[%s26304_s0 + $0x150] sm:$0xff] }
 0x624   :  { %v7710_v18 = vor.u32 %v7709_v60, %v7706_v62  ;;  %v7113_v6 = vadd.f32 %v22936_v59, %v7044_v46  ;;  %v7715_v53 = vrot.slane %v26399_v7, 3  ;;  %v7718_v12 = vrot.slane %v26401_v45, 4 }
 0x625   :  { %26659 = vst [vmem:[#allocation31_spill] sm:$0xff] %v23255_v36  ;;  %v7047_v42 = vmul.f32 %v18225_v61, %v22931_v5  ;;  %v23264_v26 = vrot.slane %v7290_v57, 4  ;;  %v7289_v11 = vpack.c.bf16 %v23255_v36, %v23233_v9  ;;  %v7179_v33 = vmax.f32 %v7115_v27, 0.0  ;;  %v20482_v61 = vld [vmem:[%s26304_s0 + $0xf0] sm:$0xff] }
 0x626   :  { %v7711_v24 = vsel %vm479_vm5, %v7701_v17, %v7710_v18  ;;  %v7177_v62 = vmax.f32 %v7113_v6, 0.0  ;;  %v7719_v60 = vor.u32 %v7718_v12, %v7715_v53  ;;  %v7045_v7 = vmul.f32 %v22931_v5, %v6807_v13  ;;  %v20483_v17 = vld [vmem:[%s26304_s0 + $0xe0] sm:$0xff] }
 0x627   :  { %18271 = vmatmul.mubr.msk.bf16.gmra.mrb[72].mxu0 %vm273_vm3, %v7711_v24  ;;  %v7116_v46 = vadd.f32 %v22936_v59, %v7047_v42  ;;  %v7362_v45 = vrot.slane %v7289_v11, 4  ;;  %v23277_v57 = vadd.f32 %v20482_v61, %v7179_v33  ;;  %v7724_v27 = vrot.slane %v7722_v39, 3  ;;  %v23286_v11 = vld [vmem:[#allocation2 + $0x58] sm:$0xff] }
 0x628   :  { %v7725_v16 = vshll.u32 %v7635_v54, 16  ;;  %v23282_v12 = vadd.f32 %v20483_v17, %v7177_v62  ;;  %v7720_v42 = vsel %vm479_vm5, %v7710_v18, %v7719_v60  ;;  %v7114_v6 = vadd.f32 %v22936_v59, %v7045_v7  ;;  %v18228_v53 = vpop.f32.mrb[32].mxu1  ;;  %v20484_v7 = vld [vmem:[%s26304_s0 + $0xf8] sm:$0xff] }
 0x629   :  { %26660 = vst [vmem:[#allocation32_spill] sm:$0xff] %v23277_v57  ;;  %v7180_v13 = vmax.f32 %v7116_v46, 0.0  ;;  %v7364_v33 = vsel %vm174_vm2, %v7362_v45, %v23264_v26  ;;  %7452 = vst.msk [vmem:[#allocation2 + $0x78] sm:$0xf0] %vm271_vm1, %v7362_v45  ;;  %18274 = vmatprep.mubr.msk.bf16.mxu0 %vm273_vm3, %v7720_v42  ;;  %v7050_v54 = vmul.f32 %v18228_v53, %v22931_v5  ;;  %v6820_v24 = vpop.f32.mrb[33].mxu1  ;;  %v7731_v62 = vshrl.u32 %v23272_v58, 16 }
 0x62a   :  { %26661 = vst [vmem:[#allocation33_spill] sm:$0xff] %v23282_v12  ;;  %v7727_v39 = vrot.slane %v7725_v16, 4  ;;  %7453 = vst.msk [vmem:[#allocation2 + $0x80] sm:$0xff] %vm273_vm3, %v7364_v33  ;;  %v7178_v46 = vmax.f32 %v7114_v6, 0.0  ;;  %v7048_v61 = vmul.f32 %v22931_v5, %v6820_v24  ;;  %v7734_v45 = vshll.u32 %v23272_v58, 16  ;;  %v18229_v17 = vpop.f32.mrb[34].mxu1 }
 0x62b   :  { %v23298_v18 = vadd.f32 %v20484_v7, %v7180_v13  ;;  %v7119_v42 = vadd.f32 %v22936_v59, %v7050_v54  ;;  %v7733_v53 = vrot.slane %v7731_v62, 3  ;;  %v26409_v52 = vshrl.u32 %v23286_v11, 16  ;;  %v6823_v63 = vpop.f32.mrb[35].mxu1  ;;  %v20485_v13 = vld [vmem:[%s26304_s0 + $0xe8] sm:$0xff]  ;;  %v23316_v62 = vld [vmem:[#allocation2 + $0x60] sm:$0xff] }
 0x62c   :  { %v7728_v16 = vor.u32 %v7727_v39, %v7724_v27  ;;  %v23309_v6 = vadd.f32 %v20485_v13, %v7178_v46  ;;  %v7117_v24 = vadd.f32 %v22936_v59, %v7048_v61  ;;  %v7736_v7 = vrot.slane %v7734_v45, 4  ;;  %v20486_v61 = vld [vmem:[%s26304_s0 + $0x110] sm:$0xff] }
 0x62d   :  { %26662 = vst [vmem:[#allocation34_spill] sm:$0xff] %v23298_v18  ;;  %v7292_v33 = vpack.c.bf16 %v23298_v18, %v23277_v57  ;;  %v7183_v28 = vmax.f32 %v7119_v42, 0.0  ;;  %v7741_v27 = vrot.slane %v26409_v52, 3  ;;  %v26408_v39 = vshll.u32 %v23286_v11, 16 }
 0x62e   :  { %26663 = vst [vmem:[#allocation35_spill] sm:$0xff] %v23309_v6  ;;  %v7729_v54 = vsel %vm479_vm5, %v7719_v60, %v7728_v16  ;;  %v7291_v35 = vpack.c.bf16 %v23309_v6, %v23282_v12  ;;  %v7181_v46 = vmax.f32 %v7117_v24, 0.0  ;;  %v7737_v13 = vor.u32 %v7736_v7, %v7733_v53  ;;  %v20487_v53 = vld [vmem:[%s26304_s0 + $0x100] sm:$0xff] }
 0x62f   :  { %v7367_v40 = vrot.slane %v7292_v33, 4  ;;  %18275 = vmatmul.mubr.msk.bf16.gmra.mrb[76].mxu0 %vm273_vm3, %v7729_v54  ;;  %v23324_v60 = vadd.f32 %v20486_v61, %v7183_v28  ;;  %v7744_v45 = vrot.slane %v26408_v39, 4  ;;  %v7051_v42 = vmul.f32 %v18229_v17, %v22931_v5 }
 0x630   :  { %v7049_v16 = vmul.f32 %v22931_v5, %v6823_v63  ;;  %v7365_v33 = vrot.slane %v7291_v35, 4  ;;  %v23334_v24 = vadd.f32 %v20487_v53, %v7181_v46  ;;  %v18232_v7 = vpop.f32.mrb[36].mxu1  ;;  %v26412_v28 = vshrl.u32 %v23316_v62, 16  ;;  %v23341_v35 = vld [vmem:[#allocation2 + $0x68] sm:$0xff]  ;;  %v23390_v36 = vld [vmem:[#allocation2 + $0x78] sm:$0xf8] }
 0x631   :  { %26664 = vst [vmem:[#allocation36_spill] sm:$0xff] %v23324_v60  ;;  %7456 = vst.msk [vmem:[#allocation2 + $0x98] sm:$0xf] %vm277_vm4, %v7367_v40  ;;  %v26413_v54 = vshll.u32 %v23316_v62, 16  ;;  %v7745_v61 = vor.u32 %v7744_v45, %v7741_v27  ;;  %v7120_v39 = vadd.f32 %v22936_v59, %v7051_v42  ;;  %v7054_v63 = vmul.f32 %v18232_v7, %v22931_v5  ;;  %v6836_v52 = vpop.f32.mrb[37].mxu1 }
 0x632   :  { %26665 = vst [vmem:[#allocation37_spill] sm:$0xff] %v23334_v24  ;;  %v7118_v17 = vadd.f32 %v22936_v59, %v7049_v16  ;;  %v7366_v6 = vsel %vm174_vm2, %v23264_v26, %v7365_v33  ;;  %v7368_v46 = vsel %vm174_vm2, %v7365_v33, %v7367_v40  ;;  %v7750_v53 = vrot.slane %v26412_v28, 3  ;;  %v18233_v45 = vpop.f32.mrb[38].mxu1 }
 0x633   :  { %v7753_v27 = vrot.slane %v26413_v54, 4  ;;  %7454 = vst.msk [vmem:[#allocation2 + $0x88] sm:$0xff] %vm273_vm3, %v7366_v6  ;;  %7455 = vst.msk [vmem:[#allocation2 + $0x90] sm:$0xff] %vm273_vm3, %v7368_v46  ;;  %v7746_v42 = vsel %vm479_vm5, %v7737_v13, %v7745_v61  ;;  %v7184_v16 = vmax.f32 %v7120_v39, 0.0  ;;  %v7123_v12 = vadd.f32 %v22936_v59, %v7054_v63  ;;  %v6839_v26 = vpop.f32.mrb[39].mxu1  ;;  %v20488_v6 = vld [vmem:[%s26304_s0 + $0x118] sm:$0xff] }
 0x634   :  { %v7182_v7 = vmax.f32 %v7118_v17, 0.0  ;;  %18278 = vmatprep.mubr.msk.bf16.mxu0 %vm273_vm3, %v7746_v42  ;;  %v7052_v33 = vmul.f32 %v22931_v5, %v6836_v52  ;;  %v26415_v28 = vshrl.u32 %v23341_v35, 16  ;;  %v26414_v54 = vshll.u32 %v23341_v35, 16  ;;  %v20489_v39 = vld [vmem:[%s26304_s0 + $0x108] sm:$0xff]  ;;  %v7636_v52 = vld [vmem:[#allocation2 + $0x70] sm:$0xf] }
 0x635   :  { %v7754_v40 = vor.u32 %v7753_v27, %v7750_v53  ;;  %v23361_v46 = vadd.f32 %v20488_v6, %v7184_v16  ;;  %v7187_v17 = vmax.f32 %v7123_v12, 0.0  ;;  %v7055_v63 = vmul.f32 %v18233_v45, %v22931_v5  ;;  %v20490_v12 = vld [vmem:[%s26304_s0 + $0x130] sm:$0xff] }
 0x636   :  { %v23366_v13 = vadd.f32 %v20489_v39, %v7182_v7  ;;  %v7121_v27 = vadd.f32 %v22936_v59, %v7052_v33  ;;  %v7759_v42 = vrot.slane %v26415_v28, 3  ;;  %v7762_v16 = vrot.slane %v26414_v54, 4 }
 0x637   :  { %26666 = vst [vmem:[#allocation38_spill] sm:$0xff] %v23361_v46  ;;  %v7755_v53 = vsel %vm479_vm5, %v7745_v61, %v7754_v40  ;;  %v7294_v6 = vpack.c.bf16 %v23361_v46, %v23324_v60  ;;  %v23382_v45 = vadd.f32 %v20490_v12, %v7187_v17  ;;  %v7124_v61 = vadd.f32 %v22936_v59, %v7055_v63  ;;  %v20491_v17 = vld [vmem:[%s26304_s0 + $0x120] sm:$0xff] }
 0x638   :  { %26667 = vst [vmem:[#allocation39_spill] sm:$0xff] %v23366_v13  ;;  %v7293_v7 = vpack.c.bf16 %v23366_v13, %v23334_v24  ;;  %18279 = vmatmul.mubr.msk.bf16.gmra.mrb[80].mxu0 %vm273_vm3, %v7755_v53  ;;  %v7185_v33 = vmax.f32 %v7121_v27, 0.0  ;;  %v7763_v39 = vor.u32 %v7762_v16, %v7759_v42  ;;  %v7053_v54 = vmul.f32 %v22931_v5, %v6839_v26  ;;  %v18236_v28 = vpop.f32.mrb[40].mxu1  ;;  %v23399_v42 = vld [vmem:[#allocation2 + $0x80] sm:$0xff] }
 0x639   :  { %26668 = vst [vmem:[#allocation40_spill] sm:$0xff] %v23382_v45  ;;  %v7766_v18 = vshrl.u32 %v7636_v52, 16  ;;  %v23387_v46 = vrot.slane %v7294_v6, 4  ;;  %v7188_v13 = vmax.f32 %v7124_v61, 0.0  ;;  %v7058_v24 = vmul.f32 %v18236_v28, %v22931_v5  ;;  %v6852_v57 = vpop.f32.mrb[41].mxu1  ;;  %v20492_v6 = vld [vmem:[%s26304_s0 + $0x138] sm:$0xff] }
 0x63a   :  { %v7369_v60 = vrot.slane %v7293_v7, 4  ;;  %v23395_v63 = vadd.f32 %v20491_v17, %v7185_v33  ;;  %v7764_v53 = vsel %vm479_vm5, %v7754_v40, %v7763_v39  ;;  %v7122_v26 = vadd.f32 %v22936_v59, %v7053_v54  ;;  %v18237_v16 = vpop.f32.mrb[42].mxu1 }
 0x63b   :  { %v7768_v27 = vrot.slane %v7766_v18, 3  ;;  %18282 = vmatprep.mubr.msk.bf16.mxu0 %vm273_vm3, %v7764_v53  ;;  %v23408_v7 = vadd.f32 %v20492_v6, %v7188_v13  ;;  %v7127_v40 = vadd.f32 %v22936_v59, %v7058_v24  ;;  %v7769_v54 = vshll.u32 %v7636_v52, 16  ;;  %v6855_v18 = vpop.f32.mrb[43].mxu1  ;;  %v20493_v24 = vld [vmem:[%s26304_s0 + $0x128] sm:$0xff] }
 0x63c   :  { %26669 = vst [vmem:[#allocation41_spill] sm:$0xff] %v23395_v63  ;;  %v7371_v28 = vsel %vm174_vm2, %v7369_v60, %v23387_v46  ;;  %7457 = vst.msk [vmem:[#allocation2 + $0xa0] sm:$0xf0] %vm271_vm1, %v7369_v60  ;;  %v7186_v12 = vmax.f32 %v7122_v26, 0.0  ;;  %v7056_v61 = vmul.f32 %v22931_v5, %v6852_v57  ;;  %v7775_v33 = vshrl.u32 %v23390_v36, 16 }
 0x63d   :  { %26670 = vst [vmem:[#allocation42_spill] sm:$0xff] %v23408_v7  ;;  %7458 = vst.msk [vmem:[#allocation2 + $0xa8] sm:$0xff] %vm273_vm3, %v7371_v28  ;;  %v7778_v60 = vshll.u32 %v23390_v36, 16  ;;  %v7296_v17 = vpack.c.bf16 %v23408_v7, %v23382_v45  ;;  %v7191_v53 = vmax.f32 %v7127_v40, 0.0  ;;  %v7771_v9 = vrot.slane %v7769_v54, 4  ;;  %v23431_v45 = vld [vmem:[#allocation2 + $0x88] sm:$0xff] }
 0x63e   :  { %v26427_v13 = vshrl.u32 %v23399_v42, 16  ;;  %v23421_v52 = vadd.f32 %v20493_v24, %v7186_v12  ;;  %v7125_v26 = vadd.f32 %v22936_v59, %v7056_v61  ;;  %v7777_v57 = vrot.slane %v7775_v33, 3 }
 0x63f   :  { %v7780_v28 = vrot.slane %v7778_v60, 4  ;;  %v7374_v6 = vrot.slane %v7296_v17, 4  ;;  %v23427_v7 = vadd.f32 %v20494_v30, %v7191_v53  ;;  %v7772_v40 = vor.u32 %v7771_v9, %v7768_v27 }
 0x640   :  { %26671 = vst [vmem:[#allocation43_spill] sm:$0xff] %v23421_v52  ;;  %v7785_v54 = vrot.slane %v26427_v13, 3  ;;  %v7295_v12 = vpack.c.bf16 %v23421_v52, %v23395_v63  ;;  %v7189_v24 = vmax.f32 %v7125_v26, 0.0  ;;  %v26429_v33 = vshll.u32 %v23399_v42, 16  ;;  %v18240_v60 = vpop.f32.mrb[44].mxu1  ;;  %v20495_v26 = vld [vmem:[%s26304_s0 + $0x140] sm:$0xff] }
 0x641   :  { %26672 = vst [vmem:[#allocation44_spill] sm:$0xff] %v23427_v7  ;;  %v7781_v61 = vor.u32 %v7780_v28, %v7777_v57  ;;  %7461 = vst.msk [vmem:[#allocation2 + $0xc0] sm:$0xf] %vm277_vm4, %v7374_v6  ;;  %v7773_v17 = vsel %vm479_vm5, %v7763_v39, %v7772_v40  ;;  %v7059_v30 = vmul.f32 %v18237_v16, %v22931_v5  ;;  %v6868_v53 = vpop.f32.mrb[45].mxu1  ;;  %v26436_v39 = vshrl.u32 %v23431_v45, 16 }
 0x642   :  { %v7057_v9 = vmul.f32 %v22931_v5, %v6855_v18  ;;  %v7062_v27 = vmul.f32 %v18240_v60, %v22931_v5  ;;  %v7372_v13 = vrot.slane %v7295_v12, 4  ;;  %18283 = vmatmul.mubr.msk.bf16.gmra.mrb[84].mxu0 %vm273_vm3, %v7773_v17  ;;  %v23445_v57 = vadd.f32 %v20495_v26, %v7189_v24  ;;  %v18241_v16 = vpop.f32.mrb[46].mxu1  ;;  %v23454_v17 = vld [vmem:[#allocation2 + $0x90] sm:$0xff] }
 0x643   :  { %v7788_v28 = vrot.slane %v26429_v33, 4  ;;  %v7128_v18 = vadd.f32 %v22936_v59, %v7059_v30  ;;  %v26435_v60 = vshll.u32 %v23431_v45, 16  ;;  %v6871_v52 = vpop.f32.mrb[47].mxu1  ;;  %v7794_v63 = vrot.slane %v26436_v39, 3 }
 0x644   :  { %26673 = vst [vmem:[#allocation45_spill] sm:$0xff] %v23445_v57  ;;  %v7126_v40 = vadd.f32 %v22936_v59, %v7057_v9  ;;  %v7131_v12 = vadd.f32 %v22936_v59, %v7062_v27  ;;  %v7373_v24 = vsel %vm174_vm2, %v23387_v46, %v7372_v13  ;;  %v7375_v26 = vsel %vm174_vm2, %v7372_v13, %v7374_v6 }
 0x645   :  { %v7789_v33 = vor.u32 %v7788_v28, %v7785_v54  ;;  %7459 = vst.msk [vmem:[#allocation2 + $0xb0] sm:$0xff] %vm273_vm3, %v7373_v24  ;;  %7460 = vst.msk [vmem:[#allocation2 + $0xb8] sm:$0xff] %vm273_vm3, %v7375_v26  ;;  %v7192_v30 = vmax.f32 %v7128_v18, 0.0  ;;  %v7797_v55 = vrot.slane %v26435_v60, 4  ;;  %v7060_v46 = vmul.f32 %v22931_v5, %v6868_v53  ;;  %v20496_v54 = vld [vmem:[%s26304_s0 + $0x158] sm:$0xff]  ;;  %v20497_v18 = vld [vmem:[%s26304_s0 + $0x148] sm:$0xff] }
 0x646   :  { %v7190_v9 = vmax.f32 %v7126_v40, 0.0  ;;  %v7195_v27 = vmax.f32 %v7131_v12, 0.0  ;;  %v26434_v13 = vshrl.u32 %v23454_v17, 16  ;;  %v26433_v6 = vshll.u32 %v23454_v17, 16 }
 0x647   :  { %v7790_v38 = vsel %vm479_vm5, %v7781_v61, %v7789_v33  ;;  %v23473_v28 = vadd.f32 %v20496_v54, %v7192_v30  ;;  %v20498_v61 = vld [vmem:[%s26304_s0 + $0x170] sm:$0xff]  ;;  %v7798_v12 = vor.u32 %v7797_v55, %v7794_v63  ;;  %v7063_v30 = vmul.f32 %v18241_v16, %v22931_v5 }
 0x648   :  { %18286 = vmatprep.mubr.msk.bf16.mxu0 %vm273_vm3, %v7790_v38  ;;  %v23478_v40 = vadd.f32 %v20497_v18, %v7190_v9  ;;  %v23483_v53 = vadd.f32 %v20498_v61, %v7195_v27  ;;  %v7129_v38 = vadd.f32 %v22936_v59, %v7060_v46  ;;  %v7803_v24 = vrot.slane %v26434_v13, 3  ;;  %v18244_v54 = vpop.f32.mrb[48].mxu1  ;;  %v23491_v9 = vld [vmem:[#allocation2 + $0x98] sm:$0xf] }
 0x649   :  { %26674 = vst [vmem:[#allocation46_spill] sm:$0xff] %v23473_v28  ;;  %v7806_v26 = vrot.slane %v26433_v6, 4  ;;  %v7298_v18 = vpack.c.bf16 %v23473_v28, %v23427_v7  ;;  %v7799_v55 = vsel %vm479_vm5, %v7789_v33, %v7798_v12  ;;  %v7061_v63 = vmul.f32 %v22931_v5, %v6871_v52  ;;  %v6884_v46 = vpop.f32.mrb[49].mxu1  ;;  %v20499_v52 = vld [vmem:[%s26304_s0 + $0x160] sm:$0xff] }
 0x64a   :  { %26675 = vst [vmem:[#allocation47_spill] sm:$0xff] %v23478_v40  ;;  %26676 = vst [vmem:[#allocation48_spill] sm:$0xff] %v23483_v53  ;;  %v7297_v27 = vpack.c.bf16 %v23478_v40, %v23445_v57  ;;  %18287 = vmatmul.mubr.msk.bf16.gmra.mrb[88].mxu0 %vm273_vm3, %v7799_v55  ;;  %v7193_v61 = vmax.f32 %v7129_v38, 0.0  ;;  %v7132_v16 = vadd.f32 %v22936_v59, %v7063_v30  ;;  %v18245_v60 = vpop.f32.mrb[50].mxu1  ;;  %v7810_v40 = vshrl.u32 %v23491_v9, 16 }
 0x64b   :  { %v7807_v6 = vor.u32 %v7806_v26, %v7803_v24  ;;  %v7066_v13 = vmul.f32 %v18244_v54, %v22931_v5  ;;  %v7377_v39 = vrot.slane %v7298_v18, 4  ;;  %v7130_v28 = vadd.f32 %v22936_v59, %v7061_v63  ;;  %v23504_v57 = vld [vmem:[#allocation2 + $0xa0] sm:$0xf8]  ;;  %v6887_v33 = vpop.f32.mrb[51].mxu1  ;;  %v23513_v54 = vld [vmem:[#allocation2 + $0xa8] sm:$0xff] }
 0x64c   :  { %v7376_v8 = vrot.slane %v7297_v27, 4  ;;  %v23509_v38 = vadd.f32 %v20499_v52, %v7193_v61  ;;  %v7196_v26 = vmax.f32 %v7132_v16, 0.0  ;;  %v7812_v55 = vrot.slane %v7810_v40, 3 }
 0x64d   :  { %v7808_v24 = vsel %vm479_vm5, %v7798_v12, %v7807_v6  ;;  %v7135_v30 = vadd.f32 %v22936_v59, %v7066_v13  ;;  %v7194_v27 = vmax.f32 %v7130_v28, 0.0  ;;  %v7813_v63 = vshll.u32 %v23491_v9, 16  ;;  %v20500_v12 = vld [vmem:[%s26304_s0 + $0x178] sm:$0xff] }
 0x64e   :  { %26677 = vst [vmem:[#allocation49_spill] sm:$0xff] %v23509_v38  ;;  %v7378_v18 = vsel %vm174_vm2, %v7376_v8, %v7377_v39  ;;  %7462 = vst.msk [vmem:[#allocation2 + $0xc8] sm:$0xf0] %vm271_vm1, %v7376_v8  ;;  %18290 = vmatprep.mubr.msk.bf16.mxu0 %vm273_vm3, %v7808_v24  ;;  %v23523_v61 = vadd.f32 %v20500_v12, %v7196_v26  ;;  %v7064_v16 = vmul.f32 %v22931_v5, %v6884_v46  ;;  %v20501_v8 = vld [vmem:[%s26304_s0 + $0x168] sm:$0xff]  ;;  %v20502_v46 = vld [vmem:[%s26304_s0 + $0x190] sm:$0xff] }
 0x64f   :  { %7463 = vst.msk [vmem:[#allocation2 + $0xd0] sm:$0xff] %vm273_vm3, %v7378_v18  ;;  %v7199_v13 = vmax.f32 %v7135_v30, 0.0  ;;  %v7819_v52 = vshrl.u32 %v23504_v57, 16  ;;  %v23530_v28 = vadd.f32 %v20501_v8, %v7194_v27  ;;  %v7815_v40 = vrot.slane %v7813_v63, 4 }
 0x650   :  { %26678 = vst [vmem:[#allocation50_spill] sm:$0xff] %v23523_v61  ;;  %v7822_v24 = vshll.u32 %v23504_v57, 16  ;;  %v26453_v18 = vshrl.u32 %v23513_v54, 16  ;;  %v7300_v26 = vpack.c.bf16 %v23523_v61, %v23483_v53  ;;  %v7133_v12 = vadd.f32 %v22936_v59, %v7064_v16  ;;  %v18248_v20 = vpop.f32.mrb[52].mxu1 }
 0x651   :  { %26679 = vst [vmem:[#allocation51_spill] sm:$0xff] %v23530_v28  ;;  %v23539_v30 = vadd.f32 %v20502_v46, %v7199_v13  ;;  %v7821_v7 = vrot.slane %v7819_v52, 3  ;;  %v7299_v27 = vpack.c.bf16 %v23530_v28, %v23509_v38  ;;  %v7816_v63 = vor.u32 %v7815_v40, %v7812_v55  ;;  %v6900_v2 = vpop.f32.mrb[53].mxu1  ;;  %v23548_v46 = vld [vmem:[#allocation2 + $0xb0] sm:$0xff]  ;;  %v23554_v55 = vld [vmem:[%s26306_s2 + $0x1] ss:$0 sm:$0xff] }
 0x652   :  { %v7824_v8 = vrot.slane %v7822_v24, 4  ;;  %v7829_v22 = vrot.slane %v26453_v18, 3  ;;  %v7381_v61 = vrot.slane %v7300_v26, 4  ;;  %v7197_v53 = vmax.f32 %v7133_v12, 0.0  ;;  %v18249_v59 = vpop.f32.mrb[54].mxu1  ;;  %v23573_v12 = vld [vmem:[#allocation2 + $0xb8] sm:$0xff] }
 0x653   :  { %26680 = vst [vmem:[#allocation52_spill] sm:$0xff] %v23539_v30  ;;  %v26449_v49 = vshll.u32 %v23513_v54, 16  ;;  %v7067_v13 = vmul.f32 %v18245_v60, %v22931_v5  ;;  %v7379_v16 = vrot.slane %v7299_v27, 4  ;;  %v7817_v52 = vsel %vm479_vm5, %v7807_v6, %v7816_v63  ;;  %v6903_v24 = vpop.f32.mrb[55].mxu1  ;;  %v20504_v5 = vld [vmem:[%s26304_s0 + $0x180] sm:$0xff] }
 0x654   :  { %v7825_v32 = vor.u32 %v7824_v8, %v7821_v7  ;;  %v7065_v40 = vmul.f32 %v23554_v55, %v6887_v33  ;;  %7466 = vst.msk [vmem:[#allocation2 + $0xe8] sm:$0xf] %vm277_vm4, %v7381_v61  ;;  %18291 = vmatmul.mubr.msk.bf16.gmra.mrb[92].mxu0 %vm273_vm3, %v7817_v52  ;;  %v23562_v60 = vadd.f32 %v20504_v5, %v7197_v53  ;;  %v23569_v6 = vld [vmem:[%s26307_s3 + $0x1] ss:$0 sm:$0xff]  ;;  %v26451_v8 = vshrl.u32 %v23548_v46, 16 }
 0x655   :  { %v7832_v7 = vrot.slane %v26449_v49, 4  ;;  %v7136_v33 = vadd.f32 %v23569_v6, %v7067_v13  ;;  %v7070_v26 = vmul.f32 %v23554_v55, %v18248_v20  ;;  %v7380_v27 = vsel %vm174_vm2, %v7377_v39, %v7379_v16 }
 0x656   :  { %26681 = vst [vmem:[#allocation53_spill] sm:$0xff] %v23562_v60  ;;  %v7382_v63 = vsel %vm174_vm2, %v7379_v16, %v7381_v61  ;;  %v7134_v53 = vadd.f32 %v23569_v6, %v7065_v40  ;;  %7464 = vst.msk [vmem:[#allocation2 + $0xd8] sm:$0xff] %vm273_vm3, %v7380_v27  ;;  %v26450_v20 = vshll.u32 %v23548_v46, 16  ;;  %v7838_v39 = vrot.slane %v26451_v8, 3  ;;  %v20506_v27 = vld [vmem:[%s26304_s0 + $0x198] sm:$0xff] }
 0x657   :  { %7465 = vst.msk [vmem:[#allocation2 + $0xe0] sm:$0xff] %vm273_vm3, %v7382_v63  ;;  %v7833_v52 = vor.u32 %v7832_v7, %v7829_v22  ;;  %v7200_v5 = vmax.f32 %v7136_v33, 0.0  ;;  %v7139_v13 = vadd.f32 %v23569_v6, %v7070_v26  ;;  %v7068_v61 = vmul.f32 %v23554_v55, %v6900_v2  ;;  %v20507_v2 = vld [vmem:[%s26304_s0 + $0x188] sm:$0xff] }
 0x658   :  { %v7198_v49 = vmax.f32 %v7134_v53, 0.0  ;;  %v26452_v16 = vshrl.u32 %v23573_v12, 16  ;;  %v7841_v33 = vrot.slane %v26450_v20, 4  ;;  %v18252_v26 = vpop.f32.mrb[56].mxu1  ;;  %v26698_v56 = vshrl.u32 %v23073_v25, 16 }
 0x659   :  { %v7834_v40 = vsel %vm479_vm5, %v7825_v32, %v7833_v52  ;;  %v23591_v22 = vadd.f32 %v20506_v27, %v7200_v5  ;;  %v7203_v7 = vmax.f32 %v7139_v13, 0.0  ;;  %v7137_v32 = vadd.f32 %v23569_v6, %v7068_v61  ;;  %v6916_v13 = vpop.f32.mrb[57].mxu1 }
 0x65a   :  { %18294 = vmatprep.mubr.msk.bf16.mxu0 %vm273_vm3, %v7834_v40  ;;  %v23599_v63 = vadd.f32 %v20507_v2, %v7198_v49  ;;  %v7847_v53 = vrot.slane %v26452_v16, 3  ;;  %v26458_v5 = vshll.u32 %v23573_v12, 16  ;;  %v20508_v40 = vld [vmem:[%s26304_s0 + $0x1b0] sm:$0xff]  ;;  %v7842_v8 = vor.u32 %v7841_v33, %v7838_v39  ;;  %v23613_v2 = vpop.f32.mrb[58].mxu1 }
 0x65b   :  { %26682 = vst [vmem:[#allocation54_spill] sm:$0xff] %v23591_v22  ;;  %v7302_v27 = vpack.c.bf16 %v23591_v22, %v23539_v30  ;;  %v23610_v20 = vadd.f32 %v20508_v40, %v7203_v7  ;;  %v7071_v49 = vmul.f32 %v23554_v55, %v18249_v59  ;;  %v7201_v16 = vmax.f32 %v7137_v32, 0.0  ;;  %v23620_v30 = vld [vmem:[#allocation2 + $0xc0] sm:$0xf]  ;;  %v6919_v28 = vpop.f32.mrb[59].mxu1 }
 0x65c   :  { %26683 = vst [vmem:[#allocation55_spill] sm:$0xff] %v23599_v63  ;;  %v7301_v61 = vpack.c.bf16 %v23599_v63, %v23562_v60  ;;  %v7850_v18 = vrot.slane %v26458_v5, 4  ;;  %v7069_v22 = vmul.f32 %v23554_v55, %v6903_v24  ;;  %v7843_v39 = vsel %vm479_vm5, %v7833_v52, %v7842_v8  ;;  %v20509_v32 = vld [vmem:[%s26304_s0 + $0x1a0] sm:$0xff] }
 0x65d   :  { %26684 = vst [vmem:[#allocation56_spill] sm:$0xff] %v23610_v20  ;;  %v23622_v38 = vrot.slane %v7302_v27, 4  ;;  %v7140_v59 = vadd.f32 %v23569_v6, %v7071_v49  ;;  %v7074_v7 = vmul.f32 %v23554_v55, %v18252_v26  ;;  %18295 = vmatmul.mubr.msk.bf16.gmra.mrb[96].mxu0 %vm273_vm3, %v7843_v39  ;;  %v23631_v40 = vadd.f32 %v20509_v32, %v7201_v16  ;;  %v23637_v26 = vld [vmem:[#allocation2 + $0xc8] sm:$0xf8]  ;;  %v23671_v47 = vld [vmem:[#allocation2 + $0xd8] sm:$0xff] }
 0x65e   :  { %v7383_v33 = vrot.slane %v7301_v61, 4  ;;  %v7851_v24 = vor.u32 %v7850_v18, %v7847_v53  ;;  %v7138_v5 = vadd.f32 %v23569_v6, %v7069_v22  ;;  %v7854_v52 = vshrl.u32 %v23620_v30, 16  ;;  %v23644_v22 = vld [vmem:[#allocation2 + $0xd0] sm:$0xff]  ;;  %v20510_v53 = vld [vmem:[%s26304_s0 + $0x1b8] sm:$0xff] }
 0x65f   :  { %26685 = vst [vmem:[#allocation57_spill] sm:$0xff] %v23631_v40  ;;  %v7204_v27 = vmax.f32 %v7140_v59, 0.0  ;;  %v7143_v63 = vadd.f32 %v23569_v6, %v7074_v7  ;;  %v7857_v49 = vshll.u32 %v23620_v30, 16  ;;  %v7072_v18 = vmul.f32 %v23554_v55, %v6916_v13 }
 0x660   :  { %v7385_v61 = vsel %vm174_vm2, %v7383_v33, %v23622_v38  ;;  %7467 = vst.msk [vmem:[#allocation2 + $0xf0] sm:$0xf0] %vm271_vm1, %v7383_v33  ;;  %v7852_v16 = vsel %vm479_vm5, %v7842_v8, %v7851_v24  ;;  %v7202_v39 = vmax.f32 %v7138_v5, 0.0  ;;  %v7856_v32 = vrot.slane %v7854_v52, 3  ;;  %v18256_v60 = vpop.f32.mrb[60].mxu1  ;;  %v20511_v8 = vld [vmem:[%s26304_s0 + $0x1a8] sm:$0xff] }
 0x661   :  { %7468 = vst.msk [vmem:[#allocation2 + $0xf8] sm:$0xff] %vm273_vm3, %v7385_v61  ;;  %18298 = vmatprep.mubr.msk.bf16.mxu0 %vm273_vm3, %v7852_v16  ;;  %v23651_v59 = vadd.f32 %v20510_v53, %v7204_v27  ;;  %v7207_v7 = vmax.f32 %v7143_v63, 0.0  ;;  %v7859_v33 = vrot.slane %v7857_v49, 4  ;;  %v7141_v13 = vadd.f32 %v23569_v6, %v7072_v18  ;;  %v6932_v48 = vpop.f32.mrb[61].mxu1  ;;  %v20512_v63 = vld [vmem:[%s26304_s0 + $0x1d0] sm:$0xff] }
 0x662   :  { %v23656_v5 = vadd.f32 %v20511_v8, %v7202_v39  ;;  %v7863_v61 = vshrl.u32 %v23637_v26, 16  ;;  %v7866_v16 = vshll.u32 %v23637_v26, 16  ;;  %v26469_v39 = vshrl.u32 %v23644_v22, 16  ;;  %v18257_v53 = vpop.f32.mrb[62].mxu1 }
 0x663   :  { %26686 = vst [vmem:[#allocation58_spill] sm:$0xff] %v23651_v59  ;;  %v7304_v27 = vpack.c.bf16 %v23651_v59, %v23610_v20  ;;  %v23666_v52 = vadd.f32 %v20512_v63, %v7207_v7  ;;  %v7860_v49 = vor.u32 %v7859_v33, %v7856_v32  ;;  %v7205_v8 = vmax.f32 %v7141_v13, 0.0  ;;  %v6935_v14 = vpop.f32.mrb[63].mxu1  ;;  %v20513_v13 = vld [vmem:[%s26304_s0 + $0x1c0] sm:$0xff] }
 0x664   :  { %26687 = vst [vmem:[#allocation59_spill] sm:$0xff] %v23656_v5  ;;  %v7303_v18 = vpack.c.bf16 %v23656_v5, %v23631_v40  ;;  %v7865_v4 = vrot.slane %v7863_v61, 3  ;;  %v7868_v29 = vrot.slane %v7866_v16, 4  ;;  %v7873_v7 = vrot.slane %v26469_v39, 3 }
 0x665   :  { %26688 = vst [vmem:[#allocation60_spill] sm:$0xff] %v23666_v52  ;;  %v7388_v59 = vrot.slane %v7304_v27, 4  ;;  %v7861_v20 = vsel %vm479_vm5, %v7851_v24, %v7860_v49  ;;  %v26468_v32 = vshll.u32 %v23644_v22, 16  ;;  %v23681_v61 = vadd.f32 %v20513_v13, %v7205_v8 }
 0x666   :  { %v7386_v33 = vrot.slane %v7303_v18, 4  ;;  %18299 = vmatmul.mubr.msk.bf16.gmra.mrb[100].mxu0 %vm273_vm3, %v7861_v20  ;;  %v7869_v16 = vor.u32 %v7868_v29, %v7865_v4  ;;  %v7075_v27 = vmul.f32 %v23554_v55, %v23613_v2  ;;  %v7073_v63 = vmul.f32 %v23554_v55, %v6919_v28  ;;  %v23691_v18 = vld [vmem:[#allocation2 + $0xe0] sm:$0xff] }
 0x667   :  { %26689 = vst [vmem:[#allocation61_spill] sm:$0xff] %v23681_v61  ;;  %7471 = vst.msk [vmem:[#allocation2 + $0x110] sm:$0xf] %vm277_vm4, %v7388_v59  ;;  %v7876_v24 = vrot.slane %v26468_v32, 4  ;;  %v7078_v49 = vmul.f32 %v23554_v55, %v18256_v60  ;;  %v26473_v20 = vshrl.u32 %v23671_v47, 16  ;;  %v26470_v2 = vshll.u32 %v23671_v47, 16 }
 0x668   :  { %v7387_v8 = vsel %vm174_vm2, %v23622_v38, %v7386_v33  ;;  %v7389_v29 = vsel %vm174_vm2, %v7386_v33, %v7388_v59  ;;  %v7144_v4 = vadd.f32 %v23569_v6, %v7075_v27  ;;  %v7142_v60 = vadd.f32 %v23569_v6, %v7073_v63 }
 0x669   :  { %7469 = vst.msk [vmem:[#allocation2 + $0x100] sm:$0xff] %vm273_vm3, %v7387_v8  ;;  %7470 = vst.msk [vmem:[#allocation2 + $0x108] sm:$0xff] %vm273_vm3, %v7389_v29  ;;  %v7877_v28 = vor.u32 %v7876_v24, %v7873_v7  ;;  %v7147_v13 = vadd.f32 %v23569_v6, %v7078_v49  ;;  %v7882_v32 = vrot.slane %v26473_v20, 3  ;;  %v7885_v38 = vrot.slane %v26470_v2, 4  ;;  %v20514_v24 = vld [vmem:[%s26304_s0 + $0x1d8] sm:$0xff] }
 0x66a   :  { %v7208_v39 = vmax.f32 %v7144_v4, 0.0  ;;  %v7076_v59 = vmul.f32 %v23554_v55, %v6932_v48  ;;  %v26472_v33 = vshrl.u32 %v23691_v18, 16  ;;  %v7206_v8 = vmax.f32 %v7142_v60, 0.0  ;;  %v23719_v2 = vld [vmem:[#allocation2 + $0xe8] sm:$0xf]  ;;  %v23752_v20 = vld [vmem:[#allocation2 + $0xf8] sm:$0xff] }
 0x66b   :  { %v7878_v27 = vsel %vm479_vm5, %v7869_v16, %v7877_v28  ;;  %v7211_v29 = vmax.f32 %v7147_v13, 0.0  ;;  %v26471_v7 = vshll.u32 %v23691_v18, 16  ;;  %v7886_v49 = vor.u32 %v7885_v38, %v7882_v32  ;;  %v20515_v16 = vld [vmem:[%s26304_s0 + $0x1c8] sm:$0xff]  ;;  %v20516_v13 = vld [vmem:[%s26304_s0 + $0x1f0] sm:$0xff] }
 0x66c   :  { %18302 = vmatprep.mubr.msk.bf16.mxu0 %vm273_vm3, %v7878_v27  ;;  %v23714_v63 = vadd.f32 %v20514_v24, %v7208_v39  ;;  %v7145_v4 = vadd.f32 %v23569_v6, %v7076_v59  ;;  %v7891_v48 = vrot.slane %v26472_v33, 3  ;;  %v23724_v60 = vadd.f32 %v20515_v16, %v7206_v8  ;;  %v23743_v33 = vld [vmem:[#allocation2 + $0xf0] sm:$0xf8] }
 0x66d   :  { %v23729_v39 = vadd.f32 %v20516_v13, %v7211_v29  ;;  %v7894_v32 = vrot.slane %v26471_v7, 4  ;;  %v7079_v38 = vmul.f32 %v23554_v55, %v18257_v53  ;;  %v7887_v27 = vsel %vm479_vm5, %v7877_v28, %v7886_v49  ;;  %v20517_v28 = vld [vmem:[%s26304_s0 + $0x1e0] sm:$0xff] }
 0x66e   :  { %26690 = vst [vmem:[#allocation62_spill] sm:$0xff] %v23714_v63  ;;  %26691 = vst [vmem:[#allocation63_spill] sm:$0xff] %v23724_v60  ;;  %v7306_v59 = vpack.c.bf16 %v23714_v63, %v23666_v52  ;;  %v7209_v24 = vmax.f32 %v7145_v4, 0.0  ;;  %v7077_v8 = vmul.f32 %v23554_v55, %v6935_v14  ;;  %v7305_v16 = vpack.c.bf16 %v23724_v60, %v23681_v61 }
 0x66f   :  { %26692 = vst [vmem:[#allocation64_spill] sm:$0xff] %v23729_v39  ;;  %18303 = vmatmul.mubr.msk.bf16.gmra.mrb[104].mxu0 %vm273_vm3, %v7887_v27  ;;  %v7895_v29 = vor.u32 %v7894_v32, %v7891_v48  ;;  %v7148_v13 = vadd.f32 %v23569_v6, %v7079_v38  ;;  %v7898_v7 = vshrl.u32 %v23719_v2, 16  ;;  %v7901_v55 = vshll.u32 %v23719_v2, 16 }
 0x670   :  { %v7391_v53 = vrot.slane %v7306_v59, 4  ;;  %v23748_v4 = vadd.f32 %v20517_v28, %v7209_v24  ;;  %v7146_v14 = vadd.f32 %v23569_v6, %v7077_v8  ;;  %v7390_v48 = vrot.slane %v7305_v16, 4  ;;  %v23758_v28 = vld [vmem:[#allocation2 + $0x100] sm:$0xff]  ;;  %v23775_v63 = vld [vmem:[#allocation2 + $0x108] sm:$0xff] }
 0x671   :  { %v7896_v32 = vsel %vm479_vm5, %v7886_v49, %v7895_v29  ;;  %v7212_v38 = vmax.f32 %v7148_v13, 0.0  ;;  %v7900_v27 = vrot.slane %v7898_v7, 3  ;;  %v7903_v60 = vrot.slane %v7901_v55, 4  ;;  %v20518_v49 = vld [vmem:[%s26304_s0 + $0x1f8] sm:$0xff]  ;;  %v20519_v13 = vld [vmem:[%s26304_s0 + $0x1e8] sm:$0xff] }
 0x672   :  { %26693 = vst [vmem:[#allocation65_spill] sm:$0xff] %v23748_v4  ;;  %18306 = vmatprep.mubr.msk.bf16.mxu0 %vm273_vm3, %v7896_v32  ;;  %v7210_v59 = vmax.f32 %v7146_v14, 0.0  ;;  %v7907_v61 = vshrl.u32 %v23743_v33, 16  ;;  %v7910_v24 = vshll.u32 %v23743_v33, 16  ;;  %v7392_v6 = vsel %vm174_vm2, %v7390_v48, %v7391_v53  ;;  %7472 = vst.msk [vmem:[#allocation2 + $0x118] sm:$0xf0] %vm271_vm1, %v7390_v48 }
 0x673   :  { %v23765_v8 = vadd.f32 %v20518_v49, %v7212_v38  ;;  %v26478_v7 = vshrl.u32 %v23752_v20, 16  ;;  %v26480_v16 = vshll.u32 %v23752_v20, 16  ;;  %7473 = vst.msk [vmem:[#allocation2 + $0x120] sm:$0xff] %vm273_vm3, %v7392_v6  ;;  %v7904_v55 = vor.u32 %v7903_v60, %v7900_v27 }
 0x674   :  { %v23773_v14 = vadd.f32 %v20519_v13, %v7210_v59  ;;  %v7909_v48 = vrot.slane %v7907_v61, 3  ;;  %v7912_v32 = vrot.slane %v7910_v24, 4  ;;  %v26487_v52 = vshrl.u32 %v23758_v28, 16 }
 0x675   :  { %26694 = vst [vmem:[#allocation66_spill] sm:$0xff] %v23765_v8  ;;  %v7308_v38 = vpack.c.bf16 %v23765_v8, %v23729_v39  ;;  %v7917_v49 = vrot.slane %v26478_v7, 3  ;;  %v7920_v6 = vrot.slane %v26480_v16, 4  ;;  %v7905_v60 = vsel %vm479_vm5, %v7895_v29, %v7904_v55 }
 0x676   :  { %26695 = vst [vmem:[#allocation67_spill] sm:$0xff] %v23773_v14  ;;  %v7307_v59 = vpack.c.bf16 %v23773_v14, %v23748_v4  ;;  %v7913_v61 = vor.u32 %v7912_v32, %v7909_v48  ;;  %v26486_v27 = vshll.u32 %v23758_v28, 16  ;;  %v7926_v7 = vrot.slane %v26487_v52, 3  ;;  %v23795_v4 = vld [vmem:[#allocation2 + $0x110] sm:$0xf] }
 0x677   :  { %v7395_v24 = vrot.slane %v7308_v38, 4  ;;  %18307 = vmatmul.mubr.msk.bf16.gmra.mrb[108].mxu0 %vm273_vm3, %v7905_v60  ;;  %v7921_v13 = vor.u32 %v7920_v6, %v7917_v49  ;;  %v26485_v8 = vshrl.u32 %v23775_v63, 16  ;;  %v26484_v14 = vshll.u32 %v23775_v63, 16 }
 0x678   :  { %v7393_v16 = vrot.slane %v7307_v59, 4  ;;  %v7929_v39 = vrot.slane %v26486_v27, 4  ;;  %v7942_v59 = vshrl.u32 %v23795_v4, 16  ;;  %v7945_v60 = vshll.u32 %v23795_v4, 16 }
 0x679   :  { %7476 = vst.msk [vmem:[#allocation2 + $0x138] sm:$0xf] %vm277_vm4, %v7395_v24  ;;  %v7922_v29 = vsel %vm479_vm5, %v7913_v61, %v7921_v13  ;;  %v7935_v55 = vrot.slane %v26485_v8, 3  ;;  %v7938_v49 = vrot.slane %v26484_v14, 4  ;;  %v23806_v6 = vld [vmem:[#allocation2 + $0x118] sm:$0xf8] }
 0x67a   :  { %v7394_v48 = vsel %vm174_vm2, %v7391_v53, %v7393_v16  ;;  %v7396_v32 = vsel %vm174_vm2, %v7393_v16, %v7395_v24  ;;  %18310 = vmatprep.mubr.msk.bf16.mxu0 %vm273_vm3, %v7922_v29  ;;  %v7930_v38 = vor.u32 %v7929_v39, %v7926_v7  ;;  %v23812_v61 = vld [vmem:[#allocation2 + $0x120] sm:$0xff]  ;;  %v7951_v53 = vshrl.u32 %v23806_v6, 16 }
 0x67b   :  { %7474 = vst.msk [vmem:[#allocation2 + $0x128] sm:$0xff] %vm273_vm3, %v7394_v48  ;;  %7475 = vst.msk [vmem:[#allocation2 + $0x130] sm:$0xff] %vm273_vm3, %v7396_v32  ;;  %v7954_v16 = vshll.u32 %v23806_v6, 16  ;;  %v7939_v7 = vor.u32 %v7938_v49, %v7935_v55  ;;  %v26489_v24 = vshrl.u32 %v23812_v61, 16  ;;  %v26490_v29 = vshll.u32 %v23812_v61, 16 }
 0x67c   :  { %v7931_v39 = vsel %vm479_vm5, %v7921_v13, %v7930_v38  ;;  %v7953_v48 = vrot.slane %v7951_v53, 3  ;;  %v7944_v13 = vrot.slane %v7942_v59, 3  ;;  %v7947_v55 = vrot.slane %v7945_v60, 4 }
 0x67d   :  { %v7956_v14 = vrot.slane %v7954_v16, 4  ;;  %v7940_v32 = vsel %vm479_vm5, %v7930_v38, %v7939_v7  ;;  %v7961_v8 = vrot.slane %v26489_v24, 3  ;;  %v7964_v27 = vrot.slane %v26490_v29, 4 }
 0x67e   :  { %v7948_v40 = vor.u32 %v7947_v55, %v7944_v13 }
 0x67f   :  { %18311 = vmatmul.mubr.msk.bf16.gmra.mrb[112].mxu0 %vm273_vm3, %v7931_v39  ;;  %v7957_v49 = vor.u32 %v7956_v14, %v7953_v48  ;;  %v7965_v52 = vor.u32 %v7964_v27, %v7961_v8 }
 0x680   :  { %18314 = vmatprep.mubr.msk.bf16.mxu0 %vm273_vm3, %v7940_v32  ;;  %v7949_v60 = vsel %vm479_vm5, %v7939_v7, %v7948_v40  ;;  %v23846_v13 = vld [vmem:[#allocation2 + $0x138] sm:$0xf] }
 0x681   :  { %v7966_v39 = vsel %vm479_vm5, %v7957_v49, %v7965_v52  ;;  %v7986_v49 = vshrl.u32 %v23846_v13, 16 }
 0x682   :  { %v23826_v5 = vld [vmem:[#allocation2 + $0x128] sm:$0xff]  ;;  %v23828_v53 = vld [vmem:[#allocation2 + $0x130] sm:$0xff] }
 0x683   :  { %v26495_v38 = vshrl.u32 %v23826_v5, 16  ;;  %v26492_v16 = vshll.u32 %v23826_v5, 16  ;;  %v26493_v24 = vshrl.u32 %v23828_v53, 16  ;;  %v26494_v29 = vshll.u32 %v23828_v53, 16 }
 0x684   :  { %v7988_v40 = vrot.slane %v7986_v49, 3  ;;  %v20306_v49 = vld [vmem:[%s26305_s1 + $0xc8] sm:$0xff]  }
 0x685   :  { %v7970_v59 = vrot.slane %v26495_v38, 3  ;;  %v7973_v8 = vrot.slane %v26492_v16, 4  ;;  %v7979_v14 = vrot.slane %v26493_v24, 3  ;;  %v7982_v27 = vrot.slane %v26494_v29, 4  ;;  %v23893_v29 = vld [vmem:[#allocation2 + $0x40] sm:$0xff] }
 0x686   :  { %v7989_v16 = vshll.u32 %v23846_v13, 16  ;;  %v7571_v38 = vrot.slane %v23893_v29, 3 }
 0x687   :  { %18315 = vmatmul.mubr.msk.bf16.gmra.mrb[116].mxu0 %vm273_vm3, %v7949_v60  ;;  %v7974_v48 = vor.u32 %v7973_v8, %v7970_v59  ;;  %v7983_v32 = vor.u32 %v7982_v27, %v7979_v14  ;;  %v20520_v60 = vld [vmem:[#allocation2] sm:$0xf8]  ;;  %v23854_v59 = vld [vmem:[#allocation2 + $0x8] sm:$0xff] }
 0x688   :  { %18318 = vmatprep.mubr.msk.bf16.mxu0 %vm273_vm3, %v7966_v39  ;;  %v7991_v7 = vrot.slane %v7989_v16, 4  ;;  %v7557_v39 = vrot.slane %v20520_v60, 3  ;;  %v7558_v8 = vrot.slane %v23854_v59, 3  ;;  %v23864_v16 = vld [vmem:[#allocation2 + $0x18] sm:$0xff]  ;;  %v7481_v60 = vld [vmem:[#allocation2 + $0x20] sm:$0x7] }
 0x689   :  { %v7975_v55 = vsel %vm479_vm5, %v7965_v52, %v7974_v48  ;;  %v7984_v24 = vsel %vm479_vm5, %v7974_v48, %v7983_v32  ;;  %v23861_v48 = vld [vmem:[#allocation2 + $0x10] sm:$0xff] }
 0x68a   :  { %v7992_v14 = vor.u32 %v7991_v7, %v7988_v40  ;;  %v7559_v27 = vsel %vm394_vm6, %v7557_v39, %v7558_v8  ;;  %v20524_v7 = vld [vmem:[%s26305_s1 + $0xc0] sm:$0xff]   ;;  %v23880_v39 = vld [vmem:[%s26305_s1 + $0xd0] sm:$0xff]  }
 0x68c   :  { %v7993_v52 = vsel %vm479_vm5, %v7983_v32, %v7992_v14  ;;  %v20525_v14 = vld [vmem:[#allocation2 + $0x28] sm:$0xf8] }
 0x68f   :  { %18319 = vmatmul.mubr.msk.bf16.gmra.mrb[120].mxu0 %vm273_vm3, %v7975_v55  ;;  %v7562_v55 = vrot.slane %v23864_v16, 3 }
 0x690   :  { %18322 = vmatprep.mubr.msk.bf16.mxu0 %vm273_vm3, %v7984_v24  ;;  %v7560_v24 = vrot.slane %v23861_v48, 3 }
 0x692   :  { %v7561_v32 = vsel %vm394_vm6, %v7558_v8, %v7560_v24  ;;  %v7563_v40 = vsel %vm394_vm6, %v7560_v24, %v7562_v55  ;;  %v7566_v8 = vrot.slane %v20525_v14, 3  ;;  %v7564_v24 = vrot.slane %v7481_v60, 3  ;;  %v7486_v60 = vld [vmem:[#allocation2 + $0x48] sm:$0x7] }
 0x697   :  { %18323 = vmatmul.mubr.msk.bf16.gmra.mrb[124].mxu0 %vm273_vm3, %v7993_v52  ;;  %v23882_v52 = vld [vmem:[#allocation2 + $0x30] sm:$0xff] }
 0x698   :  { %18330 = vmatprep.mubr.msk.bf16.mxu0 %vm273_vm3, %v7559_v27  ;;  %v7567_v27 = vrot.slane %v23882_v52, 3 }
 0x69f   :  { %18331 = vmatmul.mubr.msk.bf16.vlgmr.msra.gmra.mrb[64].mxu0 %vm273_vm3, %v7561_v32  ;;  %v7565_v32 = vsel %vm394_vm6, %v7562_v55, %v7564_v24  ;;  %v7576_v24 = vrot.slane %v23286_v11, 3 }
 0x6a0   :  { %18395 = vmatpush3.bf16.msra.mxu0 %v20524_v7  ;;  %18334 = vmatprep.mubr.msk.bf16.mxu0 %vm273_vm3, %v7563_v40  ;;  %v7568_v40 = vsel %vm394_vm6, %v7566_v8, %v7567_v27  ;;  %v23890_v7 = vld [vmem:[#allocation2 + $0x38] sm:$0xff]  ;;  %v7575_v8 = vrot.slane %v23272_v58, 3 }
 0x6a1   :  { %18396 = vmatprep.subr.bf16.mxu0 %v20306_v49  ;;  %v7569_v14 = vrot.slane %v23890_v7, 3 }
 0x6a2   :  { %v7577_v51 = vsel %vm394_vm6, %v7575_v8, %v7576_v24 }
 0x6a3   :  { %v7572_v55 = vsel %vm394_vm6, %v7569_v14, %v7571_v38 }
 0x6a4   :  { %18397 = vmatpush3.bf16.msra.mxu0 %v20306_v49  ;;  %v7570_v49 = vsel %vm394_vm6, %v7567_v27, %v7569_v14  ;;  %v7578_v27 = vrot.slane %v23316_v62, 3  ;;  %v7580_v14 = vrot.slane %v23341_v35, 3 }
 0x6a5   :  { %18462 = vmatprep.subr.bf16.mxu0 %v23880_v39 }
 0x6a6   :  { %v7581_v58 = vsel %vm394_vm6, %v7578_v27, %v7580_v14 }
 0x6a7   :  { %18335 = vmatmul.mubr.msk.bf16.gmra.mrb[68].mxu0 %vm273_vm3, %v7565_v32  ;;  %v7573_v32 = vrot.slane %v7486_v60, 3  ;;  %v7585_v60 = vrot.slane %v23399_v42, 3 }
 0x6a8   :  { %18338 = vmatprep.mubr.msk.bf16.mxu0 %vm273_vm3, %v7568_v40 }
 0x6a9   :  { %v7574_v40 = vsel %vm394_vm6, %v7571_v38, %v7573_v32  ;;  %v7584_v38 = vrot.slane %v23390_v36, 3 }
 0x6ab   :  { %v7586_v32 = vsel %vm394_vm6, %v7584_v38, %v7585_v60 }
 0x6af   :  { %18339 = vmatmul.mubr.msk.bf16.gmra.mrb[72].mxu0 %vm273_vm3, %v7570_v49  ;;  %v7579_v49 = vsel %vm394_vm6, %v7576_v24, %v7578_v27  ;;  %v7587_v24 = vrot.slane %v23431_v45, 3 }
 0x6b0   :  { %18342 = vmatprep.mubr.msk.bf16.mxu0 %vm273_vm3, %v7572_v55  ;;  %v7491_v55 = vld [vmem:[#allocation2 + $0x70] sm:$0x7] }
 0x6b1   :  { %v7582_v8 = vrot.slane %v7491_v55, 3  ;;  %v7588_v27 = vsel %vm394_vm6, %v7585_v60, %v7587_v24  ;;  %v7596_v60 = vrot.slane %v23548_v46, 3 }
 0x6b7   :  { %18343 = vmatmul.mubr.msk.bf16.gmra.mrb[76].mxu0 %vm273_vm3, %v7574_v40  ;;  %v7589_v40 = vrot.slane %v23454_v17, 3 }
 0x6b8   :  { %18346 = vmatprep.mubr.msk.bf16.mxu0 %vm273_vm3, %v7577_v51  ;;  %v7583_v51 = vsel %vm394_vm6, %v7580_v14, %v7582_v8  ;;  %v7593_v14 = vrot.slane %v23504_v57, 3 }
 0x6b9   :  { %v7590_v36 = vsel %vm394_vm6, %v7587_v24, %v7589_v40  ;;  %v7501_v24 = vld [vmem:[#allocation2 + $0xc0] sm:$0x7] }
 0x6bf   :  { %18347 = vmatmul.mubr.msk.bf16.gmra.mrb[80].mxu0 %vm273_vm3, %v7579_v49  ;;  %v7496_v49 = vld [vmem:[#allocation2 + $0x98] sm:$0x7] }
 0x6c0   :  { %18350 = vmatprep.mubr.msk.bf16.mxu0 %vm273_vm3, %v7581_v58  ;;  %v7594_v58 = vrot.slane %v23513_v54, 3  ;;  %v7591_v55 = vrot.slane %v7496_v49, 3 }
 0x6c2   :  { %v7592_v38 = vsel %vm394_vm6, %v7589_v40, %v7591_v55  ;;  %v7595_v8 = vsel %vm394_vm6, %v7593_v14, %v7594_v58  ;;  %v7602_v40 = vrot.slane %v23637_v26, 3  ;;  %v7607_v55 = vrot.slane %v23691_v18, 3 }
 0x6c7   :  { %18351 = vmatmul.mubr.msk.bf16.gmra.mrb[84].mxu0 %vm273_vm3, %v7583_v51  ;;  %v7598_v51 = vrot.slane %v23573_v12, 3 }
 0x6c8   :  { %18354 = vmatprep.mubr.msk.bf16.mxu0 %vm273_vm3, %v7586_v32  ;;  %v7597_v32 = vsel %vm394_vm6, %v7594_v58, %v7596_v60  ;;  %v7605_v58 = vrot.slane %v23671_v47, 3 }
 0x6c9   :  { %v7599_v57 = vsel %vm394_vm6, %v7596_v60, %v7598_v51  ;;  %v7611_v60 = vrot.slane %v23743_v33, 3 }
 0x6ca   :  { %v7608_v26 = vsel %vm394_vm6, %v7605_v58, %v7607_v55 }
 0x6cf   :  { %18355 = vmatmul.mubr.msk.bf16.gmra.mrb[88].mxu0 %vm273_vm3, %v7588_v27  ;;  %v7603_v27 = vrot.slane %v23644_v22, 3 }
 0x6d0   :  { %18358 = vmatprep.mubr.msk.bf16.mxu0 %vm273_vm3, %v7590_v36  ;;  %v7600_v36 = vrot.slane %v7501_v24, 3 }
 0x6d1   :  { %v7604_v14 = vsel %vm394_vm6, %v7602_v40, %v7603_v27  ;;  %v7614_v40 = vrot.slane %v23758_v28, 3 }
 0x6d2   :  { %v7601_v49 = vsel %vm394_vm6, %v7598_v51, %v7600_v36  ;;  %v7612_v51 = vrot.slane %v23752_v20, 3 }
 0x6d4   :  { %v7613_v24 = vsel %vm394_vm6, %v7611_v60, %v7612_v51  ;;  %v7615_v36 = vsel %vm394_vm6, %v7612_v51, %v7614_v40  ;;  %v7625_v60 = vrot.slane %v23828_v53, 3 }
 0x6d7   :  { %18359 = vmatmul.mubr.msk.bf16.gmra.mrb[92].mxu0 %vm273_vm3, %v7592_v38  ;;  %v7606_v38 = vsel %vm394_vm6, %v7603_v27, %v7605_v58  ;;  %v7616_v27 = vrot.slane %v23775_v63, 3  ;;  %v7621_v58 = vrot.slane %v23812_v61, 3 }
 0x6d8   :  { %18362 = vmatprep.mubr.msk.bf16.mxu0 %vm273_vm3, %v7595_v8  ;;  %v7506_v8 = vld [vmem:[#allocation2 + $0xe8] sm:$0x7] }
 0x6d9   :  { %v7617_v33 = vsel %vm394_vm6, %v7614_v40, %v7616_v27  ;;  %v8818_v40 = vrot.slane %v23854_v59, 4 }
 0x6df   :  { %18363 = vmatmul.mubr.msk.bf16.gmra.mrb[96].mxu0 %vm273_vm3, %v7597_v32  ;;  %v7609_v32 = vrot.slane %v7506_v8, 3  ;;  %v7623_v8 = vrot.slane %v23826_v5, 3 }
 0x6e0   :  { %18366 = vmatprep.mubr.msk.bf16.mxu0 %vm273_vm3, %v7599_v57 }
 0x6e1   :  { %v7610_v57 = vsel %vm394_vm6, %v7607_v55, %v7609_v32  ;;  %v7624_v51 = vsel %vm394_vm6, %v7621_v58, %v7623_v8  ;;  %v23972_v32 = vld [vmem:[#allocation2] sm:$0xf0] }
 0x6e7   :  { %18367 = vmatmul.mubr.msk.bf16.gmra.mrb[100].mxu0 %vm273_vm3, %v7601_v49  ;;  %v7511_v49 = vld [vmem:[#allocation2 + $0x110] sm:$0x7] }
 0x6e8   :  { %18370 = vmatprep.mubr.msk.bf16.mxu0 %vm273_vm3, %v7604_v14  ;;  %v7620_v14 = vrot.slane %v23806_v6, 3  ;;  %v7618_v55 = vrot.slane %v7511_v49, 3  ;;  %v7626_v6 = vsel %vm394_vm6, %v7623_v8, %v7625_v60  ;;  %v8820_v49 = vrot.slane %v23861_v48, 4  ;;  %v23995_v8 = vld [vmem:[%s26305_s1 + $0xe0] sm:$0xff]  }
 0x6ef   :  { %18371 = vmatmul.mubr.msk.bf16.gmra.mrb[104].mxu0 %vm273_vm3, %v7606_v38  ;;  %v7619_v38 = vsel %vm394_vm6, %v7616_v27, %v7618_v55  ;;  %v8821_v55 = vsel %vm174_vm2, %v8818_v40, %v8820_v49 }
 0x6f0   :  { %18374 = vmatprep.mubr.msk.bf16.mxu0 %vm273_vm3, %v7608_v26  ;;  %v7622_v26 = vsel %vm394_vm6, %v7620_v14, %v7621_v58  ;;  %v8822_v14 = vrot.slane %v23864_v16, 4  ;;  %v20308_v58 = vld [vmem:[%s26305_s1 + $0xd8] sm:$0xff]  }
 0x6f7   :  { %18375 = vmatmul.mubr.msk.bf16.gmra.mrb[108].mxu0 %vm273_vm3, %v7610_v57  ;;  %v7516_v57 = vld [vmem:[#allocation2 + $0x138] sm:$0x7] }
 0x6f8   :  { %18378 = vmatprep.mubr.msk.bf16.mxu0 %vm273_vm3, %v7613_v24  ;;  %v8817_v24 = vrot.slane %v23972_v32, 4  ;;  %v7627_v27 = vrot.slane %v7516_v57, 3 }
 0x6ff   :  { %18379 = vmatmul.mubr.msk.bf16.gmra.mrb[112].mxu0 %vm273_vm3, %v7615_v36  ;;  %v7628_v36 = vsel %vm394_vm6, %v7625_v60, %v7627_v27  ;;  %v8831_v27 = vrot.slane %v23893_v29, 4 }
 0x700   :  { %18382 = vmatprep.mubr.msk.bf16.mxu0 %vm273_vm3, %v7617_v33  ;;  %v8819_v33 = vsel %vm174_vm2, %v8817_v24, %v8818_v40  ;;  %v8829_v40 = vrot.slane %v23890_v7, 4 }
 0x707   :  { %18383 = vmatmul.mubr.msk.bf16.gmra.mrb[116].mxu0 %vm273_vm3, %v7619_v38  ;;  %v8823_v38 = vsel %vm174_vm2, %v8820_v49, %v8822_v14  ;;  %v24010_v49 = vld [vmem:[#allocation2 + $0x50] sm:$0xf0] }
 0x708   :  { %18386 = vmatprep.mubr.msk.bf16.mxu0 %vm273_vm3, %v7622_v26  ;;  %v23990_v26 = vld [vmem:[#allocation2 + $0x28] sm:$0xf0] }
 0x709   :  { %v8826_v60 = vrot.slane %v23990_v26, 4 }
 0x70f   :  { %18387 = vmatmul.mubr.msk.bf16.gmra.mrb[120].mxu0 %vm273_vm3, %v7624_v51  ;;  %v8827_v51 = vrot.slane %v23882_v52, 4 }
 0x710   :  { %18390 = vmatprep.mubr.msk.bf16.mxu0 %vm273_vm3, %v7626_v6  ;;  %v20529_v6 = vld [vmem:[#allocation2 + $0x20] sm:$0xf] }
 0x711   :  { %v8824_v57 = vrot.slane %v20529_v6, 4  ;;  %v8828_v24 = vsel %vm174_vm2, %v8826_v60, %v8827_v51 }
 0x717   :  { %18391 = vmatmul.mubr.msk.bf16.gmra.mrb[124].mxu0 %vm273_vm3, %v7628_v36  ;;  %v8830_v36 = vsel %vm174_vm2, %v8827_v51, %v8829_v40 }
 0x718   :  { %18398 = vmatprep.mubr.msk.bf16.mxu0 %vm273_vm3, %v8819_v33  ;;  %v8832_v33 = vsel %vm174_vm2, %v8829_v40, %v8831_v27 }
 0x71f   :  { %18399 = vmatmul.mubr.msk.bf16.vlgmr.msra.gmra.mrb[64].mxu0 %vm273_vm3, %v8821_v55 }
 0x720   :  { %18463 = vmatpush3.bf16.msra.mxu0 %v23880_v39  ;;  %18402 = vmatprep.mubr.msk.bf16.mxu0 %vm273_vm3, %v8823_v38  ;;  %v8825_v39 = vsel %vm174_vm2, %v8822_v14, %v8824_v57  ;;  %v8835_v14 = vrot.slane %v24010_v49, 4  ;;  %v20531_v38 = vld [vmem:[#allocation2 + $0x48] sm:$0xf]  ;;  %v24020_v57 = vld [vmem:[#allocation2 + $0x60] sm:$0xff] }
 0x721   :  { %18464 = vmatprep.subr.bf16.mxu0 %v20308_v58  ;;  %v8833_v60 = vrot.slane %v20531_v38, 4  ;;  %v24033_v38 = vld [vmem:[#allocation2 + $0x80] sm:$0xff] }
 0x723   :  { %v8834_v6 = vsel %vm174_vm2, %v8831_v27, %v8833_v60  ;;  %v8845_v60 = vrot.slane %v24033_v38, 4 }
 0x724   :  { %18465 = vmatpush3.bf16.msra.mxu0 %v20308_v58  ;;  %v24013_v58 = vld [vmem:[#allocation2 + $0x58] sm:$0xff] }
 0x725   :  { %18530 = vmatprep.subr.bf16.mxu0 %v23995_v8  ;;  %v8836_v55 = vrot.slane %v24013_v58, 4 }
 0x727   :  { %18403 = vmatmul.mubr.msk.bf16.gmra.mrb[68].mxu0 %vm273_vm3, %v8825_v39  ;;  %v8837_v51 = vsel %vm174_vm2, %v8835_v14, %v8836_v55  ;;  %v8838_v39 = vrot.slane %v24020_v57, 4 }
 0x728   :  { %18406 = vmatprep.mubr.msk.bf16.mxu0 %vm273_vm3, %v8828_v24  ;;  %v24023_v24 = vld [vmem:[#allocation2 + $0x68] sm:$0xff] }
 0x729   :  { %v8840_v40 = vrot.slane %v24023_v24, 4 }
 0x72b   :  { %v8841_v27 = vsel %vm174_vm2, %v8838_v39, %v8840_v40 }
 0x72f   :  { %18407 = vmatmul.mubr.msk.bf16.gmra.mrb[72].mxu0 %vm273_vm3, %v8830_v36  ;;  %v8839_v36 = vsel %vm174_vm2, %v8836_v55, %v8838_v39  ;;  %v24040_v39 = vld [vmem:[#allocation2 + $0x88] sm:$0xff] }
 0x730   :  { %18410 = vmatprep.mubr.msk.bf16.mxu0 %vm273_vm3, %v8832_v33  ;;  %v24030_v33 = vld [vmem:[#allocation2 + $0x78] sm:$0xf0] }
 0x731   :  { %v8844_v14 = vrot.slane %v24030_v33, 4 }
 0x733   :  { %v8846_v55 = vsel %vm174_vm2, %v8844_v14, %v8845_v60  ;;  %v8854_v14 = vrot.slane %v23513_v54, 4 }
 0x737   :  { %18411 = vmatmul.mubr.msk.bf16.gmra.mrb[76].mxu0 %vm273_vm3, %v8834_v6  ;;  %v20535_v6 = vld [vmem:[#allocation2 + $0x70] sm:$0xf] }
 0x738   :  { %18414 = vmatprep.mubr.msk.bf16.mxu0 %vm273_vm3, %v8837_v51  ;;  %v8842_v51 = vrot.slane %v20535_v6, 4 }
 0x73a   :  { %v8843_v50 = vsel %vm174_vm2, %v8840_v40, %v8842_v51  ;;  %v24048_v40 = vld [vmem:[#allocation2 + $0xa0] sm:$0xf0]  ;;  %v8851_v51 = vrot.slane %v23491_v9, 4  ;;  %v24063_v9 = vld [vmem:[#allocation2 + $0xc8] sm:$0xf0] }
 0x73f   :  { %18415 = vmatmul.mubr.msk.bf16.gmra.mrb[80].mxu0 %vm273_vm3, %v8839_v36  ;;  %v8847_v36 = vrot.slane %v24040_v39, 4 }
 0x740   :  { %18418 = vmatprep.mubr.msk.bf16.mxu0 %vm273_vm3, %v8841_v27  ;;  %v8849_v27 = vrot.slane %v23454_v17, 4 }
 0x741   :  { %v8848_v10 = vsel %vm174_vm2, %v8845_v60, %v8847_v36 }
 0x742   :  { %v8850_v6 = vsel %vm174_vm2, %v8847_v36, %v8849_v27  ;;  %v8858_v36 = vrot.slane %v23573_v12, 4 }
 0x747   :  { %18419 = vmatmul.mubr.msk.bf16.gmra.mrb[84].mxu0 %vm273_vm3, %v8843_v50  ;;  %v8853_v50 = vrot.slane %v24048_v40, 4 }
 0x748   :  { %18422 = vmatprep.mubr.msk.bf16.mxu0 %vm273_vm3, %v8846_v55  ;;  %v8852_v55 = vsel %vm174_vm2, %v8849_v27, %v8851_v51  ;;  %v8862_v27 = vrot.slane %v24063_v9, 4  ;;  %v8860_v51 = vrot.slane %v23620_v30, 4  ;;  %v24078_v30 = vld [vmem:[#allocation2 + $0xf0] sm:$0xf0] }
 0x749   :  { %v8855_v60 = vsel %vm174_vm2, %v8853_v50, %v8854_v14  ;;  %v8863_v50 = vrot.slane %v23644_v22, 4 }
 0x74f   :  { %18423 = vmatmul.mubr.msk.bf16.gmra.mrb[88].mxu0 %vm273_vm3, %v8848_v10  ;;  %v8856_v10 = vrot.slane %v23548_v46, 4 }
 0x750   :  { %18426 = vmatprep.mubr.msk.bf16.mxu0 %vm273_vm3, %v8850_v6 }
 0x751   :  { %v8857_v6 = vsel %vm174_vm2, %v8854_v14, %v8856_v10  ;;  %v8859_v0 = vsel %vm174_vm2, %v8856_v10, %v8858_v36  ;;  %v8864_v14 = vsel %vm174_vm2, %v8862_v27, %v8863_v50  ;;  %v8872_v27 = vrot.slane %v23752_v20, 4 }
 0x757   :  { %18427 = vmatmul.mubr.msk.bf16.gmra.mrb[92].mxu0 %vm273_vm3, %v8852_v55  ;;  %v8861_v55 = vsel %vm174_vm2, %v8858_v36, %v8860_v51  ;;  %v8871_v36 = vrot.slane %v24078_v30, 4  ;;  %v8869_v51 = vrot.slane %v23719_v2, 4  ;;  %v24093_v2 = vld [vmem:[#allocation2 + $0x118] sm:$0xf0] }
 0x758   :  { %18430 = vmatprep.mubr.msk.bf16.mxu0 %vm273_vm3, %v8855_v60  ;;  %v8865_v60 = vrot.slane %v23671_v47, 4 }
 0x75a   :  { %v8866_v10 = vsel %vm174_vm2, %v8863_v50, %v8865_v60  ;;  %v8873_v50 = vsel %vm174_vm2, %v8871_v36, %v8872_v27  ;;  %v8881_v36 = vrot.slane %v23812_v61, 4 }
 0x75f   :  { %18431 = vmatmul.mubr.msk.bf16.gmra.mrb[96].mxu0 %vm273_vm3, %v8857_v6 }
 0x760   :  { %18434 = vmatprep.mubr.msk.bf16.mxu0 %vm273_vm3, %v8859_v0  ;;  %v8867_v0 = vrot.slane %v23691_v18, 4 }
 0x762   :  { %v8868_v6 = vsel %vm174_vm2, %v8865_v60, %v8867_v0  ;;  %v8876_v60 = vrot.slane %v23775_v63, 4 }
 0x767   :  { %18435 = vmatmul.mubr.msk.bf16.gmra.mrb[100].mxu0 %vm273_vm3, %v8861_v55  ;;  %v8870_v55 = vsel %vm174_vm2, %v8867_v0, %v8869_v51  ;;  %v8880_v0 = vrot.slane %v24093_v2, 4  ;;  %v8878_v51 = vrot.slane %v23795_v4, 4  ;;  %v26696_v4 = vshrl.u32 %v23026_v44, 16 }
 0x768   :  { %18438 = vmatprep.mubr.msk.bf16.mxu0 %vm273_vm3, %v8864_v14  ;;  %v8874_v14 = vrot.slane %v23758_v28, 4 }
 0x769   :  { %v9371_v15 = vrot.slane %v26696_v4, 4  ;;  %v9375_v4 = vrot.slane %v26698_v56, 4  ;;  %v9393_v56 = vshrl.u32 %v23990_v26, 16 }
 0x76f   :  { %18439 = vmatmul.mubr.msk.bf16.gmra.mrb[104].mxu0 %vm273_vm3, %v8866_v10  ;;  %v8875_v10 = vsel %vm174_vm2, %v8872_v27, %v8874_v14  ;;  %v8882_v27 = vsel %vm174_vm2, %v8880_v0, %v8881_v36 }
 0x770   :  { %18442 = vmatprep.mubr.msk.bf16.mxu0 %vm273_vm3, %v8868_v6  ;;  %v8877_v6 = vsel %vm174_vm2, %v8874_v14, %v8876_v60  ;;  %v8885_v14 = vrot.slane %v23828_v53, 4 }
 0x777   :  { %18443 = vmatmul.mubr.msk.bf16.gmra.mrb[108].mxu0 %vm273_vm3, %v8870_v55  ;;  %v8879_v55 = vsel %vm174_vm2, %v8876_v60, %v8878_v51 }
 0x778   :  { %18446 = vmatprep.mubr.msk.bf16.mxu0 %vm273_vm3, %v8873_v50  ;;  %v8883_v50 = vrot.slane %v23826_v5, 4 }
 0x77a   :  { %v8884_v23 = vsel %vm174_vm2, %v8881_v36, %v8883_v50  ;;  %v8886_v60 = vsel %vm174_vm2, %v8883_v50, %v8885_v14 }
 0x77f   :  { %18447 = vmatmul.mubr.msk.bf16.gmra.mrb[112].mxu0 %vm273_vm3, %v8875_v10  ;;  %v9364_v10 = vshrl.u32 %v23972_v32, 16 }
 0x780   :  { %18450 = vmatprep.mubr.msk.bf16.mxu0 %vm273_vm3, %v8877_v6  ;;  %v9367_v6 = vshll.u32 %v23972_v32, 16  ;;  %v8887_v32 = vrot.slane %v23846_v13, 4  ;;  %v24127_v13 = vld [vmem:[#allocation2 + $0x20] sm:$0x1f] }
 0x781   :  { %v9366_v0 = vrot.slane %v9364_v10, 4 }
 0x782   :  { %v9369_v51 = vrot.slane %v9367_v6, 5  ;;  %v8888_v36 = vsel %vm174_vm2, %v8885_v14, %v8887_v32  ;;  %v26701_v6 = vshll.u32 %v23075_v34, 16  ;;  %v26702_v32 = vshrl.u32 %v23162_v41, 16 }
 0x784   :  { %v9370_v43 = vor.u32 %v9369_v51, %v9366_v0  ;;  %v9384_v0 = vshrl.u32 %v24127_v13, 16  ;;  %v20310_v51 = vld [vmem:[%s26305_s1 + $0xe8] sm:$0xff]  }
 0x787   :  { %18451 = vmatmul.mubr.msk.bf16.gmra.mrb[116].mxu0 %vm273_vm3, %v8879_v55  ;;  %v26697_v55 = vshll.u32 %v23026_v44, 16  ;;  %v26700_v44 = vshrl.u32 %v23075_v34, 16 }
 0x788   :  { %18454 = vmatprep.mubr.msk.bf16.mxu0 %vm273_vm3, %v8882_v27 }
 0x789   :  { %v9372_v27 = vrot.slane %v26697_v55, 5  ;;  %v9379_v10 = vrot.slane %v26700_v44, 4  ;;  %v9395_v55 = vrot.slane %v9393_v56, 4  ;;  %v26705_v56 = vshll.u32 %v23201_v31, 16 }
 0x78b   :  { %v9373_v37 = vor.u32 %v9372_v27, %v9371_v15  ;;  %v9380_v15 = vrot.slane %v26701_v6, 5  ;;  %v26704_v6 = vshrl.u32 %v23201_v31, 16  ;;  %v9425_v31 = vshll.u32 %v24010_v49, 16 }
 0x78d   :  { %v9374_v50 = vsel %vm2201_vm8, %v9370_v43, %v9373_v37  ;;  %v9387_v43 = vshll.u32 %v24127_v13, 16 }
 0x78f   :  { %18455 = vmatmul.mubr.msk.bf16.gmra.mrb[120].mxu0 %vm273_vm3, %v8884_v23  ;;  %v26699_v23 = vshll.u32 %v23073_v25, 16  ;;  %v9396_v25 = vshll.u32 %v23990_v26, 16  ;;  %v26703_v26 = vshll.u32 %v23162_v41, 16  ;;  %v9405_v41 = vrot.slane %v26705_v56, 5 }
 0x790   :  { %18458 = vmatprep.mubr.msk.bf16.mxu0 %vm273_vm3, %v8886_v60  ;;  %v9381_v60 = vor.u32 %v9380_v15, %v9379_v10  ;;  %v9404_v15 = vrot.slane %v26704_v6, 4 }
 0x791   :  { %v9376_v3 = vrot.slane %v26699_v23, 5  ;;  %v9398_v27 = vrot.slane %v9396_v25, 5  ;;  %v9386_v23 = vrot.slane %v9384_v0, 4  ;;  %v26706_v25 = vshrl.u32 %v23225_v19, 16 }
 0x793   :  { %v9377_v14 = vor.u32 %v9376_v3, %v9375_v4  ;;  %v9401_v4 = vrot.slane %v26703_v26, 5 }
 0x795   :  { %v9378_v34 = vsel %vm2201_vm8, %v9373_v37, %v9377_v14  ;;  %v9382_v3 = vsel %vm2201_vm8, %v9377_v14, %v9381_v60  ;;  %v9399_v37 = vor.u32 %v9398_v27, %v9395_v55  ;;  %v9406_v55 = vor.u32 %v9405_v41, %v9404_v15 }
 0x797   :  { %18459 = vmatmul.mubr.msk.bf16.gmra.mrb[124].mxu0 %vm273_vm3, %v8888_v36  ;;  %v9400_v36 = vrot.slane %v26702_v32, 4 }
 0x798   :  { %18466 = vmatprep.mubr.msk.bf16.mxu0 %vm273_vm3, %v9374_v50  ;;  %v9389_v50 = vrot.slane %v9387_v43, 5 }
 0x799   :  { %v9402_v44 = vor.u32 %v9401_v4, %v9400_v36  ;;  %v9427_v4 = vrot.slane %v9425_v31, 5  ;;  %v24183_v31 = vld [vmem:[#allocation2 + $0x70] sm:$0x1f] }
 0x79a   :  { %v9390_v10 = vor.u32 %v9389_v50, %v9386_v23  ;;  %v26708_v23 = vshrl.u32 %v23286_v11, 16 }
 0x79b   :  { %v9403_v43 = vsel %vm2201_vm8, %v9399_v37, %v9402_v44  ;;  %v26709_v37 = vshll.u32 %v23286_v11, 16  ;;  %v26713_v11 = vshll.u32 %v23341_v35, 16 }
 0x79c   :  { %v9391_v14 = vsel %vm2201_vm8, %v9381_v60, %v9390_v10  ;;  %v9422_v60 = vshrl.u32 %v24010_v49, 16  ;;  %v9429_v50 = vrot.slane %v26708_v23, 4 }
 0x79d   :  { %v9430_v10 = vrot.slane %v26709_v37, 5 }
 0x79e   :  { %v9424_v26 = vrot.slane %v9422_v60, 4 }
 0x79f   :  { %18467 = vmatmul.mubr.msk.bf16.vlgmr.msra.gmra.mrb[64].mxu0 %vm273_vm3, %v9378_v34  ;;  %v26707_v34 = vshll.u32 %v23225_v19, 16  ;;  %v9407_v19 = vsel %vm2201_vm8, %v9402_v44, %v9406_v55  ;;  %v26710_v44 = vshrl.u32 %v23316_v62, 16 }
 0x7a0   :  { %18531 = vmatpush3.bf16.msra.mxu0 %v23995_v8  ;;  %18470 = vmatprep.mubr.msk.bf16.mxu0 %vm273_vm3, %v9382_v3  ;;  %v9408_v8 = vrot.slane %v26706_v25, 4  ;;  %v9428_v15 = vor.u32 %v9427_v4, %v9424_v26 }
 0x7a1   :  { %18532 = vmatprep.subr.bf16.mxu0 %v20310_v51  ;;  %v9409_v0 = vrot.slane %v26707_v34, 5  ;;  %v9433_v41 = vrot.slane %v26710_v44, 4 }
 0x7a3   :  { %v9410_v3 = vor.u32 %v9409_v0, %v9408_v8  ;;  %v26711_v8 = vshll.u32 %v23316_v62, 16  ;;  %v26712_v0 = vshrl.u32 %v23341_v35, 16  ;;  %v9454_v62 = vshll.u32 %v24030_v33, 16 }
 0x7a4   :  { %18533 = vmatpush3.bf16.msra.mxu0 %v20310_v51  ;;  %v24157_v51 = vld [vmem:[#allocation2 + $0x48] sm:$0x1f] }
 0x7a5   :  { %v9413_v27 = vshrl.u32 %v24157_v51, 16  ;;  %v9416_v32 = vshll.u32 %v24157_v51, 16  ;;  %v9411_v36 = vsel %vm2201_vm8, %v9406_v55, %v9410_v3  ;;  %v9434_v34 = vrot.slane %v26711_v8, 5 }
 0x7a6   :  { %v9438_v55 = vrot.slane %v26713_v11, 5  ;;  %v9456_v23 = vrot.slane %v9454_v62, 5  ;;  %v26717_v8 = vshll.u32 %v23431_v45, 16 }
 0x7a7   :  { %18471 = vmatmul.mubr.msk.bf16.gmra.mrb[68].mxu0 %vm273_vm3, %v9391_v14  ;;  %v9415_v49 = vrot.slane %v9413_v27, 4  ;;  %v9418_v6 = vrot.slane %v9416_v32, 5  ;;  %v9431_v14 = vor.u32 %v9430_v10, %v9429_v50  ;;  %v9435_v27 = vor.u32 %v9434_v34, %v9433_v41 }
 0x7a8   :  { %18474 = vmatprep.mubr.msk.bf16.mxu0 %vm273_vm3, %v9403_v43  ;;  %v9437_v43 = vrot.slane %v26712_v0, 4  ;;  %v26714_v50 = vshrl.u32 %v23399_v42, 16  ;;  %v26715_v10 = vshll.u32 %v23399_v42, 16  ;;  %v9463_v34 = vrot.slane %v26717_v8, 5 }
 0x7a9   :  { %v9419_v56 = vor.u32 %v9418_v6, %v9415_v49  ;;  %v9432_v60 = vsel %vm2201_vm8, %v9428_v15, %v9431_v14  ;;  %v9436_v35 = vsel %vm2201_vm8, %v9431_v14, %v9435_v27  ;;  %v26716_v14 = vshrl.u32 %v23431_v45, 16 }
 0x7aa   :  { %v9439_v32 = vor.u32 %v9438_v55, %v9437_v43  ;;  %v9458_v37 = vrot.slane %v26714_v50, 4  ;;  %v9459_v49 = vrot.slane %v26715_v10, 5  ;;  %v26718_v0 = vshrl.u32 %v23454_v17, 16 }
 0x7ab   :  { %v9420_v25 = vsel %vm2201_vm8, %v9410_v3, %v9419_v56  ;;  %v9451_v3 = vshrl.u32 %v24030_v33, 16  ;;  %v9462_v41 = vrot.slane %v26716_v14, 4  ;;  %v26719_v42 = vshll.u32 %v23454_v17, 16 }
 0x7ac   :  { %v9440_v26 = vsel %vm2201_vm8, %v9435_v27, %v9439_v32  ;;  %v9460_v56 = vor.u32 %v9459_v49, %v9458_v37  ;;  %v9466_v43 = vrot.slane %v26718_v0, 4  ;;  %v9483_v45 = vshll.u32 %v24048_v40, 16 }
 0x7ad   :  { %v9453_v4 = vrot.slane %v9451_v3, 4  ;;  %v9467_v11 = vrot.slane %v26719_v42, 5  ;;  %v9464_v27 = vor.u32 %v9463_v34, %v9462_v41  ;;  %v26721_v50 = vshll.u32 %v23513_v54, 16 }
 0x7ae   :  { %v26723_v14 = vshll.u32 %v23548_v46, 16  ;;  %v26725_v34 = vshll.u32 %v23573_v12, 16 }
 0x7af   :  { %18475 = vmatmul.mubr.msk.bf16.gmra.mrb[72].mxu0 %vm273_vm3, %v9407_v19  ;;  %v9442_v19 = vshrl.u32 %v24183_v31, 16  ;;  %v9457_v15 = vor.u32 %v9456_v23, %v9453_v4  ;;  %v9468_v3 = vor.u32 %v9467_v11, %v9466_v43  ;;  %v9465_v17 = vsel %vm2201_vm8, %v9460_v56, %v9464_v27  ;;  %v24235_v43 = vld [vmem:[#allocation2 + $0xc0] sm:$0x1f] }
 0x7b0   :  { %18478 = vmatprep.mubr.msk.bf16.mxu0 %vm273_vm3, %v9411_v36  ;;  %v9445_v36 = vshll.u32 %v24183_v31, 16  ;;  %v26720_v4 = vshrl.u32 %v23513_v54, 16  ;;  %v9488_v37 = vrot.slane %v26721_v50, 5  ;;  %v9492_v41 = vrot.slane %v26723_v14, 5  ;;  %v24261_v14 = vld [vmem:[#allocation2 + $0xe8] sm:$0x1f] }
 0x7b1   :  { %v9444_v33 = vrot.slane %v9442_v19, 4  ;;  %v9461_v55 = vsel %vm2201_vm8, %v9457_v15, %v9460_v56  ;;  %v26722_v56 = vshrl.u32 %v23548_v46, 16  ;;  %v9496_v0 = vrot.slane %v26725_v34, 5 }
 0x7b2   :  { %v9447_v6 = vrot.slane %v9445_v36, 5  ;;  %v9469_v36 = vsel %vm2201_vm8, %v9464_v27, %v9468_v3  ;;  %v9487_v23 = vrot.slane %v26720_v4, 4  ;;  %v9512_v46 = vshll.u32 %v24063_v9, 16 }
 0x7b3   :  { %v9500_v27 = vshrl.u32 %v24235_v43, 16  ;;  %v9532_v34 = vshll.u32 %v24261_v14, 16 }
 0x7b4   :  { %v9448_v44 = vor.u32 %v9447_v6, %v9444_v33  ;;  %v9489_v33 = vor.u32 %v9488_v37, %v9487_v23  ;;  %v26728_v37 = vshrl.u32 %v23671_v47, 16 }
 0x7b7   :  { %18479 = vmatmul.mubr.msk.bf16.gmra.mrb[76].mxu0 %vm273_vm3, %v9420_v25  ;;  %v9449_v25 = vsel %vm2201_vm8, %v9439_v32, %v9448_v44  ;;  %v9480_v32 = vshrl.u32 %v24048_v40, 16  ;;  %v9491_v44 = vrot.slane %v26722_v56, 4 }
 0x7b8   :  { %18482 = vmatprep.mubr.msk.bf16.mxu0 %vm273_vm3, %v9432_v60  ;;  %v24209_v60 = vld [vmem:[#allocation2 + $0x98] sm:$0x1f] }
 0x7b9   :  { %v9471_v62 = vshrl.u32 %v24209_v60, 16  ;;  %v9474_v19 = vshll.u32 %v24209_v60, 16  ;;  %v9493_v42 = vor.u32 %v9492_v41, %v9491_v44 }
 0x7bb   :  { %v9473_v40 = vrot.slane %v9471_v62, 4  ;;  %v9476_v10 = vrot.slane %v9474_v19, 5 }
 0x7bd   :  { %v9477_v6 = vor.u32 %v9476_v10, %v9473_v40  ;;  %v9520_v40 = vrot.slane %v26728_v37, 4  ;;  %v24287_v37 = vld [vmem:[#allocation2 + $0x110] sm:$0x1f] }
 0x7bf   :  { %18483 = vmatmul.mubr.msk.bf16.gmra.mrb[80].mxu0 %vm273_vm3, %v9436_v35  ;;  %v9482_v35 = vrot.slane %v9480_v32, 4  ;;  %v9478_v15 = vsel %vm2201_vm8, %v9468_v3, %v9477_v6  ;;  %v9503_v3 = vshll.u32 %v24235_v43, 16  ;;  %v9494_v32 = vsel %vm2201_vm8, %v9489_v33, %v9493_v42 }
 0x7c0   :  { %18486 = vmatprep.mubr.msk.bf16.mxu0 %vm273_vm3, %v9440_v26  ;;  %v9485_v26 = vrot.slane %v9483_v45, 5  ;;  %v26726_v45 = vshrl.u32 %v23644_v22, 16  ;;  %v26730_v6 = vshrl.u32 %v23691_v18, 16 }
 0x7c2   :  { %v9486_v49 = vor.u32 %v9485_v26, %v9482_v35  ;;  %v9505_v26 = vrot.slane %v9503_v3, 5 }
 0x7c4   :  { %v9490_v54 = vsel %vm2201_vm8, %v9486_v49, %v9489_v33  ;;  %v26729_v49 = vshll.u32 %v23671_v47, 16  ;;  %v9541_v47 = vshll.u32 %v24078_v30, 16 }
 0x7c6   :  { %v9521_v33 = vrot.slane %v26729_v49, 5  ;;  %v9567_v49 = vshrl.u32 %v24093_v2, 16 }
 0x7c7   :  { %18487 = vmatmul.mubr.msk.bf16.gmra.mrb[84].mxu0 %vm273_vm3, %v9449_v25  ;;  %v26724_v25 = vshrl.u32 %v23573_v12, 16  ;;  %v9516_v12 = vrot.slane %v26726_v45, 4 }
 0x7c8   :  { %18490 = vmatprep.mubr.msk.bf16.mxu0 %vm273_vm3, %v9461_v55  ;;  %v9509_v55 = vshrl.u32 %v24063_v9, 16  ;;  %v9502_v9 = vrot.slane %v9500_v27, 4  ;;  %v9522_v41 = vor.u32 %v9521_v33, %v9520_v40  ;;  %v26733_v27 = vshll.u32 %v23752_v20, 16 }
 0x7c9   :  { %v9495_v8 = vrot.slane %v26724_v25, 4  ;;  %v9538_v25 = vshrl.u32 %v24078_v30, 16  ;;  %v9558_v33 = vshrl.u32 %v24287_v37, 16 }
 0x7ca   :  { %v9511_v19 = vrot.slane %v9509_v55, 4  ;;  %v9506_v50 = vor.u32 %v9505_v26, %v9502_v9  ;;  %v26732_v55 = vshrl.u32 %v23752_v20, 16  ;;  %v9546_v3 = vrot.slane %v26733_v27, 5 }
 0x7cb   :  { %v9497_v11 = vor.u32 %v9496_v0, %v9495_v8  ;;  %v9529_v8 = vshrl.u32 %v24261_v14, 16  ;;  %v26736_v26 = vshrl.u32 %v23775_v63, 16  ;;  %v26742_v27 = vshrl.u32 %v23828_v53, 16 }
 0x7cd   :  { %v9498_v62 = vsel %vm2201_vm8, %v9493_v42, %v9497_v11  ;;  %v9507_v10 = vsel %vm2201_vm8, %v9497_v11, %v9506_v50  ;;  %v9540_v42 = vrot.slane %v9538_v25, 4  ;;  %v9543_v11 = vrot.slane %v9541_v47, 5 }
 0x7ce   :  { %v9531_v30 = vrot.slane %v9529_v8, 4 }
 0x7cf   :  { %18491 = vmatmul.mubr.msk.bf16.gmra.mrb[88].mxu0 %vm273_vm3, %v9465_v17  ;;  %v9514_v17 = vrot.slane %v9512_v46, 5  ;;  %v9545_v46 = vrot.slane %v26732_v55, 4  ;;  %v9544_v45 = vor.u32 %v9543_v11, %v9540_v42  ;;  %v26740_v42 = vshrl.u32 %v23826_v5, 16 }
 0x7d0   :  { %18494 = vmatprep.mubr.msk.bf16.mxu0 %vm273_vm3, %v9469_v36  ;;  %v26727_v36 = vshll.u32 %v23644_v22, 16  ;;  %v26731_v22 = vshll.u32 %v23691_v18, 16  ;;  %v26741_v55 = vshll.u32 %v23826_v5, 16 }
 0x7d1   :  { %v9515_v4 = vor.u32 %v9514_v17, %v9511_v19  ;;  %v26734_v17 = vshrl.u32 %v23758_v28, 16  ;;  %v9578_v11 = vrot.slane %v26740_v42, 4  ;;  %v10110_v42 = vrot.slane %v24183_v31, 5  ;;  %v10065_v31 = vld [vmem:[#allocation2 + $0xa0] sm:$0xe0] }
 0x7d2   :  { %v9517_v35 = vrot.slane %v26727_v36, 5  ;;  %v9525_v56 = vrot.slane %v26731_v22, 5  ;;  %v26738_v22 = vshrl.u32 %v23812_v61, 16 }
 0x7d3   :  { %v9549_v36 = vrot.slane %v26734_v17, 4 }
 0x7d4   :  { %v9518_v23 = vor.u32 %v9517_v35, %v9516_v12  ;;  %v9547_v12 = vor.u32 %v9546_v3, %v9545_v46  ;;  %v26735_v35 = vshll.u32 %v23758_v28, 16  ;;  %v9570_v28 = vshll.u32 %v24093_v2, 16 }
 0x7d5   :  { %v9560_v2 = vrot.slane %v9558_v33, 4  ;;  %v9579_v46 = vrot.slane %v26741_v55, 5  ;;  %v9582_v3 = vrot.slane %v26742_v27, 4  ;;  %v20537_v55 = vld [vmem:[#allocation2 + $0x90] sm:$0xff]  ;;  %v10121_v27 = vrot.slane %v10065_v31, 5 }
 0x7d6   :  { %v9519_v44 = vsel %vm2201_vm8, %v9515_v4, %v9518_v23  ;;  %v9523_v18 = vsel %vm2201_vm8, %v9518_v23, %v9522_v41  ;;  %v9550_v9 = vrot.slane %v26735_v35, 5  ;;  %v9548_v20 = vsel %vm2201_vm8, %v9544_v45, %v9547_v12  ;;  %v24313_v45 = vld [vmem:[#allocation2 + $0x138] sm:$0x1f] }
 0x7d7   :  { %18495 = vmatmul.mubr.msk.bf16.gmra.mrb[92].mxu0 %vm273_vm3, %v9478_v15  ;;  %v9524_v15 = vrot.slane %v26730_v6, 4  ;;  %v9553_v4 = vrot.slane %v26736_v26, 4  ;;  %v26737_v23 = vshll.u32 %v23775_v63, 16  ;;  %v9561_v6 = vshll.u32 %v24287_v37, 16 }
 0x7d8   :  { %18498 = vmatprep.mubr.msk.bf16.mxu0 %vm273_vm3, %v9490_v54  ;;  %v9551_v40 = vor.u32 %v9550_v9, %v9549_v36  ;;  %v9574_v63 = vrot.slane %v26738_v22, 4  ;;  %v9590_v5 = vshll.u32 %v24313_v45, 16  ;;  %v10061_v9 = vld [vmem:[#allocation2] sm:$0xe0]  ;;  %v10086_v26 = vrot.slane %v23854_v59, 5 }
 0x7d9   :  { %v9526_v54 = vor.u32 %v9525_v56, %v9524_v15  ;;  %v9554_v50 = vrot.slane %v26737_v23, 5  ;;  %v9563_v47 = vrot.slane %v9561_v6, 5  ;;  %v10088_v59 = vrot.slane %v23861_v48, 5  ;;  %v10062_v6 = vld [vmem:[#allocation2 + $0x28] sm:$0xe0] }
 0x7da   :  { %v9552_v15 = vsel %vm2201_vm8, %v9547_v12, %v9551_v40  ;;  %v9580_v12 = vor.u32 %v9579_v46, %v9578_v11  ;;  %v9592_v35 = vrot.slane %v9590_v5, 5  ;;  %v10095_v22 = vrot.slane %v23882_v52, 5  ;;  %v20540_v5 = vld [vmem:[#allocation2 + $0xb8] sm:$0xff] }
 0x7db   :  { %v9527_v0 = vsel %vm2201_vm8, %v9522_v41, %v9526_v54  ;;  %v9572_v41 = vrot.slane %v9570_v28, 5  ;;  %v10089_v28 = vsel %vm2924_vm9, %v10086_v26, %v10088_v59  ;;  %v10117_v46 = vrot.slane %v20537_v55, 5 }
 0x7df   :  { %18499 = vmatmul.mubr.msk.bf16.gmra.mrb[96].mxu0 %vm273_vm3, %v9494_v32  ;;  %v9534_v32 = vrot.slane %v9532_v34, 5 }
 0x7e0   :  { %18502 = vmatprep.mubr.msk.bf16.mxu0 %vm273_vm3, %v9498_v62 }
 0x7e1   :  { %v9535_v62 = vor.u32 %v9534_v32, %v9531_v30  ;;  %v26743_v30 = vshll.u32 %v23828_v53, 16 }
 0x7e3   :  { %v9536_v19 = vsel %vm2201_vm8, %v9526_v54, %v9535_v62  ;;  %v26739_v54 = vshll.u32 %v23812_v61, 16  ;;  %v9583_v32 = vrot.slane %v26743_v30, 5 }
 0x7e5   :  { %v9575_v25 = vrot.slane %v26739_v54, 5  ;;  %v9584_v62 = vor.u32 %v9583_v32, %v9582_v3  ;;  %v20538_v3 = vld [vmem:[#allocation2 + $0xa8] sm:$0xff]  ;;  %v10119_v32 = vrot.slane %v24209_v60, 5 }
 0x7e6   :  { %v10122_v30 = vrot.slane %v20538_v3, 5  ;;  %v10066_v60 = vld [vmem:[#allocation2 + $0xc8] sm:$0xe0] }
 0x7e7   :  { %18503 = vmatmul.mubr.msk.bf16.gmra.mrb[100].mxu0 %vm273_vm3, %v9507_v10  ;;  %v9555_v10 = vor.u32 %v9554_v50, %v9553_v4  ;;  %v9576_v34 = vor.u32 %v9575_v25, %v9574_v63  ;;  %v9585_v36 = vsel %vm2201_vm8, %v9580_v12, %v9584_v62  ;;  %v10092_v63 = vrot.slane %v24127_v13, 5  ;;  %v10063_v13 = vld [vmem:[#allocation2 + $0x50] sm:$0xe0] }
 0x7e8   :  { %18506 = vmatprep.mubr.msk.bf16.mxu0 %vm273_vm3, %v9519_v44  ;;  %v9569_v44 = vrot.slane %v9567_v49, 4  ;;  %v10090_v49 = vrot.slane %v23864_v16, 5  ;;  %v10103_v54 = vrot.slane %v10063_v13, 5  ;;  %v10104_v25 = vrot.slane %v24013_v58, 5 }
 0x7e9   :  { %v9556_v56 = vsel %vm2201_vm8, %v9551_v40, %v9555_v10  ;;  %v9581_v17 = vsel %vm2201_vm8, %v9576_v34, %v9580_v12  ;;  %v20311_v40 = vld [vmem:[%s26305_s1 + $0x100] sm:$0xff]   ;;  %v10120_v12 = vsel %vm2924_vm9, %v10117_v46, %v10119_v32 }
 0x7ea   :  { %v9573_v8 = vor.u32 %v9572_v41, %v9569_v44  ;;  %18598 = vmatprep.subr.bf16.mxu1 %v20311_v40  ;;  %v10091_v33 = vsel %vm2924_vm9, %v10088_v59, %v10090_v49  ;;  %v10093_v48 = vsel %vm2924_vm9, %v10090_v49, %v10092_v63  ;;  %v10099_v44 = vrot.slane %v23893_v29, 5 }
 0x7eb   :  { %18599 = vmatpush3.bf16.msra.mxu1 %v20311_v40  ;;  %v10105_v29 = vsel %vm2924_vm9, %v10103_v54, %v10104_v25 }
 0x7ec   :  { %v9577_v61 = vsel %vm2201_vm8, %v9573_v8, %v9576_v34  ;;  %v10108_v8 = vrot.slane %v24023_v24, 5  ;;  %v10115_v24 = vrot.slane %v24040_v39, 5  ;;  %v10123_v39 = vsel %vm2924_vm9, %v10121_v27, %v10122_v30 }
 0x7ee   :  { %v10111_v11 = vsel %vm2924_vm9, %v10108_v8, %v10110_v42 }
 0x7ef   :  { %18507 = vmatmul.mubr.msk.bf16.gmra.mrb[104].mxu0 %vm273_vm3, %v9523_v18  ;;  %v9564_v18 = vor.u32 %v9563_v47, %v9560_v2  ;;  %v10101_v2 = vrot.slane %v24157_v51, 5  ;;  %v10064_v51 = vld [vmem:[#allocation2 + $0x78] sm:$0xe0] }
 0x7f0   :  { %18510 = vmatprep.mubr.msk.bf16.mxu0 %vm273_vm3, %v9527_v0 }
 0x7f1   :  { %v9565_v0 = vsel %vm2201_vm8, %v9555_v10, %v9564_v18  ;;  %v20312_v10 = vld [vmem:[%s26305_s1 + $0x108] sm:$0xff]   ;;  %v10102_v47 = vsel %vm2924_vm9, %v10099_v44, %v10101_v2  ;;  %v10112_v18 = vrot.slane %v10064_v51, 5 }
 0x7f2   :  { %18600 = vmatprep.subr.bf16.mxu1 %v20312_v10 }
 0x7f3   :  { %18601 = vmatpush3.bf16.msra.mxu1 %v20312_v10  ;;  %v20543_v10 = vld [vmem:[#allocation2 + $0xe0] sm:$0xff] }
 0x7f4   :  { %v10135_v59 = vrot.slane %v20543_v10, 5 }
 0x7f7   :  { %18511 = vmatmul.mubr.msk.bf16.gmra.mrb[108].mxu0 %vm273_vm3, %v9536_v19  ;;  %v9587_v19 = vshrl.u32 %v24313_v45, 16 }
 0x7f8   :  { %18514 = vmatprep.mubr.msk.bf16.mxu0 %vm273_vm3, %v9548_v20  ;;  %v10085_v20 = vrot.slane %v10061_v9, 5  ;;  %v20541_v9 = vld [vmem:[#allocation2 + $0xd0] sm:$0xff] }
 0x7f9   :  { %v9589_v53 = vrot.slane %v9587_v19, 4 }
 0x7fa   :  { %v10087_v50 = vsel %vm2924_vm9, %v10085_v20, %v10086_v26  ;;  %v10131_v20 = vrot.slane %v20541_v9, 5  ;;  %v10128_v26 = vrot.slane %v24235_v43, 5  ;;  %v10067_v43 = vld [vmem:[#allocation2 + $0xf0] sm:$0xe0] }
 0x7fb   :  { %v9593_v4 = vor.u32 %v9592_v35, %v9589_v53  ;;  %v10130_v35 = vrot.slane %v10066_v60, 5 }
 0x7fd   :  { %v9594_v23 = vsel %vm2201_vm8, %v9584_v62, %v9593_v4  ;;  %v20539_v62 = vld [vmem:[#allocation2 + $0xb0] sm:$0xff] }
 0x7fe   :  { %v10124_v19 = vrot.slane %v20539_v62, 5 }
 0x7ff   :  { %18515 = vmatmul.mubr.msk.bf16.gmra.mrb[112].mxu0 %vm273_vm3, %v9552_v15  ;;  %v10094_v15 = vrot.slane %v10062_v6, 5  ;;  %v20544_v6 = vld [vmem:[#allocation2 + $0xf8] sm:$0xff] }
 0x800   :  { %18518 = vmatprep.mubr.msk.bf16.mxu0 %vm273_vm3, %v9556_v56  ;;  %v10097_v56 = vrot.slane %v23890_v7, 5  ;;  %v10106_v7 = vrot.slane %v24020_v57, 5 }
 0x801   :  { %v10096_v16 = vsel %vm2924_vm9, %v10094_v15, %v10095_v22  ;;  %v10140_v15 = vrot.slane %v20544_v6, 5 }
 0x802   :  { %v10098_v41 = vsel %vm2924_vm9, %v10095_v22, %v10097_v56  ;;  %v10100_v52 = vsel %vm2924_vm9, %v10097_v56, %v10099_v44  ;;  %v10107_v34 = vsel %vm2924_vm9, %v10104_v25, %v10106_v7  ;;  %v10109_v58 = vsel %vm2924_vm9, %v10106_v7, %v10108_v8  ;;  %v20546_v44 = vld [vmem:[#allocation2 + $0x108] sm:$0xff]  ;;  %v20547_v25 = vld [vmem:[#allocation2 + $0x120] sm:$0xff] }
 0x803   :  { %v10137_v22 = vrot.slane %v24261_v14, 5  ;;  %v10068_v14 = vld [vmem:[#allocation2 + $0x118] sm:$0xe0]  ;;  %v10149_v2 = vrot.slane %v20547_v25, 5  ;;  %v20548_v8 = vld [vmem:[#allocation2 + $0x128] sm:$0xff] }
 0x804   :  { %v10148_v54 = vrot.slane %v10068_v14, 5 }
 0x805   :  { %v10138_v63 = vsel %vm2924_vm9, %v10135_v59, %v10137_v22 }
 0x806   :  { %v10150_v7 = vsel %vm2924_vm9, %v10148_v54, %v10149_v2 }
 0x807   :  { %18519 = vmatmul.mubr.msk.bf16.gmra.mrb[116].mxu0 %vm273_vm3, %v9565_v0  ;;  %v10113_v0 = vrot.slane %v24033_v38, 5  ;;  %v10118_v38 = vsel %vm2924_vm9, %v10115_v24, %v10117_v46 }
 0x808   :  { %18522 = vmatprep.mubr.msk.bf16.mxu0 %vm273_vm3, %v9577_v61 }
 0x809   :  { %v10114_v57 = vsel %vm2924_vm9, %v10112_v18, %v10113_v0  ;;  %v10116_v61 = vsel %vm2924_vm9, %v10113_v0, %v10115_v24 }
 0x80f   :  { %18523 = vmatmul.mubr.msk.bf16.gmra.mrb[120].mxu0 %vm273_vm3, %v9581_v17  ;;  %v10126_v17 = vrot.slane %v20540_v5, 5 }
 0x810   :  { %18526 = vmatprep.mubr.msk.bf16.mxu0 %vm273_vm3, %v9585_v36  ;;  %v10125_v36 = vsel %vm2924_vm9, %v10122_v30, %v10124_v19 }
 0x811   :  { %v10127_v53 = vsel %vm2924_vm9, %v10124_v19, %v10126_v17  ;;  %v10129_v4 = vsel %vm2924_vm9, %v10126_v17, %v10128_v26 }
 0x817   :  { %18527 = vmatmul.mubr.msk.bf16.gmra.mrb[124].mxu0 %vm273_vm3, %v9594_v23  ;;  %v10132_v23 = vsel %vm2924_vm9, %v10130_v35, %v10131_v20 }
 0x818   :  { %18534 = vmatprep.mubr.msk.bf16.mxu0 %vm273_vm3, %v10087_v50  ;;  %v20542_v50 = vld [vmem:[#allocation2 + $0xd8] sm:$0xff] }
 0x819   :  { %v10133_v40 = vrot.slane %v20542_v50, 5 }
 0x81b   :  { %v10134_v49 = vsel %vm2924_vm9, %v10131_v20, %v10133_v40 }
 0x81f   :  { %18535 = vmatmul.mubr.msk.bf16.vlgmr.msra.gmra.mrb[64].mxu0 %vm273_vm3, %v10089_v28  ;;  %v10136_v28 = vsel %vm2924_vm9, %v10133_v40, %v10135_v59 }
 0x820   :  { %18538 = vmatprep.mubr.msk.bf16.mxu0 %vm273_vm3, %v10091_v33  ;;  %v10139_v33 = vrot.slane %v10067_v43, 5 }
 0x827   :  { %18539 = vmatmul.mubr.msk.bf16.gmra.mrb[68].mxu0 %vm273_vm3, %v10093_v48  ;;  %v10141_v48 = vsel %vm2924_vm9, %v10139_v33, %v10140_v15 }
 0x828   :  { %18542 = vmatprep.mubr.msk.bf16.mxu0 %vm273_vm3, %v10096_v16  ;;  %v20545_v16 = vld [vmem:[#allocation2 + $0x100] sm:$0xff] }
 0x829   :  { %v10142_v56 = vrot.slane %v20545_v16, 5 }
 0x82f   :  { %18543 = vmatmul.mubr.msk.bf16.gmra.mrb[72].mxu0 %vm273_vm3, %v10098_v41  ;;  %v10144_v41 = vrot.slane %v20546_v44, 5 }
 0x830   :  { %18546 = vmatprep.mubr.msk.bf16.mxu0 %vm273_vm3, %v10100_v52  ;;  %v10143_v52 = vsel %vm2924_vm9, %v10140_v15, %v10142_v56 }
 0x831   :  { %v10145_v13 = vsel %vm2924_vm9, %v10142_v56, %v10144_v41 }
 0x837   :  { %18547 = vmatmul.mubr.msk.bf16.gmra.mrb[76].mxu0 %vm273_vm3, %v10102_v47  ;;  %v10146_v47 = vrot.slane %v24287_v37, 5  ;;  %v10155_v37 = vrot.slane %v24313_v45, 5  ;;  %v24426_v45 = vld [vmem:[%s26307_s3 + $0x2] ss:$0 sm:$0xff] }
 0x838   :  { %18550 = vmatprep.mubr.msk.bf16.mxu0 %vm273_vm3, %v10105_v29 }
 0x839   :  { %v10147_v29 = vsel %vm2924_vm9, %v10144_v41, %v10146_v47 }
 0x83f   :  { %18551 = vmatmul.mubr.msk.bf16.gmra.mrb[80].mxu0 %vm273_vm3, %v10107_v34  ;;  %v10151_v34 = vrot.slane %v20548_v8, 5 }
 0x840   :  { %18554 = vmatprep.mubr.msk.bf16.mxu0 %vm273_vm3, %v10109_v58  ;;  %v20549_v58 = vld [vmem:[#allocation2 + $0x130] sm:$0xff] }
 0x841   :  { %v10153_v51 = vrot.slane %v20549_v58, 5  ;;  %v10152_v18 = vsel %vm2924_vm9, %v10149_v2, %v10151_v34 }
 0x843   :  { %v10154_v0 = vsel %vm2924_vm9, %v10151_v34, %v10153_v51  ;;  %v10156_v42 = vsel %vm2924_vm9, %v10153_v51, %v10155_v37 }
 0x847   :  { %18555 = vmatmul.mubr.msk.bf16.gmra.mrb[84].mxu0 %vm273_vm3, %v10111_v11  ;;  %v24415_v11 = vld [vmem:[%s26305_s1 + $0xf0] sm:$0xff]  }
 0x848   :  { %18558 = vmatprep.mubr.msk.bf16.mxu0 %vm273_vm3, %v10114_v57  ;;  %18666 = vmatprep.subr.bf16.mxu1 %v24415_v11  ;;  %v24421_v57 = vld [vmem:[%s26306_s2 + $0x2] ss:$0 sm:$0xff] }
 0x84f   :  { %18559 = vmatmul.mubr.msk.bf16.gmra.mrb[88].mxu0 %vm273_vm3, %v10116_v61 }
 0x850   :  { %18562 = vmatprep.mubr.msk.bf16.mxu0 %vm273_vm3, %v10118_v38 }
 0x857   :  { %18563 = vmatmul.mubr.msk.bf16.gmra.mrb[92].mxu0 %vm273_vm3, %v10120_v12 }
 0x858   :  { %18566 = vmatprep.mubr.msk.bf16.mxu0 %vm273_vm3, %v10123_v39 }
 0x85f   :  { %18567 = vmatmul.mubr.msk.bf16.gmra.mrb[96].mxu0 %vm273_vm3, %v10125_v36 }
 0x860   :  { %18570 = vmatprep.mubr.msk.bf16.mxu0 %vm273_vm3, %v10127_v53 }
 0x867   :  { %18571 = vmatmul.mubr.msk.bf16.gmra.mrb[100].mxu0 %vm273_vm3, %v10129_v4 }
 0x868   :  { %18574 = vmatprep.mubr.msk.bf16.mxu0 %vm273_vm3, %v10132_v23 }
 0x86f   :  { %18575 = vmatmul.mubr.msk.bf16.gmra.mrb[104].mxu0 %vm273_vm3, %v10134_v49 }
 0x870   :  { %18578 = vmatprep.mubr.msk.bf16.mxu0 %vm273_vm3, %v10136_v28 }
 0x877   :  { %18579 = vmatmul.mubr.msk.bf16.gmra.mrb[108].mxu0 %vm273_vm3, %v10138_v63 }
 0x878   :  { %18582 = vmatprep.mubr.msk.bf16.mxu0 %vm273_vm3, %v10141_v48 }
 0x87f   :  { %18583 = vmatmul.mubr.msk.bf16.gmra.mrb[112].mxu0 %vm273_vm3, %v10143_v52 }
 0x880   :  { %18586 = vmatprep.mubr.msk.bf16.mxu0 %vm273_vm3, %v10145_v13 }
 0x887   :  { %18587 = vmatmul.mubr.msk.bf16.gmra.mrb[116].mxu0 %vm273_vm3, %v10147_v29 }
 0x888   :  { %18590 = vmatprep.mubr.msk.bf16.mxu0 %vm273_vm3, %v10150_v7 }
 0x88f   :  { %18591 = vmatmul.mubr.msk.bf16.gmra.mrb[120].mxu0 %vm273_vm3, %v10152_v18 }
 0x890   :  { %18594 = vmatprep.mubr.msk.bf16.mxu0 %vm273_vm3, %v10154_v0 }
 0x897   :  { %18595 = vmatmul.mubr.msk.bf16.gmra.mrb[124].mxu0 %vm273_vm3, %v10156_v42 }
 0x8f2   :  { %v18536_v24 = vpop.f32.mrb[64].mxu0 }
 0x8f3   :  { %v10630_v55 = vmul.f32 %v18536_v24, %v24421_v57  ;;  %v10304_v46 = vpop.f32.mrb[65].mxu0 }
 0x8f4   :  { %v10628_v61 = vmul.f32 %v24421_v57, %v10304_v46  ;;  %v18537_v38 = vpop.f32.mrb[66].mxu0 }
 0x8f5   :  { %v10699_v31 = vadd.f32 %v24426_v45, %v10630_v55  ;;  %v10631_v27 = vmul.f32 %v18537_v38, %v24421_v57  ;;  %v10307_v3 = vpop.f32.mrb[67].mxu0 }
 0x8f6   :  { %v10697_v30 = vadd.f32 %v24426_v45, %v10628_v61  ;;  %v10629_v32 = vmul.f32 %v24421_v57, %v10307_v3 }
 0x8f7   :  { %v10700_v12 = vadd.f32 %v24426_v45, %v10631_v27  ;;  %v10763_v62 = vmax.f32 %v10699_v31, 0.0 }
 0x8f8   :  { %v10698_v39 = vadd.f32 %v24426_v45, %v10629_v32  ;;  %v10761_v5 = vmax.f32 %v10697_v30, 0.0 }
 0x8f9   :  { %v10764_v19 = vmax.f32 %v10700_v12, 0.0 }
 0x8fa   :  { %v10762_v17 = vmax.f32 %v10698_v39, 0.0  ;;  %v18540_v36 = vpop.f32.mrb[68].mxu0 }
 0x8fb   :  { %v10826_v53 = vpack.c.bf16 %v10764_v19, %v10763_v62  ;;  %v10634_v60 = vmul.f32 %v18540_v36, %v24421_v57  ;;  %v10320_v35 = vpop.f32.mrb[69].mxu0 }
 0x8fc   :  { %v10825_v9 = vpack.c.bf16 %v10762_v17, %v10761_v5  ;;  %v10632_v20 = vmul.f32 %v24421_v57, %v10320_v35  ;;  %v18541_v26 = vpop.f32.mrb[70].mxu0 }
 0x8fd   :  { %v10890_v4 = vrot.slane %v10826_v53, 4  ;;  %v10703_v23 = vadd.f32 %v24426_v45, %v10634_v60  ;;  %v10635_v50 = vmul.f32 %v18541_v26, %v24421_v57  ;;  %v10323_v40 = vpop.f32.mrb[71].mxu0 }
 0x8fe   :  { %v10889_v10 = vrot.slane %v10825_v9, 4  ;;  %v10701_v59 = vadd.f32 %v24426_v45, %v10632_v20  ;;  %v10633_v49 = vmul.f32 %v24421_v57, %v10323_v40 }
 0x8ff   :  { %v10704_v28 = vadd.f32 %v24426_v45, %v10635_v50  ;;  %v10767_v6 = vmax.f32 %v10703_v23, 0.0 }
 0x900   :  { %v10891_v43 = vsel %vm174_vm2, %v10889_v10, %v10890_v4  ;;  %10985 = vst.msk [vmem:[#allocation2] sm:$0xf0] %vm271_vm1, %v10889_v10  ;;  %v10702_v33 = vadd.f32 %v24426_v45, %v10633_v49  ;;  %v10765_v22 = vmax.f32 %v10701_v59, 0.0 }
 0x901   :  { %10986 = vst.msk [vmem:[#allocation2 + $0x8] sm:$0xff] %vm273_vm3, %v10891_v43  ;;  %v10768_v15 = vmax.f32 %v10704_v28, 0.0 }
 0x902   :  { %v10766_v63 = vmax.f32 %v10702_v33, 0.0  ;;  %v18544_v48 = vpop.f32.mrb[72].mxu0 }
 0x903   :  { %v10828_v16 = vpack.c.bf16 %v10768_v15, %v10767_v6  ;;  %v10638_v56 = vmul.f32 %v18544_v48, %v24421_v57  ;;  %v10336_v44 = vpop.f32.mrb[73].mxu0 }
 0x904   :  { %v10827_v41 = vpack.c.bf16 %v10766_v63, %v10765_v22  ;;  %v10636_v52 = vmul.f32 %v24421_v57, %v10336_v44  ;;  %v18545_v13 = vpop.f32.mrb[74].mxu0 }
 0x905   :  { %v10894_v14 = vrot.slane %v10828_v16, 4  ;;  %v10707_v54 = vadd.f32 %v24426_v45, %v10638_v56  ;;  %v10639_v25 = vmul.f32 %v18545_v13, %v24421_v57  ;;  %v10339_v2 = vpop.f32.mrb[75].mxu0 }
 0x906   :  { %v10892_v47 = vrot.slane %v10827_v41, 4  ;;  %v10705_v29 = vadd.f32 %v24426_v45, %v10636_v52  ;;  %v10637_v7 = vmul.f32 %v24421_v57, %v10339_v2 }
 0x907   :  { %10989 = vst.msk [vmem:[#allocation2 + $0x20] sm:$0xf] %vm277_vm4, %v10894_v14  ;;  %v10708_v8 = vadd.f32 %v24426_v45, %v10639_v25  ;;  %v11025_v34 = vld [vmem:[#allocation2] sm:$0xf8]  ;;  %v10771_v18 = vmax.f32 %v10707_v54, 0.0 }
 0x908   :  { %v10893_v58 = vsel %vm174_vm2, %v10890_v4, %v10892_v47  ;;  %v10895_v51 = vsel %vm174_vm2, %v10892_v47, %v10894_v14  ;;  %v10706_v0 = vadd.f32 %v24426_v45, %v10637_v7  ;;  %v24458_v37 = vld [vmem:[#allocation2 + $0x8] sm:$0xff]  ;;  %v11191_v24 = vshrl.u32 %v11025_v34, 16 }
 0x909   :  { %10987 = vst.msk [vmem:[#allocation2 + $0x10] sm:$0xff] %vm273_vm3, %v10893_v58  ;;  %10988 = vst.msk [vmem:[#allocation2 + $0x18] sm:$0xff] %vm273_vm3, %v10895_v51  ;;  %v10772_v42 = vmax.f32 %v10708_v8, 0.0  ;;  %v11194_v55 = vshll.u32 %v11025_v34, 16  ;;  %v11199_v46 = vshrl.u32 %v24458_v37, 16  ;;  %v10769_v61 = vmax.f32 %v10705_v29, 0.0 }
 0x90a   :  { %v10770_v38 = vmax.f32 %v10706_v0, 0.0  ;;  %v18548_v31 = vpop.f32.mrb[76].mxu0  ;;  %v11202_v27 = vshll.u32 %v24458_v37, 16  ;;  %v11193_v12 = vrot.slane %v11191_v24, 3 }
 0x90b   :  { %v24464_v3 = vpack.c.bf16 %v10772_v42, %v10771_v18  ;;  %v10642_v30 = vmul.f32 %v18548_v31, %v24421_v57  ;;  %v10352_v32 = vpop.f32.mrb[77].mxu0  ;;  %v11196_v39 = vrot.slane %v11194_v55, 4  ;;  %v11201_v17 = vrot.slane %v11199_v46, 3 }
 0x90c   :  { %v10829_v62 = vpack.c.bf16 %v10770_v38, %v10769_v61  ;;  %v10640_v19 = vmul.f32 %v24421_v57, %v10352_v32  ;;  %v18549_v5 = vpop.f32.mrb[78].mxu0  ;;  %v11204_v36 = vrot.slane %v11202_v27, 4 }
 0x90d   :  { %v10897_v53 = vrot.slane %v24464_v3, 4  ;;  %v10711_v60 = vadd.f32 %v24426_v45, %v10642_v30  ;;  %v10643_v35 = vmul.f32 %v18549_v5, %v24421_v57  ;;  %v10355_v9 = vpop.f32.mrb[79].mxu0  ;;  %v11197_v20 = vor.u32 %v11196_v39, %v11193_v12  ;;  %v20314_v3 = vld [vmem:[%s26305_s1 + $0xf8] sm:$0xff]  }
 0x90e   :  { %v10896_v26 = vrot.slane %v10829_v62, 4  ;;  %v10709_v4 = vadd.f32 %v24426_v45, %v10640_v19  ;;  %v10641_v23 = vmul.f32 %v24421_v57, %v10355_v9  ;;  %v11205_v50 = vor.u32 %v11204_v36, %v11201_v17  ;;  %v11182_v40 = vld [vmem:[#allocation2 + $0x20] sm:$0xf] }
 0x90f   :  { %v10775_v10 = vmax.f32 %v10711_v60, 0.0  ;;  %v10712_v59 = vadd.f32 %v24426_v45, %v10643_v35  ;;  %v11226_v15 = vshrl.u32 %v11182_v40, 16  ;;  %v11229_v13 = vshll.u32 %v11182_v40, 16 }
 0x910   :  { %v10898_v49 = vsel %vm174_vm2, %v10896_v26, %v10897_v53  ;;  %10990 = vst.msk [vmem:[#allocation2 + $0x28] sm:$0xf0] %vm271_vm1, %v10896_v26  ;;  %v10710_v28 = vadd.f32 %v24426_v45, %v10641_v23  ;;  %v11206_v43 = vsel %vm479_vm5, %v11197_v20, %v11205_v50  ;;  %v24482_v33 = vld [vmem:[#allocation2 + $0x10] sm:$0xff]  ;;  %v24484_v6 = vld [vmem:[#allocation2 + $0x18] sm:$0xff]  ;;  %v10773_v56 = vmax.f32 %v10709_v4, 0.0 }
 0x911   :  { %10991 = vst.msk [vmem:[#allocation2 + $0x30] sm:$0xff] %vm273_vm3, %v10898_v49  ;;  %v10776_v22 = vmax.f32 %v10712_v59, 0.0  ;;  %18602 = vmatprep.mubr.msk.bf16.mxu1 %vm273_vm3, %v11206_v43  ;;  %v11208_v63 = vshrl.u32 %v24482_v33, 16  ;;  %v11211_v48 = vshll.u32 %v24482_v33, 16  ;;  %v11217_v16 = vshrl.u32 %v24484_v6, 16 }
 0x912   :  { %v10774_v44 = vmax.f32 %v10710_v28, 0.0  ;;  %v18552_v41 = vpop.f32.mrb[80].mxu0  ;;  %v26548_v52 = vshll.u32 %v24484_v6, 16  ;;  %v11228_v12 = vrot.slane %v11226_v15, 3  ;;  %v11231_v39 = vrot.slane %v11229_v13, 4 }
 0x913   :  { %v10832_v14 = vpack.c.bf16 %v10776_v22, %v10775_v10  ;;  %v10646_v54 = vmul.f32 %v18552_v41, %v24421_v57  ;;  %v10368_v25 = vpop.f32.mrb[81].mxu0  ;;  %v11210_v2 = vrot.slane %v11208_v63, 3  ;;  %v11213_v47 = vrot.slane %v11211_v48, 4  ;;  %v20315_v10 = vld [vmem:[%s26305_s1 + $0x110] sm:$0xff]  }
 0x914   :  { %v10831_v29 = vpack.c.bf16 %v10774_v44, %v10773_v56  ;;  %v10644_v7 = vmul.f32 %v24421_v57, %v10368_v25  ;;  %v18553_v8 = vpop.f32.mrb[82].mxu0  ;;  %v11219_v34 = vrot.slane %v11217_v16, 3  ;;  %v11222_v58 = vrot.slane %v26548_v52, 4 }
 0x915   :  { %v10901_v51 = vrot.slane %v10832_v14, 4  ;;  %v10715_v18 = vadd.f32 %v24426_v45, %v10646_v54  ;;  %v10647_v0 = vmul.f32 %v18553_v8, %v24421_v57  ;;  %v10371_v42 = vpop.f32.mrb[83].mxu0  ;;  %v11214_v24 = vor.u32 %v11213_v47, %v11210_v2 }
 0x916   :  { %v10899_v55 = vrot.slane %v10831_v29, 4  ;;  %v10713_v61 = vadd.f32 %v24426_v45, %v10644_v7  ;;  %v10645_v38 = vmul.f32 %v24421_v57, %v10371_v42  ;;  %v11223_v31 = vor.u32 %v11222_v58, %v11219_v34 }
 0x917   :  { %10994 = vst.msk [vmem:[#allocation2 + $0x48] sm:$0xf] %vm277_vm4, %v10901_v51  ;;  %v10716_v30 = vadd.f32 %v24426_v45, %v10647_v0  ;;  %v11215_v32 = vsel %vm479_vm5, %v11205_v50, %v11214_v24  ;;  %v11030_v62 = vld [vmem:[#allocation2 + $0x28] sm:$0xf8]  ;;  %v10779_v17 = vmax.f32 %v10715_v18, 0.0  ;;  %v11232_v28 = vor.u32 %v11231_v39, %v11228_v12 }
 0x918   :  { %v10900_v19 = vsel %vm174_vm2, %v10897_v53, %v10899_v55  ;;  %v10902_v5 = vsel %vm174_vm2, %v10899_v55, %v10901_v51  ;;  %v10714_v36 = vadd.f32 %v24426_v45, %v10645_v38  ;;  %18603 = vmatmul.mubr.msk.bf16.vlgmr.msra.gmra.mrb[64].mxu1 %vm273_vm3, %v11215_v32  ;;  %v24516_v60 = vld [vmem:[#allocation2 + $0x30] sm:$0xff]  ;;  %v10777_v35 = vmax.f32 %v10713_v61, 0.0 }
 0x919   :  { %10992 = vst.msk [vmem:[#allocation2 + $0x38] sm:$0xff] %vm273_vm3, %v10900_v19  ;;  %10993 = vst.msk [vmem:[#allocation2 + $0x40] sm:$0xff] %vm273_vm3, %v10902_v5  ;;  %v10780_v9 = vmax.f32 %v10716_v30, 0.0  ;;  %18667 = vmatpush3.bf16.msra.mxu1 %v24415_v11  ;;  %v11224_v20 = vsel %vm479_vm5, %v11214_v24, %v11223_v31  ;;  %v11235_v53 = vshrl.u32 %v11030_v62, 16  ;;  %v11238_v23 = vshll.u32 %v11030_v62, 16 }
 0x91a   :  { %v10778_v26 = vmax.f32 %v10714_v36, 0.0  ;;  %18606 = vmatprep.mubr.msk.bf16.mxu1 %vm273_vm3, %v11224_v20  ;;  %v18556_v4 = vpop.f32.mrb[84].mxu0  ;;  %v26547_v50 = vshrl.u32 %v24516_v60, 16  ;;  %v26546_v40 = vshll.u32 %v24516_v60, 16  ;;  %18668 = vmatprep.subr.bf16.mxu1 %v20314_v3  ;;  %v11233_v18 = vsel %vm479_vm5, %v11223_v31, %v11232_v28 }
 0x91b   :  { %v24528_v59 = vpack.c.bf16 %v10780_v9, %v10779_v17  ;;  %v10650_v11 = vmul.f32 %v18556_v4, %v24421_v57  ;;  %v10384_v49 = vpop.f32.mrb[85].mxu0  ;;  %v11237_v43 = vrot.slane %v11235_v53, 3  ;;  %v11240_v44 = vrot.slane %v11238_v23, 4 }
 0x91c   :  { %v10833_v15 = vpack.c.bf16 %v10778_v26, %v10777_v35  ;;  %v10648_v22 = vmul.f32 %v24421_v57, %v10384_v49  ;;  %v18557_v56 = vpop.f32.mrb[86].mxu0  ;;  %v11245_v41 = vrot.slane %v26547_v50, 3  ;;  %v11248_v2 = vrot.slane %v26546_v40, 4 }
 0x91d   :  { %v10904_v13 = vrot.slane %v24528_v59, 4  ;;  %v10719_v14 = vadd.f32 %v24426_v45, %v10650_v11  ;;  %v10651_v54 = vmul.f32 %v18557_v56, %v24421_v57  ;;  %v10387_v25 = vpop.f32.mrb[87].mxu0  ;;  %18669 = vmatpush3.bf16.msra.mxu1 %v20314_v3  ;;  %v11241_v8 = vor.u32 %v11240_v44, %v11237_v43 }
 0x91e   :  { %v10903_v47 = vrot.slane %v10833_v15, 4  ;;  %v10717_v29 = vadd.f32 %v24426_v45, %v10648_v22  ;;  %v10649_v7 = vmul.f32 %v24421_v57, %v10387_v25  ;;  %v11183_v34 = vld [vmem:[#allocation2 + $0x48] sm:$0xf]  ;;  %18734 = vmatprep.subr.bf16.mxu1 %v20315_v10  ;;  %v11249_v0 = vor.u32 %v11248_v2, %v11245_v41 }
 0x91f   :  { %v10783_v58 = vmax.f32 %v10719_v14, 0.0  ;;  %v10720_v51 = vadd.f32 %v24426_v45, %v10651_v54  ;;  %v11270_v3 = vshrl.u32 %v11183_v34, 16  ;;  %v11273_v17 = vshll.u32 %v11183_v34, 16 }
 0x920   :  { %v10905_v42 = vsel %vm174_vm2, %v10903_v47, %v10904_v13  ;;  %10995 = vst.msk [vmem:[#allocation2 + $0x50] sm:$0xf0] %vm271_vm1, %v10903_v47  ;;  %v10781_v24 = vmax.f32 %v10717_v29, 0.0  ;;  %v10718_v55 = vadd.f32 %v24426_v45, %v10649_v7  ;;  %18607 = vmatmul.mubr.msk.bf16.gmra.mrb[68].mxu1 %vm273_vm3, %v11233_v18  ;;  %v24547_v61 = vld [vmem:[#allocation2 + $0x38] sm:$0xff]  ;;  %v24549_v38 = vld [vmem:[#allocation2 + $0x40] sm:$0xff]  ;;  %v11250_v31 = vsel %vm479_vm5, %v11241_v8, %v11249_v0 }
 0x921   :  { %10996 = vst.msk [vmem:[#allocation2 + $0x58] sm:$0xff] %vm273_vm3, %v10905_v42  ;;  %v10784_v30 = vmax.f32 %v10720_v51, 0.0  ;;  %v26533_v32 = vshrl.u32 %v24547_v61, 16  ;;  %v26532_v12 = vshll.u32 %v24547_v61, 16  ;;  %18610 = vmatprep.mubr.msk.bf16.mxu1 %vm273_vm3, %v11250_v31  ;;  %v26531_v19 = vshrl.u32 %v24549_v38, 16 }
 0x922   :  { %v10782_v39 = vmax.f32 %v10718_v55, 0.0  ;;  %v18560_v62 = vpop.f32.mrb[88].mxu0  ;;  %v26527_v5 = vshll.u32 %v24549_v38, 16  ;;  %v11272_v25 = vrot.slane %v11270_v3, 3  ;;  %v11275_v2 = vrot.slane %v11273_v17, 4 }
 0x923   :  { %v10836_v36 = vpack.c.bf16 %v10784_v30, %v10783_v58  ;;  %v10654_v35 = vmul.f32 %v18560_v62, %v24421_v57  ;;  %v10400_v9 = vpop.f32.mrb[89].mxu0  ;;  %v11254_v20 = vrot.slane %v26533_v32, 3  ;;  %v11257_v53 = vrot.slane %v26532_v12, 4 }
 0x924   :  { %v10835_v26 = vpack.c.bf16 %v10782_v39, %v10781_v24  ;;  %v10652_v4 = vmul.f32 %v24421_v57, %v10400_v9  ;;  %v18561_v23 = vpop.f32.mrb[90].mxu0  ;;  %v11263_v10 = vrot.slane %v26531_v19, 3  ;;  %v11266_v59 = vrot.slane %v26527_v5, 4 }
 0x925   :  { %v10908_v11 = vrot.slane %v10836_v36, 4  ;;  %v10723_v49 = vadd.f32 %v24426_v45, %v10654_v35  ;;  %v10655_v28 = vmul.f32 %v18561_v23, %v24421_v57  ;;  %v10403_v43 = vpop.f32.mrb[91].mxu0  ;;  %v11258_v15 = vor.u32 %v11257_v53, %v11254_v20 }
 0x926   :  { %v10906_v22 = vrot.slane %v10835_v26, 4  ;;  %v10721_v56 = vadd.f32 %v24426_v45, %v10652_v4  ;;  %v10653_v44 = vmul.f32 %v24421_v57, %v10403_v43  ;;  %v11267_v41 = vor.u32 %v11266_v59, %v11263_v10 }
 0x927   :  { %10999 = vst.msk [vmem:[#allocation2 + $0x70] sm:$0xf] %vm277_vm4, %v10908_v11  ;;  %v10724_v14 = vadd.f32 %v24426_v45, %v10655_v28  ;;  %v11259_v54 = vsel %vm479_vm5, %v11249_v0, %v11258_v15  ;;  %v24575_v47 = vld [vmem:[#allocation2 + $0x50] sm:$0xf8]  ;;  %v10787_v8 = vmax.f32 %v10723_v49, 0.0  ;;  %v11276_v17 = vor.u32 %v11275_v2, %v11272_v25 }
 0x928   :  { %v10907_v29 = vsel %vm174_vm2, %v10904_v13, %v10906_v22  ;;  %v10909_v7 = vsel %vm174_vm2, %v10906_v22, %v10908_v11  ;;  %v10722_v34 = vadd.f32 %v24426_v45, %v10653_v44  ;;  %18611 = vmatmul.mubr.msk.bf16.gmra.mrb[72].mxu1 %vm273_vm3, %v11259_v54  ;;  %v24581_v58 = vld [vmem:[#allocation2 + $0x58] sm:$0xff]  ;;  %v10785_v51 = vmax.f32 %v10721_v56, 0.0 }
 0x929   :  { %10997 = vst.msk [vmem:[#allocation2 + $0x60] sm:$0xff] %vm273_vm3, %v10907_v29  ;;  %10998 = vst.msk [vmem:[#allocation2 + $0x68] sm:$0xff] %vm273_vm3, %v10909_v7  ;;  %v10788_v18 = vmax.f32 %v10724_v14, 0.0  ;;  %v11268_v0 = vsel %vm479_vm5, %v11258_v15, %v11267_v41  ;;  %v11279_v42 = vshrl.u32 %v24575_v47, 16  ;;  %v11282_v55 = vshll.u32 %v24575_v47, 16 }
 0x92a   :  { %v10786_v13 = vmax.f32 %v10722_v34, 0.0  ;;  %18614 = vmatprep.mubr.msk.bf16.mxu1 %vm273_vm3, %v11268_v0  ;;  %v18564_v24 = vpop.f32.mrb[92].mxu0  ;;  %v26525_v3 = vshrl.u32 %v24581_v58, 16  ;;  %v26524_v30 = vshll.u32 %v24581_v58, 16  ;;  %v11277_v14 = vsel %vm479_vm5, %v11267_v41, %v11276_v17 }
 0x92b   :  { %v24591_v31 = vpack.c.bf16 %v10788_v18, %v10787_v8  ;;  %v10658_v39 = vmul.f32 %v18564_v24, %v24421_v57  ;;  %v10416_v62 = vpop.f32.mrb[93].mxu0  ;;  %v11281_v36 = vrot.slane %v11279_v42, 3  ;;  %v11284_v53 = vrot.slane %v11282_v55, 4 }
 0x92c   :  { %v10837_v35 = vpack.c.bf16 %v10786_v13, %v10785_v51  ;;  %v10656_v9 = vmul.f32 %v24421_v57, %v10416_v62  ;;  %v18565_v20 = vpop.f32.mrb[94].mxu0  ;;  %v11289_v26 = vrot.slane %v26525_v3, 3  ;;  %v11292_v11 = vrot.slane %v26524_v30, 4 }
 0x92d   :  { %v10911_v4 = vrot.slane %v24591_v31, 4  ;;  %v10727_v23 = vadd.f32 %v24426_v45, %v10658_v39  ;;  %v10659_v10 = vmul.f32 %v18565_v20, %v24421_v57  ;;  %v10419_v59 = vpop.f32.mrb[95].mxu0  ;;  %v11285_v15 = vor.u32 %v11284_v53, %v11281_v36 }
 0x92e   :  { %v10910_v49 = vrot.slane %v10837_v35, 4  ;;  %v10725_v28 = vadd.f32 %v24426_v45, %v10656_v9  ;;  %v10657_v43 = vmul.f32 %v24421_v57, %v10419_v59  ;;  %v11184_v22 = vld [vmem:[#allocation2 + $0x70] sm:$0xf]  ;;  %v11293_v54 = vor.u32 %v11292_v11, %v11289_v26 }
 0x92f   :  { %v10791_v56 = vmax.f32 %v10727_v23, 0.0  ;;  %v10728_v44 = vadd.f32 %v24426_v45, %v10659_v10  ;;  %v11314_v34 = vshrl.u32 %v11184_v22, 16  ;;  %v11317_v31 = vshll.u32 %v11184_v22, 16 }
 0x930   :  { %v10912_v25 = vsel %vm174_vm2, %v10910_v49, %v10911_v4  ;;  %11000 = vst.msk [vmem:[#allocation2 + $0x78] sm:$0xf0] %vm271_vm1, %v10910_v49  ;;  %v10789_v2 = vmax.f32 %v10725_v28, 0.0  ;;  %v10726_v29 = vadd.f32 %v24426_v45, %v10657_v43  ;;  %18615 = vmatmul.mubr.msk.bf16.gmra.mrb[76].mxu1 %vm273_vm3, %v11277_v14  ;;  %v24610_v7 = vld [vmem:[#allocation2 + $0x60] sm:$0xff]  ;;  %v24612_v8 = vld [vmem:[#allocation2 + $0x68] sm:$0xff]  ;;  %v11294_v41 = vsel %vm479_vm5, %v11285_v15, %v11293_v54 }
 0x931   :  { %11001 = vst.msk [vmem:[#allocation2 + $0x80] sm:$0xff] %vm273_vm3, %v10912_v25  ;;  %v10792_v51 = vmax.f32 %v10728_v44, 0.0  ;;  %v26523_v18 = vshrl.u32 %v24610_v7, 16  ;;  %v26520_v0 = vshll.u32 %v24610_v7, 16  ;;  %18618 = vmatprep.mubr.msk.bf16.mxu1 %vm273_vm3, %v11294_v41  ;;  %v26516_v24 = vshrl.u32 %v24612_v8, 16 }
 0x932   :  { %v10790_v42 = vmax.f32 %v10726_v29, 0.0  ;;  %v18568_v13 = vpop.f32.mrb[96].mxu0  ;;  %v26514_v55 = vshll.u32 %v24612_v8, 16  ;;  %v11316_v25 = vrot.slane %v11314_v34, 3  ;;  %v12927_v37 = vrot.slane %v11217_v16, 4  ;;  %v20320_v16 = vld [vmem:[%s26305_s1 + $0x138] sm:$0xff]  }
 0x933   :  { %v10840_v39 = vpack.c.bf16 %v10792_v51, %v10791_v56  ;;  %v10662_v62 = vmul.f32 %v18568_v13, %v24421_v57  ;;  %v10432_v17 = vpop.f32.mrb[97].mxu0  ;;  %v11298_v36 = vrot.slane %v26523_v18, 3  ;;  %v11301_v35 = vrot.slane %v26520_v0, 4 }
 0x934   :  { %v10839_v9 = vpack.c.bf16 %v10790_v42, %v10789_v2  ;;  %v10660_v20 = vmul.f32 %v24421_v57, %v10432_v17  ;;  %v18569_v53 = vpop.f32.mrb[98].mxu0  ;;  %v11307_v26 = vrot.slane %v26516_v24, 3  ;;  %v11310_v23 = vrot.slane %v26514_v55, 4 }
 0x935   :  { %v10915_v10 = vrot.slane %v10840_v39, 4  ;;  %v10731_v59 = vadd.f32 %v24426_v45, %v10662_v62  ;;  %v10663_v11 = vmul.f32 %v18569_v53, %v24421_v57  ;;  %v10435_v49 = vpop.f32.mrb[99].mxu0  ;;  %v11302_v28 = vor.u32 %v11301_v35, %v11298_v36 }
 0x936   :  { %v10913_v43 = vrot.slane %v10839_v9, 4  ;;  %v10729_v15 = vadd.f32 %v24426_v45, %v10660_v20  ;;  %v10661_v22 = vmul.f32 %v24421_v57, %v10435_v49  ;;  %v11311_v56 = vor.u32 %v11310_v23, %v11307_v26 }
 0x937   :  { %11004 = vst.msk [vmem:[#allocation2 + $0x98] sm:$0xf] %vm277_vm4, %v10915_v10  ;;  %v10732_v44 = vadd.f32 %v24426_v45, %v10663_v11  ;;  %v11303_v14 = vsel %vm479_vm5, %v11293_v54, %v11302_v28  ;;  %v11319_v2 = vrot.slane %v11317_v31, 4  ;;  %v24638_v29 = vld [vmem:[#allocation2 + $0x78] sm:$0xf8]  ;;  %v10795_v42 = vmax.f32 %v10731_v59, 0.0 }
 0x938   :  { %v10914_v51 = vsel %vm174_vm2, %v10911_v4, %v10913_v43  ;;  %v10916_v41 = vsel %vm174_vm2, %v10913_v43, %v10915_v10  ;;  %v10730_v13 = vadd.f32 %v24426_v45, %v10661_v22  ;;  %18619 = vmatmul.mubr.msk.bf16.gmra.mrb[80].mxu1 %vm273_vm3, %v11303_v14  ;;  %v24644_v39 = vld [vmem:[#allocation2 + $0x80] sm:$0xff]  ;;  %v10793_v54 = vmax.f32 %v10729_v15, 0.0 }
 0x939   :  { %11002 = vst.msk [vmem:[#allocation2 + $0x88] sm:$0xff] %vm273_vm3, %v10914_v51  ;;  %11003 = vst.msk [vmem:[#allocation2 + $0x90] sm:$0xff] %vm273_vm3, %v10916_v41  ;;  %v10796_v34 = vmax.f32 %v10732_v44, 0.0  ;;  %v11312_v31 = vsel %vm479_vm5, %v11302_v28, %v11311_v56  ;;  %v11323_v62 = vshrl.u32 %v24638_v29, 16  ;;  %v11326_v36 = vshll.u32 %v24638_v29, 16 }
 0x93a   :  { %v10794_v4 = vmax.f32 %v10730_v13, 0.0  ;;  %18622 = vmatprep.mubr.msk.bf16.mxu1 %vm273_vm3, %v11312_v31  ;;  %v18572_v17 = vpop.f32.mrb[100].mxu0  ;;  %v26513_v35 = vshrl.u32 %v24644_v39, 16  ;;  %v26512_v9 = vshll.u32 %v24644_v39, 16  ;;  %v11320_v23 = vor.u32 %v11319_v2, %v11316_v25 }
 0x93b   :  { %v24654_v20 = vpack.c.bf16 %v10796_v34, %v10795_v42  ;;  %v10666_v53 = vmul.f32 %v18572_v17, %v24421_v57  ;;  %v10448_v26 = vpop.f32.mrb[101].mxu0  ;;  %v11325_v10 = vrot.slane %v11323_v62, 3  ;;  %v11328_v28 = vrot.slane %v11326_v36, 4 }
 0x93c   :  { %v10841_v59 = vpack.c.bf16 %v10794_v4, %v10793_v54  ;;  %v10664_v11 = vmul.f32 %v24421_v57, %v10448_v26  ;;  %v18573_v49 = vpop.f32.mrb[102].mxu0  ;;  %v11333_v43 = vrot.slane %v26513_v35, 3  ;;  %v11336_v51 = vrot.slane %v26512_v9, 4 }
 0x93d   :  { %v10918_v15 = vrot.slane %v24654_v20, 4  ;;  %v10735_v22 = vadd.f32 %v24426_v45, %v10666_v53  ;;  %v10667_v44 = vmul.f32 %v18573_v49, %v24421_v57  ;;  %v10451_v14 = vpop.f32.mrb[103].mxu0  ;;  %v11329_v42 = vor.u32 %v11328_v28, %v11325_v10 }
 0x93e   :  { %v10917_v25 = vrot.slane %v10841_v59, 4  ;;  %v10733_v2 = vadd.f32 %v24426_v45, %v10664_v11  ;;  %v10665_v41 = vmul.f32 %v24421_v57, %v10451_v14  ;;  %v11185_v13 = vld [vmem:[#allocation2 + $0x98] sm:$0xf]  ;;  %v11321_v31 = vsel %vm479_vm5, %v11311_v56, %v11320_v23 }
 0x93f   :  { %v10799_v54 = vmax.f32 %v10735_v22, 0.0  ;;  %v10736_v34 = vadd.f32 %v24426_v45, %v10667_v44  ;;  %v11337_v62 = vor.u32 %v11336_v51, %v11333_v43  ;;  %v11358_v26 = vshrl.u32 %v11185_v13, 16 }
 0x940   :  { %v10919_v4 = vsel %vm174_vm2, %v10917_v25, %v10918_v15  ;;  %11005 = vst.msk [vmem:[#allocation2 + $0xa0] sm:$0xf0] %vm271_vm1, %v10917_v25  ;;  %v10797_v17 = vmax.f32 %v10733_v2, 0.0  ;;  %v10734_v36 = vadd.f32 %v24426_v45, %v10665_v41  ;;  %18623 = vmatmul.mubr.msk.bf16.gmra.mrb[84].mxu1 %vm273_vm3, %v11321_v31  ;;  %v24673_v20 = vld [vmem:[#allocation2 + $0x88] sm:$0xff]  ;;  %v24675_v53 = vld [vmem:[#allocation2 + $0x90] sm:$0xff]  ;;  %v11361_v22 = vshll.u32 %v11185_v13, 16 }
 0x941   :  { %11006 = vst.msk [vmem:[#allocation2 + $0xa8] sm:$0xff] %vm273_vm3, %v10919_v4  ;;  %v10800_v10 = vmax.f32 %v10736_v34, 0.0  ;;  %v11338_v56 = vsel %vm479_vm5, %v11329_v42, %v11337_v62  ;;  %v26509_v23 = vshrl.u32 %v24673_v20, 16  ;;  %v26506_v59 = vshll.u32 %v24673_v20, 16 }
 0x942   :  { %v10798_v11 = vmax.f32 %v10734_v36, 0.0  ;;  %18626 = vmatprep.mubr.msk.bf16.mxu1 %vm273_vm3, %v11338_v56  ;;  %v18576_v49 = vpop.f32.mrb[104].mxu0  ;;  %v26507_v28 = vshrl.u32 %v24675_v53, 16  ;;  %v26508_v43 = vshll.u32 %v24675_v53, 16 }
 0x943   :  { %v10844_v44 = vpack.c.bf16 %v10800_v10, %v10799_v54  ;;  %v10670_v14 = vmul.f32 %v18576_v49, %v24421_v57  ;;  %v10464_v51 = vpop.f32.mrb[105].mxu0  ;;  %v11342_v25 = vrot.slane %v26509_v23, 3  ;;  %v11345_v2 = vrot.slane %v26506_v59, 4 }
 0x944   :  { %v10843_v41 = vpack.c.bf16 %v10798_v11, %v10797_v17  ;;  %v10668_v42 = vmul.f32 %v24421_v57, %v10464_v51  ;;  %v18577_v34 = vpop.f32.mrb[106].mxu0  ;;  %v11351_v31 = vrot.slane %v26507_v28, 3  ;;  %v11354_v13 = vrot.slane %v26508_v43, 4 }
 0x945   :  { %v10922_v54 = vrot.slane %v10844_v44, 4  ;;  %v10739_v4 = vadd.f32 %v24426_v45, %v10670_v14  ;;  %v10671_v36 = vmul.f32 %v18577_v34, %v24421_v57  ;;  %v10467_v10 = vpop.f32.mrb[107].mxu0  ;;  %v11346_v56 = vor.u32 %v11345_v2, %v11342_v25 }
 0x946   :  { %v10920_v49 = vrot.slane %v10843_v41, 4  ;;  %v10737_v59 = vadd.f32 %v24426_v45, %v10668_v42  ;;  %v10669_v17 = vmul.f32 %v24421_v57, %v10467_v10  ;;  %v11355_v11 = vor.u32 %v11354_v13, %v11351_v31 }
 0x947   :  { %11009 = vst.msk [vmem:[#allocation2 + $0xc0] sm:$0xf] %vm277_vm4, %v10922_v54  ;;  %v10740_v51 = vadd.f32 %v24426_v45, %v10671_v36  ;;  %v11347_v28 = vsel %vm479_vm5, %v11337_v62, %v11346_v56  ;;  %v11360_v43 = vrot.slane %v11358_v26, 3  ;;  %v11363_v44 = vrot.slane %v11361_v22, 4  ;;  %v24701_v23 = vld [vmem:[#allocation2 + $0xa0] sm:$0xf8] }
 0x948   :  { %v10921_v14 = vsel %vm174_vm2, %v10918_v15, %v10920_v49  ;;  %v10923_v25 = vsel %vm174_vm2, %v10920_v49, %v10922_v54  ;;  %v10803_v2 = vmax.f32 %v10739_v4, 0.0  ;;  %v10738_v41 = vadd.f32 %v24426_v45, %v10669_v17  ;;  %18627 = vmatmul.mubr.msk.bf16.gmra.mrb[88].mxu1 %vm273_vm3, %v11347_v28  ;;  %v24707_v42 = vld [vmem:[#allocation2 + $0xa8] sm:$0xff] }
 0x949   :  { %11007 = vst.msk [vmem:[#allocation2 + $0xb0] sm:$0xff] %vm273_vm3, %v10921_v14  ;;  %11008 = vst.msk [vmem:[#allocation2 + $0xb8] sm:$0xff] %vm273_vm3, %v10923_v25  ;;  %v10801_v62 = vmax.f32 %v10737_v59, 0.0  ;;  %v10804_v26 = vmax.f32 %v10740_v51, 0.0  ;;  %v11356_v22 = vsel %vm479_vm5, %v11346_v56, %v11355_v11  ;;  %v11367_v34 = vshrl.u32 %v24701_v23, 16 }
 0x94a   :  { %v10802_v15 = vmax.f32 %v10738_v41, 0.0  ;;  %18630 = vmatprep.mubr.msk.bf16.mxu1 %vm273_vm3, %v11356_v22  ;;  %v18580_v31 = vpop.f32.mrb[108].mxu0  ;;  %v11370_v13 = vshll.u32 %v24701_v23, 16  ;;  %v26510_v28 = vshrl.u32 %v24707_v42, 16  ;;  %v26511_v54 = vshll.u32 %v24707_v42, 16 }
 0x94b   :  { %v24717_v4 = vpack.c.bf16 %v10804_v26, %v10803_v2  ;;  %v10674_v36 = vmul.f32 %v18580_v31, %v24421_v57  ;;  %v10480_v59 = vpop.f32.mrb[109].mxu0  ;;  %v11364_v10 = vor.u32 %v11363_v44, %v11360_v43  ;;  %v11369_v49 = vrot.slane %v11367_v34, 3 }
 0x94c   :  { %v10845_v56 = vpack.c.bf16 %v10802_v15, %v10801_v62  ;;  %v10672_v17 = vmul.f32 %v24421_v57, %v10480_v59  ;;  %v18581_v51 = vpop.f32.mrb[110].mxu0  ;;  %v11372_v14 = vrot.slane %v11370_v13, 4  ;;  %v11377_v25 = vrot.slane %v26510_v28, 3 }
 0x94d   :  { %v10925_v41 = vrot.slane %v24717_v4, 4  ;;  %v10743_v22 = vadd.f32 %v24426_v45, %v10674_v36  ;;  %v10675_v2 = vmul.f32 %v18581_v51, %v24421_v57  ;;  %v10483_v26 = vpop.f32.mrb[111].mxu0  ;;  %v11380_v31 = vrot.slane %v26511_v54, 4 }
 0x94e   :  { %v10924_v43 = vrot.slane %v10845_v56, 4  ;;  %v10741_v44 = vadd.f32 %v24426_v45, %v10672_v17  ;;  %v10673_v62 = vmul.f32 %v24421_v57, %v10483_v26  ;;  %v11373_v34 = vor.u32 %v11372_v14, %v11369_v49  ;;  %v24730_v15 = vld [vmem:[#allocation2 + $0xc0] sm:$0xf] }
 0x94f   :  { %v10807_v13 = vmax.f32 %v10743_v22, 0.0  ;;  %v10744_v59 = vadd.f32 %v24426_v45, %v10675_v2  ;;  %v11365_v4 = vsel %vm479_vm5, %v11355_v11, %v11364_v10  ;;  %v11381_v36 = vor.u32 %v11380_v31, %v11377_v25 }
 0x950   :  { %v10926_v51 = vsel %vm174_vm2, %v10924_v43, %v10925_v41  ;;  %11010 = vst.msk [vmem:[#allocation2 + $0xc8] sm:$0xf0] %vm271_vm1, %v10924_v43  ;;  %v10805_v28 = vmax.f32 %v10741_v44, 0.0  ;;  %v10742_v56 = vadd.f32 %v24426_v45, %v10673_v62  ;;  %18631 = vmatmul.mubr.msk.bf16.gmra.mrb[92].mxu1 %vm273_vm3, %v11365_v4  ;;  %v24738_v17 = vld [vmem:[#allocation2 + $0xb0] sm:$0xff]  ;;  %v24740_v49 = vld [vmem:[#allocation2 + $0xb8] sm:$0xff]  ;;  %v11402_v14 = vshrl.u32 %v24730_v15, 16 }
 0x951   :  { %11011 = vst.msk [vmem:[#allocation2 + $0xd0] sm:$0xff] %vm273_vm3, %v10926_v51  ;;  %v10808_v22 = vmax.f32 %v10744_v59, 0.0  ;;  %v11382_v11 = vsel %vm479_vm5, %v11373_v34, %v11381_v36  ;;  %v26515_v10 = vshrl.u32 %v24738_v17, 16  ;;  %v26517_v25 = vshll.u32 %v24738_v17, 16 }
 0x952   :  { %v10806_v2 = vmax.f32 %v10742_v56, 0.0  ;;  %18634 = vmatprep.mubr.msk.bf16.mxu1 %vm273_vm3, %v11382_v11  ;;  %v18584_v26 = vpop.f32.mrb[112].mxu0  ;;  %v26518_v31 = vshrl.u32 %v24740_v49, 16  ;;  %v26519_v43 = vshll.u32 %v24740_v49, 16  ;;  %v11405_v44 = vshll.u32 %v24730_v15, 16 }
 0x953   :  { %v10848_v62 = vpack.c.bf16 %v10808_v22, %v10807_v13  ;;  %v10678_v4 = vmul.f32 %v18584_v26, %v24421_v57  ;;  %v10496_v59 = vpop.f32.mrb[113].mxu0  ;;  %v11386_v34 = vrot.slane %v26515_v10, 3  ;;  %v11389_v51 = vrot.slane %v26517_v25, 4 }
 0x954   :  { %v10847_v56 = vpack.c.bf16 %v10806_v2, %v10805_v28  ;;  %v10676_v11 = vmul.f32 %v24421_v57, %v10496_v59  ;;  %v18585_v54 = vpop.f32.mrb[114].mxu0  ;;  %v11395_v9 = vrot.slane %v26518_v31, 3  ;;  %v11398_v35 = vrot.slane %v26519_v43, 4 }
 0x955   :  { %v10929_v13 = vrot.slane %v10848_v62, 4  ;;  %v10747_v22 = vadd.f32 %v24426_v45, %v10678_v4  ;;  %v10679_v26 = vmul.f32 %v18585_v54, %v24421_v57  ;;  %v10499_v55 = vpop.f32.mrb[115].mxu0  ;;  %v11390_v10 = vor.u32 %v11389_v51, %v11386_v34 }
 0x956   :  { %v10927_v24 = vrot.slane %v10847_v56, 4  ;;  %v10745_v25 = vadd.f32 %v24426_v45, %v10676_v11  ;;  %v10677_v28 = vmul.f32 %v24421_v57, %v10499_v55  ;;  %v11399_v2 = vor.u32 %v11398_v35, %v11395_v9 }
 0x957   :  { %11014 = vst.msk [vmem:[#allocation2 + $0xe8] sm:$0xf] %vm277_vm4, %v10929_v13  ;;  %v10748_v59 = vadd.f32 %v24426_v45, %v10679_v26  ;;  %v11391_v31 = vsel %vm479_vm5, %v11381_v36, %v11390_v10  ;;  %v11404_v43 = vrot.slane %v11402_v14, 3  ;;  %v11407_v62 = vrot.slane %v11405_v44, 4  ;;  %v24768_v0 = vld [vmem:[#allocation2 + $0xc8] sm:$0xf8] }
 0x958   :  { %v10928_v54 = vsel %vm174_vm2, %v10925_v41, %v10927_v24  ;;  %v10930_v4 = vsel %vm174_vm2, %v10927_v24, %v10929_v13  ;;  %v10811_v34 = vmax.f32 %v10747_v22, 0.0  ;;  %v10746_v51 = vadd.f32 %v24426_v45, %v10677_v28  ;;  %18635 = vmatmul.mubr.msk.bf16.gmra.mrb[96].mxu1 %vm273_vm3, %v11391_v31  ;;  %v24774_v55 = vld [vmem:[#allocation2 + $0xd0] sm:$0xff]  ;;  %v24790_v26 = vld [vmem:[%s26306_s2 + $0x2] ss:$0 sm:$0xff] }
 0x959   :  { %11012 = vst.msk [vmem:[#allocation2 + $0xd8] sm:$0xff] %vm273_vm3, %v10928_v54  ;;  %11013 = vst.msk [vmem:[#allocation2 + $0xe0] sm:$0xff] %vm273_vm3, %v10930_v4  ;;  %v10809_v35 = vmax.f32 %v10745_v25, 0.0  ;;  %v10812_v9 = vmax.f32 %v10748_v59, 0.0  ;;  %v11400_v36 = vsel %vm479_vm5, %v11390_v10, %v11399_v2  ;;  %v11411_v14 = vshrl.u32 %v24768_v0, 16 }
 0x95a   :  { %v10810_v41 = vmax.f32 %v10746_v51, 0.0  ;;  %18638 = vmatprep.mubr.msk.bf16.mxu1 %vm273_vm3, %v11400_v36  ;;  %v18588_v24 = vpop.f32.mrb[116].mxu0  ;;  %v11414_v45 = vshll.u32 %v24768_v0, 16  ;;  %v26521_v31 = vshrl.u32 %v24774_v55, 16  ;;  %v26522_v44 = vshll.u32 %v24774_v55, 16 }
 0x95b   :  { %v24784_v56 = vpack.c.bf16 %v10812_v9, %v10811_v34  ;;  %v10682_v11 = vmul.f32 %v18588_v24, %v24421_v57  ;;  %v10512_v25 = vpop.f32.mrb[117].mxu0  ;;  %v11408_v13 = vor.u32 %v11407_v62, %v11404_v43  ;;  %v11413_v22 = vrot.slane %v11411_v14, 3  ;;  %v24799_v57 = vld [vmem:[%s26307_s3 + $0x2] ss:$0 sm:$0xff] }
 0x95c   :  { %v10849_v10 = vpack.c.bf16 %v10810_v41, %v10809_v35  ;;  %v10680_v28 = vmul.f32 %v24790_v26, %v10512_v25  ;;  %v18589_v59 = vpop.f32.mrb[118].mxu0  ;;  %v11416_v54 = vrot.slane %v11414_v45, 4  ;;  %v11421_v4 = vrot.slane %v26521_v31, 3 }
 0x95d   :  { %v10932_v34 = vrot.slane %v24784_v56, 4  ;;  %v10751_v43 = vadd.f32 %v24799_v57, %v10682_v11  ;;  %v10683_v62 = vmul.f32 %v24790_v26, %v18589_v59  ;;  %v10515_v51 = vpop.f32.mrb[119].mxu0  ;;  %v11424_v35 = vrot.slane %v26522_v44, 4 }
 0x95e   :  { %v10931_v9 = vrot.slane %v10849_v10, 4  ;;  %v10749_v36 = vadd.f32 %v24799_v57, %v10680_v28  ;;  %v10681_v14 = vmul.f32 %v24790_v26, %v10515_v51  ;;  %v11417_v41 = vor.u32 %v11416_v54, %v11413_v22  ;;  %v24807_v24 = vld [vmem:[#allocation2 + $0xe8] sm:$0xf] }
 0x95f   :  { %v10815_v45 = vmax.f32 %v10751_v43, 0.0  ;;  %v10752_v56 = vadd.f32 %v24799_v57, %v10683_v62  ;;  %v11409_v25 = vsel %vm479_vm5, %v11399_v2, %v11408_v13  ;;  %v11425_v11 = vor.u32 %v11424_v35, %v11421_v4 }
 0x960   :  { %v10933_v59 = vsel %vm174_vm2, %v10931_v9, %v10932_v34  ;;  %11015 = vst.msk [vmem:[#allocation2 + $0xf0] sm:$0xf0] %vm271_vm1, %v10931_v9  ;;  %v10813_v31 = vmax.f32 %v10749_v36, 0.0  ;;  %v10750_v10 = vadd.f32 %v24799_v57, %v10681_v14  ;;  %18639 = vmatmul.mubr.msk.bf16.gmra.mrb[100].mxu1 %vm273_vm3, %v11409_v25  ;;  %v24815_v28 = vld [vmem:[#allocation2 + $0xd8] sm:$0xff]  ;;  %v24817_v22 = vld [vmem:[#allocation2 + $0xe0] sm:$0xff]  ;;  %v11446_v54 = vshrl.u32 %v24807_v24, 16 }
 0x961   :  { %11016 = vst.msk [vmem:[#allocation2 + $0xf8] sm:$0xff] %vm273_vm3, %v10933_v59  ;;  %v10816_v43 = vmax.f32 %v10752_v56, 0.0  ;;  %v11426_v2 = vsel %vm479_vm5, %v11417_v41, %v11425_v11  ;;  %v26526_v13 = vshrl.u32 %v24815_v28, 16  ;;  %v26528_v4 = vshll.u32 %v24815_v28, 16 }
 0x962   :  { %v10814_v62 = vmax.f32 %v10750_v10, 0.0  ;;  %18642 = vmatprep.mubr.msk.bf16.mxu1 %vm273_vm3, %v11426_v2  ;;  %v18592_v51 = vpop.f32.mrb[120].mxu0  ;;  %v26529_v35 = vshrl.u32 %v24817_v22, 16  ;;  %v26530_v9 = vshll.u32 %v24817_v22, 16  ;;  %v11449_v36 = vshll.u32 %v24807_v24, 16 }
 0x963   :  { %v10852_v14 = vpack.c.bf16 %v10816_v43, %v10815_v45  ;;  %v10686_v25 = vmul.f32 %v24790_v26, %v18592_v51  ;;  %v10528_v56 = vpop.f32.mrb[121].mxu0  ;;  %v11430_v41 = vrot.slane %v26526_v13, 3  ;;  %v11433_v59 = vrot.slane %v26528_v4, 4 }
 0x964   :  { %v10851_v10 = vpack.c.bf16 %v10814_v62, %v10813_v31  ;;  %v10684_v2 = vmul.f32 %v24790_v26, %v10528_v56  ;;  %v18593_v44 = vpop.f32.mrb[122].mxu0  ;;  %v11439_v18 = vrot.slane %v26529_v35, 3  ;;  %v11442_v30 = vrot.slane %v26530_v9, 4 }
 0x965   :  { %v10936_v45 = vrot.slane %v10852_v14, 4  ;;  %v10755_v43 = vadd.f32 %v24799_v57, %v10686_v25  ;;  %v10687_v51 = vmul.f32 %v24790_v26, %v18593_v44  ;;  %v10531_v3 = vpop.f32.mrb[123].mxu0  ;;  %v11434_v13 = vor.u32 %v11433_v59, %v11430_v41 }
 0x966   :  { %v10934_v5 = vrot.slane %v10851_v10, 4  ;;  %v10753_v4 = vadd.f32 %v24799_v57, %v10684_v2  ;;  %v10685_v31 = vmul.f32 %v24790_v26, %v10531_v3  ;;  %v11443_v62 = vor.u32 %v11442_v30, %v11439_v18 }
 0x967   :  { %11019 = vst.msk [vmem:[#allocation2 + $0x110] sm:$0xf] %vm277_vm4, %v10936_v45  ;;  %v10756_v56 = vadd.f32 %v24799_v57, %v10687_v51  ;;  %v11435_v35 = vsel %vm479_vm5, %v11425_v11, %v11434_v13  ;;  %v11448_v9 = vrot.slane %v11446_v54, 3  ;;  %v11451_v14 = vrot.slane %v11449_v36, 4  ;;  %v24845_v19 = vld [vmem:[#allocation2 + $0xf0] sm:$0xf8] }
 0x968   :  { %v10935_v44 = vsel %vm174_vm2, %v10932_v34, %v10934_v5  ;;  %v10937_v25 = vsel %vm174_vm2, %v10934_v5, %v10936_v45  ;;  %v10819_v41 = vmax.f32 %v10755_v43, 0.0  ;;  %v10754_v59 = vadd.f32 %v24799_v57, %v10685_v31  ;;  %18643 = vmatmul.mubr.msk.bf16.gmra.mrb[104].mxu1 %vm273_vm3, %v11435_v35  ;;  %v24851_v3 = vld [vmem:[#allocation2 + $0xf8] sm:$0xff] }
 0x969   :  { %11017 = vst.msk [vmem:[#allocation2 + $0x100] sm:$0xff] %vm273_vm3, %v10935_v44  ;;  %11018 = vst.msk [vmem:[#allocation2 + $0x108] sm:$0xff] %vm273_vm3, %v10937_v25  ;;  %v10817_v30 = vmax.f32 %v10753_v4, 0.0  ;;  %v10820_v18 = vmax.f32 %v10756_v56, 0.0  ;;  %v11444_v11 = vsel %vm479_vm5, %v11434_v13, %v11443_v62  ;;  %v11455_v54 = vshrl.u32 %v24845_v19, 16 }
 0x96a   :  { %v10818_v34 = vmax.f32 %v10754_v59, 0.0  ;;  %18646 = vmatprep.mubr.msk.bf16.mxu1 %vm273_vm3, %v11444_v11  ;;  %v18596_v5 = vpop.f32.mrb[124].mxu0  ;;  %v11458_v36 = vshll.u32 %v24845_v19, 16  ;;  %v26545_v35 = vshrl.u32 %v24851_v3, 16  ;;  %v26544_v10 = vshll.u32 %v24851_v3, 16 }
 0x96b   :  { %v10854_v2 = vpack.c.bf16 %v10820_v18, %v10819_v41  ;;  %v10690_v45 = vmul.f32 %v24790_v26, %v18596_v5  ;;  %v10544_v43 = vpop.f32.mrb[125].mxu0  ;;  %v11452_v4 = vor.u32 %v11451_v14, %v11448_v9  ;;  %v11457_v51 = vrot.slane %v11455_v54, 3 }
 0x96c   :  { %v10853_v31 = vpack.c.bf16 %v10818_v34, %v10817_v30  ;;  %v10688_v13 = vmul.f32 %v24790_v26, %v10544_v43  ;;  %v18597_v56 = vpop.f32.mrb[126].mxu0  ;;  %v11460_v44 = vrot.slane %v11458_v36, 4  ;;  %v11465_v25 = vrot.slane %v26545_v35, 3 }
 0x96d   :  { %v10939_v59 = vrot.slane %v10854_v2, 4  ;;  %v10759_v11 = vadd.f32 %v24799_v57, %v10690_v45  ;;  %v10691_v12 = vmul.f32 %v24790_v26, %v18597_v56  ;;  %v10547_v32 = vpop.f32.mrb[127].mxu0  ;;  %v11468_v41 = vrot.slane %v26544_v10, 4 }
 0x96e   :  { %v10938_v18 = vrot.slane %v10853_v31, 4  ;;  %v10757_v9 = vadd.f32 %v24799_v57, %v10688_v13  ;;  %v10689_v14 = vmul.f32 %v24790_v26, %v10547_v32  ;;  %v11461_v30 = vor.u32 %v11460_v44, %v11457_v51  ;;  %v24881_v32 = vld [vmem:[#allocation2 + $0x110] sm:$0xf] }
 0x96f   :  { %v10760_v54 = vadd.f32 %v24799_v57, %v10691_v12  ;;  %v11453_v34 = vsel %vm479_vm5, %v11443_v62, %v11452_v4  ;;  %v11469_v5 = vor.u32 %v11468_v41, %v11465_v25  ;;  %v10823_v2 = vmax.f32 %v10759_v11, 0.0 }
 0x970   :  { %v10940_v36 = vsel %vm174_vm2, %v10938_v18, %v10939_v59  ;;  %11020 = vst.msk [vmem:[#allocation2 + $0x118] sm:$0xf0] %vm271_vm1, %v10938_v18  ;;  %v10758_v45 = vadd.f32 %v24799_v57, %v10689_v14  ;;  %18647 = vmatmul.mubr.msk.bf16.gmra.mrb[108].mxu1 %vm273_vm3, %v11453_v34  ;;  %v24877_v43 = vld [vmem:[#allocation2 + $0x100] sm:$0xff]  ;;  %v24879_v31 = vld [vmem:[#allocation2 + $0x108] sm:$0xff]  ;;  %v10821_v51 = vmax.f32 %v10757_v9, 0.0  ;;  %v11490_v41 = vshrl.u32 %v24881_v32, 16 }
 0x971   :  { %11021 = vst.msk [vmem:[#allocation2 + $0x120] sm:$0xff] %vm273_vm3, %v10940_v36  ;;  %v10824_v12 = vmax.f32 %v10760_v54, 0.0  ;;  %v11470_v26 = vsel %vm479_vm5, %v11461_v30, %v11469_v5  ;;  %v26543_v62 = vshrl.u32 %v24877_v43, 16  ;;  %v26541_v4 = vshll.u32 %v24877_v43, 16 }
 0x972   :  { %v10822_v13 = vmax.f32 %v10758_v45, 0.0  ;;  %18650 = vmatprep.mubr.msk.bf16.mxu1 %vm273_vm3, %v11470_v26  ;;  %v26535_v57 = vshrl.u32 %v24879_v31, 16  ;;  %v26534_v56 = vshll.u32 %v24879_v31, 16  ;;  %v11493_v30 = vshll.u32 %v24881_v32, 16 }
 0x973   :  { %v10856_v44 = vpack.c.bf16 %v10824_v12, %v10823_v2  ;;  %v11474_v25 = vrot.slane %v26543_v62, 3  ;;  %v11477_v11 = vrot.slane %v26541_v4, 4  ;;  %v11492_v12 = vrot.slane %v11490_v41, 3  ;;  %v24949_v4 = vld [vmem:[#allocation2 + $0x8] sm:$0xff] }
 0x974   :  { %v10855_v18 = vpack.c.bf16 %v10822_v13, %v10821_v51  ;;  %v11483_v9 = vrot.slane %v26535_v57, 3  ;;  %v11486_v14 = vrot.slane %v26534_v56, 4  ;;  %v11495_v57 = vrot.slane %v11493_v30, 4 }
 0x975   :  { %v10943_v54 = vrot.slane %v10856_v44, 4  ;;  %v11478_v34 = vor.u32 %v11477_v11, %v11474_v25 }
 0x976   :  { %v10941_v36 = vrot.slane %v10855_v18, 4  ;;  %v11487_v2 = vor.u32 %v11486_v14, %v11483_v9  ;;  %v11496_v30 = vor.u32 %v11495_v57, %v11492_v12 }
 0x977   :  { %11024 = vst.msk [vmem:[#allocation2 + $0x138] sm:$0xf] %vm277_vm4, %v10943_v54  ;;  %v11479_v45 = vsel %vm479_vm5, %v11469_v5, %v11478_v34  ;;  %v24902_v26 = vld [vmem:[#allocation2 + $0x118] sm:$0xf8] }
 0x978   :  { %v10942_v51 = vsel %vm174_vm2, %v10939_v59, %v10941_v36  ;;  %v10944_v13 = vsel %vm174_vm2, %v10941_v36, %v10943_v54  ;;  %18651 = vmatmul.mubr.msk.bf16.gmra.mrb[112].mxu1 %vm273_vm3, %v11479_v45  ;;  %v11488_v56 = vsel %vm479_vm5, %v11478_v34, %v11487_v2  ;;  %v24908_v44 = vld [vmem:[#allocation2 + $0x120] sm:$0xff]  ;;  %v11499_v5 = vshrl.u32 %v24902_v26, 16 }
 0x979   :  { %11022 = vst.msk [vmem:[#allocation2 + $0x128] sm:$0xff] %vm273_vm3, %v10942_v51  ;;  %11023 = vst.msk [vmem:[#allocation2 + $0x130] sm:$0xff] %vm273_vm3, %v10944_v13  ;;  %18654 = vmatprep.mubr.msk.bf16.mxu1 %vm273_vm3, %v11488_v56  ;;  %v11502_v25 = vshll.u32 %v24902_v26, 16  ;;  %v26540_v59 = vshrl.u32 %v24908_v44, 16  ;;  %v26536_v11 = vshll.u32 %v24908_v44, 16  ;;  %v11497_v56 = vsel %vm479_vm5, %v11487_v2, %v11496_v30 }
 0x97a   :  { %v11501_v41 = vrot.slane %v11499_v5, 3 }
 0x97b   :  { %v11504_v18 = vrot.slane %v11502_v25, 4  ;;  %v11509_v9 = vrot.slane %v26540_v59, 3  ;;  %v11512_v14 = vrot.slane %v26536_v11, 4 }
 0x97d   :  { %v11505_v54 = vor.u32 %v11504_v18, %v11501_v41  ;;  %v11513_v34 = vor.u32 %v11512_v14, %v11509_v9 }
 0x97e   :  { %v24933_v25 = vld [vmem:[#allocation2 + $0x138] sm:$0xf] }
 0x97f   :  { %v11514_v36 = vsel %vm479_vm5, %v11505_v54, %v11513_v34  ;;  %v11534_v54 = vshrl.u32 %v24933_v25, 16 }
 0x980   :  { %18655 = vmatmul.mubr.msk.bf16.gmra.mrb[116].mxu1 %vm273_vm3, %v11497_v56  ;;  %v24924_v45 = vld [vmem:[#allocation2 + $0x128] sm:$0xff]  ;;  %v24926_v51 = vld [vmem:[#allocation2 + $0x130] sm:$0xff]  ;;  %v11537_v56 = vshll.u32 %v24933_v25, 16 }
 0x981   :  { %18658 = vmatprep.mubr.msk.bf16.mxu1 %vm273_vm3, %v11514_v36  ;;  %v26538_v13 = vshrl.u32 %v24924_v45, 16  ;;  %v26537_v5 = vshll.u32 %v24924_v45, 16  ;;  %v26539_v57 = vshrl.u32 %v24926_v51, 16  ;;  %v26542_v12 = vshll.u32 %v24926_v51, 16 }
 0x983   :  { %v11518_v2 = vrot.slane %v26538_v13, 3  ;;  %v11521_v41 = vrot.slane %v26537_v5, 4  ;;  %v11527_v18 = vrot.slane %v26539_v57, 3  ;;  %v11530_v9 = vrot.slane %v26542_v12, 4  ;;  %v20552_v57 = vld [vmem:[#allocation2] sm:$0xf8] }
 0x984   :  { %v11536_v5 = vrot.slane %v11534_v54, 3  ;;  %v11539_v13 = vrot.slane %v11537_v56, 4  ;;  %v11105_v59 = vrot.slane %v20552_v57, 3  ;;  %v11029_v54 = vld [vmem:[#allocation2 + $0x20] sm:$0x7] }
 0x985   :  { %v11522_v14 = vor.u32 %v11521_v41, %v11518_v2  ;;  %v11531_v30 = vor.u32 %v11530_v9, %v11527_v18  ;;  %v11106_v2 = vrot.slane %v24949_v4, 3  ;;  %v24956_v9 = vld [vmem:[#allocation2 + $0x10] sm:$0xff]  ;;  %v24975_v56 = vld [vmem:[%s26305_s1 + $0x120] sm:$0xff]  }
 0x986   :  { %v11540_v41 = vor.u32 %v11539_v13, %v11536_v5  ;;  %v20316_v13 = vld [vmem:[%s26305_s1 + $0x118] sm:$0xff]  }
 0x987   :  { %v11523_v36 = vsel %vm479_vm5, %v11513_v34, %v11522_v14  ;;  %v11532_v11 = vsel %vm479_vm5, %v11522_v14, %v11531_v30  ;;  %v11107_v34 = vsel %vm394_vm6, %v11105_v59, %v11106_v2  ;;  %v24959_v14 = vld [vmem:[#allocation2 + $0x18] sm:$0xff] }
 0x988   :  { %18659 = vmatmul.mubr.msk.bf16.gmra.mrb[120].mxu1 %vm273_vm3, %v11523_v36  ;;  %v11541_v18 = vsel %vm479_vm5, %v11531_v30, %v11540_v41  ;;  %v11110_v57 = vrot.slane %v24959_v14, 3  ;;  %v20556_v30 = vld [vmem:[%s26305_s1 + $0x110] sm:$0xff]   ;;  %v20557_v36 = vld [vmem:[#allocation2 + $0x28] sm:$0xf8] }
 0x989   :  { %18662 = vmatprep.mubr.msk.bf16.mxu1 %vm273_vm3, %v11532_v11  ;;  %v11108_v11 = vrot.slane %v24956_v9, 3  ;;  %v24977_v41 = vld [vmem:[#allocation2 + $0x30] sm:$0xff] }
 0x98b   :  { %v11109_v5 = vsel %vm394_vm6, %v11106_v2, %v11108_v11  ;;  %v11111_v59 = vsel %vm394_vm6, %v11108_v11, %v11110_v57  ;;  %v11114_v2 = vrot.slane %v20557_v36, 3  ;;  %v24988_v36 = vld [vmem:[#allocation2 + $0x40] sm:$0xff] }
 0x98c   :  { %v11119_v12 = vrot.slane %v24988_v36, 3 }
 0x990   :  { %18663 = vmatmul.mubr.msk.bf16.gmra.mrb[124].mxu1 %vm273_vm3, %v11541_v18  ;;  %v11115_v18 = vrot.slane %v24977_v41, 3 }
 0x991   :  { %18670 = vmatprep.mubr.msk.bf16.mxu1 %vm273_vm3, %v11107_v34  ;;  %v11112_v34 = vrot.slane %v11029_v54, 3  ;;  %v11034_v54 = vld [vmem:[#allocation2 + $0x48] sm:$0x7] }
 0x993   :  { %v11113_v11 = vsel %vm394_vm6, %v11110_v57, %v11112_v34  ;;  %v11124_v34 = vrot.slane %v24581_v58, 3 }
 0x998   :  { %18671 = vmatmul.mubr.msk.bf16.vlgmr.msra.gmra.mrb[64].mxu1 %vm273_vm3, %v11109_v5  ;;  %v11116_v5 = vsel %vm394_vm6, %v11114_v2, %v11115_v18  ;;  %v11123_v2 = vrot.slane %v24575_v47, 3 }
 0x999   :  { %18735 = vmatpush3.bf16.msra.mxu1 %v20556_v30  ;;  %18674 = vmatprep.mubr.msk.bf16.mxu1 %vm273_vm3, %v11111_v59  ;;  %v24985_v59 = vld [vmem:[#allocation2 + $0x38] sm:$0xff] }
 0x99a   :  { %18736 = vmatprep.subr.bf16.mxu1 %v20316_v13  ;;  %v11117_v30 = vrot.slane %v24985_v59, 3  ;;  %v11125_v62 = vsel %vm394_vm6, %v11123_v2, %v11124_v34 }
 0x99c   :  { %v11120_v57 = vsel %vm394_vm6, %v11117_v30, %v11119_v12 }
 0x99d   :  { %18737 = vmatpush3.bf16.msra.mxu1 %v20316_v13  ;;  %v11118_v13 = vsel %vm394_vm6, %v11115_v18, %v11117_v30  ;;  %v11126_v18 = vrot.slane %v24610_v7, 3  ;;  %v11128_v30 = vrot.slane %v24612_v8, 3 }
 0x99e   :  { %18802 = vmatprep.subr.bf16.mxu1 %v24975_v56 }
 0x99f   :  { %v11129_v47 = vsel %vm394_vm6, %v11126_v18, %v11128_v30 }
 0x9a0   :  { %18675 = vmatmul.mubr.msk.bf16.gmra.mrb[68].mxu1 %vm273_vm3, %v11113_v11  ;;  %v11121_v11 = vrot.slane %v11034_v54, 3  ;;  %v11133_v54 = vrot.slane %v24644_v39, 3 }
 0x9a1   :  { %18678 = vmatprep.mubr.msk.bf16.mxu1 %vm273_vm3, %v11116_v5 }
 0x9a2   :  { %v11122_v5 = vsel %vm394_vm6, %v11119_v12, %v11121_v11  ;;  %v11132_v12 = vrot.slane %v24638_v29, 3 }
 0x9a4   :  { %v11134_v11 = vsel %vm394_vm6, %v11132_v12, %v11133_v54 }
 0x9a8   :  { %18679 = vmatmul.mubr.msk.bf16.gmra.mrb[72].mxu1 %vm273_vm3, %v11118_v13  ;;  %v11127_v13 = vsel %vm394_vm6, %v11124_v34, %v11126_v18  ;;  %v11135_v34 = vrot.slane %v24673_v20, 3 }
 0x9a9   :  { %18682 = vmatprep.mubr.msk.bf16.mxu1 %vm273_vm3, %v11120_v57  ;;  %v11039_v57 = vld [vmem:[#allocation2 + $0x70] sm:$0x7] }
 0x9aa   :  { %v11130_v2 = vrot.slane %v11039_v57, 3  ;;  %v11136_v18 = vsel %vm394_vm6, %v11133_v54, %v11135_v34  ;;  %v11144_v54 = vrot.slane %v24738_v17, 3 }
 0x9b0   :  { %18683 = vmatmul.mubr.msk.bf16.gmra.mrb[76].mxu1 %vm273_vm3, %v11122_v5  ;;  %v11137_v5 = vrot.slane %v24675_v53, 3 }
 0x9b1   :  { %18686 = vmatprep.mubr.msk.bf16.mxu1 %vm273_vm3, %v11125_v62  ;;  %v11131_v62 = vsel %vm394_vm6, %v11128_v30, %v11130_v2  ;;  %v11141_v30 = vrot.slane %v24701_v23, 3 }
 0x9b2   :  { %v11138_v29 = vsel %vm394_vm6, %v11135_v34, %v11137_v5  ;;  %v11049_v34 = vld [vmem:[#allocation2 + $0xc0] sm:$0x7] }
 0x9b8   :  { %18687 = vmatmul.mubr.msk.bf16.gmra.mrb[80].mxu1 %vm273_vm3, %v11127_v13  ;;  %v11044_v13 = vld [vmem:[#allocation2 + $0x98] sm:$0x7] }
 0x9b9   :  { %18690 = vmatprep.mubr.msk.bf16.mxu1 %vm273_vm3, %v11129_v47  ;;  %v11142_v47 = vrot.slane %v24707_v42, 3  ;;  %v11139_v57 = vrot.slane %v11044_v13, 3 }
 0x9bb   :  { %v11140_v12 = vsel %vm394_vm6, %v11137_v5, %v11139_v57  ;;  %v11143_v2 = vsel %vm394_vm6, %v11141_v30, %v11142_v47  ;;  %v11150_v5 = vrot.slane %v24768_v0, 3  ;;  %v11155_v57 = vrot.slane %v24817_v22, 3 }
 0x9c0   :  { %18691 = vmatmul.mubr.msk.bf16.gmra.mrb[84].mxu1 %vm273_vm3, %v11131_v62  ;;  %v11146_v62 = vrot.slane %v24740_v49, 3 }
 0x9c1   :  { %18694 = vmatprep.mubr.msk.bf16.mxu1 %vm273_vm3, %v11134_v11  ;;  %v11145_v11 = vsel %vm394_vm6, %v11142_v47, %v11144_v54  ;;  %v11153_v47 = vrot.slane %v24815_v28, 3 }
 0x9c2   :  { %v11147_v23 = vsel %vm394_vm6, %v11144_v54, %v11146_v62  ;;  %v11159_v54 = vrot.slane %v24845_v19, 3 }
 0x9c3   :  { %v11156_v0 = vsel %vm394_vm6, %v11153_v47, %v11155_v57 }
 0x9c8   :  { %18695 = vmatmul.mubr.msk.bf16.gmra.mrb[88].mxu1 %vm273_vm3, %v11136_v18  ;;  %v11151_v18 = vrot.slane %v24774_v55, 3 }
 0x9c9   :  { %18698 = vmatprep.mubr.msk.bf16.mxu1 %vm273_vm3, %v11138_v29  ;;  %v11148_v29 = vrot.slane %v11049_v34, 3 }
 0x9ca   :  { %v11152_v30 = vsel %vm394_vm6, %v11150_v5, %v11151_v18  ;;  %v11162_v5 = vrot.slane %v24877_v43, 3 }
 0x9cb   :  { %v11149_v13 = vsel %vm394_vm6, %v11146_v62, %v11148_v29  ;;  %v11160_v62 = vrot.slane %v24851_v3, 3 }
 0x9cd   :  { %v11161_v34 = vsel %vm394_vm6, %v11159_v54, %v11160_v62  ;;  %v11163_v29 = vsel %vm394_vm6, %v11160_v62, %v11162_v5  ;;  %v11173_v54 = vrot.slane %v24926_v51, 3 }
 0x9d0   :  { %18699 = vmatmul.mubr.msk.bf16.gmra.mrb[92].mxu1 %vm273_vm3, %v11140_v12  ;;  %v11154_v12 = vsel %vm394_vm6, %v11151_v18, %v11153_v47  ;;  %v11164_v18 = vrot.slane %v24879_v31, 3  ;;  %v11169_v47 = vrot.slane %v24908_v44, 3 }
 0x9d1   :  { %18702 = vmatprep.mubr.msk.bf16.mxu1 %vm273_vm3, %v11143_v2  ;;  %v11054_v2 = vld [vmem:[#allocation2 + $0xe8] sm:$0x7] }
 0x9d2   :  { %v11165_v19 = vsel %vm394_vm6, %v11162_v5, %v11164_v18  ;;  %v12366_v5 = vrot.slane %v24949_v4, 4 }
 0x9d8   :  { %18703 = vmatmul.mubr.msk.bf16.gmra.mrb[96].mxu1 %vm273_vm3, %v11145_v11  ;;  %v11157_v11 = vrot.slane %v11054_v2, 3  ;;  %v11171_v2 = vrot.slane %v24924_v45, 3 }
 0x9d9   :  { %18706 = vmatprep.mubr.msk.bf16.mxu1 %vm273_vm3, %v11147_v23 }
 0x9da   :  { %v11158_v23 = vsel %vm394_vm6, %v11155_v57, %v11157_v11  ;;  %v11172_v62 = vsel %vm394_vm6, %v11169_v47, %v11171_v2  ;;  %v25067_v11 = vld [vmem:[#allocation2] sm:$0xf0] }
 0x9e0   :  { %18707 = vmatmul.mubr.msk.bf16.gmra.mrb[100].mxu1 %vm273_vm3, %v11149_v13  ;;  %v11059_v13 = vld [vmem:[#allocation2 + $0x110] sm:$0x7] }
 0x9e1   :  { %18710 = vmatprep.mubr.msk.bf16.mxu1 %vm273_vm3, %v11152_v30  ;;  %v11168_v30 = vrot.slane %v24902_v26, 3  ;;  %v11166_v57 = vrot.slane %v11059_v13, 3  ;;  %v11174_v26 = vsel %vm394_vm6, %v11171_v2, %v11173_v54  ;;  %v12368_v13 = vrot.slane %v24956_v9, 4  ;;  %v25090_v2 = vld [vmem:[%s26305_s1 + $0x130] sm:$0xff]  }
 0x9e8   :  { %18711 = vmatmul.mubr.msk.bf16.gmra.mrb[104].mxu1 %vm273_vm3, %v11154_v12  ;;  %v11167_v12 = vsel %vm394_vm6, %v11164_v18, %v11166_v57  ;;  %v12369_v57 = vsel %vm174_vm2, %v12366_v5, %v12368_v13 }
 0x9e9   :  { %18714 = vmatprep.mubr.msk.bf16.mxu1 %vm273_vm3, %v11156_v0  ;;  %v11170_v0 = vsel %vm394_vm6, %v11168_v30, %v11169_v47  ;;  %v12370_v30 = vrot.slane %v24959_v14, 4  ;;  %v20318_v47 = vld [vmem:[%s26305_s1 + $0x128] sm:$0xff]  }
 0x9f0   :  { %18715 = vmatmul.mubr.msk.bf16.gmra.mrb[108].mxu1 %vm273_vm3, %v11158_v23  ;;  %v11064_v23 = vld [vmem:[#allocation2 + $0x138] sm:$0x7] }
 0x9f1   :  { %18718 = vmatprep.mubr.msk.bf16.mxu1 %vm273_vm3, %v11161_v34  ;;  %v12365_v34 = vrot.slane %v25067_v11, 4  ;;  %v11175_v18 = vrot.slane %v11064_v23, 3 }
 0x9f8   :  { %18719 = vmatmul.mubr.msk.bf16.gmra.mrb[112].mxu1 %vm273_vm3, %v11163_v29  ;;  %v11176_v29 = vsel %vm394_vm6, %v11173_v54, %v11175_v18  ;;  %v12379_v18 = vrot.slane %v24988_v36, 4 }
 0x9f9   :  { %18722 = vmatprep.mubr.msk.bf16.mxu1 %vm273_vm3, %v11165_v19  ;;  %v12367_v19 = vsel %vm174_vm2, %v12365_v34, %v12366_v5  ;;  %v12377_v5 = vrot.slane %v24985_v59, 4 }
 0xa00   :  { %18723 = vmatmul.mubr.msk.bf16.gmra.mrb[116].mxu1 %vm273_vm3, %v11167_v12  ;;  %v12371_v12 = vsel %vm174_vm2, %v12368_v13, %v12370_v30  ;;  %v25105_v13 = vld [vmem:[#allocation2 + $0x50] sm:$0xf0] }
 0xa01   :  { %18726 = vmatprep.mubr.msk.bf16.mxu1 %vm273_vm3, %v11170_v0  ;;  %v25085_v0 = vld [vmem:[#allocation2 + $0x28] sm:$0xf0] }
 0xa02   :  { %v12374_v54 = vrot.slane %v25085_v0, 4  ;;  %v12944_v33 = vshll.u32 %v25085_v0, 16 }
 0xa08   :  { %18727 = vmatmul.mubr.msk.bf16.gmra.mrb[120].mxu1 %vm273_vm3, %v11172_v62  ;;  %v12375_v62 = vrot.slane %v24977_v41, 4 }
 0xa09   :  { %18730 = vmatprep.mubr.msk.bf16.mxu1 %vm273_vm3, %v11174_v26  ;;  %v20561_v26 = vld [vmem:[#allocation2 + $0x20] sm:$0xf] }
 0xa0a   :  { %v12372_v23 = vrot.slane %v20561_v26, 4  ;;  %v12376_v34 = vsel %vm174_vm2, %v12374_v54, %v12375_v62 }
 0xa10   :  { %18731 = vmatmul.mubr.msk.bf16.gmra.mrb[124].mxu1 %vm273_vm3, %v11176_v29  ;;  %v12378_v29 = vsel %vm174_vm2, %v12375_v62, %v12377_v5 }
 0xa11   :  { %18738 = vmatprep.mubr.msk.bf16.mxu1 %vm273_vm3, %v12367_v19  ;;  %v12380_v19 = vsel %vm174_vm2, %v12377_v5, %v12379_v18 }
 0xa18   :  { %18739 = vmatmul.mubr.msk.bf16.vlgmr.msra.gmra.mrb[64].mxu1 %vm273_vm3, %v12369_v57 }
 0xa19   :  { %18803 = vmatpush3.bf16.msra.mxu1 %v24975_v56  ;;  %18742 = vmatprep.mubr.msk.bf16.mxu1 %vm273_vm3, %v12371_v12  ;;  %v12373_v56 = vsel %vm174_vm2, %v12370_v30, %v12372_v23  ;;  %v12383_v30 = vrot.slane %v25105_v13, 4  ;;  %v20563_v12 = vld [vmem:[#allocation2 + $0x48] sm:$0xf]  ;;  %v25115_v23 = vld [vmem:[#allocation2 + $0x60] sm:$0xff] }
 0xa1a   :  { %18804 = vmatprep.subr.bf16.mxu1 %v20318_v47  ;;  %v12381_v54 = vrot.slane %v20563_v12, 4  ;;  %v25128_v12 = vld [vmem:[#allocation2 + $0x80] sm:$0xff] }
 0xa1c   :  { %v12382_v26 = vsel %vm174_vm2, %v12379_v18, %v12381_v54  ;;  %v12393_v54 = vrot.slane %v25128_v12, 4 }
 0xa1d   :  { %18805 = vmatpush3.bf16.msra.mxu1 %v20318_v47  ;;  %v25108_v47 = vld [vmem:[#allocation2 + $0x58] sm:$0xff] }
 0xa1e   :  { %18870 = vmatprep.subr.bf16.mxu1 %v25090_v2  ;;  %v12384_v57 = vrot.slane %v25108_v47, 4 }
 0xa20   :  { %18743 = vmatmul.mubr.msk.bf16.gmra.mrb[68].mxu1 %vm273_vm3, %v12373_v56  ;;  %v12385_v62 = vsel %vm174_vm2, %v12383_v30, %v12384_v57  ;;  %v12386_v56 = vrot.slane %v25115_v23, 4 }
 0xa21   :  { %18746 = vmatprep.mubr.msk.bf16.mxu1 %vm273_vm3, %v12376_v34  ;;  %v25118_v34 = vld [vmem:[#allocation2 + $0x68] sm:$0xff] }
 0xa22   :  { %v12388_v5 = vrot.slane %v25118_v34, 4 }
 0xa24   :  { %v12389_v18 = vsel %vm174_vm2, %v12386_v56, %v12388_v5 }
 0xa28   :  { %18747 = vmatmul.mubr.msk.bf16.gmra.mrb[72].mxu1 %vm273_vm3, %v12378_v29  ;;  %v12387_v29 = vsel %vm174_vm2, %v12384_v57, %v12386_v56  ;;  %v12395_v56 = vrot.slane %v24673_v20, 4 }
 0xa29   :  { %18750 = vmatprep.mubr.msk.bf16.mxu1 %vm273_vm3, %v12380_v19  ;;  %v25125_v19 = vld [vmem:[#allocation2 + $0x78] sm:$0xf0] }
 0xa2a   :  { %v12392_v30 = vrot.slane %v25125_v19, 4 }
 0xa2c   :  { %v12394_v57 = vsel %vm174_vm2, %v12392_v30, %v12393_v54  ;;  %v20568_v30 = vld [vmem:[#allocation2 + $0x98] sm:$0xf] }
 0xa30   :  { %18751 = vmatmul.mubr.msk.bf16.gmra.mrb[76].mxu1 %vm273_vm3, %v12382_v26  ;;  %v20567_v26 = vld [vmem:[#allocation2 + $0x70] sm:$0xf] }
 0xa31   :  { %18754 = vmatprep.mubr.msk.bf16.mxu1 %vm273_vm3, %v12385_v62  ;;  %v12390_v62 = vrot.slane %v20567_v26, 4  ;;  %v25141_v26 = vld [vmem:[#allocation2 + $0xa0] sm:$0xf0] }
 0xa33   :  { %v12391_v10 = vsel %vm174_vm2, %v12388_v5, %v12390_v62  ;;  %v12402_v5 = vrot.slane %v24707_v42, 4  ;;  %v12399_v62 = vrot.slane %v20568_v30, 4  ;;  %v25155_v30 = vld [vmem:[#allocation2 + $0xc8] sm:$0xf0] }
 0xa38   :  { %18755 = vmatmul.mubr.msk.bf16.gmra.mrb[80].mxu1 %vm273_vm3, %v12387_v29  ;;  %v12397_v29 = vrot.slane %v24675_v53, 4 }
 0xa39   :  { %18758 = vmatprep.mubr.msk.bf16.mxu1 %vm273_vm3, %v12389_v18  ;;  %v12396_v18 = vsel %vm174_vm2, %v12393_v54, %v12395_v56 }
 0xa3a   :  { %v12398_v35 = vsel %vm174_vm2, %v12395_v56, %v12397_v29  ;;  %v12404_v56 = vrot.slane %v24738_v17, 4 }
 0xa40   :  { %18759 = vmatmul.mubr.msk.bf16.gmra.mrb[84].mxu1 %vm273_vm3, %v12391_v10  ;;  %v12401_v10 = vrot.slane %v25141_v26, 4 }
 0xa41   :  { %18762 = vmatprep.mubr.msk.bf16.mxu1 %vm273_vm3, %v12394_v57  ;;  %v12400_v57 = vsel %vm174_vm2, %v12397_v29, %v12399_v62  ;;  %v12410_v29 = vrot.slane %v25155_v30, 4  ;;  %v12408_v62 = vrot.slane %v24730_v15, 4  ;;  %v25170_v15 = vld [vmem:[#allocation2 + $0xf0] sm:$0xf0] }
 0xa42   :  { %v12403_v54 = vsel %vm174_vm2, %v12401_v10, %v12402_v5  ;;  %v12411_v10 = vrot.slane %v24774_v55, 4 }
 0xa48   :  { %18763 = vmatmul.mubr.msk.bf16.gmra.mrb[88].mxu1 %vm273_vm3, %v12396_v18  ;;  %v12405_v18 = vsel %vm174_vm2, %v12402_v5, %v12404_v56  ;;  %v12412_v5 = vsel %vm174_vm2, %v12410_v29, %v12411_v10  ;;  %v12420_v29 = vrot.slane %v24851_v3, 4 }
 0xa49   :  { %18766 = vmatprep.mubr.msk.bf16.mxu1 %vm273_vm3, %v12398_v35  ;;  %v12406_v35 = vrot.slane %v24740_v49, 4 }
 0xa4b   :  { %v12407_v40 = vsel %vm174_vm2, %v12404_v56, %v12406_v35 }
 0xa50   :  { %18767 = vmatmul.mubr.msk.bf16.gmra.mrb[92].mxu1 %vm273_vm3, %v12400_v57  ;;  %v12409_v57 = vsel %vm174_vm2, %v12406_v35, %v12408_v62  ;;  %v12419_v35 = vrot.slane %v25170_v15, 4  ;;  %v12417_v62 = vrot.slane %v24807_v24, 4  ;;  %v25185_v24 = vld [vmem:[#allocation2 + $0x118] sm:$0xf0] }
 0xa51   :  { %18770 = vmatprep.mubr.msk.bf16.mxu1 %vm273_vm3, %v12403_v54  ;;  %v12413_v54 = vrot.slane %v24815_v28, 4 }
 0xa53   :  { %v12414_v56 = vsel %vm174_vm2, %v12411_v10, %v12413_v54  ;;  %v12421_v10 = vsel %vm174_vm2, %v12419_v35, %v12420_v29  ;;  %v12429_v35 = vrot.slane %v24908_v44, 4 }
 0xa58   :  { %18771 = vmatmul.mubr.msk.bf16.gmra.mrb[96].mxu1 %vm273_vm3, %v12405_v18 }
 0xa59   :  { %18774 = vmatprep.mubr.msk.bf16.mxu1 %vm273_vm3, %v12407_v40  ;;  %v12415_v40 = vrot.slane %v24817_v22, 4 }
 0xa5b   :  { %v12416_v18 = vsel %vm174_vm2, %v12413_v54, %v12415_v40  ;;  %v12424_v54 = vrot.slane %v24879_v31, 4 }
 0xa60   :  { %18775 = vmatmul.mubr.msk.bf16.gmra.mrb[100].mxu1 %vm273_vm3, %v12409_v57  ;;  %v12418_v57 = vsel %vm174_vm2, %v12415_v40, %v12417_v62  ;;  %v12428_v40 = vrot.slane %v25185_v24, 4  ;;  %v12426_v62 = vrot.slane %v24881_v32, 4  ;;  %v12919_v32 = vrot.slane %v11199_v46, 4 }
 0xa61   :  { %18778 = vmatprep.mubr.msk.bf16.mxu1 %vm273_vm3, %v12412_v5  ;;  %v12422_v5 = vrot.slane %v24877_v43, 4  ;;  %v12923_v46 = vrot.slane %v11208_v63, 4  ;;  %v12941_v63 = vshrl.u32 %v25085_v0, 16  ;;  %v26746_v0 = vshll.u32 %v24516_v60, 16 }
 0xa68   :  { %18779 = vmatmul.mubr.msk.bf16.gmra.mrb[104].mxu1 %vm273_vm3, %v12414_v56  ;;  %v12423_v56 = vsel %vm174_vm2, %v12420_v29, %v12422_v5  ;;  %v12430_v29 = vsel %vm174_vm2, %v12428_v40, %v12429_v35 }
 0xa69   :  { %18782 = vmatprep.mubr.msk.bf16.mxu1 %vm273_vm3, %v12416_v18  ;;  %v12425_v18 = vsel %vm174_vm2, %v12422_v5, %v12424_v54  ;;  %v12433_v5 = vrot.slane %v24926_v51, 4 }
 0xa70   :  { %18783 = vmatmul.mubr.msk.bf16.gmra.mrb[108].mxu1 %vm273_vm3, %v12418_v57  ;;  %v12427_v57 = vsel %vm174_vm2, %v12424_v54, %v12426_v62 }
 0xa71   :  { %18786 = vmatprep.mubr.msk.bf16.mxu1 %vm273_vm3, %v12421_v10  ;;  %v12431_v10 = vrot.slane %v24924_v45, 4 }
 0xa73   :  { %v12432_v50 = vsel %vm174_vm2, %v12429_v35, %v12431_v10  ;;  %v12434_v54 = vsel %vm174_vm2, %v12431_v10, %v12433_v5 }
 0xa78   :  { %18787 = vmatmul.mubr.msk.bf16.gmra.mrb[112].mxu1 %vm273_vm3, %v12423_v56  ;;  %v12912_v56 = vshrl.u32 %v25067_v11, 16 }
 0xa79   :  { %18790 = vmatprep.mubr.msk.bf16.mxu1 %vm273_vm3, %v12425_v18  ;;  %v12915_v18 = vshll.u32 %v25067_v11, 16  ;;  %v12435_v11 = vrot.slane %v24933_v25, 4  ;;  %v25219_v25 = vld [vmem:[#allocation2 + $0x20] sm:$0x1f] }
 0xa7a   :  { %v12914_v40 = vrot.slane %v12912_v56, 4 }
 0xa7b   :  { %v12917_v62 = vrot.slane %v12915_v18, 5  ;;  %v12436_v35 = vsel %vm174_vm2, %v12433_v5, %v12435_v11  ;;  %v12949_v11 = vrot.slane %v26746_v0, 5 }
 0xa80   :  { %18791 = vmatmul.mubr.msk.bf16.gmra.mrb[116].mxu1 %vm273_vm3, %v12427_v57  ;;  %v12920_v57 = vrot.slane %v11202_v27, 5  ;;  %v26744_v27 = vshll.u32 %v24484_v6, 16 }
 0xa81   :  { %18794 = vmatprep.mubr.msk.bf16.mxu1 %vm273_vm3, %v12430_v29  ;;  %v12918_v29 = vor.u32 %v12917_v62, %v12914_v40 }
 0xa82   :  { %v12921_v52 = vor.u32 %v12920_v57, %v12919_v32  ;;  %v12928_v56 = vrot.slane %v26744_v27, 5  ;;  %v12935_v32 = vshll.u32 %v25219_v25, 16  ;;  %v12943_v57 = vrot.slane %v12941_v63, 4 }
 0xa83   :  { %v26749_v63 = vshrl.u32 %v24549_v38, 16 }
 0xa84   :  { %v12922_v10 = vsel %vm2201_vm8, %v12918_v29, %v12921_v52  ;;  %v12929_v18 = vor.u32 %v12928_v56, %v12927_v37  ;;  %v12946_v29 = vrot.slane %v12944_v33, 5  ;;  %v26747_v37 = vshrl.u32 %v24547_v61, 16 }
 0xa85   :  { %v26750_v33 = vshll.u32 %v24549_v38, 16 }
 0xa86   :  { %v12952_v27 = vrot.slane %v26747_v37, 4 }
 0xa88   :  { %18795 = vmatmul.mubr.msk.bf16.gmra.mrb[120].mxu1 %vm273_vm3, %v12432_v50  ;;  %v12924_v50 = vrot.slane %v11211_v48, 5  ;;  %v12932_v48 = vshrl.u32 %v25219_v25, 16 }
 0xa89   :  { %18798 = vmatprep.mubr.msk.bf16.mxu1 %vm273_vm3, %v12434_v54  ;;  %v26745_v54 = vshrl.u32 %v24516_v60, 16 }
 0xa8a   :  { %v12925_v5 = vor.u32 %v12924_v50, %v12923_v46  ;;  %v12937_v46 = vrot.slane %v12935_v32, 5 }
 0xa8b   :  { %v12948_v40 = vrot.slane %v26745_v54, 4 }
 0xa8c   :  { %v12926_v6 = vsel %vm2201_vm8, %v12921_v52, %v12925_v5  ;;  %v12930_v62 = vsel %vm2201_vm8, %v12925_v5, %v12929_v18  ;;  %v12947_v52 = vor.u32 %v12946_v29, %v12943_v57  ;;  %v26748_v5 = vshll.u32 %v24547_v61, 16 }
 0xa8d   :  { %v12950_v50 = vor.u32 %v12949_v11, %v12948_v40  ;;  %v12973_v61 = vshll.u32 %v25105_v13, 16  ;;  %v26751_v11 = vshrl.u32 %v24581_v58, 16 }
 0xa8e   :  { %v12953_v60 = vrot.slane %v26748_v5, 5 }
 0xa8f   :  { %v12951_v32 = vsel %vm2201_vm8, %v12947_v52, %v12950_v50  ;;  %v12975_v0 = vrot.slane %v12973_v61, 5 }
 0xa90   :  { %18799 = vmatmul.mubr.msk.bf16.gmra.mrb[124].mxu1 %vm273_vm3, %v12436_v35  ;;  %v12934_v35 = vrot.slane %v12932_v48, 4  ;;  %v12957_v48 = vrot.slane %v26750_v33, 5  ;;  %v26755_v33 = vshrl.u32 %v24612_v8, 16 }
 0xa91   :  { %18806 = vmatprep.mubr.msk.bf16.mxu1 %vm273_vm3, %v12922_v10 }
 0xa92   :  { %v12938_v10 = vor.u32 %v12937_v46, %v12934_v35  ;;  %v12977_v35 = vrot.slane %v26751_v11, 4  ;;  %v26752_v46 = vshll.u32 %v24581_v58, 16  ;;  %v26756_v58 = vshll.u32 %v24612_v8, 16 }
 0xa93   :  { %v26757_v11 = vshrl.u32 %v24644_v39, 16 }
 0xa94   :  { %v12939_v56 = vsel %vm2201_vm8, %v12929_v18, %v12938_v10  ;;  %v12970_v18 = vshrl.u32 %v25105_v13, 16  ;;  %v12978_v52 = vrot.slane %v26752_v46, 5  ;;  %v26758_v46 = vshll.u32 %v24644_v39, 16 }
 0xa95   :  { %v26762_v39 = vshll.u32 %v24675_v53, 16 }
 0xa96   :  { %v12972_v29 = vrot.slane %v12970_v18, 4  ;;  %v25275_v18 = vld [vmem:[#allocation2 + $0x70] sm:$0x1f] }
 0xa98   :  { %18807 = vmatmul.mubr.msk.bf16.vlgmr.msra.gmra.mrb[64].mxu1 %vm273_vm3, %v12926_v6  ;;  %v12954_v6 = vor.u32 %v12953_v60, %v12952_v27  ;;  %v12976_v37 = vor.u32 %v12975_v0, %v12972_v29  ;;  %v12979_v27 = vor.u32 %v12978_v52, %v12977_v35  ;;  %v13006_v35 = vrot.slane %v26757_v11, 4 }
 0xa99   :  { %18871 = vmatpush3.bf16.msra.mxu1 %v25090_v2  ;;  %18810 = vmatprep.mubr.msk.bf16.mxu1 %vm273_vm3, %v12930_v62  ;;  %v12956_v2 = vrot.slane %v26749_v63, 4  ;;  %v26754_v63 = vshll.u32 %v24610_v7, 16  ;;  %v13007_v52 = vrot.slane %v26758_v46, 5 }
 0xa9a   :  { %18872 = vmatprep.subr.bf16.mxu1 %v20320_v16  ;;  %v12955_v38 = vsel %vm2201_vm8, %v12950_v50, %v12954_v6  ;;  %v26753_v50 = vshrl.u32 %v24610_v7, 16  ;;  %v13002_v7 = vshll.u32 %v25125_v19, 16 }
 0xa9b   :  { %v12958_v54 = vor.u32 %v12957_v48, %v12956_v2  ;;  %v12982_v2 = vrot.slane %v26754_v63, 5  ;;  %v12985_v48 = vrot.slane %v26755_v33, 4 }
 0xa9c   :  { %v12981_v5 = vrot.slane %v26753_v50, 4  ;;  %v13004_v0 = vrot.slane %v13002_v7, 5 }
 0xa9d   :  { %18873 = vmatpush3.bf16.msra.mxu1 %v20320_v16  ;;  %v25249_v16 = vld [vmem:[#allocation2 + $0x48] sm:$0x1f]  ;;  %v12959_v57 = vsel %vm2201_vm8, %v12954_v6, %v12958_v54  ;;  %v12980_v6 = vsel %vm2201_vm8, %v12976_v37, %v12979_v27  ;;  %v13008_v37 = vor.u32 %v13007_v52, %v13006_v35 }
 0xa9e   :  { %v12961_v40 = vshrl.u32 %v25249_v16, 16  ;;  %v12964_v62 = vshll.u32 %v25249_v16, 16  ;;  %v12983_v61 = vor.u32 %v12982_v2, %v12981_v5  ;;  %v26761_v2 = vshrl.u32 %v24675_v53, 16 }
 0xaa0   :  { %18811 = vmatmul.mubr.msk.bf16.gmra.mrb[68].mxu1 %vm273_vm3, %v12939_v56  ;;  %v12963_v13 = vrot.slane %v12961_v40, 4  ;;  %v12966_v10 = vrot.slane %v12964_v62, 5  ;;  %v12990_v62 = vshrl.u32 %v25275_v18, 16  ;;  %v12984_v8 = vsel %vm2201_vm8, %v12979_v27, %v12983_v61 }
 0xaa1   :  { %18814 = vmatprep.mubr.msk.bf16.mxu1 %vm273_vm3, %v12951_v32  ;;  %v12986_v32 = vrot.slane %v26756_v58, 5  ;;  %v26759_v27 = vshrl.u32 %v24673_v20, 16  ;;  %v13014_v33 = vrot.slane %v26761_v2, 4  ;;  %v25327_v2 = vld [vmem:[#allocation2 + $0xc0] sm:$0x1f] }
 0xaa2   :  { %v12967_v56 = vor.u32 %v12966_v10, %v12963_v13 }
 0xaa3   :  { %v12987_v40 = vor.u32 %v12986_v32, %v12985_v48  ;;  %v13010_v50 = vrot.slane %v26759_v27, 4  ;;  %v13015_v48 = vrot.slane %v26762_v39, 5  ;;  %v25301_v32 = vld [vmem:[#allocation2 + $0x98] sm:$0x1f]  ;;  %v13057_v39 = vshrl.u32 %v25155_v30, 16 }
 0xaa4   :  { %v12968_v60 = vsel %vm2201_vm8, %v12958_v54, %v12967_v56  ;;  %v12999_v54 = vshrl.u32 %v25125_v19, 16  ;;  %v12992_v19 = vrot.slane %v12990_v62, 4  ;;  %v13022_v7 = vshll.u32 %v25301_v32, 16 }
 0xaa6   :  { %v13001_v29 = vrot.slane %v12999_v54, 4  ;;  %v13019_v54 = vshrl.u32 %v25301_v32, 16  ;;  %v13024_v35 = vrot.slane %v13022_v7, 5 }
 0xaa8   :  { %18815 = vmatmul.mubr.msk.bf16.gmra.mrb[72].mxu1 %vm273_vm3, %v12955_v38  ;;  %v12993_v38 = vshll.u32 %v25275_v18, 16  ;;  %v13005_v10 = vor.u32 %v13004_v0, %v13001_v29  ;;  %v26764_v0 = vshll.u32 %v24707_v42, 16 }
 0xaa9   :  { %18818 = vmatprep.mubr.msk.bf16.mxu1 %vm273_vm3, %v12959_v57  ;;  %v12988_v57 = vsel %vm2201_vm8, %v12983_v61, %v12987_v40  ;;  %v13016_v61 = vor.u32 %v13015_v48, %v13014_v33 }
 0xaaa   :  { %v12995_v13 = vrot.slane %v12993_v38, 5  ;;  %v13009_v58 = vsel %vm2201_vm8, %v13005_v10, %v13008_v37  ;;  %v13036_v11 = vrot.slane %v26764_v0, 5  ;;  %v26765_v10 = vshrl.u32 %v24738_v17, 16 }
 0xaac   :  { %v12996_v56 = vor.u32 %v12995_v13, %v12992_v19 }
 0xaae   :  { %v12997_v5 = vsel %vm2201_vm8, %v12987_v40, %v12996_v56  ;;  %v13028_v40 = vshrl.u32 %v25141_v26, 16  ;;  %v26766_v56 = vshll.u32 %v24738_v17, 16  ;;  %v13060_v17 = vshll.u32 %v25155_v30, 16 }
 0xab0   :  { %18819 = vmatmul.mubr.msk.bf16.gmra.mrb[76].mxu1 %vm273_vm3, %v12968_v60  ;;  %v26760_v60 = vshll.u32 %v24673_v20, 16  ;;  %v13031_v20 = vshll.u32 %v25141_v26, 16  ;;  %v13030_v38 = vrot.slane %v13028_v40, 4  ;;  %v13021_v26 = vrot.slane %v13019_v54, 4 }
 0xab1   :  { %18822 = vmatprep.mubr.msk.bf16.mxu1 %vm273_vm3, %v12980_v6  ;;  %v13040_v27 = vrot.slane %v26766_v56, 5  ;;  %v13059_v40 = vrot.slane %v13057_v39, 4  ;;  %v26769_v54 = vshrl.u32 %v24774_v55, 16 }
 0xab2   :  { %v13011_v63 = vrot.slane %v26760_v60, 5  ;;  %v13025_v19 = vor.u32 %v13024_v35, %v13021_v26  ;;  %v26768_v60 = vshll.u32 %v24740_v49, 16  ;;  %v26772_v35 = vshll.u32 %v24815_v28, 16 }
 0xab3   :  { %v13064_v7 = vrot.slane %v26769_v54, 4  ;;  %v26777_v54 = vshrl.u32 %v24877_v43, 16 }
 0xab4   :  { %v13012_v6 = vor.u32 %v13011_v63, %v13010_v50  ;;  %v13026_v13 = vsel %vm2201_vm8, %v13016_v61, %v13025_v19  ;;  %v26767_v50 = vshrl.u32 %v24740_v49, 16  ;;  %v13044_v63 = vrot.slane %v26768_v60, 5 }
 0xab6   :  { %v13013_v53 = vsel %vm2201_vm8, %v13008_v37, %v13012_v6  ;;  %v13017_v62 = vsel %vm2201_vm8, %v13012_v6, %v13016_v61  ;;  %v13039_v37 = vrot.slane %v26765_v10, 4  ;;  %v13051_v6 = vshll.u32 %v25327_v2, 16 }
 0xab8   :  { %18823 = vmatmul.mubr.msk.bf16.gmra.mrb[80].mxu1 %vm273_vm3, %v12984_v8  ;;  %v13033_v8 = vrot.slane %v13031_v20, 5  ;;  %v13041_v33 = vor.u32 %v13040_v27, %v13039_v37  ;;  %v13062_v20 = vrot.slane %v13060_v17, 5  ;;  %v25353_v37 = vld [vmem:[#allocation2 + $0xe8] sm:$0x1f]  ;;  %v26776_v17 = vshll.u32 %v24851_v3, 16 }
 0xab9   :  { %18826 = vmatprep.mubr.msk.bf16.mxu1 %vm273_vm3, %v12988_v57  ;;  %v26763_v57 = vshrl.u32 %v24707_v42, 16 }
 0xaba   :  { %v13034_v46 = vor.u32 %v13033_v8, %v13030_v38  ;;  %v13053_v38 = vrot.slane %v13051_v6, 5  ;;  %v13063_v8 = vor.u32 %v13062_v20, %v13059_v40 }
 0xabb   :  { %v13035_v29 = vrot.slane %v26763_v57, 4 }
 0xabd   :  { %v13037_v52 = vor.u32 %v13036_v11, %v13035_v29  ;;  %v26771_v11 = vshrl.u32 %v24815_v28, 16  ;;  %v13089_v28 = vshll.u32 %v25170_v15, 16 }
 0xabf   :  { %v13038_v42 = vsel %vm2201_vm8, %v13034_v46, %v13037_v52  ;;  %v13042_v61 = vsel %vm2201_vm8, %v13037_v52, %v13041_v33  ;;  %v13068_v26 = vrot.slane %v26771_v11, 4  ;;  %v13069_v46 = vrot.slane %v26772_v35, 5 }
 0xac0   :  { %18827 = vmatmul.mubr.msk.bf16.gmra.mrb[84].mxu1 %vm273_vm3, %v12997_v5  ;;  %v13043_v5 = vrot.slane %v26767_v50, 4  ;;  %v26773_v52 = vshrl.u32 %v24817_v22, 16  ;;  %v13077_v50 = vshrl.u32 %v25353_v37, 16 }
 0xac1   :  { %18830 = vmatprep.mubr.msk.bf16.mxu1 %vm273_vm3, %v13009_v58  ;;  %v13048_v58 = vshrl.u32 %v25327_v2, 16  ;;  %v13070_v56 = vor.u32 %v13069_v46, %v13068_v26  ;;  %v13115_v26 = vshrl.u32 %v25185_v24, 16 }
 0xac2   :  { %v13045_v48 = vor.u32 %v13044_v63, %v13043_v5  ;;  %v13072_v19 = vrot.slane %v26773_v52, 4  ;;  %v13080_v5 = vshll.u32 %v25353_v37, 16  ;;  %v26775_v63 = vshrl.u32 %v24851_v3, 16 }
 0xac3   :  { %v13050_v30 = vrot.slane %v13048_v58, 4  ;;  %v13094_v58 = vrot.slane %v26776_v17, 5  ;;  %v26781_v52 = vshrl.u32 %v24908_v44, 16  ;;  %v26785_v17 = vshrl.u32 %v24926_v51, 16 }
 0xac4   :  { %v13046_v49 = vsel %vm2201_vm8, %v13041_v33, %v13045_v48  ;;  %v13082_v6 = vrot.slane %v13080_v5, 5 }
 0xac5   :  { %v13054_v29 = vor.u32 %v13053_v38, %v13050_v30  ;;  %v26779_v30 = vshrl.u32 %v24879_v31, 16 }
 0xac7   :  { %v13055_v0 = vsel %vm2201_vm8, %v13045_v48, %v13054_v29  ;;  %v13091_v48 = vrot.slane %v13089_v28, 5  ;;  %v13101_v38 = vrot.slane %v26779_v30, 4  ;;  %v25379_v29 = vld [vmem:[#allocation2 + $0x110] sm:$0x1f]  ;;  %v20321_v28 = vld [vmem:[%s26308_s4] sm:$0xff]   ;;  %v13634_v30 = vrot.slane %v24949_v4, 5 }
 0xac8   :  { %18831 = vmatmul.mubr.msk.bf16.gmra.mrb[88].mxu1 %vm273_vm3, %v13013_v53  ;;  %v26770_v53 = vshll.u32 %v24774_v55, 16  ;;  %v13106_v35 = vshrl.u32 %v25379_v29, 16  ;;  %v13109_v46 = vshll.u32 %v25379_v29, 16  ;;  %18938 = vmatprep.subr.bf16.mxu0 %v20321_v28 }
 0xac9   :  { %18834 = vmatprep.mubr.msk.bf16.mxu1 %vm273_vm3, %v13017_v62  ;;  %18939 = vmatpush3.bf16.msra.mxu0 %v20321_v28 }
 0xaca   :  { %v13065_v62 = vrot.slane %v26770_v53, 5  ;;  %v26778_v53 = vshll.u32 %v24877_v43, 16  ;;  %v13118_v43 = vshll.u32 %v25185_v24, 16  ;;  %v13108_v24 = vrot.slane %v13106_v35, 4  ;;  %v13610_v35 = vld [vmem:[#allocation2 + $0x28] sm:$0xe0] }
 0xacc   :  { %v13066_v57 = vor.u32 %v13065_v62, %v13064_v7  ;;  %v13097_v7 = vrot.slane %v26777_v54, 4  ;;  %v13098_v62 = vrot.slane %v26778_v53, 5 }
 0xace   :  { %v13067_v55 = vsel %vm2201_vm8, %v13063_v8, %v13066_v57  ;;  %v13071_v60 = vsel %vm2201_vm8, %v13066_v57, %v13070_v56  ;;  %v26780_v8 = vshll.u32 %v24879_v31, 16  ;;  %v13122_v31 = vrot.slane %v26781_v52, 4 }
 0xacf   :  { %v13640_v52 = vrot.slane %v25219_v25, 5  ;;  %v13611_v25 = vld [vmem:[#allocation2 + $0x50] sm:$0xe0] }
 0xad0   :  { %18835 = vmatmul.mubr.msk.bf16.gmra.mrb[92].mxu1 %vm273_vm3, %v13026_v13  ;;  %v26774_v13 = vshll.u32 %v24817_v22, 16  ;;  %v13093_v22 = vrot.slane %v26775_v63, 4  ;;  %v13102_v57 = vrot.slane %v26780_v8, 5 }
 0xad1   :  { %18838 = vmatprep.mubr.msk.bf16.mxu1 %vm273_vm3, %v13038_v42  ;;  %v13086_v42 = vshrl.u32 %v25170_v15, 16  ;;  %v13079_v15 = vrot.slane %v13077_v50, 4 }
 0xad2   :  { %v13073_v10 = vrot.slane %v26774_v13, 5  ;;  %v13095_v40 = vor.u32 %v13094_v58, %v13093_v22  ;;  %v13103_v11 = vor.u32 %v13102_v57, %v13101_v38  ;;  %v13117_v13 = vrot.slane %v13115_v26, 4 }
 0xad3   :  { %v13088_v39 = vrot.slane %v13086_v42, 4  ;;  %v13111_v42 = vrot.slane %v13109_v46, 5  ;;  %v26783_v22 = vshrl.u32 %v24924_v45, 16  ;;  %v13130_v58 = vrot.slane %v26785_v17, 4  ;;  %v20571_v17 = vld [vmem:[#allocation2 + $0xa8] sm:$0xff] }
 0xad4   :  { %v13074_v27 = vor.u32 %v13073_v10, %v13072_v19  ;;  %v13120_v10 = vrot.slane %v13118_v43, 5  ;;  %v13638_v26 = vrot.slane %v24959_v14, 5  ;;  %v13642_v46 = vrot.slane %v13610_v35, 5 }
 0xad5   :  { %v13645_v14 = vrot.slane %v24985_v59, 5 }
 0xad6   :  { %v13075_v33 = vsel %vm2201_vm8, %v13070_v56, %v13074_v27  ;;  %v26782_v56 = vshll.u32 %v24908_v44, 16  ;;  %v13121_v50 = vor.u32 %v13120_v10, %v13117_v13  ;;  %v26784_v44 = vshll.u32 %v24924_v45, 16 }
 0xad7   :  { %v13651_v10 = vrot.slane %v13611_v25, 5 }
 0xad8   :  { %18839 = vmatmul.mubr.msk.bf16.gmra.mrb[96].mxu1 %vm273_vm3, %v13042_v61  ;;  %v13092_v61 = vor.u32 %v13091_v48, %v13088_v39  ;;  %v13127_v39 = vrot.slane %v26784_v44, 5 }
 0xad9   :  { %18842 = vmatprep.mubr.msk.bf16.mxu1 %vm273_vm3, %v13046_v49  ;;  %v13083_v49 = vor.u32 %v13082_v6, %v13079_v15  ;;  %v26786_v15 = vshll.u32 %v24926_v51, 16 }
 0xada   :  { %v13096_v3 = vsel %vm2201_vm8, %v13092_v61, %v13095_v40  ;;  %v25408_v61 = vld [vmem:[#allocation2 + $0x138] sm:$0x1f] }
 0xadb   :  { %v13084_v20 = vsel %vm2201_vm8, %v13074_v27, %v13083_v49  ;;  %v13123_v27 = vrot.slane %v26782_v56, 5  ;;  %v13131_v6 = vrot.slane %v26786_v15, 5  ;;  %v13138_v45 = vshll.u32 %v25408_v61, 16 }
 0xadc   :  { %v13652_v56 = vrot.slane %v25108_v47, 5  ;;  %v13667_v15 = vrot.slane %v25301_v32, 5  ;;  %v13614_v32 = vld [vmem:[#allocation2 + $0xc8] sm:$0xe0] }
 0xadd   :  { %v13124_v5 = vor.u32 %v13123_v27, %v13122_v31  ;;  %v13132_v49 = vor.u32 %v13131_v6, %v13130_v58  ;;  %v13140_v53 = vrot.slane %v13138_v45, 5  ;;  %v13641_v31 = vsel %vm2924_vm9, %v13638_v26, %v13640_v52  ;;  %v20573_v45 = vld [vmem:[#allocation2 + $0xb8] sm:$0xff] }
 0xade   :  { %v13649_v27 = vrot.slane %v25249_v16, 5  ;;  %v13653_v59 = vsel %vm2924_vm9, %v13651_v10, %v13652_v56  ;;  %v13612_v16 = vld [vmem:[#allocation2 + $0x78] sm:$0xe0]  ;;  %v13670_v58 = vrot.slane %v20571_v17, 5  ;;  %v13685_v52 = vrot.slane %v25353_v37, 5 }
 0xadf   :  { %v13125_v48 = vsel %vm2201_vm8, %v13121_v50, %v13124_v5  ;;  %v13660_v50 = vrot.slane %v13612_v16, 5  ;;  %v13616_v37 = vld [vmem:[#allocation2 + $0x118] sm:$0xe0]  ;;  %v20582_v16 = vld [vmem:[#allocation2 + $0x130] sm:$0xff] }
 0xae0   :  { %18843 = vmatmul.mubr.msk.bf16.gmra.mrb[100].mxu1 %vm273_vm3, %v13055_v0  ;;  %v13099_v0 = vor.u32 %v13098_v62, %v13097_v7  ;;  %v13609_v62 = vld [vmem:[#allocation2] sm:$0xe0] }
 0xae1   :  { %18846 = vmatprep.mubr.msk.bf16.mxu1 %vm273_vm3, %v13067_v55 }
 0xae2   :  { %v13100_v55 = vsel %vm2201_vm8, %v13095_v40, %v13099_v0  ;;  %v13104_v19 = vsel %vm2201_vm8, %v13099_v0, %v13103_v11  ;;  %v20322_v0 = vld [vmem:[%s26308_s4 + $0x8] sm:$0xff]  }
 0xae3   :  { %18940 = vmatprep.subr.bf16.mxu0 %v20322_v0 }
 0xae4   :  { %18941 = vmatpush3.bf16.msra.mxu0 %v20322_v0 }
 0xae8   :  { %18847 = vmatmul.mubr.msk.bf16.gmra.mrb[104].mxu1 %vm273_vm3, %v13071_v60  ;;  %v13112_v60 = vor.u32 %v13111_v42, %v13108_v24  ;;  %v13656_v42 = vrot.slane %v25118_v34, 5  ;;  %v20569_v34 = vld [vmem:[#allocation2 + $0x88] sm:$0xff] }
 0xae9   :  { %18850 = vmatprep.mubr.msk.bf16.mxu1 %vm273_vm3, %v13075_v33  ;;  %v13126_v33 = vrot.slane %v26783_v22, 4  ;;  %v13663_v22 = vrot.slane %v20569_v34, 5 }
 0xaea   :  { %v13113_v63 = vsel %vm2201_vm8, %v13103_v11, %v13112_v60  ;;  %v13636_v11 = vrot.slane %v24956_v9, 5  ;;  %v13658_v60 = vrot.slane %v25275_v18, 5  ;;  %v13613_v18 = vld [vmem:[#allocation2 + $0xa0] sm:$0xe0] }
 0xaeb   :  { %v13128_v40 = vor.u32 %v13127_v39, %v13126_v33  ;;  %v20570_v33 = vld [vmem:[#allocation2 + $0x90] sm:$0xff] }
 0xaec   :  { %v13637_v4 = vsel %vm2924_vm9, %v13634_v30, %v13636_v11  ;;  %v13639_v43 = vsel %vm2924_vm9, %v13636_v11, %v13638_v26  ;;  %v13665_v44 = vrot.slane %v20570_v33, 5  ;;  %v20576_v11 = vld [vmem:[#allocation2 + $0xe0] sm:$0xff] }
 0xaed   :  { %v13129_v54 = vsel %vm2201_vm8, %v13124_v5, %v13128_v40  ;;  %v13133_v7 = vsel %vm2201_vm8, %v13128_v40, %v13132_v49  ;;  %v13661_v5 = vrot.slane %v25128_v12, 5  ;;  %v13683_v26 = vrot.slane %v20576_v11, 5 }
 0xaee   :  { %v13666_v12 = vsel %vm2924_vm9, %v13663_v22, %v13665_v44  ;;  %v13668_v6 = vsel %vm2924_vm9, %v13665_v44, %v13667_v15 }
 0xaef   :  { %v13664_v39 = vsel %vm2924_vm9, %v13661_v5, %v13663_v22  ;;  %v25511_v22 = vld [vmem:[%s26307_s3 + $0x3] ss:$0 sm:$0xff] }
 0xaf0   :  { %18851 = vmatmul.mubr.msk.bf16.gmra.mrb[108].mxu1 %vm273_vm3, %v13084_v20  ;;  %v13135_v20 = vshrl.u32 %v25408_v61, 16 }
 0xaf1   :  { %18854 = vmatprep.mubr.msk.bf16.mxu1 %vm273_vm3, %v13096_v3  ;;  %v13633_v3 = vrot.slane %v13609_v62, 5  ;;  %v20574_v62 = vld [vmem:[#allocation2 + $0xd0] sm:$0xff] }
 0xaf2   :  { %v13137_v51 = vrot.slane %v13135_v20, 4 }
 0xaf3   :  { %v13635_v57 = vsel %vm2924_vm9, %v13633_v3, %v13634_v30  ;;  %v13679_v3 = vrot.slane %v20574_v62, 5  ;;  %v13676_v30 = vrot.slane %v25327_v2, 5  ;;  %v13615_v2 = vld [vmem:[#allocation2 + $0xf0] sm:$0xe0]  ;;  %v26787_v62 = vld [vmem:[#allocation6_spill] sm:$0xff] }
 0xaf4   :  { %v13141_v38 = vor.u32 %v13140_v53, %v13137_v51  ;;  %v13678_v53 = vrot.slane %v13614_v32, 5  ;;  %v13687_v35 = vrot.slane %v13615_v2, 5 }
 0xaf6   :  { %v13142_v8 = vsel %vm2201_vm8, %v13132_v49, %v13141_v38  ;;  %v20572_v49 = vld [vmem:[#allocation2 + $0xb0] sm:$0xff] }
 0xaf7   :  { %v13672_v20 = vrot.slane %v20572_v49, 5 }
 0xaf8   :  { %18855 = vmatmul.mubr.msk.bf16.gmra.mrb[112].mxu1 %vm273_vm3, %v13100_v55  ;;  %v13643_v55 = vrot.slane %v24977_v41, 5 }
 0xaf9   :  { %18858 = vmatprep.mubr.msk.bf16.mxu1 %vm273_vm3, %v13104_v19  ;;  %v13647_v19 = vrot.slane %v24988_v36, 5  ;;  %v13654_v36 = vrot.slane %v25115_v23, 5  ;;  %v13662_v23 = vsel %vm2924_vm9, %v13660_v50, %v13661_v5  ;;  %v13701_v50 = vrot.slane %v20582_v16, 5 }
 0xafa   :  { %v13644_v9 = vsel %vm2924_vm9, %v13642_v46, %v13643_v55  ;;  %v13646_v13 = vsel %vm2924_vm9, %v13643_v55, %v13645_v14  ;;  %v20577_v46 = vld [vmem:[#allocation2 + $0xf8] sm:$0xff] }
 0xafb   :  { %v13648_v41 = vsel %vm2924_vm9, %v13645_v14, %v13647_v19  ;;  %v13650_v24 = vsel %vm2924_vm9, %v13647_v19, %v13649_v27  ;;  %v13655_v28 = vsel %vm2924_vm9, %v13652_v56, %v13654_v36  ;;  %v13657_v47 = vsel %vm2924_vm9, %v13654_v36, %v13656_v42  ;;  %v20578_v14 = vld [vmem:[#allocation2 + $0x100] sm:$0xff] }
 0xafc   :  { %v13688_v55 = vrot.slane %v20577_v46, 5  ;;  %v13690_v19 = vrot.slane %v20578_v14, 5  ;;  %v13696_v56 = vrot.slane %v13616_v37, 5  ;;  %v20580_v27 = vld [vmem:[#allocation2 + $0x120] sm:$0xff]  ;;  %v26789_v14 = vld [vmem:[#allocation8_spill] sm:$0xff] }
 0xafd   :  { %v26791_v37 = vld [vmem:[#allocation10_spill] sm:$0xff] }
 0xafe   :  { %v13691_v25 = vsel %vm2924_vm9, %v13688_v55, %v13690_v19 }
 0xb00   :  { %18859 = vmatmul.mubr.msk.bf16.gmra.mrb[116].mxu1 %vm273_vm3, %v13113_v63  ;;  %v13659_v63 = vsel %vm2924_vm9, %v13656_v42, %v13658_v60 }
 0xb01   :  { %18862 = vmatprep.mubr.msk.bf16.mxu1 %vm273_vm3, %v13125_v48  ;;  %v13669_v48 = vrot.slane %v13613_v18, 5 }
 0xb03   :  { %v13671_v40 = vsel %vm2924_vm9, %v13669_v48, %v13670_v58 }
 0xb08   :  { %18863 = vmatmul.mubr.msk.bf16.gmra.mrb[120].mxu1 %vm273_vm3, %v13129_v54  ;;  %v13674_v54 = vrot.slane %v20573_v45, 5 }
 0xb09   :  { %18866 = vmatprep.mubr.msk.bf16.mxu1 %vm273_vm3, %v13133_v7  ;;  %v13673_v7 = vsel %vm2924_vm9, %v13670_v58, %v13672_v20 }
 0xb0a   :  { %v13675_v51 = vsel %vm2924_vm9, %v13672_v20, %v13674_v54  ;;  %v13677_v38 = vsel %vm2924_vm9, %v13674_v54, %v13676_v30  ;;  %v26788_v30 = vld [vmem:[#allocation7_spill] sm:$0xff] }
 0xb10   :  { %18867 = vmatmul.mubr.msk.bf16.gmra.mrb[124].mxu1 %vm273_vm3, %v13142_v8  ;;  %v13680_v8 = vsel %vm2924_vm9, %v13678_v53, %v13679_v3 }
 0xb11   :  { %18874 = vmatprep.mubr.msk.bf16.mxu1 %vm273_vm3, %v13635_v57  ;;  %v20575_v57 = vld [vmem:[#allocation2 + $0xd8] sm:$0xff] }
 0xb12   :  { %v13681_v0 = vrot.slane %v20575_v57, 5 }
 0xb18   :  { %18875 = vmatmul.mubr.msk.bf16.vlgmr.msra.gmra.mrb[64].mxu1 %vm273_vm3, %v13637_v4  ;;  %v13682_v4 = vsel %vm2924_vm9, %v13679_v3, %v13681_v0 }
 0xb19   :  { %18878 = vmatprep.mubr.msk.bf16.mxu1 %vm273_vm3, %v13639_v43  ;;  %v13684_v43 = vsel %vm2924_vm9, %v13681_v0, %v13683_v26 }
 0xb20   :  { %18879 = vmatmul.mubr.msk.bf16.gmra.mrb[68].mxu1 %vm273_vm3, %v13641_v31  ;;  %v13686_v31 = vsel %vm2924_vm9, %v13683_v26, %v13685_v52 }
 0xb21   :  { %18882 = vmatprep.mubr.msk.bf16.mxu1 %vm273_vm3, %v13644_v9  ;;  %v13689_v9 = vsel %vm2924_vm9, %v13687_v35, %v13688_v55 }
 0xb28   :  { %18883 = vmatmul.mubr.msk.bf16.gmra.mrb[72].mxu1 %vm273_vm3, %v13646_v13  ;;  %v20579_v13 = vld [vmem:[#allocation2 + $0x108] sm:$0xff] }
 0xb29   :  { %18886 = vmatprep.mubr.msk.bf16.mxu1 %vm273_vm3, %v13648_v41  ;;  %v13692_v41 = vrot.slane %v20579_v13, 5  ;;  %v26790_v13 = vld [vmem:[#allocation9_spill] sm:$0xff] }
 0xb2b   :  { %v13693_v10 = vsel %vm2924_vm9, %v13690_v19, %v13692_v41 }
 0xb30   :  { %18887 = vmatmul.mubr.msk.bf16.gmra.mrb[76].mxu1 %vm273_vm3, %v13650_v24  ;;  %v13697_v24 = vrot.slane %v20580_v27, 5  ;;  %v26792_v27 = vld [vmem:[#allocation11_spill] sm:$0xff] }
 0xb31   :  { %18890 = vmatprep.mubr.msk.bf16.mxu1 %vm273_vm3, %v13653_v59  ;;  %v13694_v59 = vrot.slane %v25379_v29, 5  ;;  %v13703_v29 = vrot.slane %v25408_v61, 5 }
 0xb32   :  { %v13698_v42 = vsel %vm2924_vm9, %v13696_v56, %v13697_v24 }
 0xb33   :  { %v13695_v36 = vsel %vm2924_vm9, %v13692_v41, %v13694_v59 }
 0xb38   :  { %18891 = vmatmul.mubr.msk.bf16.gmra.mrb[80].mxu1 %vm273_vm3, %v13655_v28  ;;  %v20581_v28 = vld [vmem:[#allocation2 + $0x128] sm:$0xff] }
 0xb39   :  { %18894 = vmatprep.mubr.msk.bf16.mxu1 %vm273_vm3, %v13657_v47  ;;  %v13699_v47 = vrot.slane %v20581_v28, 5 }
 0xb3b   :  { %v13700_v5 = vsel %vm2924_vm9, %v13697_v24, %v13699_v47  ;;  %v13702_v60 = vsel %vm2924_vm9, %v13699_v47, %v13701_v50 }
 0xb40   :  { %18895 = vmatmul.mubr.msk.bf16.gmra.mrb[84].mxu1 %vm273_vm3, %v13659_v63  ;;  %v13704_v63 = vsel %vm2924_vm9, %v13701_v50, %v13703_v29 }
 0xb41   :  { %18898 = vmatprep.mubr.msk.bf16.mxu1 %vm273_vm3, %v13662_v23  ;;  %v25506_v23 = vld [vmem:[%s26306_s2 + $0x3] ss:$0 sm:$0xff] }
 0xb48   :  { %18899 = vmatmul.mubr.msk.bf16.gmra.mrb[88].mxu1 %vm273_vm3, %v13664_v39 }
 0xb49   :  { %18902 = vmatprep.mubr.msk.bf16.mxu1 %vm273_vm3, %v13666_v12 }
 0xb50   :  { %18903 = vmatmul.mubr.msk.bf16.gmra.mrb[92].mxu1 %vm273_vm3, %v13668_v6 }
 0xb51   :  { %18906 = vmatprep.mubr.msk.bf16.mxu1 %vm273_vm3, %v13671_v40 }
 0xb58   :  { %18907 = vmatmul.mubr.msk.bf16.gmra.mrb[96].mxu1 %vm273_vm3, %v13673_v7 }
 0xb59   :  { %18910 = vmatprep.mubr.msk.bf16.mxu1 %vm273_vm3, %v13675_v51 }
 0xb60   :  { %18911 = vmatmul.mubr.msk.bf16.gmra.mrb[100].mxu1 %vm273_vm3, %v13677_v38 }
 0xb61   :  { %18914 = vmatprep.mubr.msk.bf16.mxu1 %vm273_vm3, %v13680_v8 }
 0xb68   :  { %18915 = vmatmul.mubr.msk.bf16.gmra.mrb[104].mxu1 %vm273_vm3, %v13682_v4 }
 0xb69   :  { %18918 = vmatprep.mubr.msk.bf16.mxu1 %vm273_vm3, %v13684_v43 }
 0xb70   :  { %18919 = vmatmul.mubr.msk.bf16.gmra.mrb[108].mxu1 %vm273_vm3, %v13686_v31 }
 0xb71   :  { %18922 = vmatprep.mubr.msk.bf16.mxu1 %vm273_vm3, %v13689_v9 }
 0xb78   :  { %18923 = vmatmul.mubr.msk.bf16.gmra.mrb[112].mxu1 %vm273_vm3, %v13691_v25 }
 0xb79   :  { %18926 = vmatprep.mubr.msk.bf16.mxu1 %vm273_vm3, %v13693_v10 }
 0xb80   :  { %18927 = vmatmul.mubr.msk.bf16.gmra.mrb[116].mxu1 %vm273_vm3, %v13695_v36 }
 0xb81   :  { %18930 = vmatprep.mubr.msk.bf16.mxu1 %vm273_vm3, %v13698_v42 }
 0xb88   :  { %18931 = vmatmul.mubr.msk.bf16.gmra.mrb[120].mxu1 %vm273_vm3, %v13700_v5 }
 0xb89   :  { %18934 = vmatprep.mubr.msk.bf16.mxu1 %vm273_vm3, %v13702_v60 }
 0xb90   :  { %18935 = vmatmul.mubr.msk.bf16.gmra.mrb[124].mxu1 %vm273_vm3, %v13704_v63 }
 0xbeb   :  { %v18876_v34 = vpop.f32.mrb[64].mxu1 }
 0xbec   :  { %v14178_v33 = vmul.f32 %v18876_v34, %v25506_v23  ;;  %v13852_v44 = vpop.f32.mrb[65].mxu1 }
 0xbed   :  { %v14176_v61 = vmul.f32 %v25506_v23, %v13852_v44  ;;  %v18877_v39 = vpop.f32.mrb[66].mxu1 }
 0xbee   :  { %v14247_v12 = vadd.f32 %v25511_v22, %v14178_v33  ;;  %v14179_v18 = vmul.f32 %v18877_v39, %v25506_v23  ;;  %v13855_v48 = vpop.f32.mrb[67].mxu1 }
 0xbef   :  { %v14245_v17 = vadd.f32 %v25511_v22, %v14176_v61  ;;  %v14177_v58 = vmul.f32 %v25506_v23, %v13855_v48  ;;  %v26794_v48 = vld [vmem:[#allocation14_spill] sm:$0xff] }
 0xbf0   :  { %v14311_v15 = vmax.f32 %v14247_v12, 0.0  ;;  %v14248_v6 = vadd.f32 %v25511_v22, %v14179_v18  ;;  %v26793_v12 = vld [vmem:[#allocation12_spill] sm:$0xff] }
 0xbf1   :  { %v14309_v40 = vmax.f32 %v14245_v17, 0.0  ;;  %v14246_v49 = vadd.f32 %v25511_v22, %v14177_v58 }
 0xbf2   :  { %v14312_v20 = vmax.f32 %v14248_v6, 0.0  ;;  %v14375_v7 = vadd.f32 %v14311_v15, %v22949_v1  ;;  %v26795_v6 = vld [vmem:[#allocation13_spill] sm:$0xff] }
 0xbf3   :  { %v14310_v45 = vmax.f32 %v14246_v49, 0.0  ;;  %v18880_v54 = vpop.f32.mrb[68].mxu1  ;;  %v14373_v3 = vadd.f32 %v14309_v40, %v26787_v62  ;;  %v26796_v49 = vld [vmem:[#allocation15_spill] sm:$0xff] }
 0xbf4   :  { %v14376_v51 = vadd.f32 %v14312_v20, %v22954_v21  ;;  %v14182_v32 = vmul.f32 %v18880_v54, %v25506_v23  ;;  %v13868_v53 = vpop.f32.mrb[69].mxu1 }
 0xbf5   :  { %v14374_v38 = vadd.f32 %v14310_v45, %v26788_v30  ;;  %v14180_v8 = vmul.f32 %v25506_v23, %v13868_v53  ;;  %v18881_v57 = vpop.f32.mrb[70].mxu1 }
 0xbf6   :  { %v14438_v0 = vpack.c.bf16 %v14376_v51, %v14375_v7  ;;  %v14251_v11 = vadd.f32 %v25511_v22, %v14182_v32  ;;  %v14183_v26 = vmul.f32 %v18881_v57, %v25506_v23  ;;  %v13871_v4 = vpop.f32.mrb[71].mxu1 }
 0xbf7   :  { %v14437_v43 = vpack.c.bf16 %v14374_v38, %v14373_v3  ;;  %v14249_v1 = vadd.f32 %v25511_v22, %v14180_v8  ;;  %v14181_v21 = vmul.f32 %v25506_v23, %v13871_v4 }
 0xbf8   :  { %v14315_v2 = vmax.f32 %v14251_v11, 0.0  ;;  %v14252_v35 = vadd.f32 %v25511_v22, %v14183_v26 }
 0xbf9   :  { %v14313_v46 = vmax.f32 %v14249_v1, 0.0  ;;  %v14250_v55 = vadd.f32 %v25511_v22, %v14181_v21  ;;  %18942 = vmatprep.mubr.msk.bf16.mxu0 %vm273_vm3, %v14437_v43  ;;  %v26797_v43 = vld [vmem:[#allocation16_spill] sm:$0xff]  ;;  %v26798_v21 = vld [vmem:[#allocation18_spill] sm:$0xff] }
 0xbfa   :  { %v14316_v52 = vmax.f32 %v14252_v35, 0.0  ;;  %18943 = vmatmul.mubr.msk.bf16.vlgmr.msra.gmra.mrb[128].mxu0 %vm273_vm3, %v14438_v0  ;;  %v14379_v19 = vadd.f32 %v14315_v2, %v26789_v14 }
 0xbfb   :  { %v14314_v31 = vmax.f32 %v14250_v55, 0.0  ;;  %v18884_v9 = vpop.f32.mrb[72].mxu1  ;;  %v14377_v56 = vadd.f32 %v14313_v46, %v26791_v37  ;;  %v26799_v55 = vld [vmem:[#allocation17_spill] sm:$0xff] }
 0xbfc   :  { %v14380_v41 = vadd.f32 %v14316_v52, %v26790_v13  ;;  %v14186_v25 = vmul.f32 %v18884_v9, %v25506_v23  ;;  %v13884_v10 = vpop.f32.mrb[73].mxu1 }
 0xbfd   :  { %v14378_v24 = vadd.f32 %v14314_v31, %v26792_v27  ;;  %v14184_v59 = vmul.f32 %v25506_v23, %v13884_v10  ;;  %v18885_v36 = vpop.f32.mrb[74].mxu1  ;;  %v26800_v31 = vld [vmem:[#allocation19_spill] sm:$0xff] }
 0xbfe   :  { %v14440_v42 = vpack.c.bf16 %v14380_v41, %v14379_v19  ;;  %v14255_v28 = vadd.f32 %v25511_v22, %v14186_v25  ;;  %v14187_v47 = vmul.f32 %v18885_v36, %v25506_v23  ;;  %v13887_v16 = vpop.f32.mrb[75].mxu1 }
 0xbff   :  { %v14439_v50 = vpack.c.bf16 %v14378_v24, %v14377_v56  ;;  %v14253_v5 = vadd.f32 %v25511_v22, %v14184_v59  ;;  %v14185_v60 = vmul.f32 %v25506_v23, %v13887_v16 }
 0xc00   :  { %v14319_v29 = vmax.f32 %v14255_v28, 0.0  ;;  %v14256_v63 = vadd.f32 %v25511_v22, %v14187_v47 }
 0xc01   :  { %v14317_v34 = vmax.f32 %v14253_v5, 0.0  ;;  %v14254_v33 = vadd.f32 %v25511_v22, %v14185_v60  ;;  %18946 = vmatprep.mubr.msk.bf16.mxu0 %vm273_vm3, %v14439_v50  ;;  %v26801_v50 = vld [vmem:[#allocation20_spill] sm:$0xff]  ;;  %v26802_v60 = vld [vmem:[#allocation22_spill] sm:$0xff] }
 0xc02   :  { %v14320_v44 = vmax.f32 %v14256_v63, 0.0  ;;  %18947 = vmatmul.mubr.msk.bf16.gmra.mrb[132].mxu0 %vm273_vm3, %v14440_v42  ;;  %v14383_v18 = vadd.f32 %v14319_v29, %v26793_v12 }
 0xc03   :  { %v14318_v61 = vmax.f32 %v14254_v33, 0.0  ;;  %v18888_v39 = vpop.f32.mrb[76].mxu1  ;;  %v14381_v40 = vadd.f32 %v14317_v34, %v26795_v6  ;;  %v26803_v33 = vld [vmem:[#allocation21_spill] sm:$0xff] }
 0xc04   :  { %v14384_v17 = vadd.f32 %v14320_v44, %v26794_v48  ;;  %v14190_v58 = vmul.f32 %v18888_v39, %v25506_v23  ;;  %v13900_v15 = vpop.f32.mrb[77].mxu1 }
 0xc05   :  { %v14382_v20 = vadd.f32 %v14318_v61, %v26796_v49  ;;  %v14188_v45 = vmul.f32 %v25506_v23, %v13900_v15  ;;  %v18889_v54 = vpop.f32.mrb[78].mxu1  ;;  %v26804_v61 = vld [vmem:[#allocation23_spill] sm:$0xff] }
 0xc06   :  { %v14442_v7 = vpack.c.bf16 %v14384_v17, %v14383_v18  ;;  %v14259_v51 = vadd.f32 %v25511_v22, %v14190_v58  ;;  %v14191_v32 = vmul.f32 %v18889_v54, %v25506_v23  ;;  %v13903_v53 = vpop.f32.mrb[79].mxu1 }
 0xc07   :  { %v14441_v62 = vpack.c.bf16 %v14382_v20, %v14381_v40  ;;  %v14257_v3 = vadd.f32 %v25511_v22, %v14188_v45  ;;  %v14189_v30 = vmul.f32 %v25506_v23, %v13903_v53 }
 0xc08   :  { %v14323_v38 = vmax.f32 %v14259_v51, 0.0  ;;  %v14260_v8 = vadd.f32 %v25511_v22, %v14191_v32 }
 0xc09   :  { %v14321_v57 = vmax.f32 %v14257_v3, 0.0  ;;  %v14258_v0 = vadd.f32 %v25511_v22, %v14189_v30  ;;  %18950 = vmatprep.mubr.msk.bf16.mxu0 %vm273_vm3, %v14441_v62  ;;  %v26805_v62 = vld [vmem:[#allocation24_spill] sm:$0xff]  ;;  %v26806_v30 = vld [vmem:[#allocation26_spill] sm:$0xff] }
 0xc0a   :  { %v14324_v11 = vmax.f32 %v14260_v8, 0.0  ;;  %18951 = vmatmul.mubr.msk.bf16.gmra.mrb[136].mxu0 %vm273_vm3, %v14442_v7  ;;  %v14387_v1 = vadd.f32 %v14323_v38, %v26797_v43 }
 0xc0b   :  { %v14322_v26 = vmax.f32 %v14258_v0, 0.0  ;;  %v18892_v4 = vpop.f32.mrb[80].mxu1  ;;  %v14385_v52 = vadd.f32 %v14321_v57, %v26799_v55  ;;  %v26807_v0 = vld [vmem:[#allocation25_spill] sm:$0xff] }
 0xc0c   :  { %v14388_v2 = vadd.f32 %v14324_v11, %v26798_v21  ;;  %v14194_v35 = vmul.f32 %v18892_v4, %v25506_v23  ;;  %v13916_v46 = vpop.f32.mrb[81].mxu1 }
 0xc0d   :  { %v14386_v9 = vadd.f32 %v14322_v26, %v26800_v31  ;;  %v14192_v14 = vmul.f32 %v25506_v23, %v13916_v46  ;;  %v18893_v19 = vpop.f32.mrb[82].mxu1  ;;  %v26808_v26 = vld [vmem:[#allocation27_spill] sm:$0xff] }
 0xc0e   :  { %v14444_v13 = vpack.c.bf16 %v14388_v2, %v14387_v1  ;;  %v14263_v41 = vadd.f32 %v25511_v22, %v14194_v35  ;;  %v14195_v25 = vmul.f32 %v18893_v19, %v25506_v23  ;;  %v13919_v10 = vpop.f32.mrb[83].mxu1 }
 0xc0f   :  { %v14443_v37 = vpack.c.bf16 %v14386_v9, %v14385_v52  ;;  %v14261_v56 = vadd.f32 %v25511_v22, %v14192_v14  ;;  %v14193_v27 = vmul.f32 %v25506_v23, %v13919_v10 }
 0xc10   :  { %v14327_v24 = vmax.f32 %v14263_v41, 0.0  ;;  %v14264_v59 = vadd.f32 %v25511_v22, %v14195_v25 }
 0xc11   :  { %v14325_v36 = vmax.f32 %v14261_v56, 0.0  ;;  %v14262_v42 = vadd.f32 %v25511_v22, %v14193_v27  ;;  %18954 = vmatprep.mubr.msk.bf16.mxu0 %vm273_vm3, %v14443_v37  ;;  %v26809_v37 = vld [vmem:[#allocation28_spill] sm:$0xff]  ;;  %v26810_v27 = vld [vmem:[#allocation30_spill] sm:$0xff] }
 0xc12   :  { %v14328_v28 = vmax.f32 %v14264_v59, 0.0  ;;  %18955 = vmatmul.mubr.msk.bf16.gmra.mrb[140].mxu0 %vm273_vm3, %v14444_v13  ;;  %v14391_v5 = vadd.f32 %v14327_v24, %v26801_v50 }
 0xc13   :  { %v14326_v47 = vmax.f32 %v14262_v42, 0.0  ;;  %v18896_v16 = vpop.f32.mrb[84].mxu1  ;;  %v14389_v44 = vadd.f32 %v14325_v36, %v26803_v33  ;;  %v26811_v42 = vld [vmem:[#allocation29_spill] sm:$0xff] }
 0xc14   :  { %v14392_v29 = vadd.f32 %v14328_v28, %v26802_v60  ;;  %v14198_v63 = vmul.f32 %v18896_v16, %v25506_v23  ;;  %v13932_v34 = vpop.f32.mrb[85].mxu1 }
 0xc15   :  { %v14390_v39 = vadd.f32 %v14326_v47, %v26804_v61  ;;  %v14196_v12 = vmul.f32 %v25506_v23, %v13932_v34  ;;  %v18897_v18 = vpop.f32.mrb[86].mxu1  ;;  %v26812_v47 = vld [vmem:[#allocation31_spill] sm:$0xff] }
 0xc16   :  { %v14446_v48 = vpack.c.bf16 %v14392_v29, %v14391_v5  ;;  %v14267_v17 = vadd.f32 %v25511_v22, %v14198_v63  ;;  %v14199_v58 = vmul.f32 %v18897_v18, %v25506_v23  ;;  %v13935_v15 = vpop.f32.mrb[87].mxu1 }
 0xc17   :  { %v14445_v6 = vpack.c.bf16 %v14390_v39, %v14389_v44  ;;  %v14265_v40 = vadd.f32 %v25511_v22, %v14196_v12  ;;  %v14197_v49 = vmul.f32 %v25506_v23, %v13935_v15 }
 0xc18   :  { %v14331_v20 = vmax.f32 %v14267_v17, 0.0  ;;  %v14268_v45 = vadd.f32 %v25511_v22, %v14199_v58 }
 0xc19   :  { %v14329_v54 = vmax.f32 %v14265_v40, 0.0  ;;  %v14266_v7 = vadd.f32 %v25511_v22, %v14197_v49  ;;  %18958 = vmatprep.mubr.msk.bf16.mxu0 %vm273_vm3, %v14445_v6  ;;  %v26813_v6 = vld [vmem:[#allocation32_spill] sm:$0xff]  ;;  %v26814_v49 = vld [vmem:[#allocation34_spill] sm:$0xff] }
 0xc1a   :  { %v14332_v51 = vmax.f32 %v14268_v45, 0.0  ;;  %18959 = vmatmul.mubr.msk.bf16.gmra.mrb[144].mxu0 %vm273_vm3, %v14446_v48  ;;  %v14395_v3 = vadd.f32 %v14331_v20, %v26805_v62 }
 0xc1b   :  { %v14330_v32 = vmax.f32 %v14266_v7, 0.0  ;;  %v18900_v53 = vpop.f32.mrb[88].mxu1  ;;  %v14393_v11 = vadd.f32 %v14329_v54, %v26807_v0  ;;  %v26815_v7 = vld [vmem:[#allocation33_spill] sm:$0xff] }
 0xc1c   :  { %v14396_v38 = vadd.f32 %v14332_v51, %v26806_v30  ;;  %v14202_v8 = vmul.f32 %v18900_v53, %v25506_v23  ;;  %v13948_v57 = vpop.f32.mrb[89].mxu1 }
 0xc1d   :  { %v14394_v4 = vadd.f32 %v14330_v32, %v26808_v26  ;;  %v14200_v43 = vmul.f32 %v25506_v23, %v13948_v57  ;;  %v18901_v1 = vpop.f32.mrb[90].mxu1  ;;  %v26816_v32 = vld [vmem:[#allocation35_spill] sm:$0xff] }
 0xc1e   :  { %v14448_v21 = vpack.c.bf16 %v14396_v38, %v14395_v3  ;;  %v14271_v2 = vadd.f32 %v25511_v22, %v14202_v8  ;;  %v14203_v35 = vmul.f32 %v18901_v1, %v25506_v23  ;;  %v13951_v46 = vpop.f32.mrb[91].mxu1 }
 0xc1f   :  { %v14447_v55 = vpack.c.bf16 %v14394_v4, %v14393_v11  ;;  %v14269_v52 = vadd.f32 %v25511_v22, %v14200_v43  ;;  %v14201_v31 = vmul.f32 %v25506_v23, %v13951_v46 }
 0xc20   :  { %v14335_v9 = vmax.f32 %v14271_v2, 0.0  ;;  %v14272_v14 = vadd.f32 %v25511_v22, %v14203_v35 }
 0xc21   :  { %v14333_v19 = vmax.f32 %v14269_v52, 0.0  ;;  %v14270_v13 = vadd.f32 %v25511_v22, %v14201_v31  ;;  %18962 = vmatprep.mubr.msk.bf16.mxu0 %vm273_vm3, %v14447_v55  ;;  %v26817_v55 = vld [vmem:[#allocation36_spill] sm:$0xff]  ;;  %v26818_v31 = vld [vmem:[#allocation38_spill] sm:$0xff] }
 0xc22   :  { %v14336_v41 = vmax.f32 %v14272_v14, 0.0  ;;  %18963 = vmatmul.mubr.msk.bf16.gmra.mrb[148].mxu0 %vm273_vm3, %v14448_v21  ;;  %v14399_v56 = vadd.f32 %v14335_v9, %v26809_v37 }
 0xc23   :  { %v14334_v25 = vmax.f32 %v14270_v13, 0.0  ;;  %v18904_v10 = vpop.f32.mrb[92].mxu1  ;;  %v14397_v28 = vadd.f32 %v14333_v19, %v26811_v42  ;;  %v26819_v13 = vld [vmem:[#allocation37_spill] sm:$0xff] }
 0xc24   :  { %v14400_v24 = vadd.f32 %v14336_v41, %v26810_v27  ;;  %v14206_v59 = vmul.f32 %v18904_v10, %v25506_v23  ;;  %v13964_v36 = vpop.f32.mrb[93].mxu1 }
 0xc25   :  { %v14398_v16 = vadd.f32 %v14334_v25, %v26812_v47  ;;  %v14204_v50 = vmul.f32 %v25506_v23, %v13964_v36  ;;  %v18905_v5 = vpop.f32.mrb[94].mxu1  ;;  %v26820_v25 = vld [vmem:[#allocation39_spill] sm:$0xff] }
 0xc26   :  { %v14450_v60 = vpack.c.bf16 %v14400_v24, %v14399_v56  ;;  %v14275_v29 = vadd.f32 %v25511_v22, %v14206_v59  ;;  %v14207_v63 = vmul.f32 %v18905_v5, %v25506_v23  ;;  %v13967_v34 = vpop.f32.mrb[95].mxu1 }
 0xc27   :  { %v14449_v33 = vpack.c.bf16 %v14398_v16, %v14397_v28  ;;  %v14273_v44 = vadd.f32 %v25511_v22, %v14204_v50  ;;  %v14205_v61 = vmul.f32 %v25506_v23, %v13967_v34 }
 0xc28   :  { %v14339_v39 = vmax.f32 %v14275_v29, 0.0  ;;  %v14276_v12 = vadd.f32 %v25511_v22, %v14207_v63 }
 0xc29   :  { %v14337_v18 = vmax.f32 %v14273_v44, 0.0  ;;  %v14274_v48 = vadd.f32 %v25511_v22, %v14205_v61  ;;  %18966 = vmatprep.mubr.msk.bf16.mxu0 %vm273_vm3, %v14449_v33  ;;  %v26821_v33 = vld [vmem:[#allocation40_spill] sm:$0xff]  ;;  %v26822_v61 = vld [vmem:[#allocation42_spill] sm:$0xff] }
 0xc2a   :  { %v14340_v17 = vmax.f32 %v14276_v12, 0.0  ;;  %18967 = vmatmul.mubr.msk.bf16.gmra.mrb[152].mxu0 %vm273_vm3, %v14450_v60  ;;  %v14403_v40 = vadd.f32 %v14339_v39, %v26813_v6 }
 0xc2b   :  { %v14338_v58 = vmax.f32 %v14274_v48, 0.0  ;;  %v18908_v15 = vpop.f32.mrb[96].mxu1  ;;  %v14401_v51 = vadd.f32 %v14337_v18, %v26815_v7  ;;  %v26823_v48 = vld [vmem:[#allocation41_spill] sm:$0xff] }
 0xc2c   :  { %v14404_v20 = vadd.f32 %v14340_v17, %v26814_v49  ;;  %v14210_v45 = vmul.f32 %v18908_v15, %v25506_v23  ;;  %v13980_v54 = vpop.f32.mrb[97].mxu1 }
 0xc2d   :  { %v14402_v53 = vadd.f32 %v14338_v58, %v26816_v32  ;;  %v14208_v62 = vmul.f32 %v25506_v23, %v13980_v54  ;;  %v18909_v3 = vpop.f32.mrb[98].mxu1  ;;  %v26824_v58 = vld [vmem:[#allocation43_spill] sm:$0xff] }
 0xc2e   :  { %v14452_v30 = vpack.c.bf16 %v14404_v20, %v14403_v40  ;;  %v14279_v38 = vadd.f32 %v25511_v22, %v14210_v45  ;;  %v14211_v8 = vmul.f32 %v18909_v3, %v25506_v23  ;;  %v13983_v57 = vpop.f32.mrb[99].mxu1 }
 0xc2f   :  { %v14451_v0 = vpack.c.bf16 %v14402_v53, %v14401_v51  ;;  %v14277_v11 = vadd.f32 %v25511_v22, %v14208_v62  ;;  %v14209_v26 = vmul.f32 %v25506_v23, %v13983_v57 }
 0xc30   :  { %v14343_v4 = vmax.f32 %v14279_v38, 0.0  ;;  %v14280_v43 = vadd.f32 %v25511_v22, %v14211_v8 }
 0xc31   :  { %v14341_v1 = vmax.f32 %v14277_v11, 0.0  ;;  %v14278_v21 = vadd.f32 %v25511_v22, %v14209_v26  ;;  %18970 = vmatprep.mubr.msk.bf16.mxu0 %vm273_vm3, %v14451_v0  ;;  %v26825_v0 = vld [vmem:[#allocation44_spill] sm:$0xff]  ;;  %v26826_v26 = vld [vmem:[#allocation46_spill] sm:$0xff] }
 0xc32   :  { %v14344_v2 = vmax.f32 %v14280_v43, 0.0  ;;  %18971 = vmatmul.mubr.msk.bf16.gmra.mrb[156].mxu0 %vm273_vm3, %v14452_v30  ;;  %v14407_v52 = vadd.f32 %v14343_v4, %v26817_v55 }
 0xc33   :  { %v14342_v35 = vmax.f32 %v14278_v21, 0.0  ;;  %v18912_v46 = vpop.f32.mrb[100].mxu1  ;;  %v14405_v41 = vadd.f32 %v14341_v1, %v26819_v13  ;;  %v26827_v21 = vld [vmem:[#allocation45_spill] sm:$0xff] }
 0xc34   :  { %v14408_v9 = vadd.f32 %v14344_v2, %v26818_v31  ;;  %v14214_v14 = vmul.f32 %v18912_v46, %v25506_v23  ;;  %v13996_v19 = vpop.f32.mrb[101].mxu1 }
 0xc35   :  { %v14406_v10 = vadd.f32 %v14342_v35, %v26820_v25  ;;  %v14212_v37 = vmul.f32 %v25506_v23, %v13996_v19  ;;  %v18913_v56 = vpop.f32.mrb[102].mxu1  ;;  %v26828_v35 = vld [vmem:[#allocation47_spill] sm:$0xff] }
 0xc36   :  { %v14454_v27 = vpack.c.bf16 %v14408_v9, %v14407_v52  ;;  %v14283_v24 = vadd.f32 %v25511_v22, %v14214_v14  ;;  %v14215_v59 = vmul.f32 %v18913_v56, %v25506_v23  ;;  %v13999_v36 = vpop.f32.mrb[103].mxu1 }
 0xc37   :  { %v14453_v42 = vpack.c.bf16 %v14406_v10, %v14405_v41  ;;  %v14281_v28 = vadd.f32 %v25511_v22, %v14212_v37  ;;  %v14213_v47 = vmul.f32 %v25506_v23, %v13999_v36 }
 0xc38   :  { %v14347_v16 = vmax.f32 %v14283_v24, 0.0  ;;  %v14284_v50 = vadd.f32 %v25511_v22, %v14215_v59 }
 0xc39   :  { %v14345_v5 = vmax.f32 %v14281_v28, 0.0  ;;  %v14282_v60 = vadd.f32 %v25511_v22, %v14213_v47  ;;  %18974 = vmatprep.mubr.msk.bf16.mxu0 %vm273_vm3, %v14453_v42  ;;  %v26829_v42 = vld [vmem:[#allocation48_spill] sm:$0xff]  ;;  %v26830_v47 = vld [vmem:[#allocation50_spill] sm:$0xff] }
 0xc3a   :  { %v14348_v29 = vmax.f32 %v14284_v50, 0.0  ;;  %18975 = vmatmul.mubr.msk.bf16.gmra.mrb[160].mxu0 %vm273_vm3, %v14454_v27  ;;  %v14411_v44 = vadd.f32 %v14347_v16, %v26821_v33 }
 0xc3b   :  { %v14346_v63 = vmax.f32 %v14282_v60, 0.0  ;;  %v18916_v34 = vpop.f32.mrb[104].mxu1  ;;  %v14409_v17 = vadd.f32 %v14345_v5, %v26823_v48  ;;  %v26831_v60 = vld [vmem:[#allocation49_spill] sm:$0xff] }
 0xc3c   :  { %v14412_v39 = vadd.f32 %v14348_v29, %v26822_v61  ;;  %v14218_v12 = vmul.f32 %v18916_v34, %v25506_v23  ;;  %v14012_v18 = vpop.f32.mrb[105].mxu1 }
 0xc3d   :  { %v14410_v15 = vadd.f32 %v14346_v63, %v26824_v58  ;;  %v14216_v6 = vmul.f32 %v25506_v23, %v14012_v18  ;;  %v18917_v40 = vpop.f32.mrb[106].mxu1  ;;  %v26832_v63 = vld [vmem:[#allocation51_spill] sm:$0xff] }
 0xc3e   :  { %v14456_v49 = vpack.c.bf16 %v14412_v39, %v14411_v44  ;;  %v14287_v20 = vadd.f32 %v25511_v22, %v14218_v12  ;;  %v14219_v45 = vmul.f32 %v18917_v40, %v25506_v23  ;;  %v14015_v54 = vpop.f32.mrb[107].mxu1 }
 0xc3f   :  { %v14455_v7 = vpack.c.bf16 %v14410_v15, %v14409_v17  ;;  %v14285_v51 = vadd.f32 %v25511_v22, %v14216_v6  ;;  %v14217_v32 = vmul.f32 %v25506_v23, %v14015_v54 }
 0xc40   :  { %v14351_v53 = vmax.f32 %v14287_v20, 0.0  ;;  %v14288_v62 = vadd.f32 %v25511_v22, %v14219_v45 }
 0xc41   :  { %v14349_v3 = vmax.f32 %v14285_v51, 0.0  ;;  %v14286_v30 = vadd.f32 %v25511_v22, %v14217_v32  ;;  %18978 = vmatprep.mubr.msk.bf16.mxu0 %vm273_vm3, %v14455_v7  ;;  %v26833_v7 = vld [vmem:[#allocation52_spill] sm:$0xff]  ;;  %v26834_v32 = vld [vmem:[#allocation54_spill] sm:$0xff] }
 0xc42   :  { %v14352_v38 = vmax.f32 %v14288_v62, 0.0  ;;  %18979 = vmatmul.mubr.msk.bf16.gmra.mrb[164].mxu0 %vm273_vm3, %v14456_v49  ;;  %v14415_v11 = vadd.f32 %v14351_v53, %v26825_v0 }
 0xc43   :  { %v14350_v8 = vmax.f32 %v14286_v30, 0.0  ;;  %v18920_v57 = vpop.f32.mrb[108].mxu1  ;;  %v14413_v2 = vadd.f32 %v14349_v3, %v26827_v21  ;;  %v26835_v30 = vld [vmem:[#allocation53_spill] sm:$0xff] }
 0xc44   :  { %v14416_v4 = vadd.f32 %v14352_v38, %v26826_v26  ;;  %v14222_v43 = vmul.f32 %v18920_v57, %v25506_v23  ;;  %v14028_v1 = vpop.f32.mrb[109].mxu1 }
 0xc45   :  { %v14414_v46 = vadd.f32 %v14350_v8, %v26828_v35  ;;  %v14220_v55 = vmul.f32 %v25506_v23, %v14028_v1  ;;  %v18921_v52 = vpop.f32.mrb[110].mxu1  ;;  %v26836_v8 = vld [vmem:[#allocation55_spill] sm:$0xff] }
 0xc46   :  { %v14458_v31 = vpack.c.bf16 %v14416_v4, %v14415_v11  ;;  %v14291_v9 = vadd.f32 %v25511_v22, %v14222_v43  ;;  %v14223_v14 = vmul.f32 %v18921_v52, %v25506_v23  ;;  %v14031_v19 = vpop.f32.mrb[111].mxu1 }
 0xc47   :  { %v14457_v13 = vpack.c.bf16 %v14414_v46, %v14413_v2  ;;  %v14289_v41 = vadd.f32 %v25511_v22, %v14220_v55  ;;  %v14221_v25 = vmul.f32 %v25506_v23, %v14031_v19 }
 0xc48   :  { %v14355_v10 = vmax.f32 %v14291_v9, 0.0  ;;  %v14292_v37 = vadd.f32 %v25511_v22, %v14223_v14 }
 0xc49   :  { %v14353_v56 = vmax.f32 %v14289_v41, 0.0  ;;  %v14290_v27 = vadd.f32 %v25511_v22, %v14221_v25  ;;  %18982 = vmatprep.mubr.msk.bf16.mxu0 %vm273_vm3, %v14457_v13  ;;  %v26837_v13 = vld [vmem:[#allocation56_spill] sm:$0xff]  ;;  %v26838_v25 = vld [vmem:[#allocation58_spill] sm:$0xff] }
 0xc4a   :  { %v14356_v24 = vmax.f32 %v14292_v37, 0.0  ;;  %18983 = vmatmul.mubr.msk.bf16.gmra.mrb[168].mxu0 %vm273_vm3, %v14458_v31  ;;  %v14419_v28 = vadd.f32 %v14355_v10, %v26829_v42 }
 0xc4b   :  { %v14354_v59 = vmax.f32 %v14290_v27, 0.0  ;;  %v18924_v36 = vpop.f32.mrb[112].mxu1  ;;  %v14417_v29 = vadd.f32 %v14353_v56, %v26831_v60  ;;  %v26839_v27 = vld [vmem:[#allocation57_spill] sm:$0xff] }
 0xc4c   :  { %v14420_v16 = vadd.f32 %v14356_v24, %v26830_v47  ;;  %v14226_v50 = vmul.f32 %v18924_v36, %v25506_v23  ;;  %v14044_v5 = vpop.f32.mrb[113].mxu1 }
 0xc4d   :  { %v14418_v34 = vadd.f32 %v14354_v59, %v26832_v63  ;;  %v14224_v33 = vmul.f32 %v25506_v23, %v14044_v5  ;;  %v18925_v44 = vpop.f32.mrb[114].mxu1  ;;  %v26840_v59 = vld [vmem:[#allocation59_spill] sm:$0xff] }
 0xc4e   :  { %v14460_v61 = vpack.c.bf16 %v14420_v16, %v14419_v28  ;;  %v14295_v39 = vadd.f32 %v25511_v22, %v14226_v50  ;;  %v14227_v12 = vmul.f32 %v18925_v44, %v25506_v23  ;;  %v14047_v18 = vpop.f32.mrb[115].mxu1 }
 0xc4f   :  { %v14459_v48 = vpack.c.bf16 %v14418_v34, %v14417_v29  ;;  %v14293_v17 = vadd.f32 %v25511_v22, %v14224_v33  ;;  %v14225_v58 = vmul.f32 %v25506_v23, %v14047_v18 }
 0xc50   :  { %v14359_v15 = vmax.f32 %v14295_v39, 0.0  ;;  %v14296_v6 = vadd.f32 %v25511_v22, %v14227_v12 }
 0xc51   :  { %v14357_v40 = vmax.f32 %v14293_v17, 0.0  ;;  %v14294_v49 = vadd.f32 %v25511_v22, %v14225_v58  ;;  %18986 = vmatprep.mubr.msk.bf16.mxu0 %vm273_vm3, %v14459_v48  ;;  %v26841_v48 = vld [vmem:[#allocation60_spill] sm:$0xff]  ;;  %v26842_v58 = vld [vmem:[#allocation62_spill] sm:$0xff] }
 0xc52   :  { %v14360_v20 = vmax.f32 %v14296_v6, 0.0  ;;  %18987 = vmatmul.mubr.msk.bf16.gmra.mrb[172].mxu0 %vm273_vm3, %v14460_v61  ;;  %v14423_v51 = vadd.f32 %v14359_v15, %v26833_v7 }
 0xc53   :  { %v14358_v45 = vmax.f32 %v14294_v49, 0.0  ;;  %v18928_v54 = vpop.f32.mrb[116].mxu1  ;;  %v14421_v38 = vadd.f32 %v14357_v40, %v26835_v30  ;;  %v26843_v49 = vld [vmem:[#allocation61_spill] sm:$0xff] }
 0xc54   :  { %v14424_v53 = vadd.f32 %v14360_v20, %v26834_v32  ;;  %v14230_v62 = vmul.f32 %v18928_v54, %v25506_v23  ;;  %v14060_v3 = vpop.f32.mrb[117].mxu1 }
 0xc55   :  { %v14422_v57 = vadd.f32 %v14358_v45, %v26836_v8  ;;  %v14228_v0 = vmul.f32 %v25506_v23, %v14060_v3  ;;  %v18929_v11 = vpop.f32.mrb[118].mxu1  ;;  %v26844_v45 = vld [vmem:[#allocation63_spill] sm:$0xff] }
 0xc56   :  { %v14462_v26 = vpack.c.bf16 %v14424_v53, %v14423_v51  ;;  %v14299_v4 = vadd.f32 %v25511_v22, %v14230_v62  ;;  %v14231_v43 = vmul.f32 %v18929_v11, %v25506_v23  ;;  %v14063_v1 = vpop.f32.mrb[119].mxu1 }
 0xc57   :  { %v14461_v21 = vpack.c.bf16 %v14422_v57, %v14421_v38  ;;  %v14297_v2 = vadd.f32 %v25511_v22, %v14228_v0  ;;  %v14229_v35 = vmul.f32 %v25506_v23, %v14063_v1  ;;  %v26845_v1 = vld [vmem:[#allocation64_spill] sm:$0xff] }
 0xc58   :  { %v14363_v46 = vmax.f32 %v14299_v4, 0.0  ;;  %v14300_v55 = vadd.f32 %v25511_v22, %v14231_v43 }
 0xc59   :  { %v14361_v52 = vmax.f32 %v14297_v2, 0.0  ;;  %v14298_v31 = vadd.f32 %v25511_v22, %v14229_v35  ;;  %18990 = vmatprep.mubr.msk.bf16.mxu0 %vm273_vm3, %v14461_v21  ;;  %v26846_v2 = vld [vmem:[#allocation66_spill] sm:$0xff] }
 0xc5a   :  { %v14364_v9 = vmax.f32 %v14300_v55, 0.0  ;;  %18991 = vmatmul.mubr.msk.bf16.gmra.mrb[176].mxu0 %vm273_vm3, %v14462_v26  ;;  %v14427_v41 = vadd.f32 %v14363_v46, %v26837_v13  ;;  %v26847_v46 = vld [vmem:[#allocation65_spill] sm:$0xff] }
 0xc5b   :  { %v14362_v14 = vmax.f32 %v14298_v31, 0.0  ;;  %v18932_v19 = vpop.f32.mrb[120].mxu1  ;;  %v14425_v24 = vadd.f32 %v14361_v52, %v26839_v27  ;;  %v26848_v52 = vld [vmem:[#allocation67_spill] sm:$0xff] }
 0xc5c   :  { %v14428_v10 = vadd.f32 %v14364_v9, %v26838_v25  ;;  %v14234_v37 = vmul.f32 %v18932_v19, %v25506_v23  ;;  %v14076_v56 = vpop.f32.mrb[121].mxu1 }
 0xc5d   :  { %v14426_v36 = vadd.f32 %v14362_v14, %v26840_v59  ;;  %v14232_v42 = vmul.f32 %v25506_v23, %v14076_v56  ;;  %v18933_v28 = vpop.f32.mrb[122].mxu1 }
 0xc5e   :  { %v14464_v47 = vpack.c.bf16 %v14428_v10, %v14427_v41  ;;  %v14303_v16 = vadd.f32 %v25511_v22, %v14234_v37  ;;  %v14235_v50 = vmul.f32 %v18933_v28, %v25506_v23  ;;  %v14079_v5 = vpop.f32.mrb[123].mxu1 }
 0xc5f   :  { %v14463_v60 = vpack.c.bf16 %v14426_v36, %v14425_v24  ;;  %v14301_v29 = vadd.f32 %v25511_v22, %v14232_v42  ;;  %v14233_v63 = vmul.f32 %v25506_v23, %v14079_v5 }
 0xc60   :  { %v14367_v34 = vmax.f32 %v14303_v16, 0.0  ;;  %v14304_v33 = vadd.f32 %v25511_v22, %v14235_v50  ;;  %v25744_v16 = vld [vmem:[%s26309_s5] ss:$0 sm:$0xff] }
 0xc61   :  { %v14365_v44 = vmax.f32 %v14301_v29, 0.0  ;;  %v14302_v61 = vadd.f32 %v25511_v22, %v14233_v63  ;;  %18994 = vmatprep.mubr.msk.bf16.mxu0 %vm273_vm3, %v14463_v60 }
 0xc62   :  { %v14368_v39 = vmax.f32 %v14304_v33, 0.0  ;;  %18995 = vmatmul.mubr.msk.bf16.gmra.mrb[180].mxu0 %vm273_vm3, %v14464_v47  ;;  %v14431_v17 = vadd.f32 %v14367_v34, %v26841_v48 }
 0xc63   :  { %v14366_v12 = vmax.f32 %v14302_v61, 0.0  ;;  %v18936_v18 = vpop.f32.mrb[124].mxu1  ;;  %v14429_v20 = vadd.f32 %v14365_v44, %v26843_v49 }
 0xc64   :  { %v14432_v15 = vadd.f32 %v14368_v39, %v26842_v58  ;;  %v14238_v6 = vmul.f32 %v18936_v18, %v25506_v23  ;;  %v14092_v40 = vpop.f32.mrb[125].mxu1 }
 0xc65   :  { %v14430_v54 = vadd.f32 %v14366_v12, %v26844_v45  ;;  %v14236_v7 = vmul.f32 %v25506_v23, %v14092_v40  ;;  %v18937_v51 = vpop.f32.mrb[126].mxu1 }
 0xc66   :  { %v14466_v32 = vpack.c.bf16 %v14432_v15, %v14431_v17  ;;  %v14307_v53 = vadd.f32 %v25511_v22, %v14238_v6  ;;  %v14239_v62 = vmul.f32 %v18937_v51, %v25506_v23  ;;  %v14095_v3 = vpop.f32.mrb[127].mxu1 }
 0xc67   :  { %v14465_v30 = vpack.c.bf16 %v14430_v54, %v14429_v20  ;;  %v14305_v38 = vadd.f32 %v25511_v22, %v14236_v7  ;;  %v14237_v8 = vmul.f32 %v25506_v23, %v14095_v3 }
 0xc68   :  { %v14371_v57 = vmax.f32 %v14307_v53, 0.0  ;;  %v14308_v0 = vadd.f32 %v25511_v22, %v14239_v62 }
 0xc69   :  { %v14369_v11 = vmax.f32 %v14305_v38, 0.0  ;;  %v14306_v26 = vadd.f32 %v25511_v22, %v14237_v8  ;;  %18998 = vmatprep.mubr.msk.bf16.mxu0 %vm273_vm3, %v14465_v30 }
 0xc6a   :  { %v14372_v4 = vmax.f32 %v14308_v0, 0.0  ;;  %18999 = vmatmul.mubr.msk.bf16.gmra.mrb[184].mxu0 %vm273_vm3, %v14466_v32  ;;  %v14435_v21 = vadd.f32 %v14371_v57, %v26845_v1 }
 0xc6b   :  { %v14370_v43 = vmax.f32 %v14306_v26, 0.0  ;;  %v14433_v55 = vadd.f32 %v14369_v11, %v26847_v46 }
 0xc6c   :  { %v14436_v35 = vadd.f32 %v14372_v4, %v26846_v2 }
 0xc6d   :  { %v14434_v23 = vadd.f32 %v14370_v43, %v26848_v52 }
 0xc6e   :  { %v14468_v31 = vpack.c.bf16 %v14436_v35, %v14435_v21 }
 0xc6f   :  { %v14467_v9 = vpack.c.bf16 %v14434_v23, %v14433_v55 }
 0xc71   :  { %19002 = vmatprep.mubr.msk.bf16.mxu0 %vm273_vm3, %v14467_v9 }
 0xc72   :  { %19003 = vmatmul.mubr.msk.bf16.gmra.mrb[188].mxu0 %vm273_vm3, %v14468_v31 }
 0xccd   :  { %v18944_v22 = vpop.f32.mrb[128].mxu0 }
 0xcce   :  { %v14622_v14 = vpop.f32.mrb[129].mxu0  ;;  %v14631_v5 = vadd.f32 %v18944_v22, %v25744_v16 }
 0xccf   :  { %v18945_v19 = vpop.f32.mrb[130].mxu0  ;;  %v14623_v63 = vadd.f32 %v25744_v16, %v14622_v14 }
 0xcd0   :  { %v14625_v13 = vpop.f32.mrb[131].mxu0  ;;  %v14634_v44 = vadd.f32 %v18945_v19, %v25744_v16 }
 0xcd1   :  { %v14626_v18 = vadd.f32 %v25744_v16, %v14625_v13 }
 0xcd5   :  { %v18948_v41 = vpop.f32.mrb[132].mxu0 }
 0xcd6   :  { %v14638_v25 = vpop.f32.mrb[133].mxu0  ;;  %v14647_v40 = vadd.f32 %v18948_v41, %v25744_v16 }
 0xcd7   :  { %v18949_v10 = vpop.f32.mrb[134].mxu0  ;;  %v14639_v45 = vadd.f32 %v25744_v16, %v14638_v25 }
 0xcd8   :  { %v14641_v37 = vpop.f32.mrb[135].mxu0  ;;  %v14650_v51 = vadd.f32 %v18949_v10, %v25744_v16 }
 0xcd9   :  { %v14642_v3 = vadd.f32 %v25744_v16, %v14641_v37 }
 0xcdd   :  { %v18952_v56 = vpop.f32.mrb[136].mxu0 }
 0xcde   :  { %v14654_v27 = vpop.f32.mrb[137].mxu0  ;;  %v14663_v11 = vadd.f32 %v18952_v56, %v25744_v16 }
 0xcdf   :  { %v18953_v24 = vpop.f32.mrb[138].mxu0  ;;  %v14655_v43 = vadd.f32 %v25744_v16, %v14654_v27 }
 0xce0   :  { %v14657_v59 = vpop.f32.mrb[139].mxu0  ;;  %v14666_v2 = vadd.f32 %v18953_v24, %v25744_v16 }
 0xce1   :  { %v14658_v52 = vadd.f32 %v25744_v16, %v14657_v59 }
 0xce5   :  { %v18956_v36 = vpop.f32.mrb[140].mxu0 }
 0xce6   :  { %v14670_v42 = vpop.f32.mrb[141].mxu0  ;;  %v14679_v19 = vadd.f32 %v18956_v36, %v25744_v16 }
 0xce7   :  { %v25737_v28 = vpop.f32.mrb[142].mxu0  ;;  %v14671_v25 = vadd.f32 %v25744_v16, %v14670_v42 }
 0xce8   :  { %v25739_v47 = vpop.f32.mrb[143].mxu0  ;;  %v14682_v56 = vadd.f32 %v25737_v28, %v25744_v16 }
 0xced   :  { %v18960_v50 = vpop.f32.mrb[144].mxu0 }
 0xcee   :  { %v14695_v60 = vadd.f32 %v18960_v50, %v25744_v16  ;;  %v14686_v29 = vpop.f32.mrb[145].mxu0  ;;  %v14674_v50 = vadd.f32 %v25744_v16, %v25739_v47 }
 0xcef   :  { %v14687_v34 = vadd.f32 %v25744_v16, %v14686_v29  ;;  %v18961_v33 = vpop.f32.mrb[146].mxu0 }
 0xcf0   :  { %v14698_v61 = vadd.f32 %v18961_v33, %v25744_v16  ;;  %v14689_v39 = vpop.f32.mrb[147].mxu0  ;;  %v20201_v12 = vpack.i.bf16 %v14695_v60, %v14631_v5 }
 0xcf1   :  { %v14690_v48 = vadd.f32 %v25744_v16, %v14689_v39  ;;  %v20197_v17 = vpack.i.bf16 %v14687_v34, %v14623_v63 }
 0xcf2   :  { %v20203_v58 = vpack.i.bf16 %v14698_v61, %v14634_v44 }
 0xcf3   :  { %20198 = vxpose.xlu0.b32.start [1/16] (narrow) %v20197_v17, 16  ;;  %v20199_v15 = vpack.i.bf16 %v14690_v48, %v14626_v18 }
 0xcf5   :  { %v18964_v6 = vpop.f32.mrb[148].mxu0 }
 0xcf6   :  { %v14711_v49 = vadd.f32 %v18964_v6, %v25744_v16  ;;  %v14702_v20 = vpop.f32.mrb[149].mxu0 }
 0xcf7   :  { %v14703_v54 = vadd.f32 %v25744_v16, %v14702_v20  ;;  %20200 = vxpose.xlu0.b32.cont [2/16] (narrow) %v20199_v15, 16  ;;  %v18965_v7 = vpop.f32.mrb[150].mxu0 }
 0xcf8   :  { %v14714_v32 = vadd.f32 %v18965_v7, %v25744_v16  ;;  %v14705_v53 = vpop.f32.mrb[151].mxu0  ;;  %v20209_v62 = vpack.i.bf16 %v14711_v49, %v14647_v40  ;;  %v20323_v49 = vld [vmem:[%s26310_s6] sm:$0xff]   ;;  %v20608_v7 = vmov 0.0  }
 0xcf9   :  { %v14706_v30 = vadd.f32 %v25744_v16, %v14705_v53  ;;  %v20205_v38 = vpack.i.bf16 %v14703_v54, %v14639_v45  ;;  %19006 = vmatprep.subr.bf16.mxu1 %v20608_v7  ;;  %19086 = vmatprep.subr.bf16.mxu0 %v20608_v7 }
 0xcfa   :  { %v20211_v8 = vpack.i.bf16 %v14714_v32, %v14650_v51  ;;  %19007 = vmatpush3.bf16.msra.mxu1 %v20323_v49  ;;  %19022 = vmatprep.mubr.msk.bf16.mxu1 %vm20609_vm10, %v20608_v7 }
 0xcfb   :  { %20202 = vxpose.xlu0.b32.cont [3/16] (narrow) %v20201_v12, 16  ;;  %v20207_v57 = vpack.i.bf16 %v14706_v30, %v14642_v3  ;;  %19008 = vmatprep.subr.bf16.mxu1 %v20608_v7 }
 0xcfc   :  { %19102 = vmatprep.mubr.msk.bf16.mxu0 %vm20609_vm10, %v20608_v7 }
 0xcfd   :  { %v18968_v0 = vpop.f32.mrb[152].mxu0 }
 0xcfe   :  { %v14727_v26 = vadd.f32 %v18968_v0, %v25744_v16  ;;  %v14718_v4 = vpop.f32.mrb[153].mxu0 }
 0xcff   :  { %v14719_v1 = vadd.f32 %v25744_v16, %v14718_v4  ;;  %20204 = vxpose.xlu0.b32.cont [4/16] (narrow) %v20203_v58, 16  ;;  %v18969_v21 = vpop.f32.mrb[154].mxu0 }
 0xd00   :  { %v14730_v35 = vadd.f32 %v18969_v21, %v25744_v16  ;;  %v14721_v46 = vpop.f32.mrb[155].mxu0  ;;  %v20217_v55 = vpack.i.bf16 %v14727_v26, %v14663_v11 }
 0xd01   :  { %v14722_v23 = vadd.f32 %v25744_v16, %v14721_v46  ;;  %v20213_v31 = vpack.i.bf16 %v14719_v1, %v14655_v43 }
 0xd02   :  { %v20219_v9 = vpack.i.bf16 %v14730_v35, %v14666_v2 }
 0xd03   :  { %20206 = vxpose.xlu0.b32.cont [5/16] (narrow) %v20205_v38, 16  ;;  %v20215_v22 = vpack.i.bf16 %v14722_v23, %v14658_v52 }
 0xd05   :  { %v18972_v14 = vpop.f32.mrb[156].mxu0 }
 0xd06   :  { %v14743_v13 = vadd.f32 %v18972_v14, %v25744_v16  ;;  %v14734_v41 = vpop.f32.mrb[157].mxu0 }
 0xd07   :  { %v14735_v10 = vadd.f32 %v25744_v16, %v14734_v41  ;;  %20208 = vxpose.xlu0.b32.cont [6/16] (narrow) %v20207_v57, 16  ;;  %v18973_v37 = vpop.f32.mrb[158].mxu0 }
 0xd08   :  { %v14746_v27 = vadd.f32 %v18973_v37, %v25744_v16  ;;  %v14737_v24 = vpop.f32.mrb[159].mxu0  ;;  %v20225_v59 = vpack.i.bf16 %v14743_v13, %v14679_v19 }
 0xd09   :  { %v14738_v36 = vadd.f32 %v25744_v16, %v14737_v24  ;;  %v20221_v5 = vpack.i.bf16 %v14735_v10, %v14671_v25  ;;  %v20324_v25 = vld [vmem:[%s26310_s6 + $0x8] sm:$0xff]  }
 0xd0a   :  { %v20227_v60 = vpack.i.bf16 %v14746_v27, %v14682_v56  ;;  %19009 = vmatpush3.bf16.msra.mxu1 %v20324_v25 }
 0xd0b   :  { %20210 = vxpose.xlu0.b32.cont [7/16] (narrow) %v20209_v62, 16  ;;  %v20223_v42 = vpack.i.bf16 %v14738_v36, %v14674_v50  ;;  %19010 = vmatprep.subr.bf16.mxu1 %v20608_v7 }
 0xd0d   :  { %v18976_v29 = vpop.f32.mrb[160].mxu0 }
 0xd0e   :  { %v14750_v63 = vpop.f32.mrb[161].mxu0  ;;  %v25792_v20 = vadd.f32 %v18976_v29, %v25744_v16 }
 0xd0f   :  { %20212 = vxpose.xlu0.b32.cont [8/16] (narrow) %v20211_v8, 16  ;;  %v18977_v34 = vpop.f32.mrb[162].mxu0  ;;  %v25800_v51 = vadd.f32 %v25744_v16, %v14750_v63 }
 0xd10   :  { %v14753_v33 = vpop.f32.mrb[163].mxu0  ;;  %v25806_v62 = vadd.f32 %v18977_v34, %v25744_v16 }
 0xd11   :  { %v25815_v8 = vadd.f32 %v25744_v16, %v14753_v33 }
 0xd13   :  { %20214 = vxpose.xlu0.b32.cont [9/16] (narrow) %v20213_v31, 16 }
 0xd15   :  { %v18980_v28 = vpop.f32.mrb[164].mxu0 }
 0xd16   :  { %v14766_v44 = vpop.f32.mrb[165].mxu0  ;;  %v25827_v43 = vadd.f32 %v18980_v28, %v25744_v16 }
 0xd17   :  { %20216 = vxpose.xlu0.b32.cont [10/16] (narrow) %v20215_v22, 16  ;;  %v18981_v61 = vpop.f32.mrb[166].mxu0  ;;  %v25833_v2 = vadd.f32 %v25744_v16, %v14766_v44 }
 0xd18   :  { %v14769_v39 = vpop.f32.mrb[167].mxu0 }
 0xd1b   :  { %20218 = vxpose.xlu0.b32.cont [11/16] (narrow) %v20217_v55, 16  ;;  %v25839_v55 = vadd.f32 %v18981_v61, %v25744_v16 }
 0xd1d   :  { %v18984_v12 = vpop.f32.mrb[168].mxu0 }
 0xd1e   :  { %v14782_v47 = vpop.f32.mrb[169].mxu0  ;;  %v25862_v10 = vadd.f32 %v18984_v12, %v25744_v16 }
 0xd1f   :  { %20220 = vxpose.xlu0.b32.cont [12/16] (narrow) %v20219_v9, 16  ;;  %v18985_v18 = vpop.f32.mrb[170].mxu0  ;;  %v25847_v9 = vadd.f32 %v25744_v16, %v14769_v39  ;;  %v25868_v27 = vadd.f32 %v25744_v16, %v14782_v47 }
 0xd20   :  { %v14785_v48 = vpop.f32.mrb[171].mxu0  ;;  %v25874_v50 = vadd.f32 %v18985_v18, %v25744_v16 }
 0xd23   :  { %20222 = vxpose.xlu0.b32.cont [13/16] (narrow) %v20221_v5, 16 }
 0xd25   :  { %v25780_v17 = vpop.f32.mrb[172].mxu0 }
 0xd26   :  { %v25782_v58 = vpop.f32.mrb[173].mxu0  ;;  %v25896_v44 = vadd.f32 %v25780_v17, %v25744_v16 }
 0xd27   :  { %20224 = vxpose.xlu0.b32.cont [14/16] (narrow) %v20223_v42, 16  ;;  %v25784_v15 = vpop.f32.mrb[174].mxu0  ;;  %v25883_v42 = vadd.f32 %v25744_v16, %v14785_v48  ;;  %v25903_v12 = vadd.f32 %v25744_v16, %v25782_v58 }
 0xd28   :  { %v25786_v6 = vpop.f32.mrb[175].mxu0  ;;  %v25910_v48 = vadd.f32 %v25784_v15, %v25744_v16 }
 0xd2b   :  { %20226 = vxpose.xlu0.b32.cont [15/16] (narrow) %v20225_v59, 16 }
 0xd2d   :  { %v18992_v40 = vpop.f32.mrb[176].mxu0 }
 0xd2e   :  { %v25795_v45 = vadd.f32 %v18992_v40, %v25744_v16  ;;  %v14814_v54 = vpop.f32.mrb[177].mxu0 }
 0xd2f   :  { %v25803_v32 = vadd.f32 %v25744_v16, %v14814_v54  ;;  %20228 = vxpose.xlu0.b32.end [16/16] (narrow) %v20227_v60, 16  ;;  %v18993_v53 = vpop.f32.mrb[178].mxu0  ;;  %v25919_v54 = vadd.f32 %v25744_v16, %v25786_v6  ;;  %v20326_v6 = vld [vmem:[%s26310_s6 + $0x18] sm:$0xff]  }
 0xd30   :  { %v20243_v3 = vpack.i.bf16 %v25795_v45, %v25792_v20  ;;  %v25811_v30 = vadd.f32 %v18993_v53, %v25744_v16  ;;  %v14817_v38 = vpop.f32.mrb[179].mxu0  ;;  %v20357_v20 = vld [vmem:[%s26310_s6 + $0x10] sm:$0xff]   ;;  %v20358_v45 = vld [vmem:[%s26310_s6 + $0x18] sm:$0xff]  }
 0xd31   :  { %v25818_v57 = vadd.f32 %v25744_v16, %v14817_v38  ;;  %v20239_v0 = vpack.i.bf16 %v25803_v32, %v25800_v51  ;;  %v20352_v51 = vld [vmem:[%s26310_s6 + $0x8] sm:$0xff]   ;;  %v20359_v32 = vld [vmem:[%s26310_s6 + $0x20] sm:$0xff]  }
 0xd32   :  { %v20245_v11 = vpack.i.bf16 %v25811_v30, %v25806_v62  ;;  %v20360_v62 = vld [vmem:[%s26310_s6 + $0x28] sm:$0xff]   ;;  %v20366_v30 = vld [vmem:[%s26310_s6 + $0x38] sm:$0xff]  }
 0xd33   :  { %v20241_v26 = vpack.i.bf16 %v25818_v57, %v25815_v8  ;;  %v20331_v57 = vld [vmem:[%s26310_s6] sm:$0xff]  }
 0xd35   :  { %v18996_v4 = vpop.f32.mrb[180].mxu0 }
 0xd36   :  { %v25830_v1 = vadd.f32 %v18996_v4, %v25744_v16  ;;  %v14830_v21 = vpop.f32.mrb[181].mxu0  ;;  %v20325_v4 = vld [vmem:[%s26310_s6 + $0x10] sm:$0xff]  }
 0xd37   :  { %v25836_v35 = vadd.f32 %v25744_v16, %v14830_v21  ;;  %v18997_v46 = vpop.f32.mrb[182].mxu0  ;;  %19011 = vmatpush3.bf16.msra.mxu1 %v20325_v4  ;;  %v20328_v21 = vld [vmem:[%s26310_s6 + $0x28] sm:$0xff]  }
 0xd38   :  { %v20251_v52 = vpack.i.bf16 %v25830_v1, %v25827_v43  ;;  %v25844_v23 = vadd.f32 %v18997_v46, %v25744_v16  ;;  %v14833_v31 = vpop.f32.mrb[183].mxu0  ;;  %19012 = vmatprep.subr.bf16.mxu1 %v20608_v7  ;;  %v20329_v46 = vld [vmem:[%s26310_s6 + $0x30] sm:$0xff]   ;;  %v20334_v1 = vld [vmem:[%s26310_s6 + $0x18] sm:$0xff]  }
 0xd39   :  { %v20247_v22 = vpack.i.bf16 %v25836_v35, %v25833_v2  ;;  %v25852_v14 = vadd.f32 %v25744_v16, %v14833_v31  ;;  %v20330_v31 = vld [vmem:[%s26310_s6 + $0x38] sm:$0xff]   ;;  %v20333_v43 = vld [vmem:[%s26310_s6 + $0x10] sm:$0xff]   ;;  %v20335_v2 = vld [vmem:[%s26310_s6 + $0x20] sm:$0xff]  }
 0xd3a   :  { %v20253_v19 = vpack.i.bf16 %v25844_v23, %v25839_v55  ;;  %v20336_v35 = vld [vmem:[%s26310_s6 + $0x28] sm:$0xff]   ;;  %v20337_v55 = vld [vmem:[%s26310_s6 + $0x30] sm:$0xff]   ;;  %v20339_v23 = vld [vmem:[%s26310_s6] sm:$0xff]  }
 0xd3b   :  { %v20249_v13 = vpack.i.bf16 %v25852_v14, %v25847_v9  ;;  %19013 = vmatpush3.bf16.msra.mxu1 %v20326_v6  ;;  %v20347_v6 = vld [vmem:[%s26310_s6] sm:$0xff]   ;;  %v20341_v14 = vld [vmem:[%s26310_s6 + $0x10] sm:$0xff]  }
 0xd3c   :  { %19014 = vmatprep.subr.bf16.mxu1 %v20608_v7  ;;  %19087 = vmatpush3.bf16.msra.mxu0 %v20347_v6 }
 0xd3d   :  { %v19000_v41 = vpop.f32.mrb[184].mxu0  ;;  %19088 = vmatprep.subr.bf16.mxu0 %v20608_v7 }
 0xd3e   :  { %v25865_v37 = vadd.f32 %v19000_v41, %v25744_v16  ;;  %v14846_v56 = vpop.f32.mrb[185].mxu0 }
 0xd3f   :  { %v25871_v24 = vadd.f32 %v25744_v16, %v14846_v56  ;;  %v19001_v59 = vpop.f32.mrb[186].mxu0 }
 0xd40   :  { %v20259_v36 = vpack.i.bf16 %v25865_v37, %v25862_v10  ;;  %v25879_v5 = vadd.f32 %v19001_v59, %v25744_v16  ;;  %v14849_v60 = vpop.f32.mrb[187].mxu0  ;;  %19089 = vmatpush3.bf16.msra.mxu0 %v20352_v51  ;;  %v20344_v10 = vld [vmem:[%s26310_s6 + $0x28] sm:$0xff]  }
 0xd41   :  { %v20255_v29 = vpack.i.bf16 %v25871_v24, %v25868_v27  ;;  %v25888_v63 = vadd.f32 %v25744_v16, %v14849_v60  ;;  %19090 = vmatprep.subr.bf16.mxu0 %v20608_v7  ;;  %v20345_v27 = vld [vmem:[%s26310_s6 + $0x30] sm:$0xff]  }
 0xd42   :  { %v20261_v34 = vpack.i.bf16 %v25879_v5, %v25874_v50  ;;  %v20346_v50 = vld [vmem:[%s26310_s6 + $0x38] sm:$0xff]  }
 0xd43   :  { %v20257_v33 = vpack.i.bf16 %v25888_v63, %v25883_v42 }
 0xd44   :  { %19091 = vmatpush3.bf16.msra.mxu0 %v20357_v20  ;;  %v20374_v20 = vld [vmem:[%s26310_s6 + $0x10] sm:$0xff]  }
 0xd45   :  { %v19004_v28 = vpop.f32.mrb[188].mxu0  ;;  %19092 = vmatprep.subr.bf16.mxu0 %v20608_v7 }
 0xd46   :  { %v25899_v61 = vadd.f32 %v19004_v28, %v25744_v16  ;;  %v14862_v39 = vpop.f32.mrb[189].mxu0 }
 0xd47   :  { %v25906_v47 = vadd.f32 %v25744_v16, %v14862_v39  ;;  %v19005_v18 = vpop.f32.mrb[190].mxu0 }
 0xd48   :  { %v20267_v17 = vpack.i.bf16 %v25899_v61, %v25896_v44  ;;  %v25915_v40 = vadd.f32 %v19005_v18, %v25744_v16  ;;  %v14865_v49 = vpop.f32.mrb[191].mxu0  ;;  %19093 = vmatpush3.bf16.msra.mxu0 %v20358_v45  ;;  %v20375_v45 = vld [vmem:[%s26310_s6 + $0x8] sm:$0xff]  }
 0xd49   :  { %v20263_v58 = vpack.i.bf16 %v25906_v47, %v25903_v12  ;;  %v25924_v53 = vadd.f32 %v25744_v16, %v14865_v49  ;;  %v20327_v16 = vld [vmem:[%s26310_s6 + $0x20] sm:$0xff]   ;;  %19094 = vmatprep.subr.bf16.mxu0 %v20608_v7  ;;  %v20349_v12 = vld [vmem:[%s26310_s6 + $0x8] sm:$0xff]  }
 0xd4a   :  { %v20269_v15 = vpack.i.bf16 %v25915_v40, %v25910_v48  ;;  %19015 = vmatpush3.bf16.msra.mxu1 %v20327_v16  ;;  %v20350_v48 = vld [vmem:[%s26310_s6 + $0x10] sm:$0xff]   ;;  %v20362_v16 = vld [vmem:[%s26310_s6] sm:$0xff]  }
 0xd4b   :  { %v20265_v38 = vpack.i.bf16 %v25924_v53, %v25919_v54  ;;  %19016 = vmatprep.subr.bf16.mxu1 %v20608_v7  ;;  %v20353_v54 = vld [vmem:[%s26310_s6 + $0x20] sm:$0xff]   ;;  %v20355_v53 = vld [vmem:[%s26310_s6 + $0x30] sm:$0xff]  }
 0xd4c   :  { %19095 = vmatpush3.bf16.msra.mxu0 %v20359_v32  ;;  %v20376_v32 = vld [vmem:[%s26310_s6 + $0x18] sm:$0xff]  }
 0xd4d   :  { %19096 = vmatprep.subr.bf16.mxu0 %v20608_v7 }
 0xd4e   :  { %19017 = vmatpush3.bf16.msra.mxu1 %v20328_v21 }
 0xd4f   :  { %19018 = vmatprep.subr.bf16.mxu1 %v20608_v7 }
 0xd50   :  { %19097 = vmatpush3.bf16.msra.mxu0 %v20360_v62  ;;  %v20377_v62 = vld [vmem:[%s26310_s6 + $0x10] sm:$0xff]  }
 0xd51   :  { %19098 = vmatprep.subr.bf16.mxu0 %v20608_v7 }
 0xd52   :  { %19019 = vmatpush3.bf16.msra.mxu1 %v20329_v46  ;;  %v20363_v46 = vld [vmem:[%s26310_s6 + $0x8] sm:$0xff]  }
 0xd53   :  { %19020 = vmatprep.subr.bf16.mxu1 %v20608_v7 }
 0xd56   :  { %19021 = vmatpush3.bf16.msra.mxu1 %v20330_v31  ;;  %v20364_v31 = vld [vmem:[%s26310_s6 + $0x10] sm:$0xff]  }
 0xd57   :  { %19026 = vmatprep.subr.bf16.mxu1 %v20608_v7 }
 0xd73   :  { %v20229_v41 = vpop.trf.xlu0 }
 0xd74   :  { %v20233_v25 = vunpack.i.h.bf16 %v20229_v41  ;;  %v20230_v56 = vunpack.i.l.bf16 %v20229_v41  ;;  %v20365_v41 = vld [vmem:[%s26310_s6 + $0x18] sm:$0xff]  }
 0xd77   :  { %v20234_v59 = vpop.trf.xlu0 }
 0xd78   :  { %v20238_v60 = vunpack.i.h.bf16 %v20234_v59  ;;  %v20235_v28 = vunpack.i.l.bf16 %v20234_v59  ;;  %v20369_v59 = vld [vmem:[%s26310_s6 + $0x30] sm:$0xff]  }
 0xd7a   :  { %v25958_v39 = vpack.c.bf16 %v20238_v60, %v20233_v25  ;;  %v25960_v18 = vpack.c.bf16 %v20235_v28, %v20230_v56  ;;  %v20367_v25 = vld [vmem:[%s26310_s6 + $0x20] sm:$0xff]   ;;  %v20368_v56 = vld [vmem:[%s26310_s6 + $0x28] sm:$0xff]   ;;  %v20370_v60 = vld [vmem:[%s26310_s6 + $0x38] sm:$0xff]  }
 0xd7b   :  { %v20371_v28 = vld [vmem:[%s26310_s6] sm:$0xff]  }
 0xd7c   :  { %15349 = vrot.lane.b32.xlu0 %v25958_v39, %s20610_s19  ;;  %15123 = vrot.lane.b32.xlu1 %v25960_v18, %s20610_s19  ;;  %v15010_v49 = vrot.slane %v25960_v18, 4  ;;  %v15236_v4 = vrot.slane %v25958_v39, 4 }
 0xd80   :  { %15011 = vrot.lane.b32.xlu1 %v15010_v49, %s20610_s19 }
 0xd84   :  { %15237 = vrot.lane.b32.xlu1 %v15236_v4, %s20610_s19 }
 0xdad   :  { %20240 = vxpose.xlu1.b32.start [1/16] (narrow) %v20239_v0, 16 }
 0xdb1   :  { %20242 = vxpose.xlu1.b32.cont [2/16] (narrow) %v20241_v26, 16  ;;  %v20332_v26 = vld [vmem:[%s26310_s6 + $0x8] sm:$0xff]  }
 0xdb5   :  { %20244 = vxpose.xlu1.b32.cont [3/16] (narrow) %v20243_v3, 16  ;;  %v20361_v3 = vld [vmem:[%s26310_s6 + $0x30] sm:$0xff]  }
 0xdb6   :  { %19099 = vmatpush3.bf16.msra.mxu0 %v20361_v3  ;;  %v20378_v3 = vld [vmem:[%s26310_s6 + $0x20] sm:$0xff]  }
 0xdb7   :  { %19100 = vmatprep.subr.bf16.mxu0 %v20608_v7 }
 0xdb9   :  { %20246 = vxpose.xlu1.b32.cont [4/16] (narrow) %v20245_v11, 16 }
 0xdba   :  { %19101 = vmatpush3.bf16.msra.mxu0 %v20366_v30  ;;  %v20379_v30 = vld [vmem:[%s26310_s6 + $0x18] sm:$0xff]  }
 0xdbb   :  { %19126 = vmatprep.subr.bf16.mxu0 %v20608_v7 }
 0xdbd   :  { %20248 = vxpose.xlu1.b32.cont [5/16] (narrow) %v20247_v22, 16  ;;  %v20340_v22 = vld [vmem:[%s26310_s6 + $0x8] sm:$0xff]  }
 0xdc1   :  { %20250 = vxpose.xlu1.b32.cont [6/16] (narrow) %v20249_v13, 16  ;;  %v20343_v13 = vld [vmem:[%s26310_s6 + $0x20] sm:$0xff]  }
 0xdc5   :  { %20252 = vxpose.xlu1.b32.cont [7/16] (narrow) %v20251_v52, 16  ;;  %v20338_v52 = vld [vmem:[%s26310_s6 + $0x38] sm:$0xff]  }
 0xdc9   :  { %20254 = vxpose.xlu1.b32.cont [8/16] (narrow) %v20253_v19, 16  ;;  %v20342_v19 = vld [vmem:[%s26310_s6 + $0x18] sm:$0xff]  }
 0xdcd   :  { %20256 = vxpose.xlu1.b32.cont [9/16] (narrow) %v20255_v29, 16  ;;  %v20348_v29 = vld [vmem:[%s26310_s6] sm:$0xff]  }
 0xdd1   :  { %20258 = vxpose.xlu1.b32.cont [10/16] (narrow) %v20257_v33, 16 }
 0xdd5   :  { %20260 = vxpose.xlu1.b32.cont [11/16] (narrow) %v20259_v36, 16 }
 0xdd9   :  { %20262 = vxpose.xlu1.b32.cont [12/16] (narrow) %v20261_v34, 16 }
 0xddd   :  { %20264 = vxpose.xlu1.b32.cont [13/16] (narrow) %v20263_v58, 16  ;;  %v20354_v58 = vld [vmem:[%s26310_s6 + $0x28] sm:$0xff]  }
 0xde1   :  { %20266 = vxpose.xlu1.b32.cont [14/16] (narrow) %v20265_v38, 16 }
 0xde5   :  { %20268 = vxpose.xlu1.b32.cont [15/16] (narrow) %v20267_v17, 16  ;;  %v20351_v17 = vld [vmem:[%s26310_s6 + $0x18] sm:$0xff]  }
 0xde9   :  { %20270 = vxpose.xlu1.b32.end [16/16] (narrow) %v20269_v15, 16  ;;  %v20356_v15 = vld [vmem:[%s26310_s6 + $0x38] sm:$0xff]  }
 0xdee   :  { %v15124_v8 = vpop.permute.xlu1 %15123  ;;  %v15350_v38 = vpop.permute.xlu0 %15349 }
 0xdef   :  { %v15127_v9 = vsel %vm15013_vm11, %v15124_v8, %v15010_v49  ;;  %v15353_v21 = vsel %vm15013_vm11, %v15350_v38, %v15236_v4  ;;  %v20372_v49 = vld [vmem:[%s26310_s6 + $0x8] sm:$0xff]   ;;  %v20373_v4 = vld [vmem:[%s26310_s6] sm:$0xff]  }
 0xdf0   :  { %v20380_v8 = vld [vmem:[%s26310_s6 + $0x28] sm:$0xff]  }
 0xdf2   :  { %v15012_v0 = vpop.permute.xlu1 %15011 }
 0xdf3   :  { %v15016_v11 = vsel %vm15013_vm11, %v25960_v18, %v15012_v0  ;;  %v20382_v0 = vld [vmem:[%s26310_s6 + $0x30] sm:$0xff]  }
 0xdf4   :  { %19023 = vmatmul.mubr.bf16.vlgmr.msra.gmra.mrb[128].mxu1 %v15016_v11  ;;  %v20383_v11 = vld [vmem:[%s26310_s6 + $0x28] sm:$0xff]  }
 0xdf5   :  { %19027 = vmatpush3.bf16.msra.mxu1 %v20331_v57  ;;  %19042 = vmatprep.mubr.msk.bf16.mxu1 %vm20609_vm10, %v20608_v7  ;;  %v20381_v57 = vld [vmem:[%s26310_s6 + $0x20] sm:$0xff]  }
 0xdf6   :  { %19028 = vmatprep.subr.bf16.mxu1 %v20608_v7  ;;  %v15238_v37 = vpop.permute.xlu1 %15237 }
 0xdf7   :  { %v15241_v33 = vsel %vm15013_vm11, %v25958_v39, %v15238_v37 }
 0xdf9   :  { %19029 = vmatpush3.bf16.msra.mxu1 %v20332_v26  ;;  %v20384_v26 = vld [vmem:[%s26310_s6 + $0x38] sm:$0xff]  }
 0xdfa   :  { %19030 = vmatprep.subr.bf16.mxu1 %v20608_v7 }
 0xdfd   :  { %19031 = vmatpush3.bf16.msra.mxu1 %v20333_v43  ;;  %v20385_v43 = vld [vmem:[%s26310_s6 + $0x30] sm:$0xff]  }
 0xdfe   :  { %19032 = vmatprep.subr.bf16.mxu1 %v20608_v7 }
 0xe01   :  { %19033 = vmatpush3.bf16.msra.mxu1 %v20334_v1 }
 0xe02   :  { %19034 = vmatprep.subr.bf16.mxu1 %v20608_v7 }
 0xe05   :  { %19035 = vmatpush3.bf16.msra.mxu1 %v20335_v2 }
 0xe06   :  { %19036 = vmatprep.subr.bf16.mxu1 %v20608_v7 }
 0xe09   :  { %19037 = vmatpush3.bf16.msra.mxu1 %v20336_v35 }
 0xe0a   :  { %19038 = vmatprep.subr.bf16.mxu1 %v20608_v7 }
 0xe0d   :  { %19039 = vmatpush3.bf16.msra.mxu1 %v20337_v55 }
 0xe0e   :  { %19040 = vmatprep.subr.bf16.mxu1 %v20608_v7 }
 0xe11   :  { %19041 = vmatpush3.bf16.msra.mxu1 %v20338_v52  ;;  %v20386_v52 = vld [vmem:[%s26310_s6 + $0x38] sm:$0xff]   ;;  %s20611_s6 = smov [#allocation3]  }
 0xe12   :  { %19046 = vmatprep.subr.bf16.mxu1 %v20608_v7  ;;  %s15918_s17 = sshll.u32 %s20611_s6, 4  ;;  %s15919_s17 = int_to_ptr.vmem [resolvable:$true] %s15918_s17 }
 0xe13   :  { %s20583_s18 = scalar_lea.vmem %s15919_s17, 1024  ;;  %p20588_p1 = scmp.lt.s32.totalorder %s15919_s17, %s15919_s17 }
 0xe14   :  { %19043 = vmatmul.mubr.bf16.vlgmr.msra.gmra.mrb[132].mxu1 %v15127_v9  ;;  %p20584_p0 = scmp.ne.s32.totalorder %s15919_s17, %s20583_s18  ;;  %p20589_p2 = scmp.lt.s32.totalorder %s20583_s18, %s20583_s18 }
 0xe15   :  { %19047 = vmatpush3.bf16.msra.mxu1 %v20339_v23  ;;  %19062 = vmatprep.mubr.msk.bf16.mxu1 %vm20609_vm10, %v20608_v7 }
 0xe16   :  { %19048 = vmatprep.subr.bf16.mxu1 %v20608_v7  ;;  %p20590_p3 = por %p20589_p2, %p20588_p1 }
 0xe18   :  { %p20591_p4 = pnand %p20590_p3, %p20584_p0 }
 0xe19   :  { %19049 = vmatpush3.bf16.msra.mxu1 %v20340_v22 }
 0xe1a   :  { %19050 = vmatprep.subr.bf16.mxu1 %v20608_v7 }
 0xe1d   :  { %19051 = vmatpush3.bf16.msra.mxu1 %v20341_v14 }
 0xe1e   :  { %19052 = vmatprep.subr.bf16.mxu1 %v20608_v7 }
 0xe21   :  { %19053 = vmatpush3.bf16.msra.mxu1 %v20342_v19 }
 0xe22   :  { %19054 = vmatprep.subr.bf16.mxu1 %v20608_v7 }
 0xe25   :  { %19055 = vmatpush3.bf16.msra.mxu1 %v20343_v13 }
 0xe26   :  { %19056 = vmatprep.subr.bf16.mxu1 %v20608_v7 }
 0xe29   :  { %19057 = vmatpush3.bf16.msra.mxu1 %v20344_v10 }
 0xe2a   :  { %19058 = vmatprep.subr.bf16.mxu1 %v20608_v7 }
 0xe2d   :  { %19059 = vmatpush3.bf16.msra.mxu1 %v20345_v27  ;;  %v20271_v24 = vpop.trf.xlu1 }
 0xe2e   :  { %19060 = vmatprep.subr.bf16.mxu1 %v20608_v7  ;;  %v20275_v36 = vunpack.i.h.bf16 %v20271_v24  ;;  %v20272_v5 = vunpack.i.l.bf16 %v20271_v24 }
 0xe31   :  { %19061 = vmatpush3.bf16.msra.mxu1 %v20346_v50  ;;  %v20276_v42 = vpop.trf.xlu1 }
 0xe32   :  { %v20280_v63 = vunpack.i.h.bf16 %v20276_v42  ;;  %v20277_v34 = vunpack.i.l.bf16 %v20276_v42  ;;  %19066 = vmatprep.subr.bf16.mxu1 %v20608_v7 }
 0xe34   :  { %v26132_v44 = vpack.c.bf16 %v20277_v34, %v20272_v5  ;;  %19063 = vmatmul.mubr.bf16.vlgmr.msra.gmra.mrb[136].mxu1 %v15241_v33  ;;  %v26134_v61 = vpack.c.bf16 %v20280_v63, %v20275_v36 }
 0xe35   :  { %19067 = vmatpush3.bf16.msra.mxu1 %v20348_v29  ;;  %19082 = vmatprep.mubr.msk.bf16.mxu1 %vm20609_vm10, %v20608_v7 }
 0xe36   :  { %15801 = vrot.lane.b32.xlu1 %v26134_v61, %s20610_s19  ;;  %19068 = vmatprep.subr.bf16.mxu1 %v20608_v7  ;;  %v15462_v47 = vrot.slane %v26132_v44, 4  ;;  %v15688_v40 = vrot.slane %v26134_v61, 4 }
 0xe38   :  { %15463 = vrot.lane.b32.xlu0 %v15462_v47, %s20610_s19 }
 0xe39   :  { %19069 = vmatpush3.bf16.msra.mxu1 %v20349_v12 }
 0xe3a   :  { %19070 = vmatprep.subr.bf16.mxu1 %v20608_v7 }
 0xe3c   :  { %15575 = vrot.lane.b32.xlu0 %v26132_v44, %s20610_s19 }
 0xe3d   :  { %19071 = vmatpush3.bf16.msra.mxu1 %v20350_v48 }
 0xe3e   :  { %19072 = vmatprep.subr.bf16.mxu1 %v20608_v7 }
 0xe40   :  { %15689 = vrot.lane.b32.xlu0 %v15688_v40, %s20610_s19 }
 0xe41   :  { %19073 = vmatpush3.bf16.msra.mxu1 %v20351_v17 }
 0xe42   :  { %19074 = vmatprep.subr.bf16.mxu1 %v20608_v7 }
 0xe45   :  { %19075 = vmatpush3.bf16.msra.mxu1 %v20353_v54 }
 0xe46   :  { %19076 = vmatprep.subr.bf16.mxu1 %v20608_v7 }
 0xe49   :  { %19077 = vmatpush3.bf16.msra.mxu1 %v20354_v58 }
 0xe4a   :  { %19078 = vmatprep.subr.bf16.mxu1 %v20608_v7 }
 0xe4d   :  { %19079 = vmatpush3.bf16.msra.mxu1 %v20355_v53 }
 0xe4e   :  { %19080 = vmatprep.subr.bf16.mxu1 %v20608_v7 }
 0xe51   :  { %19081 = vmatpush3.bf16.msra.mxu1 %v20356_v15 }
 0xe52   :  { %19106 = vmatprep.subr.bf16.mxu1 %v20608_v7 }
 0xe54   :  { %19083 = vmatmul.mubr.bf16.vlgmr.msra.gmra.mrb[140].mxu1 %v15353_v21 }
 0xe55   :  { %19107 = vmatpush3.bf16.msra.mxu1 %v20362_v16  ;;  %19122 = vmatprep.mubr.msk.bf16.mxu1 %vm20609_vm10, %v20608_v7 }
 0xe56   :  { %19108 = vmatprep.subr.bf16.mxu1 %v20608_v7 }
 0xe59   :  { %19109 = vmatpush3.bf16.msra.mxu1 %v20363_v46 }
 0xe5a   :  { %19110 = vmatprep.subr.bf16.mxu1 %v20608_v7 }
 0xe5d   :  { %19111 = vmatpush3.bf16.msra.mxu1 %v20364_v31 }
 0xe5e   :  { %19112 = vmatprep.subr.bf16.mxu1 %v20608_v7 }
 0xe61   :  { %19113 = vmatpush3.bf16.msra.mxu1 %v20365_v41 }
 0xe62   :  { %19114 = vmatprep.subr.bf16.mxu1 %v20608_v7 }
 0xe65   :  { %19115 = vmatpush3.bf16.msra.mxu1 %v20367_v25 }
 0xe66   :  { %19116 = vmatprep.subr.bf16.mxu1 %v20608_v7 }
 0xe69   :  { %19117 = vmatpush3.bf16.msra.mxu1 %v20368_v56 }
 0xe6a   :  { %19118 = vmatprep.subr.bf16.mxu1 %v20608_v7 }
 0xe6d   :  { %19119 = vmatpush3.bf16.msra.mxu1 %v20369_v59 }
 0xe6e   :  { %19120 = vmatprep.subr.bf16.mxu1 %v20608_v7 }
 0xe71   :  { %19121 = vmatpush3.bf16.msra.mxu1 %v20370_v60 }
 0xe72   :  { %19146 = vmatprep.subr.bf16.mxu1 %v20608_v7 }
 0xea8   :  { %v15802_v22 = vpop.permute.xlu1 %15801 }
 0xea9   :  { %v15805_v14 = vsel %vm15013_vm11, %v15802_v22, %v15688_v40 }
 0xeaa   :  { %v15464_v39 = vpop.permute.xlu0 %15463 }
 0xeab   :  { %v15467_v18 = vsel %vm15013_vm11, %v26132_v44, %v15464_v39 }
 0xeac   :  { %19103 = vmatmul.mubr.bf16.vlgmr.msra.gmra.mrb[192].mxu0 %v15467_v18 }
 0xead   :  { %19127 = vmatpush3.bf16.msra.mxu0 %v20371_v28  ;;  %19142 = vmatprep.mubr.msk.bf16.mxu0 %vm20609_vm10, %v20608_v7 }
 0xeae   :  { %v15576_v6 = vpop.permute.xlu0 %15575  ;;  %19128 = vmatprep.subr.bf16.mxu0 %v20608_v7 }
 0xeaf   :  { %v15579_v51 = vsel %vm15013_vm11, %v15576_v6, %v15462_v47 }
 0xeb0   :  { %19123 = vmatmul.mubr.bf16.vlgmr.msra.gmra.mrb[144].mxu1 %v15579_v51 }
 0xeb1   :  { %19129 = vmatpush3.bf16.msra.mxu0 %v20372_v49  ;;  %19147 = vmatpush3.bf16.msra.mxu1 %v20373_v4 }
 0xeb2   :  { %19130 = vmatprep.subr.bf16.mxu0 %v20608_v7  ;;  %19148 = vmatprep.subr.bf16.mxu1 %v20608_v7  ;;  %v15690_v2 = vpop.permute.xlu0 %15689 }
 0xeb3   :  { %19162 = vmatprep.mubr.msk.bf16.mxu1 %vm20609_vm10, %v20608_v7  ;;  %v15693_v9 = vsel %vm15013_vm11, %v26134_v61, %v15690_v2 }
 0xeb5   :  { %19131 = vmatpush3.bf16.msra.mxu0 %v20374_v20  ;;  %19149 = vmatpush3.bf16.msra.mxu1 %v20375_v45 }
 0xeb6   :  { %19132 = vmatprep.subr.bf16.mxu0 %v20608_v7  ;;  %19150 = vmatprep.subr.bf16.mxu1 %v20608_v7 }
 0xeb9   :  { %19133 = vmatpush3.bf16.msra.mxu0 %v20376_v32  ;;  %19151 = vmatpush3.bf16.msra.mxu1 %v20377_v62 }
 0xeba   :  { %19134 = vmatprep.subr.bf16.mxu0 %v20608_v7  ;;  %19152 = vmatprep.subr.bf16.mxu1 %v20608_v7 }
 0xebd   :  { %19135 = vmatpush3.bf16.msra.mxu0 %v20378_v3  ;;  %19153 = vmatpush3.bf16.msra.mxu1 %v20379_v30 }
 0xebe   :  { %19136 = vmatprep.subr.bf16.mxu0 %v20608_v7  ;;  %19154 = vmatprep.subr.bf16.mxu1 %v20608_v7 }
 0xec1   :  { %19137 = vmatpush3.bf16.msra.mxu0 %v20380_v8  ;;  %19155 = vmatpush3.bf16.msra.mxu1 %v20381_v57 }
 0xec2   :  { %19138 = vmatprep.subr.bf16.mxu0 %v20608_v7  ;;  %19156 = vmatprep.subr.bf16.mxu1 %v20608_v7 }
 0xec5   :  { %19139 = vmatpush3.bf16.msra.mxu0 %v20382_v0  ;;  %19157 = vmatpush3.bf16.msra.mxu1 %v20383_v11 }
 0xec6   :  { %19140 = vmatprep.subr.bf16.mxu0 %v20608_v7  ;;  %19158 = vmatprep.subr.bf16.mxu1 %v20608_v7 }
 0xec7   :  { %v15116_v1 = vpop.f32.mrb[128].mxu1 }
 0xec8   :  { %15122 = vst [vmem:[#allocation3] sm:$0xff] %v15116_v1  ;;  %v19024_v35 = vpop.f32.mrb[129].mxu1 }
 0xec9   :  { %19141 = vmatpush3.bf16.msra.mxu0 %v20384_v26  ;;  %19159 = vmatpush3.bf16.msra.mxu1 %v20385_v43  ;;  %v15119_v55 = vpop.f32.mrb[130].mxu1 }
 0xeca   :  { %v19025_v23 = vpop.f32.mrb[131].mxu1  ;;  %19160 = vmatprep.subr.bf16.mxu1 %v20608_v7 }
 0xecc   :  { %19143 = vmatmul.mubr.bf16.vlgmr.msra.gmra.mrb[196].mxu0 %v15693_v9 }
 0xecd   :  { %19161 = vmatpush3.bf16.msra.mxu1 %v20386_v52 }
 0xed0   :  { %19163 = vmatmul.mubr.bf16.vlgmr.msra.gmra.mrb[148].mxu1 %v15805_v14 }
 0xee7   :  { %v15227_v19 = vpop.f32.mrb[132].mxu1 }
 0xee8   :  { %15234 = vst [vmem:[#allocation3 + $0x8] sm:$0xff] %v15227_v19  ;;  %v19044_v13 = vpop.f32.mrb[133].mxu1 }
 0xee9   :  { %v15230_v10 = vpop.f32.mrb[134].mxu1 }
 0xeea   :  { %v19045_v37 = vpop.f32.mrb[135].mxu1 }
 0xf07   :  { %v15341_v27 = vpop.f32.mrb[136].mxu1 }
 0xf08   :  { %15348 = vst [vmem:[#allocation3 + $0x10] sm:$0xff] %v15341_v27  ;;  %v19064_v24 = vpop.f32.mrb[137].mxu1 }
 0xf09   :  { %v15344_v7 = vpop.f32.mrb[138].mxu1 }
 0xf0a   :  { %v19065_v50 = vpop.f32.mrb[139].mxu1 }
 0xf27   :  { %v15453_v36 = vpop.f32.mrb[140].mxu1 }
 0xf28   :  { %15460 = vst [vmem:[#allocation3 + $0x18] sm:$0xff] %v15453_v36  ;;  %v19084_v5 = vpop.f32.mrb[141].mxu1 }
 0xf29   :  { %v15456_v42 = vpop.f32.mrb[142].mxu1 }
 0xf2a   :  { %v19085_v29 = vpop.f32.mrb[143].mxu1 }
 0xf7f   :  { %v15567_v63 = vpop.f32.mrb[192].mxu0 }
 0xf80   :  { %15574 = vst [vmem:[#allocation3 + $0x20] sm:$0xff] %v15567_v63  ;;  %v19104_v34 = vpop.f32.mrb[193].mxu0 }
 0xf81   :  { %v15570_v33 = vpop.f32.mrb[194].mxu0 }
 0xf82   :  { %v19105_v44 = vpop.f32.mrb[195].mxu0 }
 0xf83   :  { %v15679_v61 = vpop.f32.mrb[144].mxu1 }
 0xf84   :  { %15686 = vst [vmem:[#allocation3 + $0x28] sm:$0xff] %v15679_v61  ;;  %v19124_v12 = vpop.f32.mrb[145].mxu1 }
 0xf85   :  { %v15682_v47 = vpop.f32.mrb[146].mxu1 }
 0xf86   :  { %v19125_v48 = vpop.f32.mrb[147].mxu1 }
 0xf9f   :  { %v15793_v17 = vpop.f32.mrb[196].mxu0 }
 0xfa0   :  { %15800 = vst [vmem:[#allocation3 + $0x30] sm:$0xff] %v15793_v17  ;;  %v19144_v40 = vpop.f32.mrb[197].mxu0 }
 0xfa1   :  { %v15796_v54 = vpop.f32.mrb[198].mxu0 }
 0xfa2   :  { %v19145_v58 = vpop.f32.mrb[199].mxu0 }
 0xfa3   :  { %v15905_v53 = vpop.f32.mrb[148].mxu1 }
 0xfa4   :  { %15912 = vst [vmem:[#allocation3 + $0x38] sm:$0xff] %v15905_v53  ;;  %v19164_v15 = vpop.f32.mrb[149].mxu1 }
 0xfa5   :  { %v15908_v38 = vpop.f32.mrb[150].mxu1 }
 0xfa6   :  { %20594 = shalt.err (!%p20591_p4)
}
 0xfa7   :  { %s20595_s1 = scalar_lea.hbm %s26311_s7, 1024 }
 0xfa8   :  { %p20596_p5 = scmp.ne.s32.totalorder %s26311_s7, %s20595_s1  ;;  %p20599_p6 = scmp.lt.u32.totalorder %s20595_s1, %s26311_s7 }
 0xfaa   :  { %p20601_p7 = pnand %p20599_p6, %p20596_p5 }
 0xfac   :  { %20604 = shalt.err (!%p20601_p7)
}
 0xfad   :  { %s20612_s4 = smov 128   ;;  %s20613_s25 = smov 8   ;;  %v19165_v16 = vpop.f32.mrb[151].mxu1 }
 0xfae   :  { %15924 = dma.vmem_to_hbm [thread:$0]  %s15919_s17, 1024, %s26311_s7, [#allocation4], %s20612_s4, %s20612_s4, %s20613_s25  }
 0xfaf   :  { %20605 = dma.done.wait [#allocation4], 1024  }
 0xfb0   :  { %20606 = vsyncadd [#allocation4], 4294966272 }
 0xfb1   :  { %15928 = vsyncpa [#allocation4], 1 }

</bundles_post_ra>
